<compile_context>
chip_gen: v5e
topology: v5e:2x2
jax: 0.10.0
libtpu: 0.0.40
codegen_flags: <defaults>
</compile_context>

<pallas_src>
import functools

import jax
import jax.numpy as jnp
from jax.experimental import pallas as pl
from jax.experimental.pallas import tpu as pltpu


# ----------------------------------------------------------------------------
# Fused Pallas kernel: 3x3 conv (on pre-padded input) + bias + instance-norm
#                      + optional ReLU + optional residual add
# ----------------------------------------------------------------------------

def _conv_in_body(xp_ref, w_ref, b_ref, res_ref, o_ref, slab_ref, *, relu):
    # xp_ref  : (1, H+2, W+2, Cp)  bf16  spatially pre-padded input, full Cin
    # w_ref   : (3, 3*Cp, CO)      bf16  per-kh weights, K = [kw-major x Cin]
    # b_ref   : (1, CO)            f32
    # res_ref : (1, H, W, CO)      bf16 or None (residual / skip input)
    # o_ref   : (1, H, W, CO)      bf16 (stage 1) or f32 (stage 2)
    # slab_ref: (H+2, W, 3*Cp)     bf16  VMEM scratch (W-shifted slab)
    _, Hp, Wp, Cp = xp_ref.shape
    H, W = Hp - 2, Wp - 2
    CO = o_ref.shape[-1]

    # Build the W-shifted slab once per sample: 3 copies instead of 9 per-tap
    # materializations.  The Cout-tile grid axis is "arbitrary" and runs
    # sequentially, so tiles with co > 0 reuse the scratch built at co == 0.
    @pl.when(pl.program_id(1) == 0)
    def _():
        for kw in range(3):                       # static unroll: 3 stores
            slab_ref[:, :, kw * Cp:(kw + 1) * Cp] = xp_ref[0, :, kw:kw + W, :]

    # 3x3 conv = 3 MXU matmuls with K = 3*Cp (kw folded into contraction).
    acc = jnp.zeros((H * W, CO), jnp.float32)
    for kh in range(3):                           # static unroll
        lhs = slab_ref[kh:kh + H].reshape(H * W, 3 * Cp)   # leading-axis view
        acc = acc + jnp.dot(lhs, w_ref[kh], preferred_element_type=jnp.float32)

    acc = acc + b_ref[...]                        # bias (broadcast over rows)

    # InstanceNorm2d(affine=False), eps=1e-5: one-pass stats in f32.
    inv_hw = 1.0 / (H * W)
    mean = jnp.sum(acc, axis=0, keepdims=True) * inv_hw
    mean_sq = jnp.sum(acc * acc, axis=0, keepdims=True) * inv_hw
    var = mean_sq - mean * mean
    y = (acc - mean) * jax.lax.rsqrt(var + 1e-5)

    if relu:
        y = jnp.maximum(y, 0.0)
    if res_ref is not None:
        y = y + res_ref[0].reshape(H * W, CO).astype(jnp.float32)

    o_ref[0] = y.reshape(H, W, CO).astype(o_ref.dtype)


def _stage1_kernel(xp_ref, w_ref, b_ref, o_ref, slab_ref):
    _conv_in_body(xp_ref, w_ref, b_ref, None, o_ref, slab_ref, relu=True)


def _stage2_kernel(xp_ref, w_ref, b_ref, res_ref, o_ref, slab_ref):
    _conv_in_body(xp_ref, w_ref, b_ref, res_ref, o_ref, slab_ref, relu=False)


# ----------------------------------------------------------------------------
# Wrapper: layout plumbing + pallas_call
# ----------------------------------------------------------------------------

_PAD_MODE = {"reflect": "reflect", "replicate": "edge", "zero": "constant"}


def _round_up(v, m):
    return ((v + m - 1) // m) * m


def fused_conv3x3_instnorm(x_cp, w_oihw, bias, *, relu, residual=None,
                           padding_type="reflect", out_dtype=jnp.float32):
    """Conv2d(dim,dim,3,p=1) + InstanceNorm2d + (ReLU | +residual), fused.

    x_cp     : (N, H, W, Cp) NHWC, channels already padded to Cp (mult of 128).
    w_oihw   : (C, C, 3, 3) PyTorch layout.
    residual : optional (N, H, W, Cp), added after the norm (skip connection).
    """
    N, H, W, Cp = x_cp.shape
    C = w_oihw.shape[0]
    assert H % 8 == 0 and W % 8 == 0, "spatial dims must be multiples of 8"
    assert Cp % 128 == 0 and Cp >= C

    # Spatial padding (reflection) — indexing glue, done once in JAX.
    xpad = jnp.pad(x_cp, ((0, 0), (1, 1), (1, 1), (0, 0)),
                   mode=_PAD_MODE[padding_type]).astype(jnp.bfloat16)

    # Weights (Cout, Cin, 3, 3) -> (kh, kw, Cin, Cout) -> pad channels to Cp
    # -> (3, 3*Cp, Cp): K-dim ordered kw-major then Cin, matching the slab.
    w = jnp.transpose(w_oihw, (2, 3, 1, 0))
    if Cp != C:
        w = jnp.pad(w, ((0, 0), (0, 0), (0, Cp - C), (0, Cp - C)))
    w = w.reshape(3, 3 * Cp, Cp).astype(jnp.bfloat16)

    b = (bias if bias is not None
         else jnp.zeros((C,), jnp.float32)).astype(jnp.float32)
    if Cp != C:
        b = jnp.pad(b, (0, Cp - C))     # padded lanes MUST stay zero (see note)
    b = b.reshape(1, Cp)

    # Output-channel tiling: bounds per-step VMEM (v7x: 64 MiB) and gives the
    # pipeline more steps than grid=(N,) alone.
    co_tile = 256 if Cp % 256 == 0 else 128
    n_co = Cp // co_tile

    in_arrays = [xpad, w, b]
    in_specs = [
        pl.BlockSpec((1, H + 2, W + 2, Cp), lambda n, c: (n, 0, 0, 0)),
        pl.BlockSpec((3, 3 * Cp, co_tile), lambda n, c: (0, 0, c)),
        pl.BlockSpec((1, co_tile), lambda n, c: (0, c)),
    ]
    if residual is not None:
        in_arrays.append(residual.astype(jnp.bfloat16))   # bf16 DMA, f32 add
        in_specs.append(pl.BlockSpec((1, H, W, co_tile),
                                     lambda n, c: (n, 0, 0, c)))
        kernel = _stage2_kernel
    else:
        kernel = _stage1_kernel

    return pl.pallas_call(
        kernel,
        out_shape=jax.ShapeDtypeStruct((N, H, W, Cp), out_dtype),
        grid=(N, n_co),
        in_specs=in_specs,
        out_specs=pl.BlockSpec((1, H, W, co_tile), lambda n, c: (n, 0, 0, c)),
        scratch_shapes=[pltpu.VMEM((H + 2, W, 3 * Cp), jnp.bfloat16)],
        compiler_params=pltpu.CompilerParams(
            # Cout axis must be "arbitrary": the slab scratch built at c == 0
            # is reused by the later Cout tiles of the same sample.
            dimension_semantics=("parallel", "arbitrary"),
            vmem_limit_bytes=64 * 1024 * 1024),
    )(*in_arrays)


# ----------------------------------------------------------------------------
# ResnetBlock forward + params
# ----------------------------------------------------------------------------

def init_resnet_block(key, dim):
    k = jax.random.split(key, 4)
    scale = 0.02
    return dict(
        w1=scale * jax.random.normal(k[0], (dim, dim, 3, 3), jnp.float32),
        b1=scale * jax.random.normal(k[1], (dim,), jnp.float32),
        w2=scale * jax.random.normal(k[2], (dim, dim, 3, 3), jnp.float32),
        b2=scale * jax.random.normal(k[3], (dim,), jnp.float32),
    )


def resnet_block_forward(params, x_nchw, padding_type="reflect"):
    """out = x + conv_block(x), NCHW in/out (PyTorch convention)."""
    x = jnp.transpose(x_nchw, (0, 2, 3, 1))                   # -> NHWC, f32
    N, H, W, C = x.shape
    Cp = _round_up(max(C, 128), 128)

    # Pad channels once; keep Cp layout for the whole block.
    if Cp != C:
        x = jnp.pad(x, ((0, 0), (0, 0), (0, 0), (0, Cp - C)))
    x_bf16 = x.astype(jnp.bfloat16)    # stage-1 input AND stage-2 residual

    h = fused_conv3x3_instnorm(x_bf16, params["w1"], params["b1"],
                               relu=True, padding_type=padding_type,
                               out_dtype=jnp.bfloat16)        # bf16 interstage
    # TODO(synk): nn.Dropout(0.5) for use_dropout=True is not implemented
    # (default ResnetGenerator config uses use_dropout=False).
    out = fused_conv3x3_instnorm(h, params["w2"], params["b2"],
                                 relu=False, residual=x_bf16,
                                 padding_type=padding_type,
                                 out_dtype=jnp.float32)
    if Cp != C:
        out = out[..., :C]
    return jnp.transpose(out, (0, 3, 1, 2))                   # -> NCHW


# ----------------------------------------------------------------------------
# Pure-JAX reference (f32) for correctness check
# ----------------------------------------------------------------------------

def _reference_forward(params, x_nchw, padding_type="reflect"):
    mode = _PAD_MODE[padding_type]

    def conv_in(x, w, b):
        xp = jnp.pad(x, ((0, 0), (0, 0), (1, 1), (1, 1)), mode=mode)
        y = jax.lax.conv_general_dilated(
            xp, w, (1, 1), "VALID",
            dimension_numbers=("NCHW", "OIHW", "NCHW"))
        y = y + b[None, :, None, None]
        mean = jnp.mean(y, axis=(2, 3), keepdims=True)
        var = jnp.mean(jnp.square(y - mean), axis=(2, 3), keepdims=True)
        return (y - mean) * jax.lax.rsqrt(var + 1e-5)

    h = jax.nn.relu(conv_in(x_nchw, params["w1"], params["b1"]))
    return x_nchw + conv_in(h, params["w2"], params["b2"])


# ----------------------------------------------------------------------------
# Main
# ----------------------------------------------------------------------------

if __name__ == "__main__":
    key = jax.random.PRNGKey(0)
    kx, kp = jax.random.split(key)

    # Small config consistent with ResnetGenerator bottleneck: dim=128, 16x16.
    N, DIM, S = 2, 128, 16
    x = jax.random.normal(kx, (N, DIM, S, S), jnp.float32)
    params = init_resnet_block(kp, DIM)

    fwd = jax.jit(functools.partial(resnet_block_forward, params))
    out = jax.block_until_ready(fwd(x))

    assert out.shape == (N, DIM, S, S), out.shape
    assert bool(jnp.all(jnp.isfinite(out)))

    ref = _reference_forward(params, x)
    max_err = float(jnp.max(jnp.abs(out - ref)))
    assert max_err < 0.25, max_err   # loose tolerance: bf16 MXU vs f32 ref

    print("KERNEL_OK")
</pallas_src>

<mosaic_0001>
module attributes {stable_mosaic.version = 11 : i64} {
  func.func @_stage1_kernel(%arg0: i32, %arg1: i32, %arg2: memref<1x18x18x128xbf16, #tpu.memory_space<vmem>>, %arg3: memref<3x384x128xbf16, #tpu.memory_space<vmem>>, %arg4: memref<1x128xf32, #tpu.memory_space<vmem>>, %arg5: memref<1x16x16x128xbf16, #tpu.memory_space<vmem>>, %arg6: memref<18x16x384xbf16, #tpu.memory_space<vmem>>) attributes {dimension_semantics = [#tpu.dimension_semantics<parallel>, #tpu.dimension_semantics<arbitrary>], iteration_bounds = array<i64: 2, 1>, scalar_prefetch = 0 : i64, scratch_operands = 1 : i64, tpu.core_type = #tpu.core_type<tc>, window_params = [{transform_indices = @transform_0, window_bounds = array<i64: 1, 18, 18, 128>}, {transform_indices = @transform_1, window_bounds = array<i64: 3, 384, 128>}, {transform_indices = @transform_2, window_bounds = array<i64: 1, 128>}, {transform_indices = @transform_3, window_bounds = array<i64: 1, 16, 16, 128>}]} {
    %c0_i32 = arith.constant 0 : i32
    %0 = arith.cmpi eq, %arg1, %c0_i32 : i32
    %1 = arith.extui %0 : i1 to i32
    %c0_i32_0 = arith.constant 0 : i32
    %2 = arith.cmpi ne, %1, %c0_i32_0 : i32
    scf.if %2 {
      %c0_31 = arith.constant 0 : index
      %c0_32 = arith.constant 0 : index
      %c0_33 = arith.constant 0 : index
      %c0_34 = arith.constant 0 : index
      %50 = vector.load %arg2[%c0_31, %c0_32, %c0_33, %c0_34] : memref<1x18x18x128xbf16, #tpu.memory_space<vmem>>, vector<1x18x16x128xbf16>
      %51 = vector.shape_cast %50 : vector<1x18x16x128xbf16> to vector<18x16x128xbf16>
      %c0_35 = arith.constant 0 : index
      %c0_36 = arith.constant 0 : index
      %c0_37 = arith.constant 0 : index
      %52 = vector.load %arg6[%c0_35, %c0_36, %c0_37] : memref<18x16x384xbf16, #tpu.memory_space<vmem>>, vector<18x16x128xbf16>
      tpu.vector_store %arg6[%c0_35, %c0_36, %c0_37], %51 {strides = array<i32>} : memref<18x16x384xbf16, #tpu.memory_space<vmem>>, vector<18x16x128xbf16>,
      %c0_38 = arith.constant 0 : index
      %c0_39 = arith.constant 0 : index
      %c1_40 = arith.constant 1 : index
      %c0_41 = arith.constant 0 : index
      %53 = vector.load %arg2[%c0_38, %c0_39, %c1_40, %c0_41] : memref<1x18x18x128xbf16, #tpu.memory_space<vmem>>, vector<1x18x16x128xbf16>
      %54 = vector.shape_cast %53 : vector<1x18x16x128xbf16> to vector<18x16x128xbf16>
      %c0_42 = arith.constant 0 : index
      %c0_43 = arith.constant 0 : index
      %c128 = arith.constant 128 : index
      %55 = vector.load %arg6[%c0_42, %c0_43, %c128] : memref<18x16x384xbf16, #tpu.memory_space<vmem>>, vector<18x16x128xbf16>
      tpu.vector_store %arg6[%c0_42, %c0_43, %c128], %54 {strides = array<i32>} : memref<18x16x384xbf16, #tpu.memory_space<vmem>>, vector<18x16x128xbf16>,
      %c0_44 = arith.constant 0 : index
      %c0_45 = arith.constant 0 : index
      %c2_46 = arith.constant 2 : index
      %c0_47 = arith.constant 0 : index
      %56 = vector.load %arg2[%c0_44, %c0_45, %c2_46, %c0_47] : memref<1x18x18x128xbf16, #tpu.memory_space<vmem>>, vector<1x18x16x128xbf16>
      %57 = vector.shape_cast %56 : vector<1x18x16x128xbf16> to vector<18x16x128xbf16>
      %c0_48 = arith.constant 0 : index
      %c0_49 = arith.constant 0 : index
      %c256 = arith.constant 256 : index
      %58 = vector.load %arg6[%c0_48, %c0_49, %c256] : memref<18x16x384xbf16, #tpu.memory_space<vmem>>, vector<18x16x128xbf16>
      tpu.vector_store %arg6[%c0_48, %c0_49, %c256], %57 {strides = array<i32>} : memref<18x16x384xbf16, #tpu.memory_space<vmem>>, vector<18x16x128xbf16>,
    } else {
    }
    %cst = arith.constant 0.000000e+00 : f32
    %3 = vector.broadcast %cst : f32 to vector<256x128xf32>
    %c0 = arith.constant 0 : index
    %c0_1 = arith.constant 0 : index
    %c0_2 = arith.constant 0 : index
    %4 = vector.load %arg6[%c0, %c0_1, %c0_2] : memref<18x16x384xbf16, #tpu.memory_space<vmem>>, vector<16x16x384xbf16>
    %5 = vector.shape_cast %4 : vector<16x16x384xbf16> to vector<256x384xbf16>
    %c0_3 = arith.constant 0 : index
    %c0_4 = arith.constant 0 : index
    %c0_5 = arith.constant 0 : index
    %6 = vector.load %arg3[%c0_3, %c0_4, %c0_5] : memref<3x384x128xbf16, #tpu.memory_space<vmem>>, vector<1x384x128xbf16>
    %7 = vector.shape_cast %6 : vector<1x384x128xbf16> to vector<384x128xbf16>
    %cst_6 = arith.constant dense<0.000000e+00> : vector<256x128xf32>
    %8 = tpu.matmul %5, %7, %cst_6 {dimension_numbers = #tpu.dot_dimension_numbers<[1], [0], [0], [1], [0, 0, 1, 1], [], []>} : vector<256x384xbf16>, vector<384x128xbf16>, vector<256x128xf32> -> vector<256x128xf32>
    %9 = arith.addf %3, %8 : vector<256x128xf32>
    %c1 = arith.constant 1 : index
    %c0_7 = arith.constant 0 : index
    %c0_8 = arith.constant 0 : index
    %10 = vector.load %arg6[%c1, %c0_7, %c0_8] : memref<18x16x384xbf16, #tpu.memory_space<vmem>>, vector<16x16x384xbf16>
    %11 = vector.shape_cast %10 : vector<16x16x384xbf16> to vector<256x384xbf16>
    %c1_9 = arith.constant 1 : index
    %c0_10 = arith.constant 0 : index
    %c0_11 = arith.constant 0 : index
    %12 = vector.load %arg3[%c1_9, %c0_10, %c0_11] : memref<3x384x128xbf16, #tpu.memory_space<vmem>>, vector<1x384x128xbf16>
    %13 = vector.shape_cast %12 : vector<1x384x128xbf16> to vector<384x128xbf16>
    %cst_12 = arith.constant dense<0.000000e+00> : vector<256x128xf32>
    %14 = tpu.matmul %11, %13, %cst_12 {dimension_numbers = #tpu.dot_dimension_numbers<[1], [0], [0], [1], [0, 0, 1, 1], [], []>} : vector<256x384xbf16>, vector<384x128xbf16>, vector<256x128xf32> -> vector<256x128xf32>
    %15 = arith.addf %9, %14 : vector<256x128xf32>
    %c2 = arith.constant 2 : index
    %c0_13 = arith.constant 0 : index
    %c0_14 = arith.constant 0 : index
    %16 = vector.load %arg6[%c2, %c0_13, %c0_14] : memref<18x16x384xbf16, #tpu.memory_space<vmem>>, vector<16x16x384xbf16>
    %17 = vector.shape_cast %16 : vector<16x16x384xbf16> to vector<256x384xbf16>
    %c2_15 = arith.constant 2 : index
    %c0_16 = arith.constant 0 : index
    %c0_17 = arith.constant 0 : index
    %18 = vector.load %arg3[%c2_15, %c0_16, %c0_17] : memref<3x384x128xbf16, #tpu.memory_space<vmem>>, vector<1x384x128xbf16>
    %19 = vector.shape_cast %18 : vector<1x384x128xbf16> to vector<384x128xbf16>
    %cst_18 = arith.constant dense<0.000000e+00> : vector<256x128xf32>
    %20 = tpu.matmul %17, %19, %cst_18 {dimension_numbers = #tpu.dot_dimension_numbers<[1], [0], [0], [1], [0, 0, 1, 1], [], []>} : vector<256x384xbf16>, vector<384x128xbf16>, vector<256x128xf32> -> vector<256x128xf32>
    %21 = arith.addf %15, %20 : vector<256x128xf32>
    %c0_19 = arith.constant 0 : index
    %c0_20 = arith.constant 0 : index
    %22 = vector.load %arg4[%c0_19, %c0_20] : memref<1x128xf32, #tpu.memory_space<vmem>>, vector<1x128xf32>
    %23 = vector.broadcast %22 : vector<1x128xf32> to vector<256x128xf32>
    %24 = arith.addf %21, %23 : vector<256x128xf32>
    %cst_21 = arith.constant dense<0.000000e+00> : vector<128xf32>
    %25 = vector.multi_reduction <add>, %24, %cst_21 [0] : vector<256x128xf32> to vector<128xf32>
    %26 = vector.shape_cast %25 : vector<128xf32> to vector<1x128xf32>
    %cst_22 = arith.constant 3.906250e-03 : f32
    %27 = vector.broadcast %cst_22 : f32 to vector<1x128xf32>
    %28 = arith.mulf %26, %27 : vector<1x128xf32>
    %29 = arith.mulf %24, %24 : vector<256x128xf32>
    %cst_23 = arith.constant dense<0.000000e+00> : vector<128xf32>
    %30 = vector.multi_reduction <add>, %29, %cst_23 [0] : vector<256x128xf32> to vector<128xf32>
    %31 = vector.shape_cast %30 : vector<128xf32> to vector<1x128xf32>
    %cst_24 = arith.constant 3.906250e-03 : f32
    %32 = vector.broadcast %cst_24 : f32 to vector<1x128xf32>
    %33 = arith.mulf %31, %32 : vector<1x128xf32>
    %34 = arith.mulf %28, %28 : vector<1x128xf32>
    %35 = arith.subf %33, %34 : vector<1x128xf32>
    %36 = vector.broadcast %28 : vector<1x128xf32> to vector<256x128xf32>
    %37 = arith.subf %24, %36 : vector<256x128xf32>
    %cst_25 = arith.constant 9.99999974E-6 : f32
    %38 = vector.broadcast %cst_25 : f32 to vector<1x128xf32>
    %39 = arith.addf %35, %38 : vector<1x128xf32>
    %40 = math.rsqrt %39 : vector<1x128xf32>
    %41 = vector.broadcast %40 : vector<1x128xf32> to vector<256x128xf32>
    %42 = arith.mulf %37, %41 : vector<256x128xf32>
    %cst_26 = arith.constant 0.000000e+00 : f32
    %43 = vector.broadcast %cst_26 : f32 to vector<256x128xf32>
    %44 = arith.maximumf %42, %43 : vector<256x128xf32>
    %45 = vector.shape_cast %44 : vector<256x128xf32> to vector<16x16x128xf32>
    %46 = arith.truncf %45 : vector<16x16x128xf32> to vector<16x16x128xbf16>
    %c0_27 = arith.constant 0 : index
    %c0_28 = arith.constant 0 : index
    %c0_29 = arith.constant 0 : index
    %c0_30 = arith.constant 0 : index
    %47 = vector.load %arg5[%c0_27, %c0_28, %c0_29, %c0_30] : memref<1x16x16x128xbf16, #tpu.memory_space<vmem>>, vector<1x16x16x128xbf16>
    %48 = vector.shape_cast %47 : vector<1x16x16x128xbf16> to vector<16x16x128xbf16>
    %49 = vector.shape_cast %46 : vector<16x16x128xbf16> to vector<1x16x16x128xbf16>
    tpu.vector_store %arg5[%c0_27, %c0_28, %c0_29, %c0_30], %49 {strides = array<i32>} : memref<1x16x16x128xbf16, #tpu.memory_space<vmem>>, vector<1x16x16x128xbf16>,
    return
  }
  func.func @transform_0(%arg0: i32, %arg1: i32) -> (i32, i32, i32, i32) {
    %c0_i32 = arith.constant 0 : i32
    %c0_i32_0 = arith.constant 0 : i32
    %c0_i32_1 = arith.constant 0 : i32
    %c0_i32_2 = arith.constant 0 : i32
    return %arg0, %c0_i32, %c0_i32_0, %c0_i32_1 : i32, i32, i32, i32
  }
  func.func @transform_1(%arg0: i32, %arg1: i32) -> (i32, i32, i32) {
    %c0_i32 = arith.constant 0 : i32
    %c0_i32_0 = arith.constant 0 : i32
    %c0_i32_1 = arith.constant 0 : i32
    return %c0_i32, %c0_i32_0, %arg1 : i32, i32, i32
  }
  func.func @transform_2(%arg0: i32, %arg1: i32) -> (i32, i32) {
    %c0_i32 = arith.constant 0 : i32
    %c0_i32_0 = arith.constant 0 : i32
    return %c0_i32, %arg1 : i32, i32
  }
  func.func @transform_3(%arg0: i32, %arg1: i32) -> (i32, i32, i32, i32) {
    %c0_i32 = arith.constant 0 : i32
    %c0_i32_0 = arith.constant 0 : i32
    %c0_i32_1 = arith.constant 0 : i32
    return %arg0, %c0_i32, %c0_i32_0, %arg1 : i32, i32, i32, i32
  }
}

module attributes {stable_mosaic.version = 11 : i64} {
  func.func @_stage2_kernel(%arg0: i32, %arg1: i32, %arg2: memref<1x18x18x128xbf16, #tpu.memory_space<vmem>>, %arg3: memref<3x384x128xbf16, #tpu.memory_space<vmem>>, %arg4: memref<1x128xf32, #tpu.memory_space<vmem>>, %arg5: memref<1x16x16x128xbf16, #tpu.memory_space<vmem>>, %arg6: memref<1x16x16x128xf32, #tpu.memory_space<vmem>>, %arg7: memref<18x16x384xbf16, #tpu.memory_space<vmem>>) attributes {dimension_semantics = [#tpu.dimension_semantics<parallel>, #tpu.dimension_semantics<arbitrary>], iteration_bounds = array<i64: 2, 1>, scalar_prefetch = 0 : i64, scratch_operands = 1 : i64, tpu.core_type = #tpu.core_type<tc>, window_params = [{transform_indices = @transform_0, window_bounds = array<i64: 1, 18, 18, 128>}, {transform_indices = @transform_1, window_bounds = array<i64: 3, 384, 128>}, {transform_indices = @transform_2, window_bounds = array<i64: 1, 128>}, {transform_indices = @transform_3, window_bounds = array<i64: 1, 16, 16, 128>}, {transform_indices = @transform_4, window_bounds = array<i64: 1, 16, 16, 128>}]} {
    %c0_i32 = arith.constant 0 : i32
    %0 = arith.cmpi eq, %arg1, %c0_i32 : i32
    %1 = arith.extui %0 : i1 to i32
    %c0_i32_0 = arith.constant 0 : i32
    %2 = arith.cmpi ne, %1, %c0_i32_0 : i32
    scf.if %2 {
      %c0_34 = arith.constant 0 : index
      %c0_35 = arith.constant 0 : index
      %c0_36 = arith.constant 0 : index
      %c0_37 = arith.constant 0 : index
      %52 = vector.load %arg2[%c0_34, %c0_35, %c0_36, %c0_37] : memref<1x18x18x128xbf16, #tpu.memory_space<vmem>>, vector<1x18x16x128xbf16>
      %53 = vector.shape_cast %52 : vector<1x18x16x128xbf16> to vector<18x16x128xbf16>
      %c0_38 = arith.constant 0 : index
      %c0_39 = arith.constant 0 : index
      %c0_40 = arith.constant 0 : index
      %54 = vector.load %arg7[%c0_38, %c0_39, %c0_40] : memref<18x16x384xbf16, #tpu.memory_space<vmem>>, vector<18x16x128xbf16>
      tpu.vector_store %arg7[%c0_38, %c0_39, %c0_40], %53 {strides = array<i32>} : memref<18x16x384xbf16, #tpu.memory_space<vmem>>, vector<18x16x128xbf16>,
      %c0_41 = arith.constant 0 : index
      %c0_42 = arith.constant 0 : index
      %c1_43 = arith.constant 1 : index
      %c0_44 = arith.constant 0 : index
      %55 = vector.load %arg2[%c0_41, %c0_42, %c1_43, %c0_44] : memref<1x18x18x128xbf16, #tpu.memory_space<vmem>>, vector<1x18x16x128xbf16>
      %56 = vector.shape_cast %55 : vector<1x18x16x128xbf16> to vector<18x16x128xbf16>
      %c0_45 = arith.constant 0 : index
      %c0_46 = arith.constant 0 : index
      %c128 = arith.constant 128 : index
      %57 = vector.load %arg7[%c0_45, %c0_46, %c128] : memref<18x16x384xbf16, #tpu.memory_space<vmem>>, vector<18x16x128xbf16>
      tpu.vector_store %arg7[%c0_45, %c0_46, %c128], %56 {strides = array<i32>} : memref<18x16x384xbf16, #tpu.memory_space<vmem>>, vector<18x16x128xbf16>,
      %c0_47 = arith.constant 0 : index
      %c0_48 = arith.constant 0 : index
      %c2_49 = arith.constant 2 : index
      %c0_50 = arith.constant 0 : index
      %58 = vector.load %arg2[%c0_47, %c0_48, %c2_49, %c0_50] : memref<1x18x18x128xbf16, #tpu.memory_space<vmem>>, vector<1x18x16x128xbf16>
      %59 = vector.shape_cast %58 : vector<1x18x16x128xbf16> to vector<18x16x128xbf16>
      %c0_51 = arith.constant 0 : index
      %c0_52 = arith.constant 0 : index
      %c256 = arith.constant 256 : index
      %60 = vector.load %arg7[%c0_51, %c0_52, %c256] : memref<18x16x384xbf16, #tpu.memory_space<vmem>>, vector<18x16x128xbf16>
      tpu.vector_store %arg7[%c0_51, %c0_52, %c256], %59 {strides = array<i32>} : memref<18x16x384xbf16, #tpu.memory_space<vmem>>, vector<18x16x128xbf16>,
    } else {
    }
    %cst = arith.constant 0.000000e+00 : f32
    %3 = vector.broadcast %cst : f32 to vector<256x128xf32>
    %c0 = arith.constant 0 : index
    %c0_1 = arith.constant 0 : index
    %c0_2 = arith.constant 0 : index
    %4 = vector.load %arg7[%c0, %c0_1, %c0_2] : memref<18x16x384xbf16, #tpu.memory_space<vmem>>, vector<16x16x384xbf16>
    %5 = vector.shape_cast %4 : vector<16x16x384xbf16> to vector<256x384xbf16>
    %c0_3 = arith.constant 0 : index
    %c0_4 = arith.constant 0 : index
    %c0_5 = arith.constant 0 : index
    %6 = vector.load %arg3[%c0_3, %c0_4, %c0_5] : memref<3x384x128xbf16, #tpu.memory_space<vmem>>, vector<1x384x128xbf16>
    %7 = vector.shape_cast %6 : vector<1x384x128xbf16> to vector<384x128xbf16>
    %cst_6 = arith.constant dense<0.000000e+00> : vector<256x128xf32>
    %8 = tpu.matmul %5, %7, %cst_6 {dimension_numbers = #tpu.dot_dimension_numbers<[1], [0], [0], [1], [0, 0, 1, 1], [], []>} : vector<256x384xbf16>, vector<384x128xbf16>, vector<256x128xf32> -> vector<256x128xf32>
    %9 = arith.addf %3, %8 : vector<256x128xf32>
    %c1 = arith.constant 1 : index
    %c0_7 = arith.constant 0 : index
    %c0_8 = arith.constant 0 : index
    %10 = vector.load %arg7[%c1, %c0_7, %c0_8] : memref<18x16x384xbf16, #tpu.memory_space<vmem>>, vector<16x16x384xbf16>
    %11 = vector.shape_cast %10 : vector<16x16x384xbf16> to vector<256x384xbf16>
    %c1_9 = arith.constant 1 : index
    %c0_10 = arith.constant 0 : index
    %c0_11 = arith.constant 0 : index
    %12 = vector.load %arg3[%c1_9, %c0_10, %c0_11] : memref<3x384x128xbf16, #tpu.memory_space<vmem>>, vector<1x384x128xbf16>
    %13 = vector.shape_cast %12 : vector<1x384x128xbf16> to vector<384x128xbf16>
    %cst_12 = arith.constant dense<0.000000e+00> : vector<256x128xf32>
    %14 = tpu.matmul %11, %13, %cst_12 {dimension_numbers = #tpu.dot_dimension_numbers<[1], [0], [0], [1], [0, 0, 1, 1], [], []>} : vector<256x384xbf16>, vector<384x128xbf16>, vector<256x128xf32> -> vector<256x128xf32>
    %15 = arith.addf %9, %14 : vector<256x128xf32>
    %c2 = arith.constant 2 : index
    %c0_13 = arith.constant 0 : index
    %c0_14 = arith.constant 0 : index
    %16 = vector.load %arg7[%c2, %c0_13, %c0_14] : memref<18x16x384xbf16, #tpu.memory_space<vmem>>, vector<16x16x384xbf16>
    %17 = vector.shape_cast %16 : vector<16x16x384xbf16> to vector<256x384xbf16>
    %c2_15 = arith.constant 2 : index
    %c0_16 = arith.constant 0 : index
    %c0_17 = arith.constant 0 : index
    %18 = vector.load %arg3[%c2_15, %c0_16, %c0_17] : memref<3x384x128xbf16, #tpu.memory_space<vmem>>, vector<1x384x128xbf16>
    %19 = vector.shape_cast %18 : vector<1x384x128xbf16> to vector<384x128xbf16>
    %cst_18 = arith.constant dense<0.000000e+00> : vector<256x128xf32>
    %20 = tpu.matmul %17, %19, %cst_18 {dimension_numbers = #tpu.dot_dimension_numbers<[1], [0], [0], [1], [0, 0, 1, 1], [], []>} : vector<256x384xbf16>, vector<384x128xbf16>, vector<256x128xf32> -> vector<256x128xf32>
    %21 = arith.addf %15, %20 : vector<256x128xf32>
    %c0_19 = arith.constant 0 : index
    %c0_20 = arith.constant 0 : index
    %22 = vector.load %arg4[%c0_19, %c0_20] : memref<1x128xf32, #tpu.memory_space<vmem>>, vector<1x128xf32>
    %23 = vector.broadcast %22 : vector<1x128xf32> to vector<256x128xf32>
    %24 = arith.addf %21, %23 : vector<256x128xf32>
    %cst_21 = arith.constant dense<0.000000e+00> : vector<128xf32>
    %25 = vector.multi_reduction <add>, %24, %cst_21 [0] : vector<256x128xf32> to vector<128xf32>
    %26 = vector.shape_cast %25 : vector<128xf32> to vector<1x128xf32>
    %cst_22 = arith.constant 3.906250e-03 : f32
    %27 = vector.broadcast %cst_22 : f32 to vector<1x128xf32>
    %28 = arith.mulf %26, %27 : vector<1x128xf32>
    %29 = arith.mulf %24, %24 : vector<256x128xf32>
    %cst_23 = arith.constant dense<0.000000e+00> : vector<128xf32>
    %30 = vector.multi_reduction <add>, %29, %cst_23 [0] : vector<256x128xf32> to vector<128xf32>
    %31 = vector.shape_cast %30 : vector<128xf32> to vector<1x128xf32>
    %cst_24 = arith.constant 3.906250e-03 : f32
    %32 = vector.broadcast %cst_24 : f32 to vector<1x128xf32>
    %33 = arith.mulf %31, %32 : vector<1x128xf32>
    %34 = arith.mulf %28, %28 : vector<1x128xf32>
    %35 = arith.subf %33, %34 : vector<1x128xf32>
    %36 = vector.broadcast %28 : vector<1x128xf32> to vector<256x128xf32>
    %37 = arith.subf %24, %36 : vector<256x128xf32>
    %cst_25 = arith.constant 9.99999974E-6 : f32
    %38 = vector.broadcast %cst_25 : f32 to vector<1x128xf32>
    %39 = arith.addf %35, %38 : vector<1x128xf32>
    %40 = math.rsqrt %39 : vector<1x128xf32>
    %41 = vector.broadcast %40 : vector<1x128xf32> to vector<256x128xf32>
    %42 = arith.mulf %37, %41 : vector<256x128xf32>
    %c0_26 = arith.constant 0 : index
    %c0_27 = arith.constant 0 : index
    %c0_28 = arith.constant 0 : index
    %c0_29 = arith.constant 0 : index
    %43 = vector.load %arg5[%c0_26, %c0_27, %c0_28, %c0_29] : memref<1x16x16x128xbf16, #tpu.memory_space<vmem>>, vector<1x16x16x128xbf16>
    %44 = vector.shape_cast %43 : vector<1x16x16x128xbf16> to vector<16x16x128xbf16>
    %45 = vector.shape_cast %44 : vector<16x16x128xbf16> to vector<256x128xbf16>
    %46 = arith.extf %45 : vector<256x128xbf16> to vector<256x128xf32>
    %47 = arith.addf %42, %46 : vector<256x128xf32>
    %48 = vector.shape_cast %47 : vector<256x128xf32> to vector<16x16x128xf32>
    %c0_30 = arith.constant 0 : index
    %c0_31 = arith.constant 0 : index
    %c0_32 = arith.constant 0 : index
    %c0_33 = arith.constant 0 : index
    %49 = vector.load %arg6[%c0_30, %c0_31, %c0_32, %c0_33] : memref<1x16x16x128xf32, #tpu.memory_space<vmem>>, vector<1x16x16x128xf32>
    %50 = vector.shape_cast %49 : vector<1x16x16x128xf32> to vector<16x16x128xf32>
    %51 = vector.shape_cast %48 : vector<16x16x128xf32> to vector<1x16x16x128xf32>
    tpu.vector_store %arg6[%c0_30, %c0_31, %c0_32, %c0_33], %51 {strides = array<i32>} : memref<1x16x16x128xf32, #tpu.memory_space<vmem>>, vector<1x16x16x128xf32>,
    return
  }
  func.func @transform_0(%arg0: i32, %arg1: i32) -> (i32, i32, i32, i32) {
    %c0_i32 = arith.constant 0 : i32
    %c0_i32_0 = arith.constant 0 : i32
    %c0_i32_1 = arith.constant 0 : i32
    %c0_i32_2 = arith.constant 0 : i32
    return %arg0, %c0_i32, %c0_i32_0, %c0_i32_1 : i32, i32, i32, i32
  }
  func.func @transform_1(%arg0: i32, %arg1: i32) -> (i32, i32, i32) {
    %c0_i32 = arith.constant 0 : i32
    %c0_i32_0 = arith.constant 0 : i32
    %c0_i32_1 = arith.constant 0 : i32
    return %c0_i32, %c0_i32_0, %arg1 : i32, i32, i32
  }
  func.func @transform_2(%arg0: i32, %arg1: i32) -> (i32, i32) {
    %c0_i32 = arith.constant 0 : i32
    %c0_i32_0 = arith.constant 0 : i32
    return %c0_i32, %arg1 : i32, i32
  }
  func.func @transform_3(%arg0: i32, %arg1: i32) -> (i32, i32, i32, i32) {
    %c0_i32 = arith.constant 0 : i32
    %c0_i32_0 = arith.constant 0 : i32
    %c0_i32_1 = arith.constant 0 : i32
    return %arg0, %c0_i32, %c0_i32_0, %arg1 : i32, i32, i32, i32
  }
  func.func @transform_4(%arg0: i32, %arg1: i32) -> (i32, i32, i32, i32) {
    %c0_i32 = arith.constant 0 : i32
    %c0_i32_0 = arith.constant 0 : i32
    %c0_i32_1 = arith.constant 0 : i32
    return %arg0, %c0_i32, %c0_i32_0, %arg1 : i32, i32, i32, i32
  }
}

</mosaic_0001>

<bundles_post_ra>
// kernel: resnet_block_forward.3
= control target key start
LH: loop header
LB: loop body
LE: loop exit
PB: predicated region body
PF: predicated region fallthrough
CT: control target
= control target key end

     0   :  { %9 = vsyncpa [#allocation4], 0  ;;  %s6880_s0 = inlined_call_operand.vmem [shape: bf16[2,18,18,128], index: 0, kind: input, shape index: {}]   ;;  %s6881_s1 = inlined_call_operand.vmem [shape: bf16[3,384,128], index: 1, kind: input, shape index: {}]   ;;  %s6882_s2 = inlined_call_operand.vmem [shape: f32[1,128], index: 2, kind: input, shape index: {}]   ;;  %s6883_s3 = inlined_call_operand.vmem [shape: bf16[2,16,16,128], index: 3, kind: input, shape index: {}]   ;;  %s6884_s4 = inlined_call_operand.hbm [shape: f32[2,16,16,128], index: 4, kind: output, shape index: {}]  }
   0x1   :  { %11 = vsyncpa [#allocation4 + $0x1], 0  ;;  %s5557_s15 = smov 0   ;;  %s5559_s16 = smov 0  }
   0x2   :  { %s5561_s17 = smov 0   ;;  %s5563_s18 = smov 0  }
   0x3   :  { %s5565_s19 = smov 0   ;;  %s5567_s20 = smov 0  }
   0x4 LB: > { %s4074_s21 = sadd.s32 4294967295, %s5528_s20   ;;  %s4075_s22 = sadd.s32 4294967294, %s5528_s20   ;;  %s5528_s20 = sphi %s5567_s20, %s17_s20   ;;  %s5524_s19 = sphi %s5565_s19, %s6900_s19   ;;  %s5520_s18 = sphi %s5563_s18, %s6899_s18   ;;  %s5516_s17 = sphi %s5561_s17, %s6898_s17   ;;  %s5512_s16 = sphi %s5559_s16, %s6897_s16   ;;  %s5508_s15 = sphi %s5557_s15, %s6896_s15  }
   0x5   : > { %s29_s23 = sadd.s32 1, %s5524_s19  ;;  %s144_s24 = sadd.s32 1, %s5516_s17 }
   0x6   : > { %p31_p0 = scmp.ge.s32.totalorder %s29_s23, 2  ;;  %p154_p1 = scmp.ne.s32.totalorder %s5516_s17, %s5512_s16 }
   0x7   : > { %p155_p2 = scmp.eq.s32.totalorder %s4074_s21, 1  ;;  %p160_p3 = scmp.ne.s32.totalorder %s5512_s16, %s5508_s15 }
   0x8   : > { %s6902_s23 = smov (%p31_p0, %s29_s23), 0  ;;  %p161_p5 = scmp.eq.s32.totalorder %s4075_s22, 1 }
   0x9   : > { %p5597_p4 = por %p155_p2, %p154_p1  ;;  %s139_s26 = ssub.s32 %s5524_s19, %s6902_s23 }
   0xa   : > { %p4080_p6 = scmp.ge.s32.totalorder %s5528_s20, 1  ;;  %p142_p7 = scmp.eq.s32.totalorder %s139_s26, 0 }
   0xb   : > { %p5604_p8 = por %p161_p5, %p160_p3  ;;  %p211_p9 = scmp.lt.s32.totalorder %s5528_s20, 3 }
   0xc   : > { %s5610_s28 = scalar_select %p142_p7, %s5516_s17, %s144_s24  }
   0xd   : > { %p212_p10 = pnand %p4080_p6, %p211_p9 }
   0xe   : > { %p252_p11 = scmp.lt.s32.totalorder (!%p212_p10), %s5520_s18, 1  ;;  %s5285_s29 = sshll.u32 (!%p212_p10), %s5520_s18, 8 }
   0xf   : > { %215 = sbr.rel (%p212_p10) target bundleno = 845 (0x34d), region = 36  ;;  %s5470_s14 = scalar_lea.hbm (!%p212_p10), %s6884_s4, 512 }
  0x14   : > { %v5196_v0 = vld [vmem:[%s6881_s1 + $0xf8] sm:$0xff]  ;;  %v5195_v1 = vld [vmem:[%s6881_s1 + $0xf0] sm:$0xff]  ;;  %s5620_s7 = scalar_select %p252_p11, %s5520_s18, 1  ;;  %v5194_v2 = vld [vmem:[%s6881_s1 + $0xe8] sm:$0xff]  ;;  %vm402_vm0 = vsmask.f32 3328 }
  0x15   : > { %1844 = vmatpush.bf16.msra.mxu0 %v5196_v0  ;;  %5365 = vmatpush.bf16.msra.mxu1 %v5196_v0  ;;  %v5193_v8 = vld [vmem:[%s6881_s1 + $0xe0] sm:$0xff]  ;;  %v5192_v13 = vld [vmem:[%s6881_s1 + $0xd8] sm:$0xff]  ;;  %v5191_v18 = vld [vmem:[%s6881_s1 + $0xd0] sm:$0xff]  ;;  %vm403_vm1 = vsmask.f32 7440  ;;  %vm1017_vm2 = vcmask 1042432   ;;  %s3953_s18 = scalar_lea.hbm %s6884_s4, %s5285_s29 }
  0x16   : > { %5366 = vmatpush.bf16.msra.mxu2 %v5196_v0  ;;  %5367 = vmatpush.bf16.msra.mxu3 %v5196_v0  ;;  %s5389_s8 = smul.u32 216, %s5620_s7  ;;  %v5190_v22 = vld [vmem:[%s6881_s1 + $0xc8] sm:$0xff]  ;;  %v5189_v25 = vld [vmem:[%s6881_s1 + $0xc0] sm:$0xff]  ;;  %v5212_v38 = vld [vmem:[%s6881_s1 + $0x178] sm:$0xff]  ;;  %vm1018_vm3 = vcmask 1046532   ;;  %s5068_s12 = sshll.u32 %s5620_s7, 7 }
  0x17   : > { %v5124_v39 = vld [vmem:[%s6881_s1 + $0x38] sm:$0xff]  ;;  %v5211_v48 = vld [vmem:[%s6881_s1 + $0x170] sm:$0xff]  ;;  %v5210_v52 = vld [vmem:[%s6881_s1 + $0x168] sm:$0xff]  ;;  %s6627_s22 = scalar_lea.vmem %s6883_s3, %s5068_s12  ;;  %s249_s7 = sand.u32 1, %s5512_s16  }
  0x18   : > { %s5629_s13 = scalar_lea.vmem %s6880_s0, %s5389_s8  ;;  %v5204_v46 = vld [vmem:[%s6881_s1 + $0x138] sm:$0xff]  ;;  %v5123_v49 = vld [vmem:[%s6881_s1 + $0x30] sm:$0xff]  ;;  %v5122_v53 = vld [vmem:[%s6881_s1 + $0x28] sm:$0xff]  ;;  %s4081_s24 = sshll.u32 %s249_s7, 8 }
  0x19   : > { %1845 = vmatpush.bf16.msra.mxu0 %v5195_v1  ;;  %5368 = vmatpush.bf16.msra.mxu1 %v5195_v1  ;;  %v278_v3 = vld [vmem:[%s5629_s13 + $0xc] sm:$0xf]  ;;  %v279_v4 = vld [vmem:[%s5629_s13 + $0x10] sm:$0xf]  ;;  %v286_v5 = vld [vmem:[%s5629_s13 + $0x3c] sm:$0xf] }
  0x1a   : > { %5369 = vmatpush.bf16.msra.mxu2 %v5195_v1  ;;  %5370 = vmatpush.bf16.msra.mxu3 %v5195_v1  ;;  %314 = vst [vmem:[#allocation2 + $0x18] sm:$0xf] %v278_v3  ;;  %v287_v6 = vld [vmem:[%s5629_s13 + $0x40] sm:$0xf]  ;;  %v294_v7 = vld [vmem:[%s5629_s13 + $0x6c] sm:$0xf]  ;;  %vm5772_vm4 = vmor %vm402_vm0, %vm403_vm1 }
  0x1b   : > { %315 = vst [vmem:[#allocation2 + $0x24] sm:$0xf] %v279_v4  ;;  %v295_v9 = vld [vmem:[%s5629_s13 + $0x70] sm:$0xf]  ;;  %v302_v10 = vld [vmem:[%s5629_s13 + $0x9c] sm:$0xf]  ;;  %vm5786_vm5 = vmor %vm1017_vm2, %vm1018_vm3 }
  0x1c   : > { %322 = vst [vmem:[#allocation2 + $0x78] sm:$0xf] %v286_v5  ;;  %v303_v11 = vld [vmem:[%s5629_s13 + $0xa0] sm:$0xf]  ;;  %v280_v12 = vld [vmem:[%s5629_s13 + $0x18] sm:$0xf] }
  0x1d   : > { %1846 = vmatpush.bf16.msra.mxu0 %v5194_v2  ;;  %5371 = vmatpush.bf16.msra.mxu1 %v5194_v2  ;;  %323 = vst [vmem:[#allocation2 + $0x84] sm:$0xf] %v287_v6  ;;  %v281_v14 = vld [vmem:[%s5629_s13 + $0x1c] sm:$0xf]  ;;  %v288_v15 = vld [vmem:[%s5629_s13 + $0x48] sm:$0xf] }
  0x1e   : > { %5372 = vmatpush.bf16.msra.mxu2 %v5194_v2  ;;  %5373 = vmatpush.bf16.msra.mxu3 %v5194_v2  ;;  %330 = vst [vmem:[#allocation2 + $0xd8] sm:$0xf] %v294_v7  ;;  %v289_v16 = vld [vmem:[%s5629_s13 + $0x4c] sm:$0xf]  ;;  %v296_v17 = vld [vmem:[%s5629_s13 + $0x78] sm:$0xf] }
  0x1f   : > { %331 = vst [vmem:[#allocation2 + $0xe4] sm:$0xf] %v295_v9  ;;  %v297_v19 = vld [vmem:[%s5629_s13 + $0x7c] sm:$0xf]  ;;  %v304_v20 = vld [vmem:[%s5629_s13 + $0xa8] sm:$0xf] }
  0x20   : > { %338 = vst [vmem:[#allocation2 + $0x138] sm:$0xf] %v302_v10  ;;  %v305_v21 = vld [vmem:[%s5629_s13 + $0xac] sm:$0xf]  ;;  %v282_v23 = vld [vmem:[%s5629_s13 + $0x24] sm:$0xf] }
  0x21   : > { %1847 = vmatpush.bf16.msra.mxu0 %v5193_v8  ;;  %5374 = vmatpush.bf16.msra.mxu1 %v5193_v8  ;;  %339 = vst [vmem:[#allocation2 + $0x144] sm:$0xf] %v303_v11  ;;  %v283_v24 = vld [vmem:[%s5629_s13 + $0x28] sm:$0xf]  ;;  %v4153_v26 = vld [vmem:[#allocation2 + $0x18] sm:$0xf] }
  0x22   : > { %5375 = vmatpush.bf16.msra.mxu2 %v5193_v8  ;;  %5376 = vmatpush.bf16.msra.mxu3 %v5193_v8  ;;  %316 = vst [vmem:[#allocation2 + $0x30] sm:$0xf] %v280_v12  ;;  %v5142_v27 = vld [vmem:[#allocation2 + $0x20] sm:$0xf0]  ;;  %v290_v30 = vld [vmem:[%s5629_s13 + $0x54] sm:$0xf] }
  0x23   : > { %317 = vst [vmem:[#allocation2 + $0x3c] sm:$0xf] %v281_v14  ;;  %v4201_v28 = vld [vmem:[#allocation2 + $0x78] sm:$0xf]  ;;  %v298_v35 = vld [vmem:[%s5629_s13 + $0x84] sm:$0xf]  ;;  %v4154_v41 = vor.u32 %v5142_v27, %v4153_v26 }
  0x24   : > { %324 = vst [vmem:[#allocation2 + $0x90] sm:$0xf] %v288_v15  ;;  %v5154_v29 = vld [vmem:[#allocation2 + $0x80] sm:$0xf0]  ;;  %v291_v33 = vld [vmem:[%s5629_s13 + $0x58] sm:$0xf] }
  0x25   : > { %1848 = vmatpush.bf16.msra.mxu0 %v5192_v13  ;;  %5377 = vmatpush.bf16.msra.mxu1 %v5192_v13  ;;  %325 = vst [vmem:[#allocation2 + $0x9c] sm:$0xf] %v289_v16  ;;  %v4249_v31 = vld [vmem:[#allocation2 + $0xd8] sm:$0xf]  ;;  %v299_v37 = vld [vmem:[%s5629_s13 + $0x88] sm:$0xf]  ;;  %v4202_v42 = vor.u32 %v5154_v29, %v4201_v28 }
  0x26   : > { %5378 = vmatpush.bf16.msra.mxu2 %v5192_v13  ;;  %5379 = vmatpush.bf16.msra.mxu3 %v5192_v13  ;;  %332 = vst [vmem:[#allocation2 + $0xf0] sm:$0xf] %v296_v17  ;;  %v5166_v32 = vld [vmem:[#allocation2 + $0xe0] sm:$0xf0]  ;;  %v306_v40 = vld [vmem:[%s5629_s13 + $0xb4] sm:$0xf] }
  0x27   : > { %333 = vst [vmem:[#allocation2 + $0xfc] sm:$0xf] %v297_v19  ;;  %v4297_v34 = vld [vmem:[#allocation2 + $0x138] sm:$0xf]  ;;  %v4250_v44 = vor.u32 %v5166_v32, %v4249_v31  ;;  %v5203_v50 = vld [vmem:[%s6881_s1 + $0x130] sm:$0xff]  ;;  %v5202_v54 = vld [vmem:[%s6881_s1 + $0x128] sm:$0xff] }
  0x28   : > { %340 = vst [vmem:[#allocation2 + $0x150] sm:$0xf] %v304_v20  ;;  %v5178_v36 = vld [vmem:[#allocation2 + $0x140] sm:$0xf0]  ;;  %v307_v43 = vld [vmem:[%s5629_s13 + $0xb8] sm:$0xf] }
  0x29   : > { %1849 = vmatpush.bf16.msra.mxu0 %v5191_v18  ;;  %5380 = vmatpush.bf16.msra.mxu1 %v5191_v18  ;;  %341 = vst [vmem:[#allocation2 + $0x15c] sm:$0xf] %v305_v21  ;;  %v4298_v45 = vor.u32 %v5178_v36, %v4297_v34  ;;  %v5132_v47 = vld [vmem:[%s6881_s1 + $0x78] sm:$0xff]  ;;  %v5131_v51 = vld [vmem:[%s6881_s1 + $0x70] sm:$0xff]  ;;  %v5209_v55 = vld [vmem:[%s6881_s1 + $0x160] sm:$0xff]  ;;  %s6717_s26 = scalar_lea.vmem [#allocation3], %s4081_s24 }
  0x2a   : > { %5381 = vmatpush.bf16.msra.mxu2 %v5191_v18  ;;  %5382 = vmatpush.bf16.msra.mxu3 %v5191_v18  ;;  %318 = vst [vmem:[#allocation2 + $0x48] sm:$0xf] %v282_v23  ;;  %v5121_v56 = vld [vmem:[%s6881_s1 + $0x20] sm:$0xff]  ;;  %v5130_v57 = vld [vmem:[%s6881_s1 + $0x68] sm:$0xff]  ;;  %v284_v58 = vld [vmem:[%s5629_s13 + $0x30] sm:$0xf] }
  0x2b   : > { %319 = vst [vmem:[#allocation2 + $0x54] sm:$0xf] %v283_v24  ;;  %v285_v59 = vld [vmem:[%s5629_s13 + $0x34] sm:$0xf]  ;;  %v292_v60 = vld [vmem:[%s5629_s13 + $0x60] sm:$0xf] }
  0x2c   : > { %326 = vst [vmem:[#allocation2 + $0xa8] sm:$0xf] %v290_v30  ;;  %v293_v61 = vld [vmem:[%s5629_s13 + $0x64] sm:$0xf]  ;;  %v4165_v62 = vld [vmem:[#allocation2 + $0x30] sm:$0xf] }
  0x2d   : > { %1850 = vmatpush.bf16.msra.mxu0 %v5190_v22  ;;  %5383 = vmatpush.bf16.msra.mxu1 %v5190_v22  ;;  %327 = vst [vmem:[#allocation2 + $0xb4] sm:$0xf] %v291_v33  ;;  %v5145_v63 = vld [vmem:[#allocation2 + $0x38] sm:$0xf0]  ;;  %v4213_v0 = vld [vmem:[#allocation2 + $0x90] sm:$0xf] }
  0x2e   : > { %5384 = vmatpush.bf16.msra.mxu2 %v5190_v22  ;;  %5385 = vmatpush.bf16.msra.mxu3 %v5190_v22  ;;  %334 = vst [vmem:[#allocation2 + $0x108] sm:$0xf] %v298_v35  ;;  %v5157_v1 = vld [vmem:[#allocation2 + $0x98] sm:$0xf0]  ;;  %v300_v2 = vld [vmem:[%s5629_s13 + $0x90] sm:$0xf]  ;;  %v4166_v14 = vor.u32 %v5145_v63, %v4165_v62 }
  0x2f   : > { %335 = vst [vmem:[#allocation2 + $0x114] sm:$0xf] %v299_v37  ;;  %v4261_v3 = vld [vmem:[#allocation2 + $0xf0] sm:$0xf]  ;;  %v5169_v4 = vld [vmem:[#allocation2 + $0xf8] sm:$0xf0]  ;;  %v4214_v15 = vor.u32 %v5157_v1, %v4213_v0 }
  0x30   : > { %342 = vst [vmem:[#allocation2 + $0x168] sm:$0xf] %v306_v40  ;;  %v4309_v5 = vld [vmem:[#allocation2 + $0x150] sm:$0xf]  ;;  %v301_v6 = vld [vmem:[%s5629_s13 + $0x94] sm:$0xf]  ;;  %v4262_v16 = vor.u32 %v5169_v4, %v4261_v3 }
  0x31   : > { %1851 = vmatpush.bf16.msra.mxu0 %v5189_v25  ;;  %5386 = vmatpush.bf16.msra.mxu1 %v5189_v25  ;;  %343 = vst [vmem:[#allocation2 + $0x174] sm:$0xf] %v307_v43  ;;  %v5181_v7 = vld [vmem:[#allocation2 + $0x158] sm:$0xf0]  ;;  %v308_v8 = vld [vmem:[%s5629_s13 + $0xc0] sm:$0xf] }
  0x32   : > { %5387 = vmatpush.bf16.msra.mxu2 %v5189_v25  ;;  %5388 = vmatpush.bf16.msra.mxu3 %v5189_v25  ;;  %320 = vst [vmem:[#allocation2 + $0x60] sm:$0xf] %v284_v58  ;;  %v5201_v9 = vld [vmem:[%s6881_s1 + $0x120] sm:$0xff]  ;;  %v5208_v12 = vld [vmem:[%s6881_s1 + $0x158] sm:$0xff]  ;;  %v4310_v17 = vor.u32 %v5181_v7, %v4309_v5  ;;  %v351_v18 = vld [vmem:[%s5629_s13 + $0xc] sm:$0xf] }
  0x33   : > { %321 = vst [vmem:[#allocation2 + $0x6c] sm:$0xf] %v285_v59  ;;  %v5129_v10 = vld [vmem:[%s6881_s1 + $0x60] sm:$0xff]  ;;  %v5120_v13 = vld [vmem:[%s6881_s1 + $0x18] sm:$0xff]  ;;  %v352_v21 = vld [vmem:[%s5629_s13 + $0x10] sm:$0xf] }
  0x34   : > { %1852 = vmatmul.bf16.vlgmr.msra.gmra.mxu0 %v4154_v41  ;;  %1872 = vmatmul.bf16.vlgmr.msra.gmra.mxu1 %v4202_v42  ;;  %328 = vst [vmem:[#allocation2 + $0xc0] sm:$0xf] %v292_v60  ;;  %v309_v11 = vld [vmem:[%s5629_s13 + $0xc4] sm:$0xf]  ;;  %v5200_v19 = vld [vmem:[%s6881_s1 + $0x118] sm:$0xff]  ;;  %v430_v22 = vshrl.u32 %v351_v18, 16 }
  0x35   : > { %1892 = vmatmul.bf16.vlgmr.msra.gmra.mxu2 %v4250_v44  ;;  %1912 = vmatmul.bf16.vlgmr.msra.gmra.mxu3 %v4298_v45  ;;  %329 = vst [vmem:[#allocation2 + $0xcc] sm:$0xf] %v293_v61  ;;  %v5128_v20 = vld [vmem:[%s6881_s1 + $0x58] sm:$0xff]  ;;  %v433_v23 = vshll.u32 %v351_v18, 16  ;;  %v5207_v24 = vld [vmem:[%s6881_s1 + $0x150] sm:$0xff]  ;;  %v439_v26 = vshll.u32 %v352_v21, 16 }
  0x36   : > { %2022 = vmatpush.bf16.msrb.mxu2 %v5212_v38  ;;  %2511 = vmatpush.bf16.msrb.mxu3 %v5124_v39  ;;  %336 = vst [vmem:[#allocation2 + $0x120] sm:$0xf] %v300_v2  ;;  %v5119_v25 = vld [vmem:[%s6881_s1 + $0x10] sm:$0xff]  ;;  %v443_v27 = vshrl.u32 %v352_v21, 16  ;;  %v432_v28 = vrot.slane %v430_v22, 4  ;;  %v5206_v34 = vld [vmem:[%s6881_s1 + $0x148] sm:$0xff] }
  0x37   : > { %1933 = vmatpush.bf16.msrb.mxu1 %v5204_v46  ;;  %2600 = vmatpush.bf16.msrb.mxu0 %v5132_v47  ;;  %337 = vst [vmem:[#allocation2 + $0x12c] sm:$0xf] %v301_v6  ;;  %v435_v29 = vrot.slane %v433_v23, 5  ;;  %v5199_v30 = vld [vmem:[%s6881_s1 + $0x110] sm:$0xff]  ;;  %v348_v33 = vld [vmem:[%s5629_s13] sm:$0xf] }
  0x38   : > { %344 = vst [vmem:[#allocation2 + $0x180] sm:$0xf] %v308_v8  ;;  %v5127_v31 = vld [vmem:[%s6881_s1 + $0x50] sm:$0xff]  ;;  %v5118_v35 = vld [vmem:[%s6881_s1 + $0x8] sm:$0xff]  ;;  %v441_v36 = vrot.slane %v439_v26, 5  ;;  %v445_v37 = vrot.slane %v443_v27, 4 }
  0x39   : > { %345 = vst [vmem:[#allocation2 + $0x18c] sm:$0xf] %v309_v11  ;;  %v436_v32 = vor.u32 %v435_v29, %v432_v28  ;;  %v5198_v38 = vld [vmem:[%s6881_s1 + $0x108] sm:$0xff]  ;;  %v5205_v40 = vld [vmem:[%s6881_s1 + $0x140] sm:$0xff]  ;;  %v353_v42 = vld [vmem:[%s5629_s13 + $0x14] sm:$0x1] }
  0x3a   : > { %2023 = vmatpush.bf16.msrb.mxu2 %v5211_v48  ;;  %2512 = vmatpush.bf16.msrb.mxu3 %v5123_v49  ;;  %v5126_v41 = vld [vmem:[%s6881_s1 + $0x48] sm:$0xff]  ;;  %v446_v43 = vor.u32 %v445_v37, %v441_v36  ;;  %v349_v44 = vld [vmem:[%s5629_s13 + $0x4] sm:$0xf]  ;;  %v406_v45 = vshrl.u32 %v348_v33, 16  ;;  %v449_v47 = vshll.u32 %v353_v42, 16  ;;  %s3954_s6 = sshll.u32 %s6717_s26, 4  ;;  %s3955_s6 = int_to_ptr.vmem [resolvable:$true] %s3954_s6 }
  0x3b   : > { %1934 = vmatpush.bf16.msrb.mxu1 %v5203_v50  ;;  %2601 = vmatpush.bf16.msrb.mxu0 %v5131_v51  ;;  %v437_v39 = vrot.slane %v436_v32, 4  ;;  %v912_v48 = vld [vmem:[%s5629_s13 + $0xc] sm:$0xe]  ;;  %v913_v49 = vld [vmem:[%s5629_s13 + $0x10] sm:$0xf]  ;;  %v409_v50 = vshll.u32 %v348_v33, 16 }
  0x3c   : > { %v4177_v51 = vld [vmem:[#allocation2 + $0x48] sm:$0xf]  ;;  %v914_v58 = vld [vmem:[%s5629_s13 + $0x14] sm:$0x1]  ;;  %v4086_v60 = vrot.slane %v912_v48, 9  ;;  %v1029_v61 = vrot.slane %v913_v49, 5 }
  0x3d   : > { %v4273_v62 = vld [vmem:[#allocation2 + $0x108] sm:$0xf]  ;;  %v5172_v63 = vld [vmem:[#allocation2 + $0x110] sm:$0xf0]  ;;  %v5197_v2 = vld [vmem:[%s6881_s1 + $0x100] sm:$0xff]  ;;  %v451_v4 = vrot.slane %v449_v47, 5 }
  0x3e   : > { %2024 = vmatpush.bf16.msrb.mxu2 %v5210_v52  ;;  %2513 = vmatpush.bf16.msrb.mxu3 %v5122_v53  ;;  %v5148_v52 = vld [vmem:[#allocation2 + $0x50] sm:$0xf0]  ;;  %v4225_v53 = vld [vmem:[#allocation2 + $0xa8] sm:$0xf]  ;;  %v5125_v3 = vld [vmem:[%s6881_s1 + $0x40] sm:$0xff]  ;;  %v1032_v5 = vrot.slane %v914_v58, 5  ;;  %v1030_v7 = vsel %vm5786_vm5, %v4086_v60, %v1029_v61  ;;  %v4274_v22 = vor.u32 %v5172_v63, %v4273_v62 }
  0x3f   : > { %1935 = vmatpush.bf16.msrb.mxu1 %v5202_v54  ;;  %2602 = vmatpush.bf16.msrb.mxu0 %v5130_v57  ;;  %v5160_v54 = vld [vmem:[#allocation2 + $0xb0] sm:$0xf0]  ;;  %v447_v57 = vrot.slane %v446_v43, 4  ;;  %v4321_v0 = vld [vmem:[#allocation2 + $0x168] sm:$0xf]  ;;  %v1031_v8 = vrot.slane %v1029_v61, 4  ;;  %v4178_v18 = vor.u32 %v5148_v52, %v4177_v51 }
  0x40   : > { %v5184_v1 = vld [vmem:[#allocation2 + $0x170] sm:$0xf0]  ;;  %v276_v6 = vld [vmem:[%s5629_s13] sm:$0xf]  ;;  %1184 = vst [vmem:[#allocation2 + $0x20] sm:$0xf] %v1030_v7 }
  0x41   : > { %312 = vst [vmem:[#allocation2] sm:$0xf] %v276_v6  ;;  %v452_v11 = vsel %vm5772_vm4, %v447_v57, %v451_v4  ;;  %v4322_v23 = vor.u32 %v5184_v1, %v4321_v0  ;;  %v355_v27 = vld [vmem:[%s5629_s13 + $0x1c] sm:$0xf]  ;;  %v356_v47 = vld [vmem:[%s5629_s13 + $0x20] sm:$0x1] }
  0x42   : > { %2025 = vmatpush.bf16.msrb.mxu2 %v5209_v55  ;;  %2514 = vmatpush.bf16.msrb.mxu3 %v5121_v56  ;;  %v5117_v55 = vld [vmem:[%s6881_s1] sm:$0xff]  ;;  %v442_v56 = vsel %vm5772_vm4, %v437_v39, %v441_v36  ;;  %876 = vst [vmem:[#allocation2 + $0x28] sm:$0xf] %v452_v11  ;;  %v463_v32 = vshll.u32 %v355_v27, 16  ;;  %v467_v33 = vshrl.u32 %v355_v27, 16  ;;  %v5276_v39 = vld [vmem:[%s6881_s1 + $0x1f8] sm:$0xff] }
  0x43   : > { %1936 = vmatpush.bf16.msrb.mxu1 %v5201_v9  ;;  %2603 = vmatpush.bf16.msrb.mxu0 %v5129_v10  ;;  %875 = vst [vmem:[#allocation2 + $0x1c] sm:$0xf] %v442_v56  ;;  %v277_v9 = vld [vmem:[%s5629_s13 + $0x4] sm:$0xf]  ;;  %v408_v10 = vrot.slane %v406_v45, 4  ;;  %v5284_v45 = vld [vmem:[%s6881_s1 + $0x238] sm:$0xff] }
  0x44   : > { %1857 = vmatmul.bf16.gmra.mxu0 %v4166_v14  ;;  %1877 = vmatmul.bf16.gmra.mxu1 %v4214_v15  ;;  %v415_v14 = vshll.u32 %v349_v44, 16  ;;  %v1033_v15 = vsel %vm5786_vm5, %v1031_v8, %v1032_v5  ;;  %313 = vst [vmem:[#allocation2 + $0xc] sm:$0xf] %v277_v9  ;;  %v465_v42 = vrot.slane %v463_v32, 5  ;;  %v469_v43 = vrot.slane %v467_v33, 4  ;;  %s3956_s8 = sshll.u32 %s3953_s18, 4  ;;  %s3957_s8 = int_to_ptr.hbm [resolvable:$true] %s3956_s8 }
  0x45   : > { %1897 = vmatmul.bf16.gmra.mxu2 %v4262_v16  ;;  %1917 = vmatmul.bf16.gmra.mxu3 %v4310_v17  ;;  %v419_v16 = vshrl.u32 %v349_v44, 16  ;;  %1185 = vst [vmem:[#allocation2 + $0x2c] sm:$0xf] %v1033_v15  ;;  %v915_v51 = vld [vmem:[%s5629_s13 + $0x18] sm:$0xe]  ;;  %s3941_s9 = scalar_lea.sflag [#allocation4], %s249_s7 }
  0x46   : > { %2026 = vmatpush.bf16.msrb.mxu2 %v5208_v12  ;;  %2515 = vmatpush.bf16.msrb.mxu3 %v5120_v13  ;;  %v350_v12 = vld [vmem:[%s5629_s13 + $0x8] sm:$0x1]  ;;  %v411_v13 = vrot.slane %v409_v50, 5  ;;  %v417_v21 = vrot.slane %v415_v14, 5  ;;  %v470_v49 = vor.u32 %v469_v43, %v465_v42  ;;  %v473_v50 = vshll.u32 %v356_v47, 16  ;;  %s5464_s10 = sshra.s32 %s3957_s8, 4  ;;  %s5465_s10 = int_to_ptr.hbm [resolvable:$true] %s5464_s10 }
  0x47   : > { %1937 = vmatpush.bf16.msrb.mxu1 %v5200_v19  ;;  %2604 = vmatpush.bf16.msrb.mxu0 %v5128_v20  ;;  %v425_v17 = vshll.u32 %v350_v12, 16  ;;  %v4226_v19 = vor.u32 %v5160_v54, %v4225_v53  ;;  %v916_v52 = vld [vmem:[%s5629_s13 + $0x1c] sm:$0xf]  ;;  %v917_v53 = vld [vmem:[%s5629_s13 + $0x20] sm:$0x1]  ;;  %v4087_v57 = vrot.slane %v915_v51, 9  ;;  %p5471_p1 = scmp.lt.s32.totalorder %s5465_s10, %s6884_s4 }
  0x48   : > { %v412_v20 = vor.u32 %v411_v13, %v408_v10  ;;  %v475_v56 = vrot.slane %v473_v50, 5  ;;  %v4189_v58 = vld [vmem:[#allocation2 + $0x60] sm:$0xf]  ;;  %v5151_v60 = vld [vmem:[#allocation2 + $0x68] sm:$0xf0]  ;;  %v1036_v61 = vrot.slane %v916_v52, 5 }
  0x49   : > { %v1039_v62 = vrot.slane %v917_v53, 5  ;;  %v4237_v63 = vld [vmem:[#allocation2 + $0xc0] sm:$0xf]  ;;  %v5163_v0 = vld [vmem:[#allocation2 + $0xc8] sm:$0xf0]  ;;  %v4190_v9 = vor.u32 %v5151_v60, %v4189_v58 }
  0x4a   : > { %2027 = vmatpush.bf16.msrb.mxu2 %v5207_v24  ;;  %2516 = vmatpush.bf16.msrb.mxu3 %v5119_v25  ;;  %v421_v24 = vrot.slane %v419_v16, 4  ;;  %v354_v25 = vld [vmem:[%s5629_s13 + $0x18] sm:$0xf]  ;;  %v413_v26 = vrot.slane %v412_v20, 4  ;;  %v4285_v1 = vld [vmem:[#allocation2 + $0x120] sm:$0xf]  ;;  %v1037_v4 = vsel %vm5786_vm5, %v4087_v57, %v1036_v61  ;;  %v4238_v10 = vor.u32 %v5163_v0, %v4237_v63 }
  0x4b   : > { %1938 = vmatpush.bf16.msrb.mxu1 %v5199_v30  ;;  %2605 = vmatpush.bf16.msrb.mxu0 %v5127_v31  ;;  %v454_v28 = vshrl.u32 %v354_v25, 16  ;;  %v457_v29 = vshll.u32 %v354_v25, 16  ;;  %v427_v31 = vrot.slane %v425_v17, 5  ;;  %v1038_v5 = vrot.slane %v1036_v61, 4  ;;  %v4333_v6 = vld [vmem:[#allocation2 + $0x180] sm:$0xf] }
  0x4c   : > { %v422_v30 = vor.u32 %v421_v24, %v417_v21  ;;  %v5187_v7 = vld [vmem:[#allocation2 + $0x188] sm:$0xf0]  ;;  %1186 = vst [vmem:[#allocation2 + $0x38] sm:$0xf] %v1037_v4  ;;  %v357_v13 = vld [vmem:[%s5629_s13 + $0x24] sm:$0xf] }
  0x4d   : > { %v459_v36 = vrot.slane %v457_v29, 5  ;;  %v1040_v8 = vsel %vm5786_vm5, %v1038_v5, %v1039_v62  ;;  %v4334_v12 = vor.u32 %v5187_v7, %v4333_v6  ;;  %v358_v14 = vld [vmem:[%s5629_s13 + $0x28] sm:$0xf]  ;;  %v478_v15 = vshrl.u32 %v357_v13, 16  ;;  %v918_v27 = vld [vmem:[%s5629_s13 + $0x24] sm:$0xe] }
  0x4e   : > { %2028 = vmatpush.bf16.msrb.mxu2 %v5206_v34  ;;  %2517 = vmatpush.bf16.msrb.mxu3 %v5118_v35  ;;  %v418_v34 = vsel %vm5772_vm4, %v413_v26, %v417_v21  ;;  %v456_v35 = vrot.slane %v454_v28, 4  ;;  %v423_v37 = vrot.slane %v422_v30, 4  ;;  %1187 = vst [vmem:[#allocation2 + $0x44] sm:$0xf] %v1040_v8  ;;  %v481_v16 = vshll.u32 %v357_v13, 16  ;;  %v5267_v61 = vld [vmem:[%s6881_s1 + $0x1b0] sm:$0xff] }
  0x4f   : > { %1939 = vmatpush.bf16.msrb.mxu1 %v5198_v38  ;;  %2606 = vmatpush.bf16.msrb.mxu0 %v5126_v41  ;;  %873 = vst [vmem:[#allocation2 + $0x4] sm:$0xf] %v418_v34  ;;  %v5268_v38 = vld [vmem:[%s6881_s1 + $0x1b8] sm:$0xff]  ;;  %v487_v17 = vshll.u32 %v358_v14, 16  ;;  %v480_v20 = vrot.slane %v478_v15, 4  ;;  %v5275_v62 = vld [vmem:[%s6881_s1 + $0x1f0] sm:$0xff] }
  0x50   : > { %v460_v41 = vor.u32 %v459_v36, %v456_v35  ;;  %v428_v44 = vsel %vm5772_vm4, %v423_v37, %v427_v31  ;;  %v483_v21 = vrot.slane %v481_v16, 5  ;;  %v919_v25 = vld [vmem:[%s5629_s13 + $0x28] sm:$0xf]  ;;  %v920_v28 = vld [vmem:[%s5629_s13 + $0x2c] sm:$0x1]  ;;  %v4088_v31 = vrot.slane %v918_v27, 9 }
  0x51   : > { %874 = vst [vmem:[#allocation2 + $0x10] sm:$0xf] %v428_v44  ;;  %v1043_v33 = vrot.slane %v919_v25, 5  ;;  %v1046_v34 = vrot.slane %v920_v28, 5  ;;  %v5141_v36 = vld [vmem:[#allocation2 + $0x1c] sm:$0xf] }
  0x52   : > { %2029 = vmatpush.bf16.msrb.mxu2 %v5205_v40  ;;  %2518 = vmatpush.bf16.msrb.mxu3 %v5117_v55  ;;  %v5140_v40 = vld [vmem:[%s6881_s1 + $0xb8] sm:$0xff]  ;;  %v461_v48 = vrot.slane %v460_v41, 4  ;;  %v471_v55 = vrot.slane %v470_v49, 4  ;;  %v484_v26 = vor.u32 %v483_v21, %v480_v20  ;;  %v4161_v41 = vld [vmem:[#allocation2 + $0x20] sm:$0xf] }
  0x53   : > { %1940 = vmatpush.bf16.msrb.mxu1 %v5197_v2  ;;  %2607 = vmatpush.bf16.msrb.mxu0 %v5125_v3  ;;  %v5175_v3 = vld [vmem:[#allocation2 + $0x128] sm:$0xf0]  ;;  %v362_v5 = vld [vmem:[%s5629_s13 + $0x38] sm:$0x1]  ;;  %v921_v7 = vld [vmem:[%s5629_s13 + $0x30] sm:$0xe] }
  0x54   : > { %1862 = vmatmul.bf16.gmra.mxu0 %v4178_v18  ;;  %1882 = vmatmul.bf16.gmra.mxu1 %v4226_v19  ;;  %v466_v54 = vsel %vm5772_vm4, %v461_v48, %v465_v42  ;;  %v476_v2 = vsel %vm5772_vm4, %v471_v55, %v475_v56  ;;  %v4286_v11 = vor.u32 %v5175_v3, %v4285_v1  ;;  %v491_v18 = vshrl.u32 %v358_v14, 16  ;;  %v359_v19 = vld [vmem:[%s5629_s13 + $0x2c] sm:$0x1]  ;;  %v4441_v42 = vld [vmem:[#allocation2] sm:$0xf]  ;;  %v5139_v1 = vld [vmem:[%s6881_s1 + $0xb0] sm:$0xff] }
  0x55   : > { %1902 = vmatmul.bf16.gmra.mxu2 %v4274_v22  ;;  %1922 = vmatmul.bf16.gmra.mxu3 %v4322_v23  ;;  %877 = vst [vmem:[#allocation2 + $0x34] sm:$0xf] %v466_v54  ;;  %v489_v22 = vrot.slane %v487_v17, 5  ;;  %v497_v24 = vshll.u32 %v359_v19, 16  ;;  %v485_v32 = vrot.slane %v484_v26, 4 }
  0x56   : > { %3292 = vmatpush.bf16.msra.mxu2 %v5268_v38  ;;  %3381 = vmatpush.bf16.msra.mxu3 %v5276_v39  ;;  %878 = vst [vmem:[#allocation2 + $0x40] sm:$0xf] %v476_v2  ;;  %v493_v23 = vrot.slane %v491_v18, 4  ;;  %v1044_v38 = vsel %vm5786_vm5, %v4088_v31, %v1043_v33  ;;  %v1045_v39 = vrot.slane %v1043_v33, 4  ;;  %v5069_v44 = vld [vmem:[#allocation2 + $0x4] sm:$0xf] }
  0x57   : > { %2689 = vmatpush.bf16.msra.mxu1 %v5140_v40  ;;  %3470 = vmatpush.bf16.msra.mxu0 %v5284_v45  ;;  %v499_v30 = vrot.slane %v497_v24, 5  ;;  %v490_v37 = vsel %vm5772_vm4, %v485_v32, %v489_v22  ;;  %v4155_v40 = vld [vmem:[#allocation2 + $0x24] sm:$0xf0]  ;;  %v5143_v48 = vld [vmem:[#allocation2 + $0x28] sm:$0xf0]  ;;  %v5283_v2 = vld [vmem:[%s6881_s1 + $0x230] sm:$0xff] }
  0x58   : > { %v494_v29 = vor.u32 %v493_v23, %v489_v22  ;;  %879 = vst [vmem:[#allocation2 + $0x4c] sm:$0xf] %v490_v37  ;;  %v4443_v45 = vld [vmem:[#allocation2 + $0xc] sm:$0xf0]  ;;  %v1047_v47 = vsel %vm5786_vm5, %v1045_v39, %v1046_v34  ;;  %v5070_v49 = vld [vmem:[#allocation2 + $0x8] sm:$0xf0]  ;;  %v4158_v50 = vor.u32 %v5141_v36, %v4155_v40  ;;  %v4162_v52 = vor.u32 %v5143_v48, %v4161_v41 }
  0x59   : > { %1188 = vst [vmem:[#allocation2 + $0x50] sm:$0xf] %v1044_v38  ;;  %v4446_v51 = vor.u32 %v5069_v44, %v4443_v45  ;;  %v4442_v53 = vor.u32 %v5070_v49, %v4441_v42  ;;  %v360_v54 = vld [vmem:[%s5629_s13 + $0x30] sm:$0xf]  ;;  %v361_v55 = vld [vmem:[%s5629_s13 + $0x34] sm:$0xf] }
  0x5a   : > { %v495_v35 = vrot.slane %v494_v29, 4  ;;  %1189 = vst [vmem:[#allocation2 + $0x5c] sm:$0xf] %v1047_v47  ;;  %v502_v56 = vshrl.u32 %v360_v54, 16  ;;  %v505_v57 = vshll.u32 %v360_v54, 16  ;;  %v511_v58 = vshll.u32 %v361_v55, 16  ;;  %3293 = vmatpush.bf16.msra.mxu2 %v5267_v61  ;;  %3382 = vmatpush.bf16.msra.mxu3 %v5275_v62 }
  0x5b   : > { %v515_v60 = vshrl.u32 %v361_v55, 16  ;;  %v922_v8 = vld [vmem:[%s5629_s13 + $0x34] sm:$0xf]  ;;  %2690 = vmatpush.bf16.msra.mxu1 %v5139_v1  ;;  %3471 = vmatpush.bf16.msra.mxu0 %v5283_v2  ;;  %v4453_v22 = vld [vmem:[#allocation2 + $0x18] sm:$0xf] }
  0x5c   : > { %v500_v43 = vsel %vm5772_vm4, %v495_v35, %v499_v30  ;;  %v504_v63 = vrot.slane %v502_v56, 4  ;;  %v507_v0 = vrot.slane %v505_v57, 5  ;;  %v513_v3 = vrot.slane %v511_v58, 5  ;;  %v5144_v20 = vld [vmem:[#allocation2 + $0x34] sm:$0xf] }
  0x5d   : > { %880 = vst [vmem:[#allocation2 + $0x58] sm:$0xf] %v500_v43  ;;  %v517_v4 = vrot.slane %v515_v60, 4  ;;  %v1050_v13 = vrot.slane %v922_v8, 5  ;;  %v5073_v23 = vld [vmem:[#allocation2 + $0x20] sm:$0xf0] }
  0x5e   : > { %v508_v6 = vor.u32 %v507_v0, %v504_v63  ;;  %v5072_v24 = vld [vmem:[#allocation2 + $0x1c] sm:$0xf]  ;;  %v4167_v27 = vld [vmem:[#allocation2 + $0x3c] sm:$0xf0]  ;;  %v4455_v28 = vld [vmem:[#allocation2 + $0x24] sm:$0xf0]  ;;  %v4454_v34 = vor.u32 %v5073_v23, %v4453_v22 }
  0x5f   : > { %v1052_v19 = vrot.slane %v1050_v13, 4  ;;  %v4173_v29 = vld [vmem:[#allocation2 + $0x38] sm:$0xf]  ;;  %v5146_v30 = vld [vmem:[#allocation2 + $0x40] sm:$0xf0]  ;;  %v4170_v31 = vor.u32 %v5144_v20, %v4167_v27  ;;  %v4458_v32 = vor.u32 %v5072_v24, %v4455_v28  ;;  %v5274_v20 = vld [vmem:[%s6881_s1 + $0x1e8] sm:$0xff] }
  0x60   : > { %v509_v14 = vrot.slane %v508_v6, 4  ;;  %v4174_v33 = vor.u32 %v5146_v30, %v4173_v29  ;;  %v363_v35 = vld [vmem:[%s5629_s13 + $0x3c] sm:$0xf]  ;;  %v364_v36 = vld [vmem:[%s5629_s13 + $0x40] sm:$0xf]  ;;  %3383 = vmatpush.bf16.msra.mxu3 %v5274_v20 }
  0x61   : > { %v526_v37 = vshrl.u32 %v363_v35, 16  ;;  %v529_v38 = vshll.u32 %v363_v35, 16  ;;  %v535_v39 = vshll.u32 %v364_v36, 16  ;;  %v365_v40 = vld [vmem:[%s5629_s13 + $0x44] sm:$0x1]  ;;  %v539_v41 = vshrl.u32 %v364_v36, 16 }
  0x62   : > { %v514_v21 = vsel %vm5772_vm4, %v509_v14, %v513_v3  ;;  %v925_v45 = vld [vmem:[%s5629_s13 + $0x40] sm:$0xf]  ;;  %v545_v48 = vshll.u32 %v365_v40, 16  ;;  %v924_v49 = vld [vmem:[%s5629_s13 + $0x3c] sm:$0xe]  ;;  %v5282_v35 = vld [vmem:[%s6881_s1 + $0x228] sm:$0xff] }
  0x63   : > { %881 = vst [vmem:[#allocation2 + $0x64] sm:$0xf] %v514_v21  ;;  %v528_v42 = vrot.slane %v526_v37, 4  ;;  %v531_v43 = vrot.slane %v529_v38, 5  ;;  %v537_v44 = vrot.slane %v535_v39, 5  ;;  %v541_v47 = vrot.slane %v539_v41, 4  ;;  %3472 = vmatpush.bf16.msra.mxu0 %v5282_v35 }
  0x64   : > { %1867 = vmatmul.bf16.gmra.mxu0 %v4190_v9  ;;  %1887 = vmatmul.bf16.gmra.mxu1 %v4238_v10  ;;  %v518_v9 = vor.u32 %v517_v4, %v513_v3  ;;  %v521_v10 = vshll.u32 %v362_v5, 16  ;;  %v547_v56 = vrot.slane %v545_v48, 5  ;;  %v5147_v62 = vld [vmem:[#allocation2 + $0x4c] sm:$0xf]  ;;  %v4465_v63 = vld [vmem:[#allocation2 + $0x30] sm:$0xf] }
  0x65   : > { %1907 = vmatmul.bf16.gmra.mxu2 %v4286_v11  ;;  %1927 = vmatmul.bf16.gmra.mxu3 %v4334_v12  ;;  %v923_v11 = vld [vmem:[%s5629_s13 + $0x38] sm:$0x1]  ;;  %v4089_v12 = vrot.slane %v921_v7, 9  ;;  %v542_v55 = vor.u32 %v541_v47, %v537_v44  ;;  %v5076_v0 = vld [vmem:[#allocation2 + $0x38] sm:$0xf0] }
  0x66   : > { %v1053_v15 = vrot.slane %v923_v11, 5  ;;  %v519_v16 = vrot.slane %v518_v9, 4  ;;  %v523_v17 = vrot.slane %v521_v10, 5  ;;  %v5075_v1 = vld [vmem:[#allocation2 + $0x34] sm:$0xf] }
  0x67   : > { %v1051_v18 = vsel %vm5786_vm5, %v4089_v12, %v1050_v13  ;;  %v543_v61 = vrot.slane %v542_v55, 4  ;;  %v4179_v4 = vld [vmem:[#allocation2 + $0x54] sm:$0xf0]  ;;  %v4467_v5 = vld [vmem:[#allocation2 + $0x3c] sm:$0xf0]  ;;  %v4466_v12 = vor.u32 %v5076_v0, %v4465_v63 }
  0x68   : > { %1190 = vst [vmem:[#allocation2 + $0x68] sm:$0xf] %v1051_v18  ;;  %v524_v25 = vsel %vm5772_vm4, %v519_v16, %v523_v17  ;;  %v1054_v26 = vsel %vm5786_vm5, %v1052_v19, %v1053_v15  ;;  %v4185_v7 = vld [vmem:[#allocation2 + $0x50] sm:$0xf]  ;;  %v5149_v8 = vld [vmem:[#allocation2 + $0x58] sm:$0xf0]  ;;  %v4182_v9 = vor.u32 %v5147_v62, %v4179_v4  ;;  %v4470_v10 = vor.u32 %v5075_v1, %v4467_v5 }
  0x69   : > { %882 = vst [vmem:[#allocation2 + $0x70] sm:$0xf] %v524_v25  ;;  %v548_v6 = vsel %vm5772_vm4, %v543_v61, %v547_v56  ;;  %v4186_v11 = vor.u32 %v5149_v8, %v4185_v7  ;;  %v366_v13 = vld [vmem:[%s5629_s13 + $0x48] sm:$0xf]  ;;  %v367_v14 = vld [vmem:[%s5629_s13 + $0x4c] sm:$0xf] }
  0x6a   : > { %1191 = vst [vmem:[#allocation2 + $0x74] sm:$0xf] %v1054_v26  ;;  %v550_v15 = vshrl.u32 %v366_v13, 16  ;;  %v553_v16 = vshll.u32 %v366_v13, 16  ;;  %v559_v17 = vshll.u32 %v367_v14, 16  ;;  %v563_v18 = vshrl.u32 %v367_v14, 16 }
  0x6b   : > { %884 = vst [vmem:[#allocation2 + $0x88] sm:$0xf] %v548_v6  ;;  %v5266_v19 = vld [vmem:[%s6881_s1 + $0x1a8] sm:$0xff]  ;;  %v368_v23 = vld [vmem:[%s5629_s13 + $0x50] sm:$0x1] }
  0x6c   : > { %v552_v21 = vrot.slane %v550_v15, 4  ;;  %v555_v22 = vrot.slane %v553_v16, 5  ;;  %v561_v24 = vrot.slane %v559_v17, 5  ;;  %v565_v25 = vrot.slane %v563_v18, 4  ;;  %3294 = vmatpush.bf16.msra.mxu2 %v5266_v19  ;;  %v927_v28 = vld [vmem:[%s5629_s13 + $0x48] sm:$0xe] }
  0x6d   : > { %v569_v27 = vshll.u32 %v368_v23, 16  ;;  %v928_v29 = vld [vmem:[%s5629_s13 + $0x4c] sm:$0xf]  ;;  %v371_v0 = vld [vmem:[%s5629_s13 + $0x5c] sm:$0x1] }
  0x6e   : > { %v556_v26 = vor.u32 %v555_v22, %v552_v21  ;;  %v566_v30 = vor.u32 %v565_v25, %v561_v24  ;;  %v5078_v47 = vld [vmem:[#allocation2 + $0x4c] sm:$0xf]  ;;  %v931_v5 = vld [vmem:[%s5629_s13 + $0x58] sm:$0xf]  ;;  %v593_v7 = vshll.u32 %v371_v0, 16  ;;  %v5137_v0 = vld [vmem:[%s6881_s1 + $0xa0] sm:$0xff] }
  0x6f   : > { %v571_v37 = vrot.slane %v569_v27, 5  ;;  %v930_v8 = vld [vmem:[%s5629_s13 + $0x54] sm:$0xe]  ;;  %v4489_v21 = vld [vmem:[#allocation2 + $0x60] sm:$0xf] }
  0x70   : > { %v557_v36 = vrot.slane %v556_v26, 4  ;;  %v567_v39 = vrot.slane %v566_v30, 4  ;;  %v595_v15 = vrot.slane %v593_v7, 5  ;;  %v5081_v22 = vld [vmem:[#allocation2 + $0x64] sm:$0xf] }
  0x71   : > { %v4491_v23 = vld [vmem:[#allocation2 + $0x6c] sm:$0xf0]  ;;  %v5082_v30 = vld [vmem:[#allocation2 + $0x68] sm:$0xf0] }
  0x72   : > { %v572_v48 = vsel %vm5772_vm4, %v567_v39, %v571_v37  ;;  %v4203_v27 = vld [vmem:[#allocation2 + $0x84] sm:$0xf0]  ;;  %v372_v37 = vld [vmem:[%s5629_s13 + $0x60] sm:$0xf] }
  0x73   : > { %886 = vst [vmem:[#allocation2 + $0xa0] sm:$0xf] %v572_v48  ;;  %v598_v39 = vshrl.u32 %v372_v37, 16  ;;  %v374_v48 = vld [vmem:[%s5629_s13 + $0x68] sm:$0x1] }
  0x74   : > { %1941 = vmatmul.bf16.vlgmr.msrb.gmra.mxu1 %v4158_v50  ;;  %2608 = vmatmul.bf16.vlgmr.msrb.gmra.mxu0 %v4446_v51  ;;  %v926_v50 = vld [vmem:[%s5629_s13 + $0x44] sm:$0x1]  ;;  %v532_v51 = vor.u32 %v531_v43, %v528_v42  ;;  %v562_v42 = vsel %vm5772_vm4, %v557_v36, %v561_v24  ;;  %v4490_v36 = vor.u32 %v5082_v30, %v4489_v21 }
  0x75   : > { %2030 = vmatmul.bf16.vlgmr.msrb.gmra.mxu2 %v4162_v52  ;;  %2519 = vmatmul.bf16.vlgmr.msrb.gmra.mxu3 %v4442_v53  ;;  %v4090_v52 = vrot.slane %v924_v49, 9  ;;  %v1057_v53 = vrot.slane %v925_v45, 5  ;;  %v1060_v54 = vrot.slane %v926_v50, 5  ;;  %v5150_v43 = vld [vmem:[#allocation2 + $0x64] sm:$0xf] }
  0x76   : > { %v533_v57 = vrot.slane %v532_v51, 4  ;;  %v4477_v45 = vld [vmem:[#allocation2 + $0x48] sm:$0xf]  ;;  %885 = vst [vmem:[#allocation2 + $0x94] sm:$0xf] %v562_v42 }
  0x77   : > { %v1058_v58 = vsel %vm5786_vm5, %v4090_v52, %v1057_v53  ;;  %v1059_v60 = vrot.slane %v1057_v53, 4  ;;  %v4191_v50 = vld [vmem:[#allocation2 + $0x6c] sm:$0xf0]  ;;  %v4479_v51 = vld [vmem:[#allocation2 + $0x54] sm:$0xf0] }
  0x78   : > { %1192 = vst [vmem:[#allocation2 + $0x80] sm:$0xf] %v1058_v58  ;;  %v538_v2 = vsel %vm5772_vm4, %v533_v57, %v537_v44  ;;  %v4197_v44 = vld [vmem:[#allocation2 + $0x68] sm:$0xf]  ;;  %v5152_v52 = vld [vmem:[#allocation2 + $0x70] sm:$0xf0]  ;;  %v4482_v55 = vor.u32 %v5078_v47, %v4479_v51 }
  0x79   : > { %v1061_v3 = vsel %vm5786_vm5, %v1059_v60, %v1060_v54  ;;  %883 = vst [vmem:[#allocation2 + $0x7c] sm:$0xf] %v538_v2  ;;  %v5079_v53 = vld [vmem:[#allocation2 + $0x50] sm:$0xf0]  ;;  %v4194_v54 = vor.u32 %v5150_v43, %v4191_v50  ;;  %v4198_v56 = vor.u32 %v5152_v52, %v4197_v44  ;;  %v370_v60 = vld [vmem:[%s5629_s13 + $0x58] sm:$0xf] }
  0x7a   : > { %1193 = vst [vmem:[#allocation2 + $0x8c] sm:$0xf] %v1061_v3  ;;  %v4478_v57 = vor.u32 %v5079_v53, %v4477_v45  ;;  %v369_v58 = vld [vmem:[%s5629_s13 + $0x54] sm:$0xf]  ;;  %v583_v63 = vshll.u32 %v370_v60, 16  ;;  %v587_v1 = vshrl.u32 %v370_v60, 16 }
  0x7b   : > { %v574_v61 = vshrl.u32 %v369_v58, 16  ;;  %v577_v62 = vshll.u32 %v369_v58, 16  ;;  %v5265_v43 = vld [vmem:[%s6881_s1 + $0x1a0] sm:$0xff]  ;;  %v600_v45 = vrot.slane %v598_v39, 4  ;;  %v617_v52 = vshll.u32 %v374_v48, 16 }
  0x7c   : > { %v585_v4 = vrot.slane %v583_v63, 5  ;;  %v589_v6 = vrot.slane %v587_v1, 4  ;;  %v5273_v44 = vld [vmem:[%s6881_s1 + $0x1e0] sm:$0xff]  ;;  %3295 = vmatpush.bf16.msra.mxu2 %v5265_v43  ;;  %v935_v58 = vld [vmem:[%s5629_s13 + $0x68] sm:$0x1] }
  0x7d   : > { %v576_v2 = vrot.slane %v574_v61, 4  ;;  %v579_v3 = vrot.slane %v577_v62, 5  ;;  %3384 = vmatpush.bf16.msra.mxu3 %v5273_v44  ;;  %v933_v53 = vld [vmem:[%s5629_s13 + $0x60] sm:$0xe]  ;;  %v937_v39 = vld [vmem:[%s5629_s13 + $0x70] sm:$0xf] }
  0x7e   : > { %v590_v14 = vor.u32 %v589_v6, %v585_v4  ;;  %v4093_v60 = vrot.slane %v933_v53, 9  ;;  %v5281_v1 = vld [vmem:[%s6881_s1 + $0x220] sm:$0xff]  ;;  %v938_v43 = vld [vmem:[%s5629_s13 + $0x74] sm:$0x1] }
  0x7f   : > { %v4209_v20 = vld [vmem:[#allocation2 + $0x80] sm:$0xf]  ;;  %3473 = vmatpush.bf16.msra.mxu0 %v5281_v1  ;;  %v4513_v1 = vld [vmem:[#allocation2 + $0x90] sm:$0xf] }
  0x80   : > { %v591_v19 = vrot.slane %v590_v14, 4  ;;  %v5153_v26 = vld [vmem:[#allocation2 + $0x7c] sm:$0xf] }
  0x84   : > { %1946 = vmatmul.bf16.gmra.mxu1 %v4170_v31  ;;  %2613 = vmatmul.bf16.gmra.mxu0 %v4458_v32  ;;  %v929_v31 = vld [vmem:[%s5629_s13 + $0x50] sm:$0x1]  ;;  %v4091_v32 = vrot.slane %v927_v28, 9  ;;  %v596_v28 = vsel %vm5772_vm4, %v591_v19, %v595_v15  ;;  %v4215_v15 = vld [vmem:[#allocation2 + $0x9c] sm:$0xf0] }
  0x85   : > { %2035 = vmatmul.bf16.gmra.mxu2 %v4174_v33  ;;  %2524 = vmatmul.bf16.gmra.mxu3 %v4454_v34  ;;  %v1064_v33 = vrot.slane %v928_v29, 5  ;;  %v5138_v34 = vld [vmem:[%s6881_s1 + $0xa8] sm:$0xff]  ;;  %v1067_v38 = vrot.slane %v929_v31, 5  ;;  %888 = vst [vmem:[#allocation2 + $0xb8] sm:$0xf] %v596_v28  ;;  %v4206_v31 = vor.u32 %v5153_v26, %v4203_v27 }
  0x86   : > { %2691 = vmatpush.bf16.msra.mxu1 %v5138_v34  ;;  %v5155_v29 = vld [vmem:[#allocation2 + $0x88] sm:$0xf0]  ;;  %v376_v28 = vld [vmem:[%s5629_s13 + $0x70] sm:$0xf] }
  0x87   : > { %v1065_v40 = vsel %vm5786_vm5, %v4091_v32, %v1064_v33  ;;  %v1066_v41 = vrot.slane %v1064_v33, 4  ;;  %v4494_v32 = vor.u32 %v5081_v22, %v4491_v23  ;;  %v4210_v35 = vor.u32 %v5155_v29, %v4209_v20  ;;  %v375_v27 = vld [vmem:[%s5629_s13 + $0x6c] sm:$0xf] }
  0x88   : > { %1194 = vst [vmem:[#allocation2 + $0x98] sm:$0xf] %v1065_v40  ;;  %v601_v40 = vshll.u32 %v372_v37, 16  ;;  %v622_v29 = vshrl.u32 %v375_v27, 16  ;;  %v625_v30 = vshll.u32 %v375_v27, 16 }
  0x89   : > { %v1068_v49 = vsel %vm5786_vm5, %v1066_v41, %v1067_v38  ;;  %v373_v38 = vld [vmem:[%s5629_s13 + $0x64] sm:$0xf] }
  0x8a   : > { %1195 = vst [vmem:[#allocation2 + $0xa4] sm:$0xf] %v1068_v49  ;;  %v607_v41 = vshll.u32 %v373_v38, 16  ;;  %v611_v42 = vshrl.u32 %v373_v38, 16  ;;  %v603_v47 = vrot.slane %v601_v40, 5  ;;  %2692 = vmatpush.bf16.msra.mxu1 %v5137_v0  ;;  %v627_v37 = vrot.slane %v625_v30, 5 }
  0x8b   : > { %v5272_v30 = vld [vmem:[%s6881_s1 + $0x1d8] sm:$0xff] }
  0x8c   : > { %v609_v49 = vrot.slane %v607_v41, 5  ;;  %v613_v50 = vrot.slane %v611_v42, 4  ;;  %v604_v51 = vor.u32 %v603_v47, %v600_v45  ;;  %v936_v42 = vld [vmem:[%s5629_s13 + $0x6c] sm:$0xe]  ;;  %3385 = vmatpush.bf16.msra.mxu3 %v5272_v30 }
  0x8d   : > { %v4094_v48 = vrot.slane %v936_v42, 9 }
  0x94   : > { %1951 = vmatmul.bf16.gmra.mxu1 %v4182_v9  ;;  %2618 = vmatmul.bf16.gmra.mxu0 %v4470_v10  ;;  %v932_v9 = vld [vmem:[%s5629_s13 + $0x5c] sm:$0x1]  ;;  %v580_v10 = vor.u32 %v579_v3, %v576_v2  ;;  %v605_v2 = vrot.slane %v604_v51, 4  ;;  %v619_v3 = vrot.slane %v617_v52, 5 }
  0x95   : > { %2040 = vmatmul.bf16.gmra.mxu2 %v4186_v11  ;;  %2529 = vmatmul.bf16.gmra.mxu3 %v4466_v12  ;;  %v4092_v11 = vrot.slane %v930_v8, 9  ;;  %v1071_v12 = vrot.slane %v931_v5, 5  ;;  %v1074_v13 = vrot.slane %v932_v9, 5  ;;  %v5156_v9 = vld [vmem:[#allocation2 + $0x94] sm:$0xf] }
  0x96   : > { %v581_v16 = vrot.slane %v580_v10, 4  ;;  %v610_v8 = vsel %vm5772_vm4, %v605_v2, %v609_v49  ;;  %v4221_v10 = vld [vmem:[#allocation2 + $0x98] sm:$0xf]  ;;  %v4218_v21 = vor.u32 %v5156_v9, %v4215_v15  ;;  %v5087_v2 = vld [vmem:[#allocation2 + $0x94] sm:$0xf] }
  0x97   : > { %v1072_v17 = vsel %vm5786_vm5, %v4092_v11, %v1071_v12  ;;  %v1073_v18 = vrot.slane %v1071_v12, 4  ;;  %v4501_v11 = vld [vmem:[#allocation2 + $0x78] sm:$0xf]  ;;  %v5084_v12 = vld [vmem:[#allocation2 + $0x7c] sm:$0xf] }
  0x98   : > { %1196 = vst [vmem:[#allocation2 + $0xb0] sm:$0xf] %v1072_v17  ;;  %v586_v24 = vsel %vm5772_vm4, %v581_v16, %v585_v4  ;;  %v1081_v4 = vrot.slane %v935_v58, 5  ;;  %v4503_v16 = vld [vmem:[#allocation2 + $0x84] sm:$0xf0] }
  0x99   : > { %v1075_v25 = vsel %vm5786_vm5, %v1073_v18, %v1074_v13  ;;  %887 = vst [vmem:[#allocation2 + $0xac] sm:$0xf] %v586_v24  ;;  %v5158_v17 = vld [vmem:[#allocation2 + $0xa0] sm:$0xf0]  ;;  %v4506_v22 = vor.u32 %v5084_v12, %v4503_v16 }
  0x9a   : > { %1197 = vst [vmem:[#allocation2 + $0xbc] sm:$0xf] %v1075_v25  ;;  %v5085_v18 = vld [vmem:[#allocation2 + $0x80] sm:$0xf0]  ;;  %v4222_v25 = vor.u32 %v5158_v17, %v4221_v10  ;;  %v5088_v10 = vld [vmem:[#allocation2 + $0x98] sm:$0xf0] }
  0x9b   : > { %889 = vst [vmem:[#allocation2 + $0xc4] sm:$0xf] %v610_v8  ;;  %v4502_v26 = vor.u32 %v5085_v18, %v4501_v11  ;;  %v4514_v18 = vor.u32 %v5088_v10, %v4513_v1 }
  0x9f   : > { %v4233_v0 = vld [vmem:[#allocation2 + $0xb0] sm:$0xf] }
  0xa1   : > { %v5161_v9 = vld [vmem:[#allocation2 + $0xb8] sm:$0xf0] }
  0xa2   : > { %v4234_v17 = vor.u32 %v5161_v9, %v4233_v0 }
  0xa4   : > { %1956 = vmatmul.bf16.gmra.mxu1 %v4194_v54  ;;  %2623 = vmatmul.bf16.gmra.mxu0 %v4482_v55  ;;  %v934_v54 = vld [vmem:[%s5629_s13 + $0x64] sm:$0xf] }
  0xa5   : > { %2045 = vmatmul.bf16.gmra.mxu2 %v4198_v56  ;;  %2534 = vmatmul.bf16.gmra.mxu3 %v4478_v57  ;;  %v614_v57 = vor.u32 %v613_v50, %v609_v49  ;;  %v1078_v61 = vrot.slane %v934_v54, 5  ;;  %v1085_v49 = vrot.slane %v937_v39, 5  ;;  %v1088_v50 = vrot.slane %v938_v43, 5 }
  0xa7   : > { %v615_v5 = vrot.slane %v614_v57, 4  ;;  %v1079_v6 = vsel %vm5786_vm5, %v4093_v60, %v1078_v61  ;;  %v1080_v7 = vrot.slane %v1078_v61, 4  ;;  %v1086_v58 = vsel %vm5786_vm5, %v4094_v48, %v1085_v49  ;;  %v941_v48 = vld [vmem:[%s5629_s13 + $0x80] sm:$0x1] }
  0xa8   : > { %1198 = vst [vmem:[#allocation2 + $0xc8] sm:$0xf] %v1079_v6  ;;  %v1087_v60 = vrot.slane %v1085_v49, 4  ;;  %v5159_v6 = vld [vmem:[#allocation2 + $0xac] sm:$0xf] }
  0xa9   : > { %v620_v13 = vsel %vm5772_vm4, %v615_v5, %v619_v3  ;;  %v1082_v14 = vsel %vm5786_vm5, %v1080_v7, %v1081_v4  ;;  %1200 = vst [vmem:[#allocation2 + $0xe0] sm:$0xf] %v1086_v58  ;;  %v4515_v3 = vld [vmem:[#allocation2 + $0x9c] sm:$0xf0]  ;;  %v4227_v7 = vld [vmem:[#allocation2 + $0xb4] sm:$0xf0] }
  0xaa   : > { %890 = vst [vmem:[#allocation2 + $0xd0] sm:$0xf] %v620_v13  ;;  %v1089_v5 = vsel %vm5786_vm5, %v1087_v60, %v1088_v50  ;;  %v4230_v13 = vor.u32 %v5159_v6, %v4227_v7  ;;  %v1095_v60 = vrot.slane %v941_v48, 5  ;;  %v4525_v7 = vld [vmem:[#allocation2 + $0xa8] sm:$0xf] }
  0xab   : > { %1199 = vst [vmem:[#allocation2 + $0xd4] sm:$0xf] %v1082_v14  ;;  %v4518_v14 = vor.u32 %v5087_v2, %v4515_v3  ;;  %v5136_v2 = vld [vmem:[%s6881_s1 + $0x98] sm:$0xff]  ;;  %v943_v48 = vld [vmem:[%s5629_s13 + $0x88] sm:$0xf] }
  0xac   : > { %1201 = vst [vmem:[#allocation2 + $0xec] sm:$0xf] %v1089_v5  ;;  %v5280_v3 = vld [vmem:[%s6881_s1 + $0x218] sm:$0xff]  ;;  %v5162_v5 = vld [vmem:[#allocation2 + $0xc4] sm:$0xf]  ;;  %2693 = vmatpush.bf16.msra.mxu1 %v5136_v2  ;;  %v1099_v2 = vrot.slane %v943_v48, 5 }
  0xad   : > { %3474 = vmatpush.bf16.msra.mxu0 %v5280_v3 }
  0xaf   : > { %v4245_v6 = vld [vmem:[#allocation2 + $0xc8] sm:$0xf] }
  0xb1   : > { %v5929_v33 = vpop.f32.mrf.mxu0  ;;  %v5931_v34 = vpop.f32.mrf.mxu1 }
  0xb4   : > { %1961 = vmatmul.bf16.gmra.mxu1 %v4206_v31  ;;  %2628 = vmatmul.bf16.gmra.mxu0 %v4494_v32  ;;  %v631_v31 = vshll.u32 %v376_v28, 16  ;;  %v377_v32 = vld [vmem:[%s5629_s13 + $0x74] sm:$0x1] }
  0xb5   : > { %2050 = vmatmul.bf16.gmra.mxu2 %v4210_v35  ;;  %2539 = vmatmul.bf16.gmra.mxu3 %v4490_v36  ;;  %v635_v35 = vshrl.u32 %v376_v28, 16  ;;  %v624_v36 = vrot.slane %v622_v29, 4  ;;  %v641_v41 = vshll.u32 %v377_v32, 16  ;;  %v5264_v29 = vld [vmem:[%s6881_s1 + $0x198] sm:$0xff] }
  0xb6   : > { %v633_v38 = vrot.slane %v631_v31, 5  ;;  %3296 = vmatpush.bf16.msra.mxu2 %v5264_v29 }
  0xb7   : > { %v637_v40 = vrot.slane %v635_v35, 4  ;;  %v628_v47 = vor.u32 %v627_v37, %v624_v36  ;;  %v643_v54 = vrot.slane %v641_v41, 5  ;;  %v380_v35 = vld [vmem:[%s5629_s13 + $0x80] sm:$0x1]  ;;  %v940_v41 = vld [vmem:[%s5629_s13 + $0x7c] sm:$0xf] }
  0xb8   : > { %v5944_v55 = vpop.f32.mrf.mxu2  ;;  %v5946_v56 = vpop.f32.mrf.mxu3  ;;  %v665_v39 = vshll.u32 %v380_v35, 16  ;;  %v1092_v50 = vrot.slane %v940_v41, 5 }
  0xb9   : > { %v5949_v62 = vpop.f32.mrf.mxu0  ;;  %v5951_v63 = vpop.f32.mrf.mxu1  ;;  %v638_v53 = vor.u32 %v637_v40, %v633_v38  ;;  %v629_v57 = vrot.slane %v628_v47, 4  ;;  %v939_v40 = vld [vmem:[%s5629_s13 + $0x78] sm:$0xe] }
  0xba   : > { %v4095_v49 = vrot.slane %v939_v40, 9  ;;  %v667_v58 = vrot.slane %v665_v39, 5  ;;  %v1094_v1 = vrot.slane %v1092_v50, 4 }
  0xbb   : > { %v639_v61 = vrot.slane %v638_v53, 4  ;;  %v634_v4 = vsel %vm5772_vm4, %v629_v57, %v633_v38 }
  0xbc   : > { %891 = vst [vmem:[#allocation2 + $0xdc] sm:$0xf] %v634_v4  ;;  %v1093_v0 = vsel %vm5786_vm5, %v4095_v49, %v1092_v50  ;;  %v1096_v10 = vsel %vm5786_vm5, %v1094_v1, %v1095_v60 }
  0xbd   : > { %v644_v8 = vsel %vm5772_vm4, %v639_v61, %v643_v54  ;;  %1202 = vst [vmem:[#allocation2 + $0xf8] sm:$0xf] %v1093_v0 }
  0xbe   : > { %892 = vst [vmem:[#allocation2 + $0xe8] sm:$0xf] %v644_v8  ;;  %v5090_v8 = vld [vmem:[#allocation2 + $0xac] sm:$0xf] }
  0xbf   : > { %1203 = vst [vmem:[#allocation2 + $0x104] sm:$0xf] %v1096_v10  ;;  %v1101_v10 = vrot.slane %v1099_v2, 4 }
  0xc0   : > { %v5967_v19 = vpop.f32.mrf.mxu2  ;;  %v5969_v20 = vpop.f32.mrf.mxu3 }
  0xc1   : > { %v5971_v23 = vpop.f32.mrf.mxu0  ;;  %v5973_v24 = vpop.f32.mrf.mxu1 }
  0xc4   : > { %1966 = vmatmul.bf16.gmra.mxu1 %v4218_v21  ;;  %2633 = vmatmul.bf16.gmra.mxu0 %v4506_v22  ;;  %v378_v21 = vld [vmem:[%s5629_s13 + $0x78] sm:$0xf]  ;;  %v379_v22 = vld [vmem:[%s5629_s13 + $0x7c] sm:$0xf] }
  0xc5   : > { %2055 = vmatmul.bf16.gmra.mxu2 %v4222_v25  ;;  %2544 = vmatmul.bf16.gmra.mxu3 %v4502_v26  ;;  %v646_v25 = vshrl.u32 %v378_v21, 16  ;;  %v649_v26 = vshll.u32 %v378_v21, 16  ;;  %v655_v27 = vshll.u32 %v379_v22, 16  ;;  %v659_v28 = vshrl.u32 %v379_v22, 16 }
  0xc7   : > { %v648_v31 = vrot.slane %v646_v25, 4  ;;  %v651_v32 = vrot.slane %v649_v26, 5  ;;  %v657_v36 = vrot.slane %v655_v27, 5  ;;  %v661_v37 = vrot.slane %v659_v28, 4 }
  0xc8   : > { %v5981_v44 = vpop.f32.mrf.mxu2  ;;  %v5983_v45 = vpop.f32.mrf.mxu3 }
  0xc9   : > { %v5985_v51 = vpop.f32.mrf.mxu0  ;;  %v5987_v52 = vpop.f32.mrf.mxu1  ;;  %v652_v38 = vor.u32 %v651_v32, %v648_v31  ;;  %v662_v47 = vor.u32 %v661_v37, %v657_v36  ;;  %v381_v31 = vld [vmem:[%s5629_s13 + $0x84] sm:$0xf]  ;;  %v382_v32 = vld [vmem:[%s5629_s13 + $0x88] sm:$0xf] }
  0xca   : > { %v670_v35 = vshrl.u32 %v381_v31, 16  ;;  %v679_v37 = vshll.u32 %v382_v32, 16  ;;  %v683_v39 = vshrl.u32 %v382_v32, 16 }
  0xcb   : > { %v653_v57 = vrot.slane %v652_v38, 4  ;;  %v663_v61 = vrot.slane %v662_v47, 4  ;;  %v383_v38 = vld [vmem:[%s5629_s13 + $0x8c] sm:$0x1] }
  0xcc   : > { %v672_v40 = vrot.slane %v670_v35, 4  ;;  %v681_v47 = vrot.slane %v679_v37, 5  ;;  %v685_v49 = vrot.slane %v683_v39, 4  ;;  %v689_v50 = vshll.u32 %v383_v38, 16  ;;  %v5167_v35 = vld [vmem:[#allocation2 + $0xe8] sm:$0xf0] }
  0xcd   : > { %v658_v4 = vsel %vm5772_vm4, %v653_v57, %v657_v36  ;;  %v668_v9 = vsel %vm5772_vm4, %v663_v61, %v667_v58  ;;  %v673_v36 = vshll.u32 %v381_v31, 16  ;;  %v942_v57 = vld [vmem:[%s5629_s13 + $0x84] sm:$0xe]  ;;  %v944_v58 = vld [vmem:[%s5629_s13 + $0x8c] sm:$0x1] }
  0xce   : > { %893 = vst [vmem:[#allocation2 + $0xf4] sm:$0xf] %v658_v4  ;;  %v4096_v1 = vrot.slane %v942_v57, 9  ;;  %v1102_v3 = vrot.slane %v944_v58, 5  ;;  %v4251_v31 = vld [vmem:[#allocation2 + $0xe4] sm:$0xf0] }
  0xcf   : > { %894 = vst [vmem:[#allocation2 + $0x100] sm:$0xf] %v668_v9  ;;  %v675_v41 = vrot.slane %v673_v36, 5  ;;  %v5094_v36 = vld [vmem:[#allocation2 + $0xc8] sm:$0xf0] }
  0xd0   : > { %v5997_v11 = vpop.f32.mrf.mxu2  ;;  %v5999_v12 = vpop.f32.mrf.mxu3  ;;  %v1100_v9 = vsel %vm5786_vm5, %v4096_v1, %v1099_v2  ;;  %v385_v57 = vld [vmem:[%s5629_s13 + $0x94] sm:$0xf] }
  0xd1   : > { %v6001_v15 = vpop.f32.mrf.mxu0  ;;  %v6003_v16 = vpop.f32.mrf.mxu1  ;;  %v676_v0 = vor.u32 %v675_v41, %v672_v40  ;;  %1204 = vst [vmem:[#allocation2 + $0x110] sm:$0xf] %v1100_v9  ;;  %v703_v2 = vshll.u32 %v385_v57, 16  ;;  %v386_v9 = vld [vmem:[%s5629_s13 + $0x98] sm:$0x1] }
  0xd4   : > { %1971 = vmatmul.bf16.gmra.mxu1 %v4230_v13  ;;  %2638 = vmatmul.bf16.gmra.mxu0 %v4518_v14  ;;  %v4239_v13 = vld [vmem:[#allocation2 + $0xcc] sm:$0xf0]  ;;  %v4527_v14 = vld [vmem:[#allocation2 + $0xb4] sm:$0xf0] }
  0xd5   : > { %2060 = vmatmul.bf16.gmra.mxu2 %v4234_v17  ;;  %2549 = vmatmul.bf16.gmra.mxu3 %v4514_v18  ;;  %v5164_v17 = vld [vmem:[#allocation2 + $0xd0] sm:$0xf0]  ;;  %v4242_v25 = vor.u32 %v5162_v5, %v4239_v13  ;;  %v4530_v26 = vor.u32 %v5090_v8, %v4527_v14  ;;  %v677_v8 = vrot.slane %v676_v0, 4  ;;  %v4257_v14 = vld [vmem:[#allocation2 + $0xe0] sm:$0xf] }
  0xd6   : > { %v5091_v18 = vld [vmem:[#allocation2 + $0xb0] sm:$0xf0]  ;;  %v4246_v29 = vor.u32 %v5164_v17, %v4245_v6  ;;  %v686_v6 = vor.u32 %v685_v49, %v681_v47  ;;  %v4537_v17 = vld [vmem:[#allocation2 + $0xc0] sm:$0xf]  ;;  %v4258_v48 = vor.u32 %v5167_v35, %v4257_v14 }
  0xd7   : > { %v4526_v30 = vor.u32 %v5091_v18, %v4525_v7  ;;  %v691_v7 = vrot.slane %v689_v50, 5  ;;  %v5093_v18 = vld [vmem:[#allocation2 + $0xc4] sm:$0xf]  ;;  %v4538_v49 = vor.u32 %v5094_v36, %v4537_v17  ;;  %v384_v50 = vld [vmem:[%s5629_s13 + $0x90] sm:$0xf]  ;;  %v713_v17 = vshll.u32 %v386_v9, 16 }
  0xd8   : > { %v6016_v42 = vpop.f32.mrf.mxu2  ;;  %v6018_v43 = vpop.f32.mrf.mxu3  ;;  %v687_v13 = vrot.slane %v686_v6, 4  ;;  %v694_v0 = vshrl.u32 %v384_v50, 16  ;;  %v697_v1 = vshll.u32 %v384_v50, 16  ;;  %v5263_v6 = vld [vmem:[%s6881_s1 + $0x190] sm:$0xff] }
  0xd9   : > { %v6021_v53 = vpop.f32.mrf.mxu0  ;;  %v6023_v54 = vpop.f32.mrf.mxu1  ;;  %3297 = vmatpush.bf16.msra.mxu2 %v5263_v6 }
  0xda   : > { %v692_v32 = vsel %vm5772_vm4, %v687_v13, %v691_v7  ;;  %v5271_v7 = vld [vmem:[%s6881_s1 + $0x1d0] sm:$0xff] }
  0xdb   : > { %896 = vst [vmem:[#allocation2 + $0x118] sm:$0xf] %v692_v32  ;;  %3386 = vmatpush.bf16.msra.mxu3 %v5271_v7  ;;  %v5168_v7 = vld [vmem:[#allocation2 + $0xf4] sm:$0xf] }
  0xe0   : > { %v6039_v21 = vpop.f32.mrf.mxu2  ;;  %v6041_v22 = vpop.f32.mrf.mxu3 }
  0xe1   : > { %v6043_v27 = vpop.f32.mrf.mxu0  ;;  %v6045_v28 = vpop.f32.mrf.mxu1 }
  0xe4   : > { %1976 = vmatmul.bf16.gmra.mxu1 %v4242_v25  ;;  %2643 = vmatmul.bf16.gmra.mxu0 %v4530_v26  ;;  %v4539_v25 = vld [vmem:[#allocation2 + $0xcc] sm:$0xf0]  ;;  %v682_v26 = vsel %vm5772_vm4, %v677_v8, %v681_v47  ;;  %v699_v8 = vrot.slane %v697_v1, 5 }
  0xe5   : > { %2065 = vmatmul.bf16.gmra.mxu2 %v4246_v29  ;;  %2554 = vmatmul.bf16.gmra.mxu3 %v4526_v30  ;;  %v1103_v29 = vsel %vm5786_vm5, %v1101_v10, %v1102_v3  ;;  %v5165_v30 = vld [vmem:[#allocation2 + $0xdc] sm:$0xf]  ;;  %895 = vst [vmem:[#allocation2 + $0x10c] sm:$0xf] %v682_v26  ;;  %v4542_v40 = vor.u32 %v5093_v18, %v4539_v25  ;;  %v707_v3 = vshrl.u32 %v385_v57, 16  ;;  %v705_v10 = vrot.slane %v703_v2, 5 }
  0xe6   : > { %1205 = vst [vmem:[#allocation2 + $0x11c] sm:$0xf] %v1103_v29  ;;  %v4254_v39 = vor.u32 %v5165_v30, %v4251_v31  ;;  %v945_v18 = vld [vmem:[%s5629_s13 + $0x90] sm:$0xe]  ;;  %v946_v25 = vld [vmem:[%s5629_s13 + $0x94] sm:$0xf] }
  0xe7   : > { %v709_v13 = vrot.slane %v707_v3, 4  ;;  %v947_v31 = vld [vmem:[%s5629_s13 + $0x98] sm:$0x1]  ;;  %v4097_v32 = vrot.slane %v945_v18, 9  ;;  %v1106_v35 = vrot.slane %v946_v25, 5  ;;  %v5135_v3 = vld [vmem:[%s6881_s1 + $0x90] sm:$0xff] }
  0xe8   : > { %v6053_v60 = vpop.f32.mrf.mxu2  ;;  %v6055_v61 = vpop.f32.mrf.mxu3  ;;  %2694 = vmatpush.bf16.msra.mxu1 %v5135_v3  ;;  %v5170_v18 = vld [vmem:[#allocation2 + $0x100] sm:$0xf0] }
  0xe9   : > { %v6057_v4 = vpop.f32.mrf.mxu0  ;;  %v6059_v5 = vpop.f32.mrf.mxu1  ;;  %v710_v30 = vor.u32 %v709_v13, %v705_v10  ;;  %v1108_v1 = vrot.slane %v1106_v35, 4  ;;  %v5097_v25 = vld [vmem:[#allocation2 + $0xe0] sm:$0xf0] }
  0xeb   : > { %v711_v57 = vrot.slane %v710_v30, 4 }
  0xf0   : > { %v6069_v37 = vpop.f32.mrf.mxu2  ;;  %v6071_v38 = vpop.f32.mrf.mxu3 }
  0xf1   : > { %v1942_v41 = vpop.f32.mrf.mxu1  ;;  %v2609_v47 = vpop.f32.mrf.mxu0 }
  0xf2   : > { %v1943_v58 = vadd.f32 %v1942_v41, %v5929_v33  ;;  %v696_v33 = vrot.slane %v694_v0, 4  ;;  %v1107_v0 = vsel %vm5786_vm5, %v4097_v32, %v1106_v35 }
  0xf3   : > { %1206 = vst [vmem:[#allocation2 + $0x128] sm:$0xf] %v1107_v0 }
  0xf4   : > { %1981 = vmatmul.bf16.gmra.mxu1 %v4254_v39  ;;  %2648 = vmatmul.bf16.gmra.mxu0 %v4542_v40  ;;  %v700_v14 = vor.u32 %v699_v8, %v696_v33  ;;  %v4549_v33 = vld [vmem:[#allocation2 + $0xd8] sm:$0xf]  ;;  %v5096_v8 = vld [vmem:[#allocation2 + $0xdc] sm:$0xf] }
  0xf5   : > { %2070 = vmatmul.bf16.gmra.mxu2 %v4258_v48  ;;  %2559 = vmatmul.bf16.gmra.mxu3 %v4538_v49  ;;  %v715_v48 = vrot.slane %v713_v17, 5  ;;  %v1109_v49 = vrot.slane %v947_v31, 5  ;;  %v4551_v17 = vld [vmem:[#allocation2 + $0xe4] sm:$0xf0] }
  0xf6   : > { %v701_v41 = vrot.slane %v700_v14, 4  ;;  %v4263_v14 = vld [vmem:[#allocation2 + $0xfc] sm:$0xf0]  ;;  %v4554_v31 = vor.u32 %v5096_v8, %v4551_v17 }
  0xf7   : > { %v716_v9 = vsel %vm5772_vm4, %v711_v57, %v715_v48  ;;  %v1110_v13 = vsel %vm5786_vm5, %v1108_v1, %v1109_v49  ;;  %v4266_v30 = vor.u32 %v5168_v7, %v4263_v14  ;;  %v387_v48 = vld [vmem:[%s5629_s13 + $0x9c] sm:$0xf]  ;;  %v388_v49 = vld [vmem:[%s5629_s13 + $0xa0] sm:$0xf] }
  0xf8   : > { %v2031_v26 = vpop.f32.mrf.mxu2  ;;  %v2520_v29 = vpop.f32.mrf.mxu3  ;;  %v706_v6 = vsel %vm5772_vm4, %v701_v41, %v705_v10  ;;  %898 = vst [vmem:[#allocation2 + $0x130] sm:$0xf] %v716_v9  ;;  %v4550_v41 = vor.u32 %v5097_v25, %v4549_v33  ;;  %v718_v0 = vshrl.u32 %v387_v48, 16  ;;  %v721_v1 = vshll.u32 %v387_v48, 16  ;;  %v949_v33 = vld [vmem:[%s5629_s13 + $0xa0] sm:$0xf] }
  0xf9   : > { %v2032_v36 = vadd.f32 %v2031_v26, %v1943_v58  ;;  %v1944_v39 = vpop.f32.mrf.mxu1  ;;  %v2611_v40 = vpop.f32.mrf.mxu0  ;;  %v5279_v58 = vld [vmem:[%s6881_s1 + $0x210] sm:$0xff]  ;;  %897 = vst [vmem:[#allocation2 + $0x124] sm:$0xf] %v706_v6  ;;  %v731_v3 = vshrl.u32 %v388_v49, 16  ;;  %v948_v9 = vld [vmem:[%s5629_s13 + $0x9c] sm:$0xe] }
  0xfa   : > { %v1945_v50 = vadd.f32 %v1944_v39, %v5949_v62  ;;  %v4269_v62 = vld [vmem:[#allocation2 + $0xf8] sm:$0xf]  ;;  %3475 = vmatpush.bf16.msra.mxu0 %v5279_v58  ;;  %1207 = vst [vmem:[#allocation2 + $0x134] sm:$0xf] %v1110_v13  ;;  %v720_v6 = vrot.slane %v718_v0, 4  ;;  %v723_v7 = vrot.slane %v721_v1, 5 }
  0xfb   : > { %v2521_v2 = vadd.f32 %v2520_v29, %v2032_v36  ;;  %v4270_v39 = vor.u32 %v5170_v18, %v4269_v62  ;;  %v733_v8 = vrot.slane %v731_v3, 4  ;;  %v950_v13 = vld [vmem:[%s5629_s13 + $0xa4] sm:$0x1]  ;;  %v4098_v25 = vrot.slane %v948_v9, 9  ;;  %v4281_v1 = vld [vmem:[#allocation2 + $0x110] sm:$0xf] }
  0xfc   : > { %v724_v18 = vor.u32 %v723_v7, %v720_v6  ;;  %v4563_v3 = vld [vmem:[#allocation2 + $0xfc] sm:$0xf0]  ;;  %v5171_v7 = vld [vmem:[#allocation2 + $0x10c] sm:$0xf]  ;;  %v5100_v9 = vld [vmem:[#allocation2 + $0xf8] sm:$0xf0] }
  0xfd   : > { %v6101_v10 = vadd.f32 %v2609_v47, %v2521_v2  ;;  %v727_v2 = vshll.u32 %v388_v49, 16 }
  0xff   : > { %v729_v62 = vrot.slane %v727_v2, 5  ;;  %v4561_v2 = vld [vmem:[#allocation2 + $0xf0] sm:$0xf] }
 0x100   : > { %v2033_v26 = vpop.f32.mrf.mxu2  ;;  %v2522_v29 = vpop.f32.mrf.mxu3 }
 0x101   : > { %v2034_v32 = vadd.f32 %v2033_v26, %v1945_v50  ;;  %v1947_v35 = vpop.f32.mrf.mxu1  ;;  %v2614_v36 = vpop.f32.mrf.mxu0  ;;  %v389_v50 = vld [vmem:[%s5629_s13 + $0xa4] sm:$0x1]  ;;  %v1113_v26 = vrot.slane %v949_v33, 5 }
 0x102   : > { %v1948_v57 = vadd.f32 %v1947_v35, %v5971_v23  ;;  %v737_v23 = vshll.u32 %v389_v50, 16  ;;  %v734_v35 = vor.u32 %v733_v8, %v729_v62  ;;  %v5099_v50 = vld [vmem:[#allocation2 + $0xf4] sm:$0xf] }
 0x103   : > { %v2523_v47 = vadd.f32 %v2522_v29, %v2034_v32  ;;  %v1116_v29 = vrot.slane %v950_v13, 5  ;;  %v1114_v48 = vsel %vm5786_vm5, %v4098_v25, %v1113_v26  ;;  %v1115_v49 = vrot.slane %v1113_v26, 4 }
 0x104   : > { %1986 = vmatmul.bf16.gmra.mxu1 %v4266_v30  ;;  %2653 = vmatmul.bf16.gmra.mxu0 %v4554_v31  ;;  %v735_v0 = vrot.slane %v734_v35, 4  ;;  %1208 = vst [vmem:[#allocation2 + $0x140] sm:$0xf] %v1114_v48  ;;  %v391_v35 = vld [vmem:[%s5629_s13 + $0xac] sm:$0xf] }
 0x105   : > { %2075 = vmatmul.bf16.gmra.mxu2 %v4270_v39  ;;  %2564 = vmatmul.bf16.gmra.mxu3 %v4550_v41  ;;  %v6107_v58 = vadd.f32 %v2611_v40, %v2523_v47  ;;  %v739_v40 = vrot.slane %v737_v23, 5  ;;  %v725_v41 = vrot.slane %v724_v18, 4  ;;  %v1117_v6 = vsel %vm5786_vm5, %v1115_v49, %v1116_v29  ;;  %v5173_v23 = vld [vmem:[#allocation2 + $0x118] sm:$0xf0] }
 0x106   : > { %1209 = vst [vmem:[#allocation2 + $0x14c] sm:$0xf] %v1117_v6  ;;  %v4282_v29 = vor.u32 %v5173_v23, %v4281_v1  ;;  %v751_v49 = vshll.u32 %v391_v35, 16 }
 0x107   : > { %v740_v33 = vsel %vm5772_vm4, %v735_v0, %v739_v40  ;;  %v5270_v0 = vld [vmem:[%s6881_s1 + $0x1c8] sm:$0xff] }
 0x108   : > { %v2036_v14 = vpop.f32.mrf.mxu2  ;;  %v2525_v17 = vpop.f32.mrf.mxu3  ;;  %900 = vst [vmem:[#allocation2 + $0x148] sm:$0xf] %v740_v33  ;;  %3387 = vmatpush.bf16.msra.mxu3 %v5270_v0  ;;  %v952_v33 = vld [vmem:[%s5629_s13 + $0xac] sm:$0xf]  ;;  %v5174_v0 = vld [vmem:[#allocation2 + $0x124] sm:$0xf] }
 0x109   : > { %v2037_v30 = vadd.f32 %v2036_v14, %v1948_v57  ;;  %v1949_v31 = vpop.f32.mrf.mxu1  ;;  %v2616_v32 = vpop.f32.mrf.mxu0  ;;  %v730_v57 = vsel %vm5772_vm4, %v725_v41, %v729_v62 }
 0x10a   : > { %v1950_v39 = vadd.f32 %v1949_v31, %v5985_v51  ;;  %v4275_v51 = vld [vmem:[#allocation2 + $0x114] sm:$0xf0]  ;;  %899 = vst [vmem:[#allocation2 + $0x13c] sm:$0xf] %v730_v57  ;;  %v390_v31 = vld [vmem:[%s5629_s13 + $0xa8] sm:$0xf] }
 0x10b   : > { %v2526_v47 = vadd.f32 %v2525_v17, %v2037_v30  ;;  %v4278_v62 = vor.u32 %v5171_v7, %v4275_v51  ;;  %v4566_v17 = vor.u32 %v5099_v50, %v4563_v3  ;;  %v4562_v30 = vor.u32 %v5100_v9, %v4561_v2  ;;  %v392_v50 = vld [vmem:[%s5629_s13 + $0xb0] sm:$0x1]  ;;  %v951_v51 = vld [vmem:[%s5629_s13 + $0xa8] sm:$0xe] }
 0x10c   : > { %v742_v41 = vshrl.u32 %v390_v31, 16  ;;  %v745_v48 = vshll.u32 %v390_v31, 16  ;;  %v753_v3 = vrot.slane %v751_v49, 5  ;;  %v761_v7 = vshll.u32 %v392_v50, 16 }
 0x10d   : > { %v6121_v8 = vadd.f32 %v2614_v36, %v2526_v47  ;;  %v755_v47 = vshrl.u32 %v391_v35, 16 }
 0x10e   : > { %v747_v1 = vrot.slane %v745_v48, 5 }
 0x10f   : > { %v757_v57 = vrot.slane %v755_v47, 4  ;;  %v5134_v47 = vld [vmem:[%s6881_s1 + $0x88] sm:$0xff] }
 0x110   : > { %v2038_v13 = vpop.f32.mrf.mxu2  ;;  %v2527_v14 = vpop.f32.mrf.mxu3  ;;  %2695 = vmatpush.bf16.msra.mxu1 %v5134_v47 }
 0x111   : > { %v2039_v18 = vadd.f32 %v2038_v13, %v1950_v39  ;;  %v1952_v25 = vpop.f32.mrf.mxu1  ;;  %v2619_v26 = vpop.f32.mrf.mxu0  ;;  %v5262_v39 = vld [vmem:[%s6881_s1 + $0x188] sm:$0xff]  ;;  %v758_v13 = vor.u32 %v757_v57, %v753_v3 }
 0x112   : > { %v1953_v40 = vadd.f32 %v1952_v25, %v6001_v15  ;;  %v744_v15 = vrot.slane %v742_v41, 4  ;;  %3298 = vmatpush.bf16.msra.mxu2 %v5262_v39 }
 0x113   : > { %v2528_v36 = vadd.f32 %v2527_v14, %v2039_v18  ;;  %v953_v14 = vld [vmem:[%s5629_s13 + $0xb0] sm:$0x1] }
 0x114   : > { %1991 = vmatmul.bf16.gmra.mxu1 %v4278_v62  ;;  %2658 = vmatmul.bf16.gmra.mxu0 %v4566_v17  ;;  %v748_v6 = vor.u32 %v747_v1, %v744_v15  ;;  %v4099_v62 = vrot.slane %v951_v51, 9  ;;  %v1120_v17 = vrot.slane %v952_v33, 5  ;;  %v1123_v31 = vrot.slane %v953_v14, 5  ;;  %v4573_v15 = vld [vmem:[#allocation2 + $0x108] sm:$0xf] }
 0x115   : > { %2080 = vmatmul.bf16.gmra.mxu2 %v4282_v29  ;;  %2569 = vmatmul.bf16.gmra.mxu3 %v4562_v30  ;;  %v6132_v2 = vadd.f32 %v2616_v32, %v2528_v36  ;;  %v763_v30 = vrot.slane %v761_v7, 5  ;;  %v759_v36 = vrot.slane %v758_v13, 4  ;;  %v5102_v1 = vld [vmem:[#allocation2 + $0x10c] sm:$0xf]  ;;  %v4575_v7 = vld [vmem:[#allocation2 + $0x114] sm:$0xf0] }
 0x116   : > { %v749_v32 = vrot.slane %v748_v6, 4  ;;  %v1121_v41 = vsel %vm5786_vm5, %v4099_v62, %v1120_v17  ;;  %v1122_v48 = vrot.slane %v1120_v17, 4  ;;  %v4287_v6 = vld [vmem:[#allocation2 + $0x12c] sm:$0xf0]  ;;  %v5176_v51 = vld [vmem:[#allocation2 + $0x130] sm:$0xf0]  ;;  %v4578_v14 = vor.u32 %v5102_v1, %v4575_v7 }
 0x117   : > { %1210 = vst [vmem:[#allocation2 + $0x158] sm:$0xf] %v1121_v41  ;;  %v764_v50 = vsel %vm5772_vm4, %v759_v36, %v763_v30  ;;  %v5103_v33 = vld [vmem:[#allocation2 + $0x110] sm:$0xf0]  ;;  %v4290_v13 = vor.u32 %v5174_v0, %v4287_v6 }
 0x118   : > { %v2041_v23 = vpop.f32.mrf.mxu2  ;;  %v2530_v9 = vpop.f32.mrf.mxu3  ;;  %v754_v39 = vsel %vm5772_vm4, %v749_v32, %v753_v3  ;;  %v1124_v57 = vsel %vm5786_vm5, %v1122_v48, %v1123_v31  ;;  %902 = vst [vmem:[#allocation2 + $0x160] sm:$0xf] %v764_v50  ;;  %v4574_v32 = vor.u32 %v5103_v33, %v4573_v15  ;;  %v393_v30 = vld [vmem:[%s5629_s13 + $0xb4] sm:$0xf]  ;;  %v394_v31 = vld [vmem:[%s5629_s13 + $0xb8] sm:$0xf] }
 0x119   : > { %v2042_v18 = vadd.f32 %v2041_v23, %v1953_v40  ;;  %v1954_v25 = vpop.f32.mrf.mxu1  ;;  %v2621_v29 = vpop.f32.mrf.mxu0  ;;  %v5278_v40 = vld [vmem:[%s6881_s1 + $0x208] sm:$0xff]  ;;  %901 = vst [vmem:[#allocation2 + $0x154] sm:$0xf] %v754_v39  ;;  %v766_v41 = vshrl.u32 %v393_v30, 16  ;;  %v769_v48 = vshll.u32 %v393_v30, 16  ;;  %v779_v47 = vshrl.u32 %v394_v31, 16 }
 0x11a   : > { %v1955_v35 = vadd.f32 %v1954_v25, %v6021_v53  ;;  %v4293_v53 = vld [vmem:[#allocation2 + $0x128] sm:$0xf]  ;;  %3476 = vmatpush.bf16.msra.mxu0 %v5278_v40  ;;  %1211 = vst [vmem:[#allocation2 + $0x164] sm:$0xf] %v1124_v57  ;;  %v955_v15 = vld [vmem:[%s5629_s13 + $0xb8] sm:$0xf] }
 0x11b   : > { %v2531_v49 = vadd.f32 %v2530_v9, %v2042_v18  ;;  %v4294_v25 = vor.u32 %v5176_v51, %v4293_v53  ;;  %v768_v39 = vrot.slane %v766_v41, 4  ;;  %v771_v0 = vrot.slane %v769_v48, 5  ;;  %v954_v50 = vld [vmem:[%s5629_s13 + $0xb4] sm:$0xe]  ;;  %v956_v57 = vld [vmem:[%s5629_s13 + $0xbc] sm:$0x1] }
 0x11c   : > { %v781_v1 = vrot.slane %v779_v47, 4  ;;  %v4100_v33 = vrot.slane %v954_v50, 9  ;;  %v4305_v48 = vld [vmem:[#allocation2 + $0x140] sm:$0xf]  ;;  %v4587_v47 = vld [vmem:[#allocation2 + $0x12c] sm:$0xf0] }
 0x11d   : > { %v6153_v3 = vadd.f32 %v2619_v26, %v2531_v49  ;;  %v775_v49 = vshll.u32 %v394_v31, 16  ;;  %v772_v51 = vor.u32 %v771_v0, %v768_v39  ;;  %v5177_v0 = vld [vmem:[#allocation2 + $0x13c] sm:$0xf]  ;;  %v5106_v50 = vld [vmem:[#allocation2 + $0x128] sm:$0xf0] }
 0x11f   : > { %v777_v53 = vrot.slane %v775_v49, 5  ;;  %v4585_v49 = vld [vmem:[#allocation2 + $0x120] sm:$0xf] }
 0x120   : > { %v2043_v23 = vpop.f32.mrf.mxu2  ;;  %v2532_v9 = vpop.f32.mrf.mxu3 }
 0x121   : > { %v2044_v62 = vadd.f32 %v2043_v23, %v1955_v35  ;;  %v1957_v17 = vpop.f32.mrf.mxu1  ;;  %v2624_v18 = vpop.f32.mrf.mxu0  ;;  %v395_v35 = vld [vmem:[%s5629_s13 + $0xbc] sm:$0x1]  ;;  %v1127_v23 = vrot.slane %v955_v15, 5 }
 0x122   : > { %v1958_v36 = vadd.f32 %v1957_v17, %v6043_v27  ;;  %v785_v27 = vshll.u32 %v395_v35, 16  ;;  %v782_v17 = vor.u32 %v781_v1, %v777_v53  ;;  %v5105_v35 = vld [vmem:[#allocation2 + $0x124] sm:$0xf] }
 0x123   : > { %v2533_v26 = vadd.f32 %v2532_v9, %v2044_v62  ;;  %v1130_v9 = vrot.slane %v956_v57, 5  ;;  %v1128_v30 = vsel %vm5786_vm5, %v4100_v33, %v1127_v23  ;;  %v1129_v31 = vrot.slane %v1127_v23, 4 }
 0x124   : > { %1996 = vmatmul.bf16.gmra.mxu1 %v4290_v13  ;;  %2663 = vmatmul.bf16.gmra.mxu0 %v4578_v14  ;;  %v783_v41 = vrot.slane %v782_v17, 4  ;;  %1212 = vst [vmem:[#allocation2 + $0x170] sm:$0xf] %v1128_v30  ;;  %v397_v17 = vld [vmem:[%s5629_s13 + $0xc4] sm:$0xf] }
 0x125   : > { %2085 = vmatmul.bf16.gmra.mxu2 %v4294_v25  ;;  %2574 = vmatmul.bf16.gmra.mxu3 %v4574_v32  ;;  %v6159_v40 = vadd.f32 %v2621_v29, %v2533_v26  ;;  %v787_v29 = vrot.slane %v785_v27, 5  ;;  %v773_v32 = vrot.slane %v772_v51, 4  ;;  %v1131_v39 = vsel %vm5786_vm5, %v1129_v31, %v1130_v9  ;;  %v5179_v27 = vld [vmem:[#allocation2 + $0x148] sm:$0xf0] }
 0x126   : > { %1213 = vst [vmem:[#allocation2 + $0x17c] sm:$0xf] %v1131_v39  ;;  %v4306_v9 = vor.u32 %v5179_v27, %v4305_v48  ;;  %v799_v30 = vshll.u32 %v397_v17, 16  ;;  %v803_v31 = vshrl.u32 %v397_v17, 16  ;;  %v958_v27 = vld [vmem:[%s5629_s13 + $0xc4] sm:$0xf] }
 0x127   : > { %v788_v15 = vsel %vm5772_vm4, %v783_v41, %v787_v29 }
 0x128   : > { %v2046_v6 = vpop.f32.mrf.mxu2  ;;  %v2535_v7 = vpop.f32.mrf.mxu3  ;;  %904 = vst [vmem:[#allocation2 + $0x178] sm:$0xf] %v788_v15  ;;  %v957_v15 = vld [vmem:[%s5629_s13 + $0xc0] sm:$0xe] }
 0x129   : > { %v2047_v13 = vadd.f32 %v2046_v6, %v1958_v36  ;;  %v1959_v14 = vpop.f32.mrf.mxu1  ;;  %v2626_v62 = vpop.f32.mrf.mxu0  ;;  %v778_v36 = vsel %vm5772_vm4, %v773_v32, %v777_v53 }
 0x12a   : > { %v1960_v25 = vadd.f32 %v1959_v14, %v6057_v4  ;;  %v4299_v4 = vld [vmem:[#allocation2 + $0x144] sm:$0xf0]  ;;  %903 = vst [vmem:[#allocation2 + $0x16c] sm:$0xf] %v778_v36  ;;  %v396_v14 = vld [vmem:[%s5629_s13 + $0xc0] sm:$0xf] }
 0x12b   : > { %v2536_v26 = vadd.f32 %v2535_v7, %v2047_v13  ;;  %v4302_v53 = vor.u32 %v5177_v0, %v4299_v4  ;;  %v4590_v7 = vor.u32 %v5105_v35, %v4587_v47  ;;  %v4586_v13 = vor.u32 %v5106_v50, %v4585_v49  ;;  %v398_v35 = vld [vmem:[%s5629_s13 + $0xc8] sm:$0x1] }
 0x12c   : > { %v790_v32 = vshrl.u32 %v396_v14, 16  ;;  %v801_v47 = vrot.slane %v799_v30, 5  ;;  %v805_v36 = vrot.slane %v803_v31, 4  ;;  %v809_v4 = vshll.u32 %v398_v35, 16  ;;  %v5133_v30 = vld [vmem:[%s6881_s1 + $0x80] sm:$0xff] }
 0x12d   : > { %v6173_v1 = vadd.f32 %v2624_v18, %v2536_v26  ;;  %v793_v18 = vshll.u32 %v396_v14, 16  ;;  %v5269_v26 = vld [vmem:[%s6881_s1 + $0x1c0] sm:$0xff]  ;;  %v5108_v35 = vld [vmem:[#allocation2 + $0x13c] sm:$0xf]  ;;  %2696 = vmatpush.bf16.msra.mxu1 %v5133_v30 }
 0x12e   : > { %v792_v41 = vrot.slane %v790_v32, 4  ;;  %3388 = vmatpush.bf16.msra.mxu3 %v5269_v26  ;;  %v811_v17 = vrot.slane %v809_v4, 5  ;;  %v5277_v31 = vld [vmem:[%s6881_s1 + $0x200] sm:$0xff]  ;;  %v5180_v26 = vld [vmem:[#allocation2 + $0x154] sm:$0xf] }
 0x12f   : > { %v795_v48 = vrot.slane %v793_v18, 5  ;;  %v4599_v4 = vld [vmem:[#allocation2 + $0x144] sm:$0xf0]  ;;  %3477 = vmatpush.bf16.msra.mxu0 %v5277_v31 }
 0x130   : > { %v2048_v57 = vpop.f32.mrf.mxu2  ;;  %v2537_v6 = vpop.f32.mrf.mxu3 }
 0x131   : > { %v2049_v51 = vadd.f32 %v2048_v57, %v1960_v25  ;;  %v1962_v33 = vpop.f32.mrf.mxu1  ;;  %v2629_v23 = vpop.f32.mrf.mxu0  ;;  %v5261_v25 = vld [vmem:[%s6881_s1 + $0x180] sm:$0xff]  ;;  %v796_v0 = vor.u32 %v795_v48, %v792_v41  ;;  %v4317_v41 = vld [vmem:[#allocation2 + $0x158] sm:$0xf] }
 0x132   : > { %v1963_v39 = vadd.f32 %v1962_v33, %v5931_v34  ;;  %3299 = vmatpush.bf16.msra.mxu2 %v5261_v25  ;;  %v4597_v48 = vld [vmem:[#allocation2 + $0x138] sm:$0xf] }
 0x133   : > { %v2538_v29 = vadd.f32 %v2537_v6, %v2049_v51  ;;  %v806_v6 = vor.u32 %v805_v36, %v801_v47  ;;  %v1134_v51 = vrot.slane %v958_v27, 5  ;;  %v797_v14 = vrot.slane %v796_v0, 4  ;;  %v4311_v0 = vld [vmem:[#allocation2 + $0x15c] sm:$0xf0]  ;;  %v5109_v27 = vld [vmem:[#allocation2 + $0x140] sm:$0xf0] }
 0x134   : > { %2001 = vmatmul.bf16.gmra.mxu1 %v4302_v53  ;;  %2668 = vmatmul.bf16.gmra.mxu0 %v4590_v7  ;;  %v959_v53 = vld [vmem:[%s5629_s13 + $0xc8] sm:$0x1]  ;;  %v4101_v7 = vrot.slane %v957_v15, 9 }
 0x135   : > { %2090 = vmatmul.bf16.gmra.mxu2 %v4306_v9  ;;  %2579 = vmatmul.bf16.gmra.mxu3 %v4586_v13  ;;  %v6183_v49 = vadd.f32 %v2626_v62, %v2538_v29  ;;  %v1137_v29 = vrot.slane %v959_v53, 5  ;;  %v807_v32 = vrot.slane %v806_v6, 4  ;;  %v1136_v33 = vrot.slane %v1134_v51, 4 }
 0x136   : > { %v1135_v34 = vsel %vm5786_vm5, %v4101_v7, %v1134_v51  ;;  %v802_v25 = vsel %vm5772_vm4, %v797_v14, %v801_v47  ;;  %v5182_v47 = vld [vmem:[#allocation2 + $0x160] sm:$0xf0]  ;;  %v4314_v53 = vor.u32 %v5180_v26, %v4311_v0  ;;  %v4602_v7 = vor.u32 %v5108_v35, %v4599_v4  ;;  %v4329_v4 = vld [vmem:[#allocation2 + $0x170] sm:$0xf] }
 0x137   : > { %1214 = vst [vmem:[#allocation2 + $0x188] sm:$0xf] %v1135_v34  ;;  %v812_v36 = vsel %vm5772_vm4, %v807_v32, %v811_v17  ;;  %v4318_v17 = vor.u32 %v5182_v47, %v4317_v41  ;;  %v5183_v47 = vld [vmem:[#allocation2 + $0x16c] sm:$0xf] }
 0x138   : > { %v2051_v50 = vpop.f32.mrf.mxu2  ;;  %v2540_v57 = vpop.f32.mrf.mxu3  ;;  %905 = vst [vmem:[#allocation2 + $0x184] sm:$0xf] %v802_v25 }
 0x139   : > { %v2052_v9 = vadd.f32 %v2051_v50, %v1963_v39  ;;  %v1964_v62 = vpop.f32.mrf.mxu1  ;;  %v2631_v13 = vpop.f32.mrf.mxu0  ;;  %v1138_v39 = vsel %vm5786_vm5, %v1136_v33, %v1137_v29  ;;  %906 = vst [vmem:[#allocation2 + $0x190] sm:$0xf] %v812_v36  ;;  %v4598_v29 = vor.u32 %v5109_v27, %v4597_v48  ;;  %v909_v33 = vld [vmem:[%s5629_s13] sm:$0xe]  ;;  %v4323_v27 = vld [vmem:[#allocation2 + $0x174] sm:$0xf0] }
 0x13a   : > { %1215 = vst [vmem:[#allocation2 + $0x194] sm:$0xf] %v1138_v39  ;;  %v1965_v50 = vadd.f32 %v1964_v62, %v5951_v63  ;;  %v4085_v25 = vrot.slane %v909_v33, 9 }
 0x13b   : > { %v2541_v18 = vadd.f32 %v2540_v57, %v2052_v9 }
 0x13d   : > { %v6204_v15 = vadd.f32 %v2629_v23, %v2541_v18  ;;  %v910_v23 = vld [vmem:[%s5629_s13 + $0x4] sm:$0xf]  ;;  %v911_v18 = vld [vmem:[%s5629_s13 + $0x8] sm:$0x1] }
 0x13e   : > { %v1022_v63 = vrot.slane %v910_v23, 5  ;;  %v1025_v35 = vrot.slane %v911_v18, 5 }
 0x140   : > { %v2053_v57 = vpop.f32.mrf.mxu2  ;;  %v2542_v6 = vpop.f32.mrf.mxu3  ;;  %v1024_v26 = vrot.slane %v1022_v63, 4  ;;  %v1023_v39 = vsel %vm5786_vm5, %v4085_v25, %v1022_v63 }
 0x141   : > { %v2054_v51 = vadd.f32 %v2053_v57, %v1965_v50  ;;  %v1967_v9 = vpop.f32.mrf.mxu1  ;;  %v2634_v14 = vpop.f32.mrf.mxu0  ;;  %1182 = vst [vmem:[#allocation2 + $0x8] sm:$0xf] %v1023_v39  ;;  %v4611_v50 = vld [vmem:[#allocation2 + $0x15c] sm:$0xf0]  ;;  %v5186_v39 = vld [vmem:[#allocation2 + $0x184] sm:$0xf] }
 0x142   : > { %v1968_v62 = vadd.f32 %v1967_v9, %v5973_v24  ;;  %v5111_v24 = vld [vmem:[#allocation2 + $0x154] sm:$0xf] }
 0x143   : > { %v2543_v32 = vadd.f32 %v2542_v6, %v2054_v51  ;;  %v5185_v6 = vld [vmem:[#allocation2 + $0x178] sm:$0xf0] }
 0x144   : > { %2006 = vmatmul.bf16.gmra.mxu1 %v4314_v53  ;;  %2673 = vmatmul.bf16.gmra.mxu0 %v4602_v7  ;;  %v4609_v53 = vld [vmem:[#allocation2 + $0x150] sm:$0xf]  ;;  %v5112_v7 = vld [vmem:[#allocation2 + $0x158] sm:$0xf0]  ;;  %v4330_v33 = vor.u32 %v5185_v6, %v4329_v4  ;;  %v5114_v4 = vld [vmem:[#allocation2 + $0x16c] sm:$0xf] }
 0x145   : > { %2095 = vmatmul.bf16.gmra.mxu2 %v4318_v17  ;;  %2584 = vmatmul.bf16.gmra.mxu3 %v4598_v29  ;;  %v6208_v34 = vadd.f32 %v2631_v13, %v2543_v32  ;;  %v1026_v13 = vsel %vm5786_vm5, %v1024_v26, %v1025_v35  ;;  %v4326_v29 = vor.u32 %v5183_v47, %v4323_v27  ;;  %v5188_v27 = vld [vmem:[#allocation2 + $0x190] sm:$0xf0] }
 0x146   : > { %1183 = vst [vmem:[#allocation2 + $0x14] sm:$0xf] %v1026_v13  ;;  %v4614_v32 = vor.u32 %v5111_v24, %v4611_v50  ;;  %v4610_v18 = vor.u32 %v5112_v7, %v4609_v53  ;;  %v4341_v13 = vld [vmem:[#allocation2 + $0x188] sm:$0xf]  ;;  %v4623_v24 = vld [vmem:[#allocation2 + $0x174] sm:$0xf0] }
 0x147   : > { %v4621_v50 = vld [vmem:[#allocation2 + $0x168] sm:$0xf]  ;;  %v5115_v6 = vld [vmem:[#allocation2 + $0x170] sm:$0xf0] }
 0x148   : > { %v2056_v30 = vpop.f32.mrf.mxu2  ;;  %v2545_v31 = vpop.f32.mrf.mxu3 }
 0x149   : > { %v2057_v41 = vadd.f32 %v2056_v30, %v1968_v62  ;;  %v1969_v48 = vpop.f32.mrf.mxu1  ;;  %v2636_v36 = vpop.f32.mrf.mxu0 }
 0x14a   : > { %v1970_v51 = vadd.f32 %v1969_v48, %v5987_v52 }
 0x14b   : > { %v2546_v0 = vadd.f32 %v2545_v31, %v2057_v41 }
 0x14d   : > { %v6217_v57 = vadd.f32 %v2634_v14, %v2546_v0  ;;  %v4335_v0 = vld [vmem:[#allocation2 + $0x18c] sm:$0xf0] }
 0x14e   : > { %v4338_v7 = vor.u32 %v5186_v39, %v4335_v0  ;;  %v4785_v39 = vld [vmem:[#allocation2 + $0x38] sm:$0xf] }
 0x150   : > { %v2058_v9 = vpop.f32.mrf.mxu2  ;;  %v2547_v17 = vpop.f32.mrf.mxu3 }
 0x151   : > { %v2059_v23 = vadd.f32 %v2058_v9, %v1970_v51  ;;  %v1972_v63 = vpop.f32.mrf.mxu1  ;;  %v2639_v62 = vpop.f32.mrf.mxu0  ;;  %v4626_v51 = vor.u32 %v5114_v4, %v4623_v24  ;;  %v5214_v4 = vld [vmem:[#allocation2 + $0x38] sm:$0xf0]  ;;  %v5213_v24 = vld [vmem:[#allocation2 + $0x34] sm:$0xf] }
 0x152   : > { %v1973_v31 = vadd.f32 %v1972_v63, %v6003_v16 }
 0x153   : > { %v2548_v30 = vadd.f32 %v2547_v17, %v2059_v23  ;;  %v4622_v23 = vor.u32 %v5115_v6, %v4621_v50 }
 0x154   : > { %2011 = vmatmul.bf16.gmra.mxu1 %v4326_v29  ;;  %2678 = vmatmul.bf16.gmra.mxu0 %v4614_v32  ;;  %v4342_v32 = vor.u32 %v5188_v27, %v4341_v13  ;;  %v5215_v13 = vld [vmem:[#allocation2 + $0x40] sm:$0xf0]  ;;  %v4779_v27 = vld [vmem:[#allocation2 + $0x3c] sm:$0xf0] }
 0x155   : > { %2100 = vmatmul.bf16.gmra.mxu2 %v4330_v33  ;;  %2589 = vmatmul.bf16.gmra.mxu3 %v4610_v18  ;;  %v6220_v14 = vadd.f32 %v2636_v36, %v2548_v30 }
 0x158   : > { %v2061_v25 = vpop.f32.mrf.mxu2  ;;  %v2550_v52 = vpop.f32.mrf.mxu3 }
 0x159   : > { %v2062_v26 = vadd.f32 %v2061_v25, %v1973_v31  ;;  %v1974_v35 = vpop.f32.mrf.mxu1  ;;  %v2641_v41 = vpop.f32.mrf.mxu0 }
 0x15a   : > { %v1975_v36 = vadd.f32 %v1974_v35, %v6023_v54  ;;  %v4777_v35 = vld [vmem:[#allocation2 + $0x30] sm:$0xf] }
 0x15b   : > { %v2551_v48 = vadd.f32 %v2550_v52, %v2062_v26  ;;  %v4449_v26 = vld [vmem:[#allocation2 + $0x8] sm:$0xf] }
 0x15d   : > { %v6223_v47 = vadd.f32 %v2639_v62, %v2551_v48  ;;  %v5071_v48 = vld [vmem:[#allocation2 + $0x10] sm:$0xf0] }
 0x15e   : > { %v4450_v6 = vor.u32 %v5071_v48, %v4449_v26  ;;  %v4797_v26 = vld [vmem:[#allocation2 + $0x50] sm:$0xf] }
 0x160   : > { %v2063_v53 = vpop.f32.mrf.mxu2  ;;  %v2552_v16 = vpop.f32.mrf.mxu3 }
 0x161   : > { %v2064_v9 = vadd.f32 %v2063_v53, %v1975_v36  ;;  %v1977_v17 = vpop.f32.mrf.mxu1  ;;  %v2644_v29 = vpop.f32.mrf.mxu0  ;;  %v4786_v36 = vor.u32 %v5215_v13, %v4785_v39  ;;  %v5217_v39 = vld [vmem:[#allocation2 + $0x50] sm:$0xf0]  ;;  %v5216_v13 = vld [vmem:[#allocation2 + $0x4c] sm:$0xf] }
 0x162   : > { %v1978_v33 = vadd.f32 %v1977_v17, %v6045_v28 }
 0x163   : > { %v2553_v63 = vadd.f32 %v2552_v16, %v2064_v9  ;;  %v4782_v9 = vor.u32 %v5213_v24, %v4779_v27 }
 0x164   : > { %2016 = vmatmul.bf16.gmra.mxu1 %v4338_v7  ;;  %2683 = vmatmul.bf16.gmra.mxu0 %v4626_v51  ;;  %v4778_v51 = vor.u32 %v5214_v4, %v4777_v35  ;;  %v5218_v35 = vld [vmem:[#allocation2 + $0x58] sm:$0xf0]  ;;  %v4791_v4 = vld [vmem:[#allocation2 + $0x54] sm:$0xf0] }
 0x165   : > { %2105 = vmatmul.bf16.gmra.mxu2 %v4342_v32  ;;  %2594 = vmatmul.bf16.gmra.mxu3 %v4622_v23  ;;  %v6226_v62 = vadd.f32 %v2641_v41, %v2553_v63 }
 0x168   : > { %v2066_v18 = vpop.f32.mrf.mxu2  ;;  %v2555_v54 = vpop.f32.mrf.mxu3 }
 0x169   : > { %v2067_v30 = vadd.f32 %v2066_v18, %v1978_v33  ;;  %v1979_v31 = vpop.f32.mrf.mxu1  ;;  %v2646_v25 = vpop.f32.mrf.mxu0 }
 0x16a   : > { %v1980_v41 = vadd.f32 %v1979_v31, %v6059_v5  ;;  %v5074_v31 = vld [vmem:[#allocation2 + $0x28] sm:$0xf0] }
 0x16b   : > { %v2556_v52 = vadd.f32 %v2555_v54, %v2067_v30  ;;  %v4461_v30 = vld [vmem:[#allocation2 + $0x20] sm:$0xf] }
 0x16c   : > { %v4462_v27 = vor.u32 %v5074_v31, %v4461_v30  ;;  %v4809_v30 = vld [vmem:[#allocation2 + $0x68] sm:$0xf]  ;;  %v5221_v31 = vld [vmem:[#allocation2 + $0x70] sm:$0xf0] }
 0x16d   : > { %v6229_v0 = vadd.f32 %v2644_v29, %v2556_v52  ;;  %v4789_v52 = vld [vmem:[#allocation2 + $0x48] sm:$0xf] }
 0x170   : > { %v2068_v50 = vpop.f32.mrf.mxu2  ;;  %v2557_v28 = vpop.f32.mrf.mxu3 }
 0x171   : > { %v2069_v53 = vadd.f32 %v2068_v50, %v1980_v41  ;;  %v1982_v16 = vpop.f32.mrf.mxu1  ;;  %v2649_v7 = vpop.f32.mrf.mxu0  ;;  %v4798_v41 = vor.u32 %v5218_v35, %v4797_v26  ;;  %v5220_v26 = vld [vmem:[#allocation2 + $0x68] sm:$0xf0]  ;;  %v5219_v35 = vld [vmem:[#allocation2 + $0x64] sm:$0xf] }
 0x172   : > { %v1983_v32 = vadd.f32 %v1982_v16, %v5944_v55 }
 0x173   : > { %v2558_v17 = vadd.f32 %v2557_v28, %v2069_v53  ;;  %v4794_v53 = vor.u32 %v5216_v13, %v4791_v4 }
 0x174   : > { %2697 = vmatmul.bf16.vlgmr.msra.gmra.mxu1 %v4450_v6  ;;  %3478 = vmatmul.bf16.vlgmr.msra.gmra.mxu0 %v4786_v36  ;;  %v4790_v36 = vor.u32 %v5217_v39, %v4789_v52  ;;  %v4803_v39 = vld [vmem:[#allocation2 + $0x6c] sm:$0xf0] }
 0x175   : > { %3300 = vmatmul.bf16.vlgmr.msra.gmra.mxu2 %v4778_v51  ;;  %3389 = vmatmul.bf16.vlgmr.msra.gmra.mxu3 %v4782_v9  ;;  %v6232_v29 = vadd.f32 %v2646_v25, %v2558_v17 }
 0x178   : > { %v2071_v23 = vpop.f32.mrf.mxu2  ;;  %v2560_v5 = vpop.f32.mrf.mxu3 }
 0x179   : > { %v2072_v63 = vadd.f32 %v2071_v23, %v1983_v32  ;;  %v1984_v33 = vpop.f32.mrf.mxu1  ;;  %v2651_v18 = vpop.f32.mrf.mxu0 }
 0x17a   : > { %v1985_v25 = vadd.f32 %v1984_v33, %v5967_v19  ;;  %v5077_v33 = vld [vmem:[#allocation2 + $0x40] sm:$0xf0] }
 0x17b   : > { %v2561_v54 = vadd.f32 %v2560_v5, %v2072_v63  ;;  %v4473_v63 = vld [vmem:[#allocation2 + $0x38] sm:$0xf] }
 0x17c   : > { %v4474_v4 = vor.u32 %v5077_v33, %v4473_v63  ;;  %v4821_v63 = vld [vmem:[#allocation2 + $0x80] sm:$0xf]  ;;  %v5224_v33 = vld [vmem:[#allocation2 + $0x88] sm:$0xf0] }
 0x17d   : > { %v6235_v48 = vadd.f32 %v2649_v7, %v2561_v54  ;;  %v4801_v54 = vld [vmem:[#allocation2 + $0x60] sm:$0xf] }
 0x180   : > { %v2073_v24 = vpop.f32.mrf.mxu2  ;;  %v2562_v55 = vpop.f32.mrf.mxu3 }
 0x181   : > { %v2074_v50 = vadd.f32 %v2073_v24, %v1985_v25  ;;  %v1987_v28 = vpop.f32.mrf.mxu1  ;;  %v2654_v6 = vpop.f32.mrf.mxu0  ;;  %v4810_v25 = vor.u32 %v5221_v31, %v4809_v30  ;;  %v5223_v30 = vld [vmem:[#allocation2 + $0x80] sm:$0xf0]  ;;  %v5222_v31 = vld [vmem:[#allocation2 + $0x7c] sm:$0xf] }
 0x182   : > { %v1988_v51 = vadd.f32 %v1987_v28, %v5981_v44 }
 0x183   : > { %v2563_v16 = vadd.f32 %v2562_v55, %v2074_v50  ;;  %v4806_v50 = vor.u32 %v5219_v35, %v4803_v39 }
 0x184   : > { %2702 = vmatmul.bf16.gmra.mxu1 %v4462_v27  ;;  %3483 = vmatmul.bf16.gmra.mxu0 %v4798_v41  ;;  %v4802_v41 = vor.u32 %v5220_v26, %v4801_v54  ;;  %v4815_v26 = vld [vmem:[#allocation2 + $0x84] sm:$0xf0] }
 0x185   : > { %3305 = vmatmul.bf16.gmra.mxu2 %v4790_v36  ;;  %3394 = vmatmul.bf16.gmra.mxu3 %v4794_v53  ;;  %v6238_v7 = vadd.f32 %v2651_v18, %v2563_v16 }
 0x188   : > { %v2076_v9 = vpop.f32.mrf.mxu2  ;;  %v2565_v19 = vpop.f32.mrf.mxu3 }
 0x189   : > { %v2077_v17 = vadd.f32 %v2076_v9, %v1988_v51  ;;  %v1989_v32 = vpop.f32.mrf.mxu1  ;;  %v2656_v23 = vpop.f32.mrf.mxu0 }
 0x18a   : > { %v1990_v18 = vadd.f32 %v1989_v32, %v5997_v11  ;;  %v5080_v32 = vld [vmem:[#allocation2 + $0x58] sm:$0xf0] }
 0x18b   : > { %v2566_v5 = vadd.f32 %v2565_v19, %v2077_v17  ;;  %v4485_v17 = vld [vmem:[#allocation2 + $0x50] sm:$0xf] }
 0x18c   : > { %v4486_v39 = vor.u32 %v5080_v32, %v4485_v17  ;;  %v4833_v17 = vld [vmem:[#allocation2 + $0x98] sm:$0xf]  ;;  %v5227_v32 = vld [vmem:[#allocation2 + $0xa0] sm:$0xf0] }
 0x18d   : > { %v6241_v52 = vadd.f32 %v2654_v6, %v2566_v5  ;;  %v4813_v5 = vld [vmem:[#allocation2 + $0x78] sm:$0xf] }
 0x190   : > { %v2078_v13 = vpop.f32.mrf.mxu2  ;;  %v2567_v44 = vpop.f32.mrf.mxu3 }
 0x191   : > { %v2079_v24 = vadd.f32 %v2078_v13, %v1990_v18  ;;  %v1992_v55 = vpop.f32.mrf.mxu1  ;;  %v2659_v27 = vpop.f32.mrf.mxu0  ;;  %v4822_v18 = vor.u32 %v5224_v33, %v4821_v63  ;;  %v5226_v63 = vld [vmem:[#allocation2 + $0x98] sm:$0xf0]  ;;  %v5225_v33 = vld [vmem:[#allocation2 + $0x94] sm:$0xf] }
 0x192   : > { %v1993_v36 = vadd.f32 %v1992_v55, %v6016_v42 }
 0x193   : > { %v2568_v28 = vadd.f32 %v2567_v44, %v2079_v24  ;;  %v4818_v24 = vor.u32 %v5222_v31, %v4815_v26 }
 0x194   : > { %2707 = vmatmul.bf16.gmra.mxu1 %v4474_v4  ;;  %3488 = vmatmul.bf16.gmra.mxu0 %v4810_v25  ;;  %v4814_v25 = vor.u32 %v5223_v30, %v4813_v5  ;;  %v4827_v30 = vld [vmem:[#allocation2 + $0x9c] sm:$0xf0] }
 0x195   : > { %3310 = vmatmul.bf16.gmra.mxu2 %v4802_v41  ;;  %3399 = vmatmul.bf16.gmra.mxu3 %v4806_v50  ;;  %v6244_v6 = vadd.f32 %v2656_v23, %v2568_v28 }
 0x198   : > { %v2081_v53 = vpop.f32.mrf.mxu2  ;;  %v2570_v11 = vpop.f32.mrf.mxu3 }
 0x199   : > { %v2082_v16 = vadd.f32 %v2081_v53, %v1993_v36  ;;  %v1994_v51 = vpop.f32.mrf.mxu1  ;;  %v2661_v9 = vpop.f32.mrf.mxu0 }
 0x19a   : > { %v1995_v23 = vadd.f32 %v1994_v51, %v6039_v21  ;;  %v5083_v51 = vld [vmem:[#allocation2 + $0x70] sm:$0xf0] }
 0x19b   : > { %v2571_v19 = vadd.f32 %v2570_v11, %v2082_v16  ;;  %v4497_v16 = vld [vmem:[#allocation2 + $0x68] sm:$0xf] }
 0x19c   : > { %v4498_v26 = vor.u32 %v5083_v51, %v4497_v16  ;;  %v4845_v16 = vld [vmem:[#allocation2 + $0xb0] sm:$0xf]  ;;  %v5230_v51 = vld [vmem:[#allocation2 + $0xb8] sm:$0xf0] }
 0x19d   : > { %v6247_v54 = vadd.f32 %v2659_v27, %v2571_v19  ;;  %v4825_v19 = vld [vmem:[#allocation2 + $0x90] sm:$0xf] }
 0x1a0   : > { %v2083_v35 = vpop.f32.mrf.mxu2  ;;  %v2572_v42 = vpop.f32.mrf.mxu3 }
 0x1a1   : > { %v2084_v13 = vadd.f32 %v2083_v35, %v1995_v23  ;;  %v1997_v44 = vpop.f32.mrf.mxu1  ;;  %v2664_v4 = vpop.f32.mrf.mxu0  ;;  %v4834_v23 = vor.u32 %v5227_v32, %v4833_v17  ;;  %v5229_v17 = vld [vmem:[#allocation2 + $0xb0] sm:$0xf0]  ;;  %v5228_v32 = vld [vmem:[#allocation2 + $0xac] sm:$0xf] }
 0x1a2   : > { %v1998_v41 = vadd.f32 %v1997_v44, %v6053_v60 }
 0x1a3   : > { %v2573_v55 = vadd.f32 %v2572_v42, %v2084_v13  ;;  %v4830_v13 = vor.u32 %v5225_v33, %v4827_v30 }
 0x1a4   : > { %2712 = vmatmul.bf16.gmra.mxu1 %v4486_v39  ;;  %3493 = vmatmul.bf16.gmra.mxu0 %v4822_v18  ;;  %v4826_v18 = vor.u32 %v5226_v63, %v4825_v19  ;;  %v4839_v63 = vld [vmem:[#allocation2 + $0xb4] sm:$0xf0] }
 0x1a5   : > { %3315 = vmatmul.bf16.gmra.mxu2 %v4814_v25  ;;  %3404 = vmatmul.bf16.gmra.mxu3 %v4818_v24  ;;  %v6250_v27 = vadd.f32 %v2661_v9, %v2573_v55 }
 0x1a8   : > { %v2086_v50 = vpop.f32.mrf.mxu2  ;;  %v2575_v21 = vpop.f32.mrf.mxu3 }
 0x1a9   : > { %v2087_v28 = vadd.f32 %v2086_v50, %v1998_v41  ;;  %v1999_v36 = vpop.f32.mrf.mxu1  ;;  %v2666_v53 = vpop.f32.mrf.mxu0 }
 0x1aa   : > { %v2000_v9 = vadd.f32 %v1999_v36, %v6069_v37  ;;  %v5086_v36 = vld [vmem:[#allocation2 + $0x88] sm:$0xf0] }
 0x1ab   : > { %v2576_v11 = vadd.f32 %v2575_v21, %v2087_v28  ;;  %v4509_v28 = vld [vmem:[#allocation2 + $0x80] sm:$0xf] }
 0x1ac   : > { %v4510_v30 = vor.u32 %v5086_v36, %v4509_v28  ;;  %v4857_v28 = vld [vmem:[#allocation2 + $0xc8] sm:$0xf]  ;;  %v5233_v36 = vld [vmem:[#allocation2 + $0xd0] sm:$0xf0] }
 0x1ad   : > { %v6253_v5 = vadd.f32 %v2664_v4, %v2576_v11  ;;  %v4837_v11 = vld [vmem:[#allocation2 + $0xa8] sm:$0xf] }
 0x1b0   : > { %v2088_v31 = vpop.f32.mrf.mxu2  ;;  %v2577_v60 = vpop.f32.mrf.mxu3 }
 0x1b1   : > { %v2089_v35 = vadd.f32 %v2088_v31, %v2000_v9  ;;  %v2002_v42 = vpop.f32.mrf.mxu1  ;;  %v2669_v39 = vpop.f32.mrf.mxu0  ;;  %v4846_v9 = vor.u32 %v5230_v51, %v4845_v16  ;;  %v5232_v16 = vld [vmem:[#allocation2 + $0xc8] sm:$0xf0]  ;;  %v5231_v51 = vld [vmem:[#allocation2 + $0xc4] sm:$0xf] }
 0x1b2   : > { %v2003_v25 = vadd.f32 %v2002_v42, %v5946_v56 }
 0x1b3   : > { %v2578_v44 = vadd.f32 %v2577_v60, %v2089_v35  ;;  %v4842_v35 = vor.u32 %v5228_v32, %v4839_v63 }
 0x1b4   : > { %2717 = vmatmul.bf16.gmra.mxu1 %v4498_v26  ;;  %3498 = vmatmul.bf16.gmra.mxu0 %v4834_v23  ;;  %v4838_v23 = vor.u32 %v5229_v17, %v4837_v11  ;;  %v4851_v17 = vld [vmem:[#allocation2 + $0xcc] sm:$0xf0] }
 0x1b5   : > { %3320 = vmatmul.bf16.gmra.mxu2 %v4826_v18  ;;  %3409 = vmatmul.bf16.gmra.mxu3 %v4830_v13  ;;  %v6256_v4 = vadd.f32 %v2666_v53, %v2578_v44 }
 0x1b8   : > { %v2091_v24 = vpop.f32.mrf.mxu2  ;;  %v2580_v37 = vpop.f32.mrf.mxu3 }
 0x1b9   : > { %v2092_v55 = vadd.f32 %v2091_v24, %v2003_v25  ;;  %v2004_v41 = vpop.f32.mrf.mxu1  ;;  %v2671_v50 = vpop.f32.mrf.mxu0 }
 0x1ba   : > { %v2005_v53 = vadd.f32 %v2004_v41, %v5969_v20  ;;  %v5089_v41 = vld [vmem:[#allocation2 + $0xa0] sm:$0xf0] }
 0x1bb   : > { %v2581_v21 = vadd.f32 %v2580_v37, %v2092_v55  ;;  %v4521_v55 = vld [vmem:[#allocation2 + $0x98] sm:$0xf] }
 0x1bc   : > { %v4522_v63 = vor.u32 %v5089_v41, %v4521_v55  ;;  %v4869_v55 = vld [vmem:[#allocation2 + $0xe0] sm:$0xf]  ;;  %v5236_v41 = vld [vmem:[#allocation2 + $0xe8] sm:$0xf0] }
 0x1bd   : > { %v6259_v19 = vadd.f32 %v2669_v39, %v2581_v21  ;;  %v4849_v21 = vld [vmem:[#allocation2 + $0xc0] sm:$0xf] }
 0x1c0   : > { %v2093_v33 = vpop.f32.mrf.mxu2  ;;  %v2582_v56 = vpop.f32.mrf.mxu3 }
 0x1c1   : > { %v2094_v31 = vadd.f32 %v2093_v33, %v2005_v53  ;;  %v2007_v60 = vpop.f32.mrf.mxu1  ;;  %v2674_v26 = vpop.f32.mrf.mxu0  ;;  %v4858_v53 = vor.u32 %v5233_v36, %v4857_v28  ;;  %v5235_v28 = vld [vmem:[#allocation2 + $0xe0] sm:$0xf0]  ;;  %v5234_v36 = vld [vmem:[#allocation2 + $0xdc] sm:$0xf] }
 0x1c2   : > { %v2008_v18 = vadd.f32 %v2007_v60, %v5983_v45 }
 0x1c3   : > { %v2583_v42 = vadd.f32 %v2582_v56, %v2094_v31  ;;  %v4854_v31 = vor.u32 %v5231_v51, %v4851_v17 }
 0x1c4   : > { %2722 = vmatmul.bf16.gmra.mxu1 %v4510_v30  ;;  %3503 = vmatmul.bf16.gmra.mxu0 %v4846_v9  ;;  %v4850_v9 = vor.u32 %v5232_v16, %v4849_v21  ;;  %v4863_v16 = vld [vmem:[#allocation2 + $0xe4] sm:$0xf0] }
 0x1c5   : > { %3325 = vmatmul.bf16.gmra.mxu2 %v4838_v23  ;;  %3414 = vmatmul.bf16.gmra.mxu3 %v4842_v35  ;;  %v6262_v39 = vadd.f32 %v2671_v50, %v2583_v42 }
 0x1c8   : > { %v2096_v13 = vpop.f32.mrf.mxu2  ;;  %v2585_v20 = vpop.f32.mrf.mxu3 }
 0x1c9   : > { %v2097_v44 = vadd.f32 %v2096_v13, %v2008_v18  ;;  %v2009_v25 = vpop.f32.mrf.mxu1  ;;  %v2676_v24 = vpop.f32.mrf.mxu0 }
 0x1ca   : > { %v2010_v50 = vadd.f32 %v2009_v25, %v5999_v12  ;;  %v5092_v25 = vld [vmem:[#allocation2 + $0xb8] sm:$0xf0] }
 0x1cb   : > { %v2586_v37 = vadd.f32 %v2585_v20, %v2097_v44  ;;  %v4533_v44 = vld [vmem:[#allocation2 + $0xb0] sm:$0xf] }
 0x1cc   : > { %v4534_v17 = vor.u32 %v5092_v25, %v4533_v44  ;;  %v4881_v44 = vld [vmem:[#allocation2 + $0xf8] sm:$0xf]  ;;  %v5239_v25 = vld [vmem:[#allocation2 + $0x100] sm:$0xf0] }
 0x1cd   : > { %v6265_v11 = vadd.f32 %v2674_v26, %v2586_v37  ;;  %v4861_v37 = vld [vmem:[#allocation2 + $0xd8] sm:$0xf] }
 0x1d0   : > { %v2098_v32 = vpop.f32.mrf.mxu2  ;;  %v2587_v45 = vpop.f32.mrf.mxu3 }
 0x1d1   : > { %v2099_v33 = vadd.f32 %v2098_v32, %v2010_v50  ;;  %v2012_v56 = vpop.f32.mrf.mxu1  ;;  %v2679_v30 = vpop.f32.mrf.mxu0  ;;  %v4870_v50 = vor.u32 %v5236_v41, %v4869_v55  ;;  %v5238_v55 = vld [vmem:[#allocation2 + $0xf8] sm:$0xf0]  ;;  %v5237_v41 = vld [vmem:[#allocation2 + $0xf4] sm:$0xf] }
 0x1d2   : > { %v2013_v23 = vadd.f32 %v2012_v56, %v6018_v43 }
 0x1d3   : > { %v2588_v60 = vadd.f32 %v2587_v45, %v2099_v33  ;;  %v4866_v33 = vor.u32 %v5234_v36, %v4863_v16 }
 0x1d4   : > { %2727 = vmatmul.bf16.gmra.mxu1 %v4522_v63  ;;  %3508 = vmatmul.bf16.gmra.mxu0 %v4858_v53  ;;  %v4862_v53 = vor.u32 %v5235_v28, %v4861_v37  ;;  %v4875_v28 = vld [vmem:[#allocation2 + $0xfc] sm:$0xf0] }
 0x1d5   : > { %3330 = vmatmul.bf16.gmra.mxu2 %v4850_v9  ;;  %3419 = vmatmul.bf16.gmra.mxu3 %v4854_v31  ;;  %v6268_v26 = vadd.f32 %v2676_v24, %v2588_v60 }
 0x1d8   : > { %v2101_v35 = vpop.f32.mrf.mxu2  ;;  %v2590_v12 = vpop.f32.mrf.mxu3 }
 0x1d9   : > { %v2102_v42 = vadd.f32 %v2101_v35, %v2013_v23  ;;  %v2014_v18 = vpop.f32.mrf.mxu1  ;;  %v2681_v13 = vpop.f32.mrf.mxu0 }
 0x1da   : > { %v2015_v24 = vadd.f32 %v2014_v18, %v6041_v22  ;;  %v5095_v18 = vld [vmem:[#allocation2 + $0xd0] sm:$0xf0] }
 0x1db   : > { %v2591_v20 = vadd.f32 %v2590_v12, %v2102_v42  ;;  %v4545_v42 = vld [vmem:[#allocation2 + $0xc8] sm:$0xf] }
 0x1dc   : > { %v4546_v16 = vor.u32 %v5095_v18, %v4545_v42  ;;  %v4893_v18 = vld [vmem:[#allocation2 + $0x110] sm:$0xf] }
 0x1dd   : > { %v6271_v21 = vadd.f32 %v2679_v30, %v2591_v20  ;;  %v4873_v20 = vld [vmem:[#allocation2 + $0xf0] sm:$0xf] }
 0x1e0   : > { %v2103_v51 = vpop.f32.mrf.mxu2  ;;  %v2592_v43 = vpop.f32.mrf.mxu3 }
 0x1e1   : > { %v2104_v32 = vadd.f32 %v2103_v51, %v2015_v24  ;;  %v2017_v45 = vpop.f32.mrf.mxu1  ;;  %v2684_v63 = vpop.f32.mrf.mxu0  ;;  %v4882_v24 = vor.u32 %v5239_v25, %v4881_v44  ;;  %v5241_v44 = vld [vmem:[#allocation2 + $0x110] sm:$0xf0]  ;;  %v5240_v25 = vld [vmem:[#allocation2 + $0x10c] sm:$0xf] }
 0x1e2   : > { %v2018_v9 = vadd.f32 %v2017_v45, %v6055_v61 }
 0x1e3   : > { %v2593_v56 = vadd.f32 %v2592_v43, %v2104_v32  ;;  %v4878_v32 = vor.u32 %v5237_v41, %v4875_v28 }
 0x1e4   : > { %2732 = vmatmul.bf16.gmra.mxu1 %v4534_v17  ;;  %3513 = vmatmul.bf16.gmra.mxu0 %v4870_v50  ;;  %v4874_v50 = vor.u32 %v5238_v55, %v4873_v20  ;;  %v5242_v20 = vld [vmem:[#allocation2 + $0x118] sm:$0xf0]  ;;  %v4887_v55 = vld [vmem:[#allocation2 + $0x114] sm:$0xf0] }
 0x1e5   : > { %3335 = vmatmul.bf16.gmra.mxu2 %v4862_v53  ;;  %3424 = vmatmul.bf16.gmra.mxu3 %v4866_v33  ;;  %v6274_v30 = vadd.f32 %v2681_v13, %v2593_v56 }
 0x1e8   : > { %v2106_v31 = vpop.f32.mrf.mxu2  ;;  %v2595_v22 = vpop.f32.mrf.mxu3 }
 0x1e9   : > { %v2107_v60 = vadd.f32 %v2106_v31, %v2018_v9  ;;  %v2019_v23 = vpop.f32.mrf.mxu1  ;;  %v2686_v35 = vpop.f32.mrf.mxu0 }
 0x1ea   : > { %v2020_v13 = vadd.f32 %v2019_v23, %v6071_v38  ;;  %v4557_v23 = vld [vmem:[#allocation2 + $0xe0] sm:$0xf] }
 0x1eb   : > { %v2596_v12 = vadd.f32 %v2595_v22, %v2107_v60 }
 0x1ed   : > { %v6277_v37 = vadd.f32 %v2684_v63, %v2596_v12  ;;  %v5098_v12 = vld [vmem:[#allocation2 + $0xe8] sm:$0xf0] }
 0x1ee   : > { %v4558_v28 = vor.u32 %v5098_v12, %v4557_v23  ;;  %v5245_v12 = vld [vmem:[#allocation2 + $0x130] sm:$0xf0] }
 0x1f0   : > { %v2108_v36 = vpop.f32.mrf.mxu2  ;;  %v2597_v61 = vpop.f32.mrf.mxu3 }
 0x1f1   : > { %v2109_v51 = vadd.f32 %v2108_v36, %v2020_v13  ;;  %v2698_v43 = vpop.f32.mrf.mxu1  ;;  %v3479_v17 = vpop.f32.mrf.mxu0  ;;  %v4894_v13 = vor.u32 %v5242_v20, %v4893_v18  ;;  %v4899_v18 = vld [vmem:[#allocation2 + $0x12c] sm:$0xf0] }
 0x1f2   : > { %v2699_v45 = vadd.f32 %v2698_v43, %v6101_v10  ;;  %v4885_v10 = vld [vmem:[#allocation2 + $0x108] sm:$0xf] }
 0x1f3   : > { %v2598_v53 = vadd.f32 %v2597_v61, %v2109_v51 }
 0x1f4   : > { %2737 = vmatmul.bf16.gmra.mxu1 %v4546_v16  ;;  %3518 = vmatmul.bf16.gmra.mxu0 %v4882_v24  ;;  %v4886_v24 = vor.u32 %v5241_v44, %v4885_v10  ;;  %v5244_v10 = vld [vmem:[#allocation2 + $0x128] sm:$0xf0] }
 0x1f5   : > { %3340 = vmatmul.bf16.gmra.mxu2 %v4874_v50  ;;  %3429 = vmatmul.bf16.gmra.mxu3 %v4878_v32  ;;  %v6281_v63 = vadd.f32 %v2686_v35, %v2598_v53 }
 0x1f8   : > { %v3301_v33 = vpop.f32.mrf.mxu2  ;;  %v3390_v38 = vpop.f32.mrf.mxu3 }
 0x1f9   : > { %v3391_v56 = vadd.f32 %v3390_v38, %v3301_v33  ;;  %v2700_v9 = vpop.f32.mrf.mxu1  ;;  %v3481_v31 = vpop.f32.mrf.mxu0 }
 0x1fa   : > { %v2701_v22 = vadd.f32 %v2700_v9, %v6107_v58  ;;  %v4890_v58 = vor.u32 %v5240_v25, %v4887_v55  ;;  %v4569_v9 = vld [vmem:[#allocation2 + $0xf8] sm:$0xf] }
 0x1fb   : > { %v3480_v60 = vadd.f32 %v3479_v17, %v3391_v56 }
 0x1fd   : > { %v6284_v42 = vadd.f32 %v3480_v60, %v2699_v45  ;;  %v5101_v60 = vld [vmem:[#allocation2 + $0x100] sm:$0xf0] }
 0x1fe   : > { %v4570_v25 = vor.u32 %v5101_v60, %v4569_v9  ;;  %v5248_v60 = vld [vmem:[#allocation2 + $0x148] sm:$0xf0] }
 0x200   : > { %v3303_v35 = vpop.f32.mrf.mxu2  ;;  %v3392_v41 = vpop.f32.mrf.mxu3 }
 0x201   : > { %v3393_v36 = vadd.f32 %v3392_v41, %v3303_v35  ;;  %v2703_v61 = vpop.f32.mrf.mxu1  ;;  %v3484_v16 = vpop.f32.mrf.mxu0 }
 0x202   : > { %v2704_v51 = vadd.f32 %v2703_v61, %v6121_v8  ;;  %v4897_v8 = vld [vmem:[#allocation2 + $0x120] sm:$0xf] }
 0x203   : > { %v3482_v43 = vadd.f32 %v3481_v31, %v3393_v36  ;;  %v4905_v31 = vld [vmem:[#allocation2 + $0x128] sm:$0xf] }
 0x204   : > { %2742 = vmatmul.bf16.gmra.mxu1 %v4558_v28  ;;  %3523 = vmatmul.bf16.gmra.mxu0 %v4894_v13  ;;  %v4906_v55 = vor.u32 %v5245_v12, %v4905_v31  ;;  %v4898_v13 = vor.u32 %v5244_v10, %v4897_v8  ;;  %v5247_v8 = vld [vmem:[#allocation2 + $0x140] sm:$0xf0]  ;;  %v4911_v31 = vld [vmem:[#allocation2 + $0x144] sm:$0xf0] }
 0x205   : > { %v6287_v17 = vadd.f32 %v3482_v43, %v2701_v22  ;;  %3345 = vmatmul.bf16.gmra.mxu2 %v4886_v24  ;;  %3434 = vmatmul.bf16.gmra.mxu3 %v4890_v58  ;;  %v5243_v22 = vld [vmem:[#allocation2 + $0x124] sm:$0xf] }
 0x208   : > { %v3306_v50 = vpop.f32.mrf.mxu2  ;;  %v3395_v32 = vpop.f32.mrf.mxu3 }
 0x209   : > { %v3396_v45 = vadd.f32 %v3395_v32, %v3306_v50  ;;  %v2705_v53 = vpop.f32.mrf.mxu1  ;;  %v3486_v33 = vpop.f32.mrf.mxu0 }
 0x20a   : > { %v2706_v38 = vadd.f32 %v2705_v53, %v6132_v2  ;;  %v4902_v2 = vor.u32 %v5243_v22, %v4899_v18  ;;  %v4581_v53 = vld [vmem:[#allocation2 + $0x110] sm:$0xf] }
 0x20b   : > { %v3485_v56 = vadd.f32 %v3484_v16, %v3396_v45 }
 0x20d   : > { %v6290_v23 = vadd.f32 %v3485_v56, %v2704_v51  ;;  %v5104_v56 = vld [vmem:[#allocation2 + $0x118] sm:$0xf0] }
 0x20e   : > { %v4582_v22 = vor.u32 %v5104_v56, %v4581_v53  ;;  %v5251_v56 = vld [vmem:[#allocation2 + $0x160] sm:$0xf0] }
 0x210   : > { %v3308_v20 = vpop.f32.mrf.mxu2  ;;  %v3397_v44 = vpop.f32.mrf.mxu3 }
 0x211   : > { %v3398_v35 = vadd.f32 %v3397_v44, %v3308_v20  ;;  %v2708_v41 = vpop.f32.mrf.mxu1  ;;  %v3489_v28 = vpop.f32.mrf.mxu0 }
 0x212   : > { %v2709_v36 = vadd.f32 %v2708_v41, %v6153_v3  ;;  %v4909_v3 = vld [vmem:[#allocation2 + $0x138] sm:$0xf] }
 0x213   : > { %v3487_v61 = vadd.f32 %v3486_v33, %v3398_v35  ;;  %v4917_v33 = vld [vmem:[#allocation2 + $0x140] sm:$0xf] }
 0x214   : > { %2747 = vmatmul.bf16.gmra.mxu1 %v4570_v25  ;;  %3528 = vmatmul.bf16.gmra.mxu0 %v4906_v55  ;;  %v4918_v18 = vor.u32 %v5248_v60, %v4917_v33  ;;  %v4910_v55 = vor.u32 %v5247_v8, %v4909_v3  ;;  %v5249_v3 = vld [vmem:[#allocation2 + $0x154] sm:$0xf]  ;;  %v4923_v33 = vld [vmem:[#allocation2 + $0x15c] sm:$0xf0] }
 0x215   : > { %v6293_v16 = vadd.f32 %v3487_v61, %v2706_v38  ;;  %3350 = vmatmul.bf16.gmra.mxu2 %v4898_v13  ;;  %3439 = vmatmul.bf16.gmra.mxu3 %v4902_v2  ;;  %v5246_v38 = vld [vmem:[#allocation2 + $0x13c] sm:$0xf] }
 0x218   : > { %v3311_v24 = vpop.f32.mrf.mxu2  ;;  %v3400_v58 = vpop.f32.mrf.mxu3 }
 0x219   : > { %v3401_v51 = vadd.f32 %v3400_v58, %v3311_v24  ;;  %v2710_v43 = vpop.f32.mrf.mxu1  ;;  %v3491_v50 = vpop.f32.mrf.mxu0 }
 0x21a   : > { %v2711_v32 = vadd.f32 %v2710_v43, %v6159_v40  ;;  %v4914_v40 = vor.u32 %v5246_v38, %v4911_v31  ;;  %v4593_v43 = vld [vmem:[#allocation2 + $0x128] sm:$0xf] }
 0x21b   : > { %v3490_v45 = vadd.f32 %v3489_v28, %v3401_v51 }
 0x21d   : > { %v6296_v9 = vadd.f32 %v3490_v45, %v2709_v36  ;;  %v5107_v45 = vld [vmem:[#allocation2 + $0x130] sm:$0xf0] }
 0x21e   : > { %v4594_v38 = vor.u32 %v5107_v45, %v4593_v43 }
 0x220   : > { %v3313_v12 = vpop.f32.mrf.mxu2  ;;  %v3402_v10 = vpop.f32.mrf.mxu3 }
 0x221   : > { %v3403_v20 = vadd.f32 %v3402_v10, %v3313_v12  ;;  %v2713_v44 = vpop.f32.mrf.mxu1  ;;  %v3494_v25 = vpop.f32.mrf.mxu0 }
 0x222   : > { %v2714_v35 = vadd.f32 %v2713_v44, %v6173_v1  ;;  %v4921_v1 = vld [vmem:[#allocation2 + $0x150] sm:$0xf] }
 0x223   : > { %v3492_v41 = vadd.f32 %v3491_v50, %v3403_v20  ;;  %v4929_v50 = vld [vmem:[#allocation2 + $0x158] sm:$0xf]  ;;  %v399_v20 = vld [vmem:[%s5629_s13 + $0xcc] sm:$0xf] }
 0x224   : > { %2752 = vmatmul.bf16.gmra.mxu1 %v4582_v22  ;;  %3533 = vmatmul.bf16.gmra.mxu0 %v4918_v18  ;;  %v4930_v31 = vor.u32 %v5251_v56, %v4929_v50  ;;  %v4926_v18 = vor.u32 %v5249_v3, %v4923_v33 }
 0x225   : > { %v6299_v28 = vadd.f32 %v3492_v41, %v2711_v32  ;;  %3355 = vmatmul.bf16.gmra.mxu2 %v4910_v55  ;;  %3444 = vmatmul.bf16.gmra.mxu3 %v4914_v40  ;;  %v5250_v32 = vld [vmem:[#allocation2 + $0x158] sm:$0xf0]  ;;  %v400_v55 = vld [vmem:[%s5629_s13 + $0xd0] sm:$0xf]  ;;  %v814_v40 = vshrl.u32 %v399_v20, 16 }
 0x226   : > { %v4922_v22 = vor.u32 %v5250_v32, %v4921_v1  ;;  %v401_v41 = vld [vmem:[%s5629_s13 + $0xd4] sm:$0x1] }
 0x227   : > { %v833_v43 = vshll.u32 %v401_v41, 16 }
 0x228   : > { %v3316_v13 = vpop.f32.mrf.mxu2  ;;  %v3405_v2 = vpop.f32.mrf.mxu3 }
 0x229   : > { %v3406_v36 = vadd.f32 %v3405_v2, %v3316_v13  ;;  %v2715_v61 = vpop.f32.mrf.mxu1  ;;  %v3496_v24 = vpop.f32.mrf.mxu0  ;;  %v816_v13 = vrot.slane %v814_v40, 4  ;;  %v961_v2 = vld [vmem:[%s5629_s13 + $0xd0] sm:$0xf]  ;;  %v5110_v40 = vld [vmem:[#allocation2 + $0x148] sm:$0xf0] }
 0x22a   : > { %v2716_v58 = vadd.f32 %v2715_v61, %v6183_v49  ;;  %v823_v61 = vshll.u32 %v400_v55, 16 }
 0x22b   : > { %v3495_v51 = vadd.f32 %v3494_v25, %v3406_v36  ;;  %v817_v36 = vshll.u32 %v399_v20, 16 }
 0x22c   : > { %v825_v56 = vrot.slane %v823_v61, 5 }
 0x22d   : > { %v6302_v53 = vadd.f32 %v3495_v51, %v2714_v35  ;;  %v827_v51 = vshrl.u32 %v400_v55, 16  ;;  %v819_v50 = vrot.slane %v817_v36, 5  ;;  %v4605_v55 = vld [vmem:[#allocation2 + $0x140] sm:$0xf] }
 0x230   : > { %v3318_v60 = vpop.f32.mrf.mxu2  ;;  %v3407_v8 = vpop.f32.mrf.mxu3 }
 0x231   : > { %v3408_v12 = vadd.f32 %v3407_v8, %v3318_v60  ;;  %v2718_v49 = vpop.f32.mrf.mxu1  ;;  %v3499_v10 = vpop.f32.mrf.mxu0  ;;  %v835_v60 = vrot.slane %v833_v43, 5  ;;  %v962_v8 = vld [vmem:[%s5629_s13 + $0xd4] sm:$0x1] }
 0x232   : > { %v2719_v44 = vadd.f32 %v2718_v49, %v6204_v15  ;;  %v960_v15 = vld [vmem:[%s5629_s13 + $0xcc] sm:$0xe]  ;;  %v311_v49 = vld [vmem:[%s5629_s13 + $0xd0] sm:$0xf] }
 0x233   : > { %v3497_v25 = vadd.f32 %v3496_v24, %v3408_v12  ;;  %v1141_v24 = vrot.slane %v961_v2, 5  ;;  %v310_v12 = vld [vmem:[%s5629_s13 + $0xcc] sm:$0xf]  ;;  %v4933_v2 = vld [vmem:[#allocation2 + $0x168] sm:$0xf]  ;;  %s5466_s13 = scalar_lea.hbm %s5465_s10, 256 }
 0x234   : > { %2757 = vmatmul.bf16.gmra.mxu1 %v4594_v38  ;;  %3538 = vmatmul.bf16.gmra.mxu0 %v4930_v31  ;;  %v4102_v38 = vrot.slane %v960_v15, 9  ;;  %346 = vst [vmem:[#allocation2 + $0x198] sm:$0xf] %v310_v12  ;;  %v5254_v15 = vld [vmem:[#allocation2 + $0x178] sm:$0xf0]  ;;  %p5467_p12 = scmp.ne.s32.totalorder %s5465_s10, %s5466_s13  ;;  %p5472_p2 = scmp.lt.s32.totalorder %s5470_s14, %s5466_s13 }
 0x235   : > { %v6307_v35 = vadd.f32 %v3497_v25, %v2716_v58  ;;  %3360 = vmatmul.bf16.gmra.mxu2 %v4922_v22  ;;  %3449 = vmatmul.bf16.gmra.mxu3 %v4926_v18  ;;  %v829_v58 = vrot.slane %v827_v51, 4  ;;  %v820_v22 = vor.u32 %v819_v50, %v816_v13  ;;  %v1143_v20 = vrot.slane %v1141_v24, 4  ;;  %347 = vst [vmem:[#allocation2 + $0x1a4] sm:$0xf] %v311_v49  ;;  %v5253_v13 = vld [vmem:[#allocation2 + $0x170] sm:$0xf0] }
 0x236   : > { %v1142_v41 = vsel %vm5786_vm5, %v4102_v38, %v1141_v24  ;;  %v1144_v51 = vrot.slane %v962_v8, 5  ;;  %v4934_v49 = vor.u32 %v5253_v13, %v4933_v2  ;;  %v4617_v2 = vld [vmem:[#allocation2 + $0x158] sm:$0xf]  ;;  %p5468_p13 = pnand %p5467_p12, %p5597_p4  ;;  %p5473_p3 = por %p5472_p2, %p5471_p1 }
 0x237   : > { %v830_v18 = vor.u32 %v829_v58, %v825_v56  ;;  %v821_v36 = vrot.slane %v820_v22, 4  ;;  %1216 = vst [vmem:[#allocation2 + $0x1a0] sm:$0xf] %v1142_v41 }
 0x238   : > { %v3321_v45 = vpop.f32.mrf.mxu2  ;;  %v3410_v1 = vpop.f32.mrf.mxu3  ;;  %v1145_v24 = vsel %vm5786_vm5, %v1143_v20, %v1144_v51  ;;  %v5257_v51 = vld [vmem:[#allocation2 + $0x190] sm:$0xf0]  ;;  %p5469_p0 = pneg %p5468_p13 }
 0x239   : > { %v3411_v32 = vadd.f32 %v3410_v1, %v3321_v45  ;;  %v2720_v3 = vpop.f32.mrf.mxu1  ;;  %v3501_v33 = vpop.f32.mrf.mxu0  ;;  %v831_v61 = vrot.slane %v830_v18, 4  ;;  %v5252_v45 = vld [vmem:[#allocation2 + $0x16c] sm:$0xf]  ;;  %v4935_v1 = vld [vmem:[#allocation2 + $0x174] sm:$0xf0] }
 0x23a   : > { %v2721_v31 = vadd.f32 %v2720_v3, %v6208_v34  ;;  %v4941_v34 = vld [vmem:[#allocation2 + $0x170] sm:$0xf]  ;;  %v4938_v22 = vor.u32 %v5252_v45, %v4935_v1  ;;  %1217 = vst [vmem:[#allocation2 + $0x1ac] sm:$0xf] %v1145_v24  ;;  %p5474_p5 = pnand %p5473_p3, %p5469_p0 }
 0x23b   : > { %v3500_v25 = vadd.f32 %v3499_v10, %v3411_v32  ;;  %v826_v10 = vsel %vm5772_vm4, %v821_v36, %v825_v56  ;;  %v836_v50 = vsel %vm5772_vm4, %v831_v61, %v835_v60  ;;  %v4942_v3 = vor.u32 %v5254_v15, %v4941_v34  ;;  %v5113_v36 = vld [vmem:[#allocation2 + $0x160] sm:$0xf0]  ;;  %v5256_v34 = vld [vmem:[#allocation2 + $0x188] sm:$0xf0]  ;;  %v4947_v15 = vld [vmem:[#allocation2 + $0x18c] sm:$0xf0] }
 0x23c   : > { %907 = vst [vmem:[#allocation2 + $0x19c] sm:$0xf] %v826_v10  ;;  %v4618_v1 = vor.u32 %v5113_v36, %v4617_v2  ;;  %v5259_v2 = vld [vmem:[#allocation2 + $0x1a0] sm:$0xf0] }
 0x23d   : > { %v6318_v43 = vadd.f32 %v3500_v25, %v2719_v44  ;;  %v4606_v44 = vor.u32 %v5110_v40, %v4605_v55  ;;  %908 = vst [vmem:[#allocation2 + $0x1a8] sm:$0xf] %v836_v50 }
 0x240   : > { %v3323_v58 = vpop.f32.mrf.mxu2  ;;  %v3412_v32 = vpop.f32.mrf.mxu3 }
 0x241   : > { %v3413_v8 = vadd.f32 %v3412_v32, %v3323_v58  ;;  %v2723_v38 = vpop.f32.mrf.mxu1  ;;  %v3504_v12 = vpop.f32.mrf.mxu0 }
 0x242   : > { %v2724_v56 = vadd.f32 %v2723_v38, %v6217_v57  ;;  %v4945_v57 = vld [vmem:[#allocation2 + $0x180] sm:$0xf] }
 0x243   : > { %v3502_v18 = vadd.f32 %v3501_v33, %v3413_v8  ;;  %v4953_v33 = vld [vmem:[#allocation2 + $0x188] sm:$0xf]  ;;  %v4946_v32 = vor.u32 %v5256_v34, %v4945_v57 }
 0x244   : > { %2762 = vmatmul.bf16.gmra.mxu1 %v4606_v44  ;;  %3543 = vmatmul.bf16.gmra.mxu0 %v4942_v3  ;;  %v4954_v10 = vor.u32 %v5257_v51, %v4953_v33  ;;  %v4959_v36 = vld [vmem:[#allocation2 + $0x1a4] sm:$0xf0] }
 0x245   : > { %v6327_v46 = vadd.f32 %v3502_v18, %v2721_v31  ;;  %3365 = vmatmul.bf16.gmra.mxu2 %v4934_v49  ;;  %3454 = vmatmul.bf16.gmra.mxu3 %v4938_v22  ;;  %v5255_v31 = vld [vmem:[#allocation2 + $0x184] sm:$0xf] }
 0x248   : > { %v3326_v59 = vpop.f32.mrf.mxu2  ;;  %v3415_v60 = vpop.f32.mrf.mxu3 }
 0x249   : > { %v3416_v20 = vadd.f32 %v3415_v60, %v3326_v59  ;;  %v2725_v25 = vpop.f32.mrf.mxu1  ;;  %v3506_v55 = vpop.f32.mrf.mxu0  ;;  %v4629_v60 = vld [vmem:[#allocation2 + $0x170] sm:$0xf] }
 0x24a   : > { %v2726_v40 = vadd.f32 %v2725_v25, %v6220_v14  ;;  %v4950_v14 = vor.u32 %v5255_v31, %v4947_v15 }
 0x24b   : > { %v3505_v41 = vadd.f32 %v3504_v12, %v3416_v20  ;;  %v5116_v20 = vld [vmem:[#allocation2 + $0x178] sm:$0xf0] }
 0x24c   : > { %v4630_v51 = vor.u32 %v5116_v20, %v4629_v60 }
 0x24d   : > { %v6330_v61 = vadd.f32 %v3505_v41, %v2724_v56  ;;  %v5260_v41 = vld [vmem:[#allocation2 + $0x1a8] sm:$0xf0] }
 0x250   : > { %v3328_v13 = vpop.f32.mrf.mxu2  ;;  %v3417_v45 = vpop.f32.mrf.mxu3 }
 0x251   : > { %v3418_v50 = vadd.f32 %v3417_v45, %v3328_v13  ;;  %v2728_v24 = vpop.f32.mrf.mxu1  ;;  %v3509_v58 = vpop.f32.mrf.mxu0 }
 0x252   : > { %v2729_v44 = vadd.f32 %v2728_v24, %v6223_v47  ;;  %v4957_v47 = vld [vmem:[#allocation2 + $0x198] sm:$0xf] }
 0x253   : > { %v3507_v3 = vadd.f32 %v3506_v55, %v3418_v50  ;;  %v4965_v55 = vld [vmem:[#allocation2 + $0x1a0] sm:$0xf]  ;;  %v4958_v45 = vor.u32 %v5259_v2, %v4957_v47 }
 0x254   : > { %2767 = vmatmul.bf16.gmra.mxu1 %v4618_v1  ;;  %3548 = vmatmul.bf16.gmra.mxu0 %v4954_v10  ;;  %v4966_v34 = vor.u32 %v5260_v41, %v4965_v55 }
 0x255   : > { %v6333_v8 = vadd.f32 %v3507_v3, %v2726_v40  ;;  %3370 = vmatmul.bf16.gmra.mxu2 %v4946_v32  ;;  %3459 = vmatmul.bf16.gmra.mxu3 %v4950_v14  ;;  %v5258_v40 = vld [vmem:[#allocation2 + $0x19c] sm:$0xf] }
 0x258   : > { %v3331_v38 = vpop.f32.mrf.mxu2  ;;  %v3420_v12 = vpop.f32.mrf.mxu3 }
 0x259   : > { %v3421_v49 = vadd.f32 %v3420_v12, %v3331_v38  ;;  %v2730_v22 = vpop.f32.mrf.mxu1  ;;  %v3511_v56 = vpop.f32.mrf.mxu0 }
 0x25a   : > { %v2731_v18 = vadd.f32 %v2730_v22, %v6226_v62  ;;  %v4962_v62 = vor.u32 %v5258_v40, %v4959_v36 }
 0x25b   : > { %v3510_v59 = vadd.f32 %v3509_v58, %v3421_v49 }
 0x25d   : > { %v6336_v25 = vadd.f32 %v3510_v59, %v2729_v44 }
 0x260   : > { %v3333_v57 = vpop.f32.mrf.mxu2  ;;  %v3422_v33 = vpop.f32.mrf.mxu3 }
 0x261   : > { %v3423_v31 = vadd.f32 %v3422_v33, %v3333_v57  ;;  %v2733_v15 = vpop.f32.mrf.mxu1  ;;  %v3514_v13 = vpop.f32.mrf.mxu0 }
 0x262   : > { %v2734_v1 = vadd.f32 %v2733_v15, %v6229_v0 }
 0x263   : > { %v3512_v10 = vadd.f32 %v3511_v56, %v3423_v31 }
 0x264   : > { %2772 = vmatmul.bf16.gmra.mxu1 %v4630_v51  ;;  %3553 = vmatmul.bf16.gmra.mxu0 %v4966_v34 }
 0x265   : > { %v6339_v50 = vadd.f32 %v3512_v10, %v2731_v18  ;;  %3375 = vmatmul.bf16.gmra.mxu2 %v4958_v45  ;;  %3464 = vmatmul.bf16.gmra.mxu3 %v4962_v62 }
 0x268   : > { %v3336_v24 = vpop.f32.mrf.mxu2  ;;  %v3425_v58 = vpop.f32.mrf.mxu3 }
 0x269   : > { %v3426_v32 = vadd.f32 %v3425_v58, %v3336_v24  ;;  %v2735_v14 = vpop.f32.mrf.mxu1  ;;  %v3516_v44 = vpop.f32.mrf.mxu0 }
 0x26a   : > { %v2736_v3 = vadd.f32 %v2735_v14, %v6232_v29 }
 0x26b   : > { %v3515_v38 = vadd.f32 %v3514_v13, %v3426_v32 }
 0x26d   : > { %v6342_v12 = vadd.f32 %v3515_v38, %v2734_v1 }
 0x270   : > { %v3338_v49 = vpop.f32.mrf.mxu2  ;;  %v3427_v22 = vpop.f32.mrf.mxu3 }
 0x271   : > { %v3428_v0 = vadd.f32 %v3427_v22, %v3338_v49  ;;  %v2738_v56 = vpop.f32.mrf.mxu1  ;;  %v3519_v59 = vpop.f32.mrf.mxu0 }
 0x272   : > { %v2739_v18 = vadd.f32 %v2738_v56, %v6235_v48 }
 0x273   : > { %v3517_v60 = vadd.f32 %v3516_v44, %v3428_v0 }
 0x275   : > { %v6345_v20 = vadd.f32 %v3517_v60, %v2736_v3 }
 0x278   : > { %v3341_v47 = vpop.f32.mrf.mxu2  ;;  %v3430_v55 = vpop.f32.mrf.mxu3 }
 0x279   : > { %v3431_v41 = vadd.f32 %v3430_v55, %v3341_v47  ;;  %v2740_v2 = vpop.f32.mrf.mxu1  ;;  %v3521_v40 = vpop.f32.mrf.mxu0 }
 0x27a   : > { %v2741_v29 = vadd.f32 %v2740_v2, %v6238_v7 }
 0x27b   : > { %v3520_v36 = vadd.f32 %v3519_v59, %v3431_v41 }
 0x27d   : > { %v6348_v57 = vadd.f32 %v3520_v36, %v2739_v18 }
 0x280   : > { %v3343_v33 = vpop.f32.mrf.mxu2  ;;  %v3432_v51 = vpop.f32.mrf.mxu3 }
 0x281   : > { %v3433_v34 = vadd.f32 %v3432_v51, %v3343_v33  ;;  %v2743_v31 = vpop.f32.mrf.mxu1  ;;  %v3524_v15 = vpop.f32.mrf.mxu0 }
 0x282   : > { %v2744_v48 = vadd.f32 %v2743_v31, %v6241_v52 }
 0x283   : > { %v3522_v13 = vadd.f32 %v3521_v40, %v3433_v34 }
 0x285   : > { %v6351_v45 = vadd.f32 %v3522_v13, %v2741_v29 }
 0x288   : > { %v3346_v62 = vpop.f32.mrf.mxu2  ;;  %v3435_v1 = vpop.f32.mrf.mxu3 }
 0x289   : > { %v3436_v10 = vadd.f32 %v3435_v1, %v3346_v62  ;;  %v2745_v24 = vpop.f32.mrf.mxu1  ;;  %v3526_v58 = vpop.f32.mrf.mxu0 }
 0x28a   : > { %v2746_v7 = vadd.f32 %v2745_v24, %v6244_v6  ;;  %v6366_v6 = vld [vmem:[%s6882_s2] ss:$0 sm:$0xff] }
 0x28b   : > { %v3525_v32 = vadd.f32 %v3524_v15, %v3436_v10  ;;  %v6370_v2 = vadd.f32 %v6366_v6, %v6287_v17  ;;  %v6376_v40 = vadd.f32 %v6366_v6, %v6284_v42  ;;  %v6380_v29 = vadd.f32 %v6366_v6, %v6290_v23 }
 0x28c   : > { %v6390_v17 = vadd.f32 %v6366_v6, %v6293_v16  ;;  %v6402_v15 = vadd.f32 %v6366_v6, %v6296_v9  ;;  %v6410_v62 = vadd.f32 %v6366_v6, %v6299_v28  ;;  %v6417_v9 = vadd.f32 %v6366_v6, %v6302_v53 }
 0x28d   : > { %v6354_v14 = vadd.f32 %v3525_v32, %v2744_v48  ;;  %v3666_v51 = vmul.f32 %v6370_v2, %v6370_v2  ;;  %v3665_v42 = vmul.f32 %v6376_v40, %v6376_v40  ;;  %v3667_v23 = vmul.f32 %v6380_v29, %v6380_v29 }
 0x28e   : > { %v3627_v48 = vadd.f32 %v6370_v2, %v6376_v40  ;;  %v3668_v16 = vmul.f32 %v6390_v17, %v6390_v17  ;;  %v3669_v24 = vmul.f32 %v6402_v15, %v6402_v15  ;;  %v6424_v28 = vadd.f32 %v6366_v6, %v6307_v35 }
 0x28f   : > { %v3697_v13 = vadd.f32 %v3666_v51, %v3665_v42 }
 0x290   : > { %v3348_v44 = vpop.f32.mrf.mxu2  ;;  %v3437_v3 = vpop.f32.mrf.mxu3  ;;  %v3628_v1 = vadd.f32 %v3627_v48, %v6380_v29  ;;  %v3672_v35 = vmul.f32 %v6424_v28, %v6424_v28 }
 0x291   : > { %v3438_v38 = vadd.f32 %v3437_v3, %v3348_v44  ;;  %v2748_v49 = vpop.f32.mrf.mxu1  ;;  %v3529_v22 = vpop.f32.mrf.mxu0  ;;  %v3698_v10 = vadd.f32 %v3697_v13, %v3667_v23  ;;  %v3670_v3 = vmul.f32 %v6410_v62, %v6410_v62 }
 0x292   : > { %v2749_v52 = vadd.f32 %v2748_v49, %v6247_v54  ;;  %v3629_v32 = vadd.f32 %v3628_v1, %v6390_v17 }
 0x293   : > { %v3527_v0 = vadd.f32 %v3526_v58, %v3438_v38  ;;  %v3699_v44 = vadd.f32 %v3698_v10, %v3668_v16 }
 0x295   : > { %v6357_v56 = vadd.f32 %v3527_v0, %v2746_v7  ;;  %v3700_v53 = vadd.f32 %v3699_v44, %v3669_v24  ;;  %v6435_v0 = vadd.f32 %v6366_v6, %v6318_v43  ;;  %v6449_v43 = vadd.f32 %v6366_v6, %v6330_v61 }
 0x297   : > { %v3673_v42 = vmul.f32 %v6435_v0, %v6435_v0  ;;  %v3675_v61 = vmul.f32 %v6449_v43, %v6449_v43 }
 0x298   : > { %v3351_v59 = vpop.f32.mrf.mxu2  ;;  %v3440_v18 = vpop.f32.mrf.mxu3 }
 0x299   : > { %v3441_v60 = vadd.f32 %v3440_v18, %v3351_v59  ;;  %v6359_v47 = vpop.f32.mrf.mxu1  ;;  %v6361_v55 = vpop.f32.mrf.mxu0  ;;  %v3701_v18 = vadd.f32 %v3700_v53, %v3670_v3  ;;  %v6465_v3 = vadd.f32 %v6366_v6, %v6336_v25  ;;  %v6479_v25 = vadd.f32 %v6366_v6, %v6342_v12 }
 0x29b   : > { %v3530_v41 = vadd.f32 %v3529_v22, %v3441_v60  ;;  %v3630_v22 = vadd.f32 %v3629_v32, %v6402_v15  ;;  %v6442_v60 = vadd.f32 %v6366_v6, %v6327_v46  ;;  %v6456_v46 = vadd.f32 %v6366_v6, %v6333_v8 }
 0x29d   : > { %v6372_v54 = vadd.f32 %v3530_v41, %v2749_v52  ;;  %v3671_v52 = vmul.f32 %v6417_v9, %v6417_v9  ;;  %v3631_v59 = vadd.f32 %v3630_v22, %v6410_v62  ;;  %v3674_v1 = vmul.f32 %v6442_v60, %v6442_v60 }
 0x29e   : > { %v3676_v8 = vmul.f32 %v6456_v46, %v6456_v46 }
 0x29f   : > { %v3632_v41 = vadd.f32 %v3631_v59, %v6417_v9  ;;  %v3702_v51 = vadd.f32 %v3701_v18, %v3671_v52  ;;  %v6472_v52 = vadd.f32 %v6366_v6, %v6339_v50  ;;  %v6486_v50 = vadd.f32 %v6366_v6, %v6345_v20 }
 0x2a0   : > { %v6382_v36 = vpop.f32.mrf.mxu2  ;;  %v6384_v33 = vpop.f32.mrf.mxu3 }
 0x2a1   : > { %v6392_v34 = vpop.f32.mrf.mxu1  ;;  %v6394_v31 = vpop.f32.mrf.mxu0  ;;  %v3633_v13 = vadd.f32 %v3632_v41, %v6424_v28  ;;  %v3703_v16 = vadd.f32 %v3702_v51, %v3672_v35  ;;  %v3677_v35 = vmul.f32 %v6465_v3, %v6465_v3 }
 0x2a3   : > { %v3634_v32 = vadd.f32 %v3633_v13, %v6435_v0  ;;  %v3704_v44 = vadd.f32 %v3703_v16, %v3673_v42  ;;  %v3678_v16 = vmul.f32 %v6472_v52, %v6472_v52 }
 0x2a5   : > { %v3635_v22 = vadd.f32 %v3634_v32, %v6442_v60  ;;  %v3705_v53 = vadd.f32 %v3704_v44, %v3674_v1  ;;  %v3443_v44 = vadd.f32 %v6384_v33, %v6382_v36  ;;  %v6502_v36 = vadd.f32 %v6366_v6, %v6351_v45 }
 0x2a7   : > { %v3636_v59 = vadd.f32 %v3635_v22, %v6449_v43  ;;  %v3706_v18 = vadd.f32 %v3705_v53, %v3675_v61  ;;  %v3679_v22 = vmul.f32 %v6479_v25, %v6479_v25  ;;  %v6495_v53 = vadd.f32 %v6366_v6, %v6348_v57 }
 0x2a8   : > { %v3356_v58 = vpop.f32.mrf.mxu2  ;;  %v3445_v7 = vpop.f32.mrf.mxu3  ;;  %v3532_v33 = vadd.f32 %v6361_v55, %v3443_v44 }
 0x2a9   : > { %v6426_v38 = vpop.f32.mrf.mxu1  ;;  %v6428_v49 = vpop.f32.mrf.mxu0  ;;  %v3637_v42 = vadd.f32 %v3636_v59, %v6456_v46  ;;  %v3707_v13 = vadd.f32 %v3706_v18, %v3676_v8  ;;  %v3446_v8 = vadd.f32 %v3445_v7, %v3356_v58  ;;  %v3680_v18 = vmul.f32 %v6486_v50, %v6486_v50 }
 0x2aa   : > { %v3681_v57 = vmul.f32 %v6495_v53, %v6495_v53  ;;  %v6510_v58 = vadd.f32 %v6366_v6, %v6354_v14  ;;  %v2751_v7 = vadd.f32 %v6359_v47, %v6250_v27  ;;  %v6520_v14 = vadd.f32 %v6366_v6, %v6357_v56 }
 0x2ab   : > { %v3638_v12 = vadd.f32 %v3637_v42, %v6465_v3  ;;  %v3708_v61 = vadd.f32 %v3707_v13, %v3677_v35  ;;  %v2754_v27 = vadd.f32 %v6392_v34, %v6253_v5  ;;  %v2756_v56 = vadd.f32 %v6426_v38, %v6256_v4 }
 0x2ad   : > { %v3639_v59 = vadd.f32 %v3638_v12, %v6472_v52  ;;  %v3709_v20 = vadd.f32 %v3708_v61, %v3678_v16  ;;  %v3535_v16 = vadd.f32 %v6394_v31, %v3446_v8 }
 0x2af   : > { %v3640_v42 = vadd.f32 %v3639_v59, %v6479_v25  ;;  %v3710_v13 = vadd.f32 %v3709_v20, %v3679_v22  ;;  %v3580_v59 = vadd.f32 %v3532_v33, %v2751_v7 }
 0x2b0   : > { %v3358_v23 = vpop.f32.mrf.mxu2  ;;  %v3447_v48 = vpop.f32.mrf.mxu3 }
 0x2b1   : > { %v6458_v10 = vpop.f32.mrf.mxu1  ;;  %v3539_v24 = vpop.f32.mrf.mxu0  ;;  %v3448_v35 = vadd.f32 %v3447_v48, %v3358_v23  ;;  %v3641_v55 = vadd.f32 %v3640_v42, %v6486_v50  ;;  %v3711_v23 = vadd.f32 %v3710_v13, %v3680_v18  ;;  %v3682_v48 = vmul.f32 %v6502_v36, %v6502_v36 }
 0x2b2   : > { %v3683_v18 = vmul.f32 %v6510_v58, %v6510_v58 }
 0x2b3   : > { %v3537_v47 = vadd.f32 %v6428_v49, %v3448_v35  ;;  %v3642_v31 = vadd.f32 %v3641_v55, %v6495_v53  ;;  %v3712_v8 = vadd.f32 %v3711_v23, %v3681_v57  ;;  %v3684_v49 = vmul.f32 %v6520_v14, %v6520_v14 }
 0x2b4   : > { %v6538_v35 = vadd.f32 %v6366_v6, %v3580_v59 }
 0x2b5   : > { %v3643_v33 = vadd.f32 %v3642_v31, %v6502_v36  ;;  %v3713_v34 = vadd.f32 %v3712_v8, %v3682_v48  ;;  %v3582_v42 = vadd.f32 %v3537_v47, %v2756_v56 }
 0x2b7   : > { %v3644_v13 = vadd.f32 %v3643_v33, %v6510_v58  ;;  %v3714_v7 = vadd.f32 %v3713_v34, %v3683_v18 }
 0x2b8   : > { %v3361_v41 = vpop.f32.mrf.mxu2  ;;  %v3450_v51 = vpop.f32.mrf.mxu3 }
 0x2b9   : > { %v2760_v1 = vpop.f32.mrf.mxu1  ;;  %v3541_v32 = vpop.f32.mrf.mxu0  ;;  %v3451_v44 = vadd.f32 %v3450_v51, %v3361_v41  ;;  %v6530_v41 = vadd.f32 %v6366_v6, %v6372_v54  ;;  %v3581_v51 = vadd.f32 %v3535_v16, %v2754_v27  ;;  %v2759_v54 = vadd.f32 %v6458_v10, %v6259_v19 }
 0x2ba   : > { %v2761_v55 = vadd.f32 %v2760_v1, %v6262_v39  ;;  %v3715_v59 = vadd.f32 %v3714_v7, %v3684_v49  ;;  %v3686_v19 = vmul.f32 %v6538_v35, %v6538_v35  ;;  %v6553_v10 = vadd.f32 %v6366_v6, %v3582_v42 }
 0x2bb   : > { %v3540_v5 = vadd.f32 %v3539_v24, %v3451_v44  ;;  %v3685_v4 = vmul.f32 %v6530_v41, %v6530_v41  ;;  %v6546_v38 = vadd.f32 %v6366_v6, %v3581_v51 }
 0x2bc   : > { %v3688_v56 = vmul.f32 %v6553_v10, %v6553_v10 }
 0x2bd   : > { %v3716_v8 = vadd.f32 %v3715_v59, %v3685_v4  ;;  %v3687_v39 = vmul.f32 %v6546_v38, %v6546_v38 }
 0x2bf   : > { %v3717_v51 = vadd.f32 %v3716_v8, %v3686_v19 }
 0x2c0   : > { %v3363_v45 = vpop.f32.mrf.mxu2  ;;  %v3452_v12 = vpop.f32.mrf.mxu3 }
 0x2c1   : > { %v2763_v61 = vpop.f32.mrf.mxu1  ;;  %v3544_v22 = vpop.f32.mrf.mxu0  ;;  %v3453_v20 = vadd.f32 %v3452_v12, %v3363_v45  ;;  %v3645_v45 = vadd.f32 %v3644_v13, %v6520_v14  ;;  %v3583_v12 = vadd.f32 %v3540_v5, %v2759_v54 }
 0x2c2   : > { %v2764_v47 = vadd.f32 %v2763_v61, %v6265_v11  ;;  %v3718_v11 = vadd.f32 %v3717_v51, %v3687_v39 }
 0x2c3   : > { %v3542_v57 = vadd.f32 %v3541_v32, %v3453_v20  ;;  %v3646_v32 = vadd.f32 %v3645_v45, %v6530_v41  ;;  %v6561_v20 = vadd.f32 %v6366_v6, %v3583_v12 }
 0x2c5   : > { %v3584_v27 = vadd.f32 %v3542_v57, %v2761_v55  ;;  %v3647_v1 = vadd.f32 %v3646_v32, %v6538_v35  ;;  %v3689_v49 = vmul.f32 %v6561_v20, %v6561_v20  ;;  %v3719_v57 = vadd.f32 %v3718_v11, %v3688_v56 }
 0x2c7   : > { %v3648_v33 = vadd.f32 %v3647_v1, %v6546_v38  ;;  %v6567_v5 = vadd.f32 %v6366_v6, %v3584_v27  ;;  %v3720_v12 = vadd.f32 %v3719_v57, %v3689_v49 }
 0x2c8   : > { %v3366_v24 = vpop.f32.mrf.mxu2  ;;  %v3455_v16 = vpop.f32.mrf.mxu3 }
 0x2c9   : > { %v3456_v23 = vadd.f32 %v3455_v16, %v3366_v24  ;;  %v2765_v48 = vpop.f32.mrf.mxu1  ;;  %v3546_v44 = vpop.f32.mrf.mxu0  ;;  %v3649_v34 = vadd.f32 %v3648_v33, %v6553_v10  ;;  %v3690_v4 = vmul.f32 %v6567_v5, %v6567_v5 }
 0x2ca   : > { %v2766_v24 = vadd.f32 %v2765_v48, %v6268_v26 }
 0x2cb   : > { %v3545_v31 = vadd.f32 %v3544_v22, %v3456_v23  ;;  %v3650_v7 = vadd.f32 %v3649_v34, %v6561_v20  ;;  %v3721_v19 = vadd.f32 %v3720_v12, %v3690_v4 }
 0x2cd   : > { %v3585_v18 = vadd.f32 %v3545_v31, %v2764_v47  ;;  %v3651_v55 = vadd.f32 %v3650_v7, %v6567_v5 }
 0x2cf   : > { %v6573_v42 = vadd.f32 %v6366_v6, %v3585_v18 }
 0x2d0   : > { %v3368_v61 = vpop.f32.mrf.mxu2  ;;  %v3457_v22 = vpop.f32.mrf.mxu3 }
 0x2d1   : > { %v3458_v13 = vadd.f32 %v3457_v22, %v3368_v61  ;;  %v2768_v54 = vpop.f32.mrf.mxu1  ;;  %v3549_v45 = vpop.f32.mrf.mxu0  ;;  %v3691_v23 = vmul.f32 %v6573_v42, %v6573_v42  ;;  %v3652_v32 = vadd.f32 %v3651_v55, %v6573_v42 }
 0x2d2   : > { %v2769_v1 = vadd.f32 %v2768_v54, %v6271_v21 }
 0x2d3   : > { %v3547_v16 = vadd.f32 %v3546_v44, %v3458_v13  ;;  %v3722_v8 = vadd.f32 %v3721_v19, %v3691_v23 }
 0x2d5   : > { %v3586_v59 = vadd.f32 %v3547_v16, %v2766_v24 }
 0x2d7   : > { %v6584_v27 = vadd.f32 %v6366_v6, %v3586_v59 }
 0x2d8   : > { %v3371_v47 = vpop.f32.mrf.mxu2  ;;  %v3460_v31 = vpop.f32.mrf.mxu3 }
 0x2d9   : > { %v3653_v26 = vadd.f32 %v3652_v32, %v6584_v27  ;;  %v3692_v48 = vmul.f32 %v6584_v27, %v6584_v27  ;;  %v3461_v44 = vadd.f32 %v3460_v31, %v3371_v47  ;;  %v2770_v51 = vpop.f32.mrf.mxu1  ;;  %v3551_v33 = vpop.f32.mrf.mxu0 }
 0x2da   : > { %v2771_v7 = vadd.f32 %v2770_v51, %v6274_v30 }
 0x2db   : > { %v3723_v39 = vadd.f32 %v3722_v8, %v3692_v48  ;;  %v3550_v18 = vadd.f32 %v3549_v45, %v3461_v44 }
 0x2dd   : > { %v3587_v56 = vadd.f32 %v3550_v18, %v2769_v1 }
 0x2df   : > { %v6591_v11 = vadd.f32 %v6366_v6, %v3587_v56 }
 0x2e0   : > { %v3373_v61 = vpop.f32.mrf.mxu2  ;;  %v3462_v22 = vpop.f32.mrf.mxu3 }
 0x2e1   : > { %v3654_v34 = vadd.f32 %v3653_v26, %v6591_v11  ;;  %v3693_v49 = vmul.f32 %v6591_v11, %v6591_v11  ;;  %v3463_v13 = vadd.f32 %v3462_v22, %v3373_v61  ;;  %v2773_v54 = vpop.f32.mrf.mxu1  ;;  %v3554_v16 = vpop.f32.mrf.mxu0 }
 0x2e2   : > { %v2774_v32 = vadd.f32 %v2773_v54, %v6277_v37 }
 0x2e3   : > { %v3724_v57 = vadd.f32 %v3723_v39, %v3693_v49  ;;  %v3552_v4 = vadd.f32 %v3551_v33, %v3463_v13 }
 0x2e5   : > { %v3588_v21 = vadd.f32 %v3552_v4, %v2771_v7 }
 0x2e7   : > { %v6598_v24 = vadd.f32 %v6366_v6, %v3588_v21 }
 0x2e8   : > { %v3376_v45 = vpop.f32.mrf.mxu2  ;;  %v3465_v12 = vpop.f32.mrf.mxu3 }
 0x2e9   : > { %v3655_v55 = vadd.f32 %v3654_v34, %v6598_v24  ;;  %v3694_v23 = vmul.f32 %v6598_v24, %v6598_v24  ;;  %v3466_v59 = vadd.f32 %v3465_v12, %v3376_v45  ;;  %v2775_v8 = vpop.f32.mrf.mxu1  ;;  %v3556_v18 = vpop.f32.mrf.mxu0 }
 0x2ea   : > { %v2776_v56 = vadd.f32 %v2775_v8, %v6281_v63 }
 0x2eb   : > { %v3725_v19 = vadd.f32 %v3724_v57, %v3694_v23  ;;  %v3555_v47 = vadd.f32 %v3554_v16, %v3466_v59 }
 0x2ed   : > { %v3589_v30 = vadd.f32 %v3555_v47, %v2774_v32 }
 0x2ef   : > { %v6605_v31 = vadd.f32 %v6366_v6, %v3589_v30 }
 0x2f0   : > { %v3378_v26 = vpop.f32.mrf.mxu2  ;;  %v3467_v48 = vpop.f32.mrf.mxu3 }
 0x2f1   : > { %v3656_v44 = vadd.f32 %v3655_v55, %v6605_v31  ;;  %v3695_v39 = vmul.f32 %v6605_v31, %v6605_v31  ;;  %v3468_v1 = vadd.f32 %v3467_v48, %v3378_v26 }
 0x2f3   : > { %v3726_v51 = vadd.f32 %v3725_v19, %v3695_v39  ;;  %v3557_v33 = vadd.f32 %v3556_v18, %v3468_v1  ;;  %v6640_v1 = vld [vmem:[%s6627_s22] sm:$0xff]   ;;  %v6643_v18 = vld [vmem:[%s6627_s22 + $0x8] sm:$0xff]  }
 0x2f5   : > { %v3590_v37 = vadd.f32 %v3557_v33, %v2776_v56  ;;  %v6649_v33 = vld [vmem:[%s6627_s22 + $0x18] sm:$0xff]  }
 0x2f7   : > { %v6612_v61 = vadd.f32 %v6366_v6, %v3590_v37  ;;  %v6652_v37 = vld [vmem:[%s6627_s22 + $0x78] sm:$0xff]  }
 0x2f9   : > { %v3657_v22 = vadd.f32 %v3656_v44, %v6612_v61  ;;  %v3696_v34 = vmul.f32 %v6612_v61, %v6612_v61 }
 0x2fb   : > { %v3658_v49 = vrot.slane %v3657_v22, 4  ;;  %v3727_v13 = vadd.f32 %v3726_v51, %v3696_v34  ;;  %v6646_v51 = vld [vmem:[%s6627_s22 + $0x10] sm:$0xff]   ;;  %v5289_v34 = vunpack.c.h.bf16 %v6640_v1 }
 0x2fd   : > { %v3659_v57 = vadd.f32 %v3658_v49, %v3657_v22  ;;  %v3728_v7 = vrot.slane %v3727_v13, 4 }
 0x2ff   : > { %v3660_v4 = vrot.slane %v3659_v57, 2  ;;  %v3729_v21 = vadd.f32 %v3728_v7, %v3727_v13 }
 0x301   : > { %v3661_v54 = vadd.f32 %v3660_v4, %v3659_v57  ;;  %v3730_v16 = vrot.slane %v3729_v21, 2 }
 0x303   : > { %v3662_v63 = vrot.slane %v3661_v54, 1  ;;  %v3731_v45 = vadd.f32 %v3730_v16, %v3729_v21 }
 0x305   : > { %v3663_v12 = vadd.f32 %v3662_v63, %v3661_v54  ;;  %v3732_v55 = vrot.slane %v3731_v45, 1  ;;  %v5349_v54 = vunpack.c.h.bf16 %v6652_v37 }
 0x307   : > { %v6617_v6 = vmul.f32 0.00390625, %v3663_v12  ;;  %v3733_v23 = vadd.f32 %v3732_v55, %v3731_v45 }
 0x309   : > { %v3734_v59 = vmul.f32 0.00390625, %v3733_v23  ;;  %v3735_v19 = vmul.f32 %v6617_v6, %v6617_v6  ;;  %v3768_v32 = vsub.f32 %v6612_v61, %v6617_v6  ;;  %v3763_v8 = vsub.f32 %v6573_v42, %v6617_v6 }
 0x30a   : > { %v3764_v26 = vsub.f32 %v6584_v27, %v6617_v6  ;;  %v3765_v48 = vsub.f32 %v6591_v11, %v6617_v6  ;;  %v3766_v44 = vsub.f32 %v6598_v24, %v6617_v6  ;;  %v3767_v39 = vsub.f32 %v6605_v31, %v6617_v6 }
 0x30b   : > { %v3736_v47 = vsub.f32 %v3734_v59, %v3735_v19  ;;  %v5288_v61 = vunpack.c.l.bf16 %v6640_v1  ;;  %v3737_v16 = vsub.f32 %v6376_v40, %v6617_v6  ;;  %v3738_v63 = vsub.f32 %v6370_v2, %v6617_v6 }
 0x30c   : > { %v3739_v45 = vsub.f32 %v6380_v29, %v6617_v6  ;;  %v3740_v12 = vsub.f32 %v6390_v17, %v6617_v6  ;;  %v3741_v23 = vsub.f32 %v6402_v15, %v6617_v6  ;;  %v3742_v59 = vsub.f32 %v6410_v62, %v6617_v6 }
 0x30d   : > { %v3769_v30 = vadd.f32 1e-05, %v3736_v47  ;;  %v3743_v19 = vsub.f32 %v6417_v9, %v6617_v6  ;;  %v3744_v40 = vsub.f32 %v6424_v28, %v6617_v6  ;;  %v3745_v2 = vsub.f32 %v6435_v0, %v6617_v6 }
 0x30e   : > { %v3746_v29 = vsub.f32 %v6442_v60, %v6617_v6  ;;  %v3747_v17 = vsub.f32 %v6449_v43, %v6617_v6  ;;  %v3748_v62 = vsub.f32 %v6456_v46, %v6617_v6  ;;  %v3749_v9 = vsub.f32 %v6465_v3, %v6617_v6 }
 0x30f   : > { %5448 = vrsqrt.f32 %v3769_v30  ;;  %v3750_v28 = vsub.f32 %v6472_v52, %v6617_v6  ;;  %v3751_v0 = vsub.f32 %v6479_v25, %v6617_v6  ;;  %v3752_v60 = vsub.f32 %v6486_v50, %v6617_v6 }
 0x310   : > { %v3753_v43 = vsub.f32 %v6495_v53, %v6617_v6  ;;  %vm3776_vm7 = vweird.f32 %v3769_v30  ;;  %v3754_v46 = vsub.f32 %v6502_v36, %v6617_v6  ;;  %v3755_v3 = vsub.f32 %v6510_v58, %v6617_v6 }
 0x311   : > { %v3756_v52 = vsub.f32 %v6520_v14, %v6617_v6  ;;  %v3757_v25 = vsub.f32 %v6530_v41, %v6617_v6  ;;  %v3758_v50 = vsub.f32 %v6538_v35, %v6617_v6  ;;  %v3759_v53 = vsub.f32 %v6546_v38, %v6617_v6 }
 0x312   : > { %v3760_v36 = vsub.f32 %v6553_v10, %v6617_v6  ;;  %v3761_v58 = vsub.f32 %v6561_v20, %v6617_v6  ;;  %v5301_v24 = vunpack.c.h.bf16 %v6649_v33 }
 0x315   : > { %v5449_v56 = vpop.eup %5448 }
 0x316   : > { %v3771_v22 = vmul.f32 %v5449_v56, %v3769_v30  ;;  %vm3777_vm6 = vweird.f32 %v5449_v56 }
 0x317   : > { %vm3778_vm8 = vmor %vm3776_vm7, %vm3777_vm6 }
 0x318   : > { %v3772_v21 = vmul.f32 %v5449_v56, %v3771_v22  ;;  %v3762_v22 = vsub.f32 %v6567_v5, %v6617_v6 }
 0x31a   : > { %v3773_v55 = vmul.f32 0.5, %v3772_v21 }
 0x31c   : > { %v3774_v15 = vsub.f32 1.5, %v3773_v55 }
 0x31e   : > { %v3775_v47 = vmul.f32 %v5449_v56, %v3774_v15 }
 0x320   : > { %v3779_v30 = vsel %vm3778_vm8, %v5449_v56, %v3775_v47 }
 0x321   : > { %v3811_v14 = vmul.f32 %v3779_v30, %v3768_v32  ;;  %v3780_v21 = vmul.f32 %v3779_v30, %v3737_v16  ;;  %v3781_v55 = vmul.f32 %v3779_v30, %v3738_v63  ;;  %v3782_v41 = vmul.f32 %v3779_v30, %v3739_v45 }
 0x322   : > { %v3783_v15 = vmul.f32 %v3779_v30, %v3740_v12  ;;  %v3784_v4 = vmul.f32 %v3779_v30, %v3741_v23  ;;  %v3785_v35 = vmul.f32 %v3779_v30, %v3742_v59  ;;  %v3786_v7 = vmul.f32 %v3779_v30, %v3743_v19 }
 0x323   : > { %v3907_v57 = vadd.f32 %v5349_v54, %v3811_v14  ;;  %v3787_v38 = vmul.f32 %v3779_v30, %v3744_v40  ;;  %v3788_v56 = vmul.f32 %v3779_v30, %v3745_v2  ;;  %v3789_v47 = vmul.f32 %v3779_v30, %v3746_v29  ;;  %v5353_v2 = vld [vmem:[%s6627_s22 + $0x20] sm:$0xff]  }
 0x324   : > { %v3790_v13 = vmul.f32 %v3779_v30, %v3747_v17  ;;  %v3791_v10 = vmul.f32 %v3779_v30, %v3748_v62  ;;  %v3792_v49 = vmul.f32 %v3779_v30, %v3749_v9  ;;  %v3793_v20 = vmul.f32 %v3779_v30, %v3750_v28 }
 0x325   : > { %3939 = vst [vmem:[%s6717_s26 + $0xf8] sm:$0xff] %v3907_v57  ;;  %v3794_v5 = vmul.f32 %v3779_v30, %v3751_v0  ;;  %v6720_v32 = vmul.f32 %v3779_v30, %v3752_v60  ;;  %v6722_v16 = vmul.f32 %v3779_v30, %v3753_v43  ;;  %v6724_v63 = vmul.f32 %v3779_v30, %v3754_v46 }
 0x326   : > { %v6726_v54 = vmul.f32 %v3779_v30, %v3755_v3  ;;  %v6728_v45 = vmul.f32 %v3779_v30, %v3756_v52  ;;  %v6730_v12 = vmul.f32 %v3779_v30, %v3757_v25  ;;  %v6732_v23 = vmul.f32 %v3779_v30, %v3758_v50  ;;  %v5356_v3 = vld [vmem:[%s6627_s22 + $0x38] sm:$0xff]   ;;  %v5357_v50 = vld [vmem:[%s6627_s22 + $0x40] sm:$0xff]  }
 0x327   : > { %v6734_v59 = vmul.f32 %v3779_v30, %v3759_v53  ;;  %v6736_v19 = vmul.f32 %v3779_v30, %v3760_v36  ;;  %v6738_v57 = vmul.f32 %v3779_v30, %v3761_v58  ;;  %v6740_v40 = vmul.f32 %v3779_v30, %v3762_v22  ;;  %v5358_v36 = vld [vmem:[%s6627_s22 + $0x48] sm:$0xff]  }
 0x328   : > { %v6746_v29 = vmul.f32 %v3779_v30, %v3763_v8  ;;  %v6751_v17 = vmul.f32 %v3779_v30, %v3764_v26  ;;  %v6756_v62 = vmul.f32 %v3779_v30, %v3765_v48  ;;  %v6761_v9 = vmul.f32 %v3779_v30, %v3766_v44  ;;  %v5354_v48 = vld [vmem:[%s6627_s22 + $0x28] sm:$0xff]  }
 0x329   : > { %v6766_v42 = vmul.f32 %v3779_v30, %v3767_v39  ;;  %v3876_v27 = vadd.f32 %v5288_v61, %v3780_v21  ;;  %v3877_v11 = vadd.f32 %v5289_v34, %v3781_v55  ;;  %v6891_v8 = vunpack.c.l.bf16 %v6643_v18  ;;  %v5355_v61 = vld [vmem:[%s6627_s22 + $0x30] sm:$0xff]  }
 0x32a   : > { %v6892_v44 = vunpack.c.h.bf16 %v6643_v18  ;;  %v5304_v6 = vunpack.c.l.bf16 %v5353_v2  ;;  %v6893_v39 = vunpack.c.l.bf16 %v6646_v51  ;;  %v5305_v1 = vunpack.c.h.bf16 %v5353_v2  ;;  %v5359_v55 = vld [vmem:[%s6627_s22 + $0x50] sm:$0xff]  }
 0x32b   : > { %v3878_v26 = vadd.f32 %v6891_v8, %v3782_v41  ;;  %3908 = vst [vmem:[%s6717_s26] sm:$0xff] %v3876_v27  ;;  %v6894_v34 = vunpack.c.h.bf16 %v6646_v51  ;;  %v5308_v60 = vunpack.c.l.bf16 %v5354_v48  ;;  %v6895_v43 = vunpack.c.l.bf16 %v6649_v33 }
 0x32c   : > { %v3879_v31 = vadd.f32 %v6892_v44, %v3783_v15  ;;  %v3880_v28 = vadd.f32 %v6893_v39, %v3784_v4  ;;  %3909 = vst [vmem:[%s6717_s26 + $0x8] sm:$0xff] %v3877_v11  ;;  %v5309_v46 = vunpack.c.h.bf16 %v5354_v48  ;;  %v3883_v4 = vadd.f32 %v5301_v24, %v3787_v38  ;;  %v5360_v38 = vld [vmem:[%s6627_s22 + $0x58] sm:$0xff]   ;;  %v5362_v11 = vld [vmem:[%s6627_s22 + $0x68] sm:$0xff]  }
 0x32d   : > { %v3881_v0 = vadd.f32 %v6894_v34, %v3785_v35  ;;  %v3882_v18 = vadd.f32 %v6895_v43, %v3786_v7  ;;  %3910 = vst [vmem:[%s6717_s26 + $0x10] sm:$0xff] %v3878_v26  ;;  %v5312_v52 = vunpack.c.l.bf16 %v5355_v61  ;;  %v3884_v25 = vadd.f32 %v5304_v6, %v3788_v56 }
 0x32e   : > { %3911 = vst [vmem:[%s6717_s26 + $0x18] sm:$0xff] %v3879_v31  ;;  %v5313_v51 = vunpack.c.h.bf16 %v5355_v61  ;;  %v3885_v53 = vadd.f32 %v5305_v1, %v3789_v47  ;;  %v5316_v33 = vunpack.c.l.bf16 %v5356_v3  ;;  %v3886_v7 = vadd.f32 %v5308_v60, %v3790_v13 }
 0x32f   : > { %3912 = vst [vmem:[%s6717_s26 + $0x20] sm:$0xff] %v3880_v28  ;;  %v5317_v30 = vunpack.c.h.bf16 %v5356_v3  ;;  %v3887_v58 = vadd.f32 %v5309_v46, %v3791_v10  ;;  %v5320_v22 = vunpack.c.l.bf16 %v5357_v50  ;;  %v3888_v14 = vadd.f32 %v5312_v52, %v3792_v49 }
 0x330   : > { %3913 = vst [vmem:[%s6717_s26 + $0x28] sm:$0xff] %v3881_v0  ;;  %v5321_v21 = vunpack.c.h.bf16 %v5357_v50  ;;  %v3889_v41 = vadd.f32 %v5313_v51, %v3793_v20  ;;  %v5324_v15 = vunpack.c.l.bf16 %v5358_v36  ;;  %v3890_v13 = vadd.f32 %v5316_v33, %v3794_v5  ;;  %v5361_v20 = vld [vmem:[%s6627_s22 + $0x60] sm:$0xff]  }
 0x331   : > { %3914 = vst [vmem:[%s6717_s26 + $0x30] sm:$0xff] %v3882_v18  ;;  %v5325_v35 = vunpack.c.h.bf16 %v5358_v36  ;;  %v3891_v56 = vadd.f32 %v5317_v30, %v6720_v32  ;;  %v5328_v47 = vunpack.c.l.bf16 %v5359_v55  ;;  %v3892_v49 = vadd.f32 %v5320_v22, %v6722_v16 }
 0x332   : > { %3915 = vst [vmem:[%s6717_s26 + $0x38] sm:$0xff] %v3883_v4  ;;  %v5329_v10 = vunpack.c.h.bf16 %v5359_v55  ;;  %v3893_v2 = vadd.f32 %v5321_v21, %v6724_v63  ;;  %v5332_v5 = vunpack.c.l.bf16 %v5360_v38  ;;  %v3894_v27 = vadd.f32 %v5324_v15, %v6726_v54  ;;  %v5363_v63 = vld [vmem:[%s6627_s22 + $0x70] sm:$0xff]  }
 0x333   : > { %3916 = vst [vmem:[%s6717_s26 + $0x40] sm:$0xff] %v3884_v25  ;;  %v5333_v32 = vunpack.c.h.bf16 %v5360_v38  ;;  %v3895_v8 = vadd.f32 %v5325_v35, %v6728_v45  ;;  %v5336_v16 = vunpack.c.l.bf16 %v5361_v20  ;;  %v3896_v26 = vadd.f32 %v5328_v47, %v6730_v12 }
 0x334   : > { %3917 = vst [vmem:[%s6717_s26 + $0x48] sm:$0xff] %v3885_v53  ;;  %v5337_v24 = vunpack.c.h.bf16 %v5361_v20  ;;  %v3897_v48 = vadd.f32 %v5329_v10, %v6732_v23  ;;  %v5340_v54 = vunpack.c.l.bf16 %v5362_v11  ;;  %v3898_v44 = vadd.f32 %v5332_v5, %v6734_v59 }
 0x335   : > { %3918 = vst [vmem:[%s6717_s26 + $0x50] sm:$0xff] %v3886_v7  ;;  %v5341_v45 = vunpack.c.h.bf16 %v5362_v11  ;;  %v3899_v31 = vadd.f32 %v5333_v32, %v6736_v19  ;;  %v5344_v12 = vunpack.c.l.bf16 %v5363_v63  ;;  %v3900_v6 = vadd.f32 %v5336_v16, %v6738_v57 }
 0x336   : > { %3919 = vst [vmem:[%s6717_s26 + $0x58] sm:$0xff] %v3887_v58  ;;  %v5345_v23 = vunpack.c.h.bf16 %v5363_v63  ;;  %v3901_v39 = vadd.f32 %v5337_v24, %v6740_v40  ;;  %v5348_v59 = vunpack.c.l.bf16 %v6652_v37  ;;  %v3902_v19 = vadd.f32 %v5340_v54, %v6746_v29 }
 0x337   : > { %3920 = vst [vmem:[%s6717_s26 + $0x60] sm:$0xff] %v3888_v14  ;;  %v3903_v57 = vadd.f32 %v5341_v45, %v6751_v17  ;;  %v3904_v40 = vadd.f32 %v5344_v12, %v6756_v62 }
 0x338   : > { %3921 = vst [vmem:[%s6717_s26 + $0x68] sm:$0xff] %v3889_v41  ;;  %v3905_v28 = vadd.f32 %v5345_v23, %v6761_v9  ;;  %v3906_v37 = vadd.f32 %v5348_v59, %v6766_v42 }
 0x339   : > { %3922 = vst [vmem:[%s6717_s26 + $0x70] sm:$0xff] %v3890_v13 }
 0x33a   : > { %3923 = vst [vmem:[%s6717_s26 + $0x78] sm:$0xff] %v3891_v56 }
 0x33b   : > { %3924 = vst [vmem:[%s6717_s26 + $0x80] sm:$0xff] %v3892_v49 }
 0x33c   : > { %3925 = vst [vmem:[%s6717_s26 + $0x88] sm:$0xff] %v3893_v2 }
 0x33d   : > { %3926 = vst [vmem:[%s6717_s26 + $0x90] sm:$0xff] %v3894_v27 }
 0x33e   : > { %3927 = vst [vmem:[%s6717_s26 + $0x98] sm:$0xff] %v3895_v8 }
 0x33f   : > { %3928 = vst [vmem:[%s6717_s26 + $0xa0] sm:$0xff] %v3896_v26 }
 0x340   : > { %3929 = vst [vmem:[%s6717_s26 + $0xa8] sm:$0xff] %v3897_v48 }
 0x341   : > { %3930 = vst [vmem:[%s6717_s26 + $0xb0] sm:$0xff] %v3898_v44 }
 0x342   : > { %3931 = vst [vmem:[%s6717_s26 + $0xb8] sm:$0xff] %v3899_v31 }
 0x343   : > { %3932 = vst [vmem:[%s6717_s26 + $0xc0] sm:$0xff] %v3900_v6 }
 0x344   : > { %3933 = vst [vmem:[%s6717_s26 + $0xc8] sm:$0xff] %v3901_v39 }
 0x345   : > { %3934 = vst [vmem:[%s6717_s26 + $0xd0] sm:$0xff] %v3902_v19 }
 0x346   : > { %3935 = vst [vmem:[%s6717_s26 + $0xd8] sm:$0xff] %v3903_v57 }
 0x347   : > { %3936 = vst [vmem:[%s6717_s26 + $0xe0] sm:$0xff] %v3904_v40 }
 0x348   : > { %3937 = vst [vmem:[%s6717_s26 + $0xe8] sm:$0xff] %v3905_v28 }
 0x349   : > { %3938 = vst [vmem:[%s6717_s26 + $0xf0] sm:$0xff] %v3906_v37 }
 0x34a   : > { %5477 = shalt.err (!%p5474_p5)
}
 0x34b   : > { %s5530_s7 = smov 128   ;;  %s5531_s24 = smov 8  }
 0x34c   : > { %5390 = dma.vmem_to_hbm [thread:$0]  (%p5597_p4), %s3955_s6, 4096, %s3957_s8, %s3941_s9, %s5530_s7, %s5530_s7, %s5531_s24  }
 0x34d PF: > { %p5396_p6 = scmp.ge.s32.totalorder %s5528_s20, 2  ;;  %s3971_s26 = sand.u32 1, %s5508_s15  }
 0x34e   : > { %s3972_s29 = scalar_lea.sflag [#allocation4], %s3971_s26 }
 0x34f   : > { %p5393_p7 = pnand %p5396_p6, %p5604_p8 }
 0x351   : > { %p5394_p9 = pneg %p5393_p7 }
 0x353   : > { %5503 = dma.done.wait (%p5394_p9), %s3972_s29, 4096  }
 0x354   : > { %5505 = vsyncadd (%p5394_p9), %s3972_s29, 4294963200  ;;  %s17_s20 = sadd.s32 1, %s5528_s20   ;;  %s6896_s15 = smov %s5512_s16 }
 0x355   : > { %p14_p10 = scmp.ge.s32.totalorder %s17_s20, 4   ;;  %s6897_s16 = smov %s5516_s17 }
 0x356   : > { %s6898_s17 = smov %s5610_s28  ;;  %s6899_s18 = smov %s5524_s19 }
 0x357   : > { %s6900_s19 = smov %s6902_s23  ;;  %16 = sbr.rel (!%p14_p10) target bundleno = 4 (0x4), region = 88 }
 0x35c   :  { %3978 = vsyncpa [#allocation4], 1 }
 0x35d   :  { %3980 = vsyncpa [#allocation4 + $0x1], 1 }

// kernel: resnet_block_forward.2
= control target key start
LH: loop header
LB: loop body
LE: loop exit
PB: predicated region body
PF: predicated region fallthrough
CT: control target
= control target key end

     0   :  { %s5361_s12 = smov 0   ;;  %s5363_s13 = smov 0   ;;  %s6511_s0 = inlined_call_operand.vmem [shape: bf16[2,18,18,128], index: 0, kind: input, shape index: {}]   ;;  %s6512_s1 = inlined_call_operand.vmem [shape: bf16[3,384,128], index: 1, kind: input, shape index: {}]   ;;  %s6513_s2 = inlined_call_operand.vmem [shape: f32[1,128], index: 2, kind: input, shape index: {}]   ;;  %s6514_s3 = inlined_call_operand.vmem [shape: bf16[2,16,16,128], index: 3, kind: output, shape index: {}]  }
   0x1   :  { %s5365_s14 = smov 0  }
   0x2 LB: > { %s25_s15 = sadd.s32 1, %s5335_s13  ;;  %p3969_p0 = scmp.ge.s32.totalorder %s5339_s14, 1  ;;  %s5339_s14 = sphi %s5365_s14, %s13_s14   ;;  %s5335_s13 = sphi %s5363_s13, %s6520_s13   ;;  %s5331_s12 = sphi %s5361_s12, %s6519_s12  }
   0x3   : > { %p27_p1 = scmp.ge.s32.totalorder %s25_s15, 2  ;;  %p168_p2 = scmp.lt.s32.totalorder %s5339_s14, 3 }
   0x5   : > { %s6522_s15 = smov (%p27_p1, %s25_s15), 0  ;;  %p169_p3 = pnand %p3969_p0, %p168_p2 }
   0x6   : > { %p202_p4 = scmp.lt.s32.totalorder (!%p169_p3), %s5331_s12, 1 }
   0x7   : > { %172 = sbr.rel (%p169_p3) target bundleno = 827 (0x33b), region = 32 }
   0xc   : > { %v5081_v0 = vld [vmem:[%s6512_s1 + $0xf8] sm:$0xff]  ;;  %v5080_v1 = vld [vmem:[%s6512_s1 + $0xf0] sm:$0xff]  ;;  %s6524_s12 = smov (!%p202_p4, %s5331_s12), 1  ;;  %v5079_v2 = vld [vmem:[%s6512_s1 + $0xe8] sm:$0xff]  ;;  %vm352_vm0 = vsmask.f32 3328 }
   0xd   : > { %1794 = vmatpush.bf16.msra.mxu0 %v5081_v0  ;;  %5265 = vmatpush.bf16.msra.mxu1 %v5081_v0  ;;  %s5289_s20 = smul.u32 216, %s6524_s12  ;;  %v5078_v8 = vld [vmem:[%s6512_s1 + $0xe0] sm:$0xff]  ;;  %v5077_v13 = vld [vmem:[%s6512_s1 + $0xd8] sm:$0xff]  ;;  %v5076_v18 = vld [vmem:[%s6512_s1 + $0xd0] sm:$0xff]  ;;  %vm353_vm1 = vsmask.f32 7440 }
   0xe   : > { %5266 = vmatpush.bf16.msra.mxu2 %v5081_v0  ;;  %5267 = vmatpush.bf16.msra.mxu3 %v5081_v0  ;;  %v5075_v22 = vld [vmem:[%s6512_s1 + $0xc8] sm:$0xff]  ;;  %v5074_v25 = vld [vmem:[%s6512_s1 + $0xc0] sm:$0xff]  ;;  %v5097_v38 = vld [vmem:[%s6512_s1 + $0x178] sm:$0xff]  ;;  %vm967_vm2 = vcmask 1042432   ;;  %vm968_vm3 = vcmask 1046532   ;;  %s4953_s6 = sshll.u32 %s6524_s12, 7 }
   0xf   : > { %s5394_s25 = scalar_lea.vmem %s6511_s0, %s5289_s20  ;;  %v5009_v39 = vld [vmem:[%s6512_s1 + $0x38] sm:$0xff]  ;;  %v5096_v48 = vld [vmem:[%s6512_s1 + $0x170] sm:$0xff]  ;;  %v5095_v52 = vld [vmem:[%s6512_s1 + $0x168] sm:$0xff]  ;;  %s6484_s9 = scalar_lea.vmem %s6514_s3, %s4953_s6 }
  0x10   : > { %v228_v3 = vld [vmem:[%s5394_s25 + $0xc] sm:$0xf]  ;;  %v229_v4 = vld [vmem:[%s5394_s25 + $0x10] sm:$0xf]  ;;  %v236_v5 = vld [vmem:[%s5394_s25 + $0x3c] sm:$0xf] }
  0x11   : > { %1795 = vmatpush.bf16.msra.mxu0 %v5080_v1  ;;  %5268 = vmatpush.bf16.msra.mxu1 %v5080_v1  ;;  %264 = vst [vmem:[#allocation2 + $0x18] sm:$0xf] %v228_v3  ;;  %v237_v6 = vld [vmem:[%s5394_s25 + $0x40] sm:$0xf]  ;;  %v244_v7 = vld [vmem:[%s5394_s25 + $0x6c] sm:$0xf]  ;;  %vm5537_vm4 = vmor %vm352_vm0, %vm353_vm1 }
  0x12   : > { %5269 = vmatpush.bf16.msra.mxu2 %v5080_v1  ;;  %5270 = vmatpush.bf16.msra.mxu3 %v5080_v1  ;;  %265 = vst [vmem:[#allocation2 + $0x24] sm:$0xf] %v229_v4  ;;  %v245_v9 = vld [vmem:[%s5394_s25 + $0x70] sm:$0xf]  ;;  %v252_v10 = vld [vmem:[%s5394_s25 + $0x9c] sm:$0xf]  ;;  %vm5551_vm5 = vmor %vm967_vm2, %vm968_vm3 }
  0x13   : > { %272 = vst [vmem:[#allocation2 + $0x78] sm:$0xf] %v236_v5  ;;  %v253_v11 = vld [vmem:[%s5394_s25 + $0xa0] sm:$0xf]  ;;  %v230_v12 = vld [vmem:[%s5394_s25 + $0x18] sm:$0xf] }
  0x14   : > { %273 = vst [vmem:[#allocation2 + $0x84] sm:$0xf] %v237_v6  ;;  %v231_v14 = vld [vmem:[%s5394_s25 + $0x1c] sm:$0xf]  ;;  %v238_v15 = vld [vmem:[%s5394_s25 + $0x48] sm:$0xf] }
  0x15   : > { %1796 = vmatpush.bf16.msra.mxu0 %v5079_v2  ;;  %5271 = vmatpush.bf16.msra.mxu1 %v5079_v2  ;;  %280 = vst [vmem:[#allocation2 + $0xd8] sm:$0xf] %v244_v7  ;;  %v239_v16 = vld [vmem:[%s5394_s25 + $0x4c] sm:$0xf]  ;;  %v246_v17 = vld [vmem:[%s5394_s25 + $0x78] sm:$0xf] }
  0x16   : > { %5272 = vmatpush.bf16.msra.mxu2 %v5079_v2  ;;  %5273 = vmatpush.bf16.msra.mxu3 %v5079_v2  ;;  %281 = vst [vmem:[#allocation2 + $0xe4] sm:$0xf] %v245_v9  ;;  %v247_v19 = vld [vmem:[%s5394_s25 + $0x7c] sm:$0xf]  ;;  %v254_v20 = vld [vmem:[%s5394_s25 + $0xa8] sm:$0xf] }
  0x17   : > { %288 = vst [vmem:[#allocation2 + $0x138] sm:$0xf] %v252_v10  ;;  %v255_v21 = vld [vmem:[%s5394_s25 + $0xac] sm:$0xf]  ;;  %v232_v23 = vld [vmem:[%s5394_s25 + $0x24] sm:$0xf] }
  0x18   : > { %289 = vst [vmem:[#allocation2 + $0x144] sm:$0xf] %v253_v11  ;;  %v233_v24 = vld [vmem:[%s5394_s25 + $0x28] sm:$0xf]  ;;  %v4041_v26 = vld [vmem:[#allocation2 + $0x18] sm:$0xf] }
  0x19   : > { %1797 = vmatpush.bf16.msra.mxu0 %v5078_v8  ;;  %5274 = vmatpush.bf16.msra.mxu1 %v5078_v8  ;;  %266 = vst [vmem:[#allocation2 + $0x30] sm:$0xf] %v230_v12  ;;  %v5027_v27 = vld [vmem:[#allocation2 + $0x20] sm:$0xf0]  ;;  %v240_v30 = vld [vmem:[%s5394_s25 + $0x54] sm:$0xf] }
  0x1a   : > { %5275 = vmatpush.bf16.msra.mxu2 %v5078_v8  ;;  %5276 = vmatpush.bf16.msra.mxu3 %v5078_v8  ;;  %267 = vst [vmem:[#allocation2 + $0x3c] sm:$0xf] %v231_v14  ;;  %v4089_v28 = vld [vmem:[#allocation2 + $0x78] sm:$0xf]  ;;  %v248_v35 = vld [vmem:[%s5394_s25 + $0x84] sm:$0xf]  ;;  %v4042_v41 = vor.u32 %v5027_v27, %v4041_v26 }
  0x1b   : > { %274 = vst [vmem:[#allocation2 + $0x90] sm:$0xf] %v238_v15  ;;  %v5039_v29 = vld [vmem:[#allocation2 + $0x80] sm:$0xf0]  ;;  %v241_v33 = vld [vmem:[%s5394_s25 + $0x58] sm:$0xf] }
  0x1c   : > { %275 = vst [vmem:[#allocation2 + $0x9c] sm:$0xf] %v239_v16  ;;  %v4137_v31 = vld [vmem:[#allocation2 + $0xd8] sm:$0xf]  ;;  %v249_v37 = vld [vmem:[%s5394_s25 + $0x88] sm:$0xf]  ;;  %v4090_v42 = vor.u32 %v5039_v29, %v4089_v28 }
  0x1d   : > { %1798 = vmatpush.bf16.msra.mxu0 %v5077_v13  ;;  %5277 = vmatpush.bf16.msra.mxu1 %v5077_v13  ;;  %282 = vst [vmem:[#allocation2 + $0xf0] sm:$0xf] %v246_v17  ;;  %v5051_v32 = vld [vmem:[#allocation2 + $0xe0] sm:$0xf0]  ;;  %v256_v40 = vld [vmem:[%s5394_s25 + $0xb4] sm:$0xf] }
  0x1e   : > { %5278 = vmatpush.bf16.msra.mxu2 %v5077_v13  ;;  %5279 = vmatpush.bf16.msra.mxu3 %v5077_v13  ;;  %283 = vst [vmem:[#allocation2 + $0xfc] sm:$0xf] %v247_v19  ;;  %v4185_v34 = vld [vmem:[#allocation2 + $0x138] sm:$0xf]  ;;  %v4138_v44 = vor.u32 %v5051_v32, %v4137_v31  ;;  %v5008_v49 = vld [vmem:[%s6512_s1 + $0x30] sm:$0xff]  ;;  %v5007_v53 = vld [vmem:[%s6512_s1 + $0x28] sm:$0xff] }
  0x1f   : > { %290 = vst [vmem:[#allocation2 + $0x150] sm:$0xf] %v254_v20  ;;  %v5063_v36 = vld [vmem:[#allocation2 + $0x140] sm:$0xf0]  ;;  %v257_v43 = vld [vmem:[%s5394_s25 + $0xb8] sm:$0xf] }
  0x20   : > { %291 = vst [vmem:[#allocation2 + $0x15c] sm:$0xf] %v255_v21  ;;  %v4186_v45 = vor.u32 %v5063_v36, %v4185_v34  ;;  %v5089_v46 = vld [vmem:[%s6512_s1 + $0x138] sm:$0xff]  ;;  %v5088_v50 = vld [vmem:[%s6512_s1 + $0x130] sm:$0xff]  ;;  %v5087_v54 = vld [vmem:[%s6512_s1 + $0x128] sm:$0xff] }
  0x21   : > { %1799 = vmatpush.bf16.msra.mxu0 %v5076_v18  ;;  %5280 = vmatpush.bf16.msra.mxu1 %v5076_v18  ;;  %268 = vst [vmem:[#allocation2 + $0x48] sm:$0xf] %v232_v23  ;;  %v5017_v47 = vld [vmem:[%s6512_s1 + $0x78] sm:$0xff]  ;;  %v5016_v51 = vld [vmem:[%s6512_s1 + $0x70] sm:$0xff]  ;;  %v5094_v55 = vld [vmem:[%s6512_s1 + $0x160] sm:$0xff] }
  0x22   : > { %5281 = vmatpush.bf16.msra.mxu2 %v5076_v18  ;;  %5282 = vmatpush.bf16.msra.mxu3 %v5076_v18  ;;  %269 = vst [vmem:[#allocation2 + $0x54] sm:$0xf] %v233_v24  ;;  %v5006_v56 = vld [vmem:[%s6512_s1 + $0x20] sm:$0xff]  ;;  %v5015_v57 = vld [vmem:[%s6512_s1 + $0x68] sm:$0xff]  ;;  %v234_v58 = vld [vmem:[%s5394_s25 + $0x30] sm:$0xf] }
  0x23   : > { %276 = vst [vmem:[#allocation2 + $0xa8] sm:$0xf] %v240_v30  ;;  %v235_v59 = vld [vmem:[%s5394_s25 + $0x34] sm:$0xf]  ;;  %v242_v60 = vld [vmem:[%s5394_s25 + $0x60] sm:$0xf] }
  0x24   : > { %277 = vst [vmem:[#allocation2 + $0xb4] sm:$0xf] %v241_v33  ;;  %v243_v61 = vld [vmem:[%s5394_s25 + $0x64] sm:$0xf]  ;;  %v4053_v62 = vld [vmem:[#allocation2 + $0x30] sm:$0xf] }
  0x25   : > { %1800 = vmatpush.bf16.msra.mxu0 %v5075_v22  ;;  %5283 = vmatpush.bf16.msra.mxu1 %v5075_v22  ;;  %284 = vst [vmem:[#allocation2 + $0x108] sm:$0xf] %v248_v35  ;;  %v5030_v63 = vld [vmem:[#allocation2 + $0x38] sm:$0xf0]  ;;  %v4101_v0 = vld [vmem:[#allocation2 + $0x90] sm:$0xf] }
  0x26   : > { %5284 = vmatpush.bf16.msra.mxu2 %v5075_v22  ;;  %5285 = vmatpush.bf16.msra.mxu3 %v5075_v22  ;;  %285 = vst [vmem:[#allocation2 + $0x114] sm:$0xf] %v249_v37  ;;  %v5042_v1 = vld [vmem:[#allocation2 + $0x98] sm:$0xf0]  ;;  %v250_v2 = vld [vmem:[%s5394_s25 + $0x90] sm:$0xf]  ;;  %v4054_v14 = vor.u32 %v5030_v63, %v4053_v62 }
  0x27   : > { %292 = vst [vmem:[#allocation2 + $0x168] sm:$0xf] %v256_v40  ;;  %v4149_v3 = vld [vmem:[#allocation2 + $0xf0] sm:$0xf]  ;;  %v5054_v4 = vld [vmem:[#allocation2 + $0xf8] sm:$0xf0]  ;;  %v4102_v15 = vor.u32 %v5042_v1, %v4101_v0 }
  0x28   : > { %293 = vst [vmem:[#allocation2 + $0x174] sm:$0xf] %v257_v43  ;;  %v4197_v5 = vld [vmem:[#allocation2 + $0x150] sm:$0xf]  ;;  %v251_v6 = vld [vmem:[%s5394_s25 + $0x94] sm:$0xf]  ;;  %v4150_v16 = vor.u32 %v5054_v4, %v4149_v3 }
  0x29   : > { %1801 = vmatpush.bf16.msra.mxu0 %v5074_v25  ;;  %5286 = vmatpush.bf16.msra.mxu1 %v5074_v25  ;;  %270 = vst [vmem:[#allocation2 + $0x60] sm:$0xf] %v234_v58  ;;  %v5066_v7 = vld [vmem:[#allocation2 + $0x158] sm:$0xf0]  ;;  %v258_v8 = vld [vmem:[%s5394_s25 + $0xc0] sm:$0xf] }
  0x2a   : > { %5287 = vmatpush.bf16.msra.mxu2 %v5074_v25  ;;  %5288 = vmatpush.bf16.msra.mxu3 %v5074_v25  ;;  %271 = vst [vmem:[#allocation2 + $0x6c] sm:$0xf] %v235_v59  ;;  %v5086_v9 = vld [vmem:[%s6512_s1 + $0x120] sm:$0xff]  ;;  %v5093_v12 = vld [vmem:[%s6512_s1 + $0x158] sm:$0xff]  ;;  %v4198_v17 = vor.u32 %v5066_v7, %v4197_v5  ;;  %v301_v18 = vld [vmem:[%s5394_s25 + $0xc] sm:$0xf] }
  0x2b   : > { %278 = vst [vmem:[#allocation2 + $0xc0] sm:$0xf] %v242_v60  ;;  %v5014_v10 = vld [vmem:[%s6512_s1 + $0x60] sm:$0xff]  ;;  %v5005_v13 = vld [vmem:[%s6512_s1 + $0x18] sm:$0xff]  ;;  %v302_v21 = vld [vmem:[%s5394_s25 + $0x10] sm:$0xf] }
  0x2c   : > { %1802 = vmatmul.bf16.vlgmr.msra.gmra.mxu0 %v4042_v41  ;;  %1822 = vmatmul.bf16.vlgmr.msra.gmra.mxu1 %v4090_v42  ;;  %279 = vst [vmem:[#allocation2 + $0xcc] sm:$0xf] %v243_v61  ;;  %v259_v11 = vld [vmem:[%s5394_s25 + $0xc4] sm:$0xf]  ;;  %v5085_v19 = vld [vmem:[%s6512_s1 + $0x118] sm:$0xff]  ;;  %v380_v22 = vshrl.u32 %v301_v18, 16 }
  0x2d   : > { %1842 = vmatmul.bf16.vlgmr.msra.gmra.mxu2 %v4138_v44  ;;  %1862 = vmatmul.bf16.vlgmr.msra.gmra.mxu3 %v4186_v45  ;;  %286 = vst [vmem:[#allocation2 + $0x120] sm:$0xf] %v250_v2  ;;  %v5013_v20 = vld [vmem:[%s6512_s1 + $0x58] sm:$0xff]  ;;  %v383_v23 = vshll.u32 %v301_v18, 16  ;;  %v5092_v24 = vld [vmem:[%s6512_s1 + $0x150] sm:$0xff]  ;;  %v389_v26 = vshll.u32 %v302_v21, 16 }
  0x2e   : > { %1972 = vmatpush.bf16.msrb.mxu2 %v5097_v38  ;;  %2461 = vmatpush.bf16.msrb.mxu3 %v5009_v39  ;;  %287 = vst [vmem:[#allocation2 + $0x12c] sm:$0xf] %v251_v6  ;;  %v5004_v25 = vld [vmem:[%s6512_s1 + $0x10] sm:$0xff]  ;;  %v393_v27 = vshrl.u32 %v302_v21, 16  ;;  %v382_v28 = vrot.slane %v380_v22, 4  ;;  %v5091_v34 = vld [vmem:[%s6512_s1 + $0x148] sm:$0xff] }
  0x2f   : > { %1883 = vmatpush.bf16.msrb.mxu1 %v5089_v46  ;;  %2550 = vmatpush.bf16.msrb.mxu0 %v5017_v47  ;;  %294 = vst [vmem:[#allocation2 + $0x180] sm:$0xf] %v258_v8  ;;  %v385_v29 = vrot.slane %v383_v23, 5  ;;  %v5084_v30 = vld [vmem:[%s6512_s1 + $0x110] sm:$0xff]  ;;  %v298_v33 = vld [vmem:[%s5394_s25] sm:$0xf] }
  0x30   : > { %295 = vst [vmem:[#allocation2 + $0x18c] sm:$0xf] %v259_v11  ;;  %v5012_v31 = vld [vmem:[%s6512_s1 + $0x50] sm:$0xff]  ;;  %v5003_v35 = vld [vmem:[%s6512_s1 + $0x8] sm:$0xff]  ;;  %v391_v36 = vrot.slane %v389_v26, 5  ;;  %v395_v37 = vrot.slane %v393_v27, 4 }
  0x31   : > { %v386_v32 = vor.u32 %v385_v29, %v382_v28  ;;  %v5083_v38 = vld [vmem:[%s6512_s1 + $0x108] sm:$0xff]  ;;  %v5090_v40 = vld [vmem:[%s6512_s1 + $0x140] sm:$0xff]  ;;  %v303_v42 = vld [vmem:[%s5394_s25 + $0x14] sm:$0x1]  ;;  %v356_v45 = vshrl.u32 %v298_v33, 16 }
  0x32   : > { %1973 = vmatpush.bf16.msrb.mxu2 %v5096_v48  ;;  %2462 = vmatpush.bf16.msrb.mxu3 %v5008_v49  ;;  %v5011_v41 = vld [vmem:[%s6512_s1 + $0x48] sm:$0xff]  ;;  %v396_v43 = vor.u32 %v395_v37, %v391_v36  ;;  %v299_v44 = vld [vmem:[%s5394_s25 + $0x4] sm:$0xf]  ;;  %v399_v47 = vshll.u32 %v303_v42, 16  ;;  %v863_v49 = vld [vmem:[%s5394_s25 + $0x10] sm:$0xf] }
  0x33   : > { %1884 = vmatpush.bf16.msrb.mxu1 %v5088_v50  ;;  %2551 = vmatpush.bf16.msrb.mxu0 %v5016_v51  ;;  %v387_v39 = vrot.slane %v386_v32, 4  ;;  %v862_v48 = vld [vmem:[%s5394_s25 + $0xc] sm:$0xe]  ;;  %v359_v50 = vshll.u32 %v298_v33, 16  ;;  %v4065_v51 = vld [vmem:[#allocation2 + $0x48] sm:$0xf] }
  0x34   : > { %v864_v58 = vld [vmem:[%s5394_s25 + $0x14] sm:$0x1]  ;;  %v3974_v60 = vrot.slane %v862_v48, 9  ;;  %v979_v61 = vrot.slane %v863_v49, 5  ;;  %v4161_v62 = vld [vmem:[#allocation2 + $0x108] sm:$0xf] }
  0x35   : > { %v5057_v63 = vld [vmem:[#allocation2 + $0x110] sm:$0xf0]  ;;  %v4209_v0 = vld [vmem:[#allocation2 + $0x168] sm:$0xf]  ;;  %v5082_v2 = vld [vmem:[%s6512_s1 + $0x100] sm:$0xff]  ;;  %v401_v4 = vrot.slane %v399_v47, 5 }
  0x36   : > { %1974 = vmatpush.bf16.msrb.mxu2 %v5095_v52  ;;  %2463 = vmatpush.bf16.msrb.mxu3 %v5007_v53  ;;  %v5033_v52 = vld [vmem:[#allocation2 + $0x50] sm:$0xf0]  ;;  %v4113_v53 = vld [vmem:[#allocation2 + $0xa8] sm:$0xf]  ;;  %v5010_v3 = vld [vmem:[%s6512_s1 + $0x40] sm:$0xff]  ;;  %v982_v5 = vrot.slane %v864_v58, 5  ;;  %v980_v7 = vsel %vm5551_vm5, %v3974_v60, %v979_v61  ;;  %v4162_v22 = vor.u32 %v5057_v63, %v4161_v62 }
  0x37   : > { %1885 = vmatpush.bf16.msrb.mxu1 %v5087_v54  ;;  %2552 = vmatpush.bf16.msrb.mxu0 %v5015_v57  ;;  %v5045_v54 = vld [vmem:[#allocation2 + $0xb0] sm:$0xf0]  ;;  %v397_v57 = vrot.slane %v396_v43, 4  ;;  %v226_v6 = vld [vmem:[%s5394_s25] sm:$0xf]  ;;  %v981_v8 = vrot.slane %v979_v61, 4  ;;  %v4066_v18 = vor.u32 %v5033_v52, %v4065_v51 }
  0x38   : > { %v5069_v1 = vld [vmem:[#allocation2 + $0x170] sm:$0xf0]  ;;  %262 = vst [vmem:[#allocation2] sm:$0xf] %v226_v6  ;;  %v305_v27 = vld [vmem:[%s5394_s25 + $0x1c] sm:$0xf] }
  0x39   : > { %v402_v11 = vsel %vm5537_vm4, %v397_v57, %v401_v4  ;;  %1134 = vst [vmem:[#allocation2 + $0x20] sm:$0xf] %v980_v7  ;;  %v4210_v23 = vor.u32 %v5069_v1, %v4209_v0  ;;  %v413_v32 = vshll.u32 %v305_v27, 16  ;;  %v417_v33 = vshrl.u32 %v305_v27, 16  ;;  %v306_v47 = vld [vmem:[%s5394_s25 + $0x20] sm:$0x1] }
  0x3a   : > { %1975 = vmatpush.bf16.msrb.mxu2 %v5094_v55  ;;  %2464 = vmatpush.bf16.msrb.mxu3 %v5006_v56  ;;  %v5002_v55 = vld [vmem:[%s6512_s1] sm:$0xff]  ;;  %v392_v56 = vsel %vm5537_vm4, %v387_v39, %v391_v36  ;;  %826 = vst [vmem:[#allocation2 + $0x28] sm:$0xf] %v402_v11  ;;  %v5161_v39 = vld [vmem:[%s6512_s1 + $0x1f8] sm:$0xff]  ;;  %v5036_v60 = vld [vmem:[#allocation2 + $0x68] sm:$0xf0] }
  0x3b   : > { %1886 = vmatpush.bf16.msrb.mxu1 %v5086_v9  ;;  %2553 = vmatpush.bf16.msrb.mxu0 %v5014_v10  ;;  %825 = vst [vmem:[#allocation2 + $0x1c] sm:$0xf] %v392_v56  ;;  %v227_v9 = vld [vmem:[%s5394_s25 + $0x4] sm:$0xf]  ;;  %v358_v10 = vrot.slane %v356_v45, 4  ;;  %v415_v42 = vrot.slane %v413_v32, 5 }
  0x3c   : > { %1807 = vmatmul.bf16.gmra.mxu0 %v4054_v14  ;;  %1827 = vmatmul.bf16.gmra.mxu1 %v4102_v15  ;;  %v365_v14 = vshll.u32 %v299_v44, 16  ;;  %v983_v15 = vsel %vm5551_vm5, %v981_v8, %v982_v5  ;;  %263 = vst [vmem:[#allocation2 + $0xc] sm:$0xf] %v227_v9  ;;  %v419_v43 = vrot.slane %v417_v33, 4  ;;  %v5169_v45 = vld [vmem:[%s6512_s1 + $0x238] sm:$0xff] }
  0x3d   : > { %1847 = vmatmul.bf16.gmra.mxu2 %v4150_v16  ;;  %1867 = vmatmul.bf16.gmra.mxu3 %v4198_v17  ;;  %v369_v16 = vshrl.u32 %v299_v44, 16  ;;  %1135 = vst [vmem:[#allocation2 + $0x2c] sm:$0xf] %v983_v15  ;;  %v865_v51 = vld [vmem:[%s5394_s25 + $0x18] sm:$0xe] }
  0x3e   : > { %1976 = vmatpush.bf16.msrb.mxu2 %v5093_v12  ;;  %2465 = vmatpush.bf16.msrb.mxu3 %v5005_v13  ;;  %v300_v12 = vld [vmem:[%s5394_s25 + $0x8] sm:$0x1]  ;;  %v361_v13 = vrot.slane %v359_v50, 5  ;;  %v367_v21 = vrot.slane %v365_v14, 5  ;;  %v420_v49 = vor.u32 %v419_v43, %v415_v42  ;;  %v423_v50 = vshll.u32 %v306_v47, 16 }
  0x3f   : > { %1887 = vmatpush.bf16.msrb.mxu1 %v5085_v19  ;;  %2554 = vmatpush.bf16.msrb.mxu0 %v5013_v20  ;;  %v375_v17 = vshll.u32 %v300_v12, 16  ;;  %v4114_v19 = vor.u32 %v5045_v54, %v4113_v53  ;;  %v866_v52 = vld [vmem:[%s5394_s25 + $0x1c] sm:$0xf]  ;;  %v867_v53 = vld [vmem:[%s5394_s25 + $0x20] sm:$0x1]  ;;  %v3975_v57 = vrot.slane %v865_v51, 9 }
  0x40   : > { %v362_v20 = vor.u32 %v361_v13, %v358_v10  ;;  %v425_v56 = vrot.slane %v423_v50, 5  ;;  %v4077_v58 = vld [vmem:[#allocation2 + $0x60] sm:$0xf]  ;;  %v986_v61 = vrot.slane %v866_v52, 5  ;;  %v989_v62 = vrot.slane %v867_v53, 5 }
  0x41   : > { %v4125_v63 = vld [vmem:[#allocation2 + $0xc0] sm:$0xf]  ;;  %v5048_v0 = vld [vmem:[#allocation2 + $0xc8] sm:$0xf0]  ;;  %v4078_v9 = vor.u32 %v5036_v60, %v4077_v58  ;;  %v307_v13 = vld [vmem:[%s5394_s25 + $0x24] sm:$0xf] }
  0x42   : > { %1977 = vmatpush.bf16.msrb.mxu2 %v5092_v24  ;;  %2466 = vmatpush.bf16.msrb.mxu3 %v5004_v25  ;;  %v371_v24 = vrot.slane %v369_v16, 4  ;;  %v304_v25 = vld [vmem:[%s5394_s25 + $0x18] sm:$0xf]  ;;  %v363_v26 = vrot.slane %v362_v20, 4  ;;  %v4173_v1 = vld [vmem:[#allocation2 + $0x120] sm:$0xf]  ;;  %v987_v4 = vsel %vm5551_vm5, %v3975_v57, %v986_v61  ;;  %v4126_v10 = vor.u32 %v5048_v0, %v4125_v63 }
  0x43   : > { %1888 = vmatpush.bf16.msrb.mxu1 %v5084_v30  ;;  %2555 = vmatpush.bf16.msrb.mxu0 %v5012_v31  ;;  %v404_v28 = vshrl.u32 %v304_v25, 16  ;;  %v407_v29 = vshll.u32 %v304_v25, 16  ;;  %v377_v31 = vrot.slane %v375_v17, 5  ;;  %v988_v5 = vrot.slane %v986_v61, 4  ;;  %v4221_v6 = vld [vmem:[#allocation2 + $0x180] sm:$0xf] }
  0x44   : > { %v372_v30 = vor.u32 %v371_v24, %v367_v21  ;;  %v5072_v7 = vld [vmem:[#allocation2 + $0x188] sm:$0xf0]  ;;  %1136 = vst [vmem:[#allocation2 + $0x38] sm:$0xf] %v987_v4  ;;  %v308_v14 = vld [vmem:[%s5394_s25 + $0x28] sm:$0xf] }
  0x45   : > { %v409_v36 = vrot.slane %v407_v29, 5  ;;  %v990_v8 = vsel %vm5551_vm5, %v988_v5, %v989_v62  ;;  %v4222_v12 = vor.u32 %v5072_v7, %v4221_v6  ;;  %v428_v15 = vshrl.u32 %v307_v13, 16  ;;  %v869_v25 = vld [vmem:[%s5394_s25 + $0x28] sm:$0xf]  ;;  %v868_v27 = vld [vmem:[%s5394_s25 + $0x24] sm:$0xe] }
  0x46   : > { %1978 = vmatpush.bf16.msrb.mxu2 %v5091_v34  ;;  %2467 = vmatpush.bf16.msrb.mxu3 %v5003_v35  ;;  %v368_v34 = vsel %vm5537_vm4, %v363_v26, %v367_v21  ;;  %v406_v35 = vrot.slane %v404_v28, 4  ;;  %v373_v37 = vrot.slane %v372_v30, 4  ;;  %1137 = vst [vmem:[#allocation2 + $0x44] sm:$0xf] %v990_v8  ;;  %v431_v16 = vshll.u32 %v307_v13, 16  ;;  %v5152_v61 = vld [vmem:[%s6512_s1 + $0x1b0] sm:$0xff] }
  0x47   : > { %1889 = vmatpush.bf16.msrb.mxu1 %v5083_v38  ;;  %2556 = vmatpush.bf16.msrb.mxu0 %v5011_v41  ;;  %823 = vst [vmem:[#allocation2 + $0x4] sm:$0xf] %v368_v34  ;;  %v5153_v38 = vld [vmem:[%s6512_s1 + $0x1b8] sm:$0xff]  ;;  %v437_v17 = vshll.u32 %v308_v14, 16  ;;  %v430_v20 = vrot.slane %v428_v15, 4  ;;  %v993_v33 = vrot.slane %v869_v25, 5 }
  0x48   : > { %v410_v41 = vor.u32 %v409_v36, %v406_v35  ;;  %v378_v44 = vsel %vm5537_vm4, %v373_v37, %v377_v31  ;;  %v433_v21 = vrot.slane %v431_v16, 5  ;;  %v870_v28 = vld [vmem:[%s5394_s25 + $0x2c] sm:$0x1]  ;;  %v3976_v31 = vrot.slane %v868_v27, 9  ;;  %v5026_v36 = vld [vmem:[#allocation2 + $0x1c] sm:$0xf] }
  0x49   : > { %824 = vst [vmem:[#allocation2 + $0x10] sm:$0xf] %v378_v44  ;;  %v996_v34 = vrot.slane %v870_v28, 5  ;;  %v5160_v62 = vld [vmem:[%s6512_s1 + $0x1f0] sm:$0xff]  ;;  %v312_v5 = vld [vmem:[%s5394_s25 + $0x38] sm:$0x1] }
  0x4a   : > { %1979 = vmatpush.bf16.msrb.mxu2 %v5090_v40  ;;  %2468 = vmatpush.bf16.msrb.mxu3 %v5002_v55  ;;  %v5025_v40 = vld [vmem:[%s6512_s1 + $0xb8] sm:$0xff]  ;;  %v411_v48 = vrot.slane %v410_v41, 4  ;;  %v421_v55 = vrot.slane %v420_v49, 4  ;;  %v434_v26 = vor.u32 %v433_v21, %v430_v20  ;;  %v4049_v41 = vld [vmem:[#allocation2 + $0x20] sm:$0xf] }
  0x4b   : > { %1890 = vmatpush.bf16.msrb.mxu1 %v5082_v2  ;;  %2557 = vmatpush.bf16.msrb.mxu0 %v5010_v3  ;;  %v5060_v3 = vld [vmem:[#allocation2 + $0x128] sm:$0xf0]  ;;  %v871_v7 = vld [vmem:[%s5394_s25 + $0x30] sm:$0xe]  ;;  %v872_v8 = vld [vmem:[%s5394_s25 + $0x34] sm:$0xf] }
  0x4c   : > { %1812 = vmatmul.bf16.gmra.mxu0 %v4066_v18  ;;  %1832 = vmatmul.bf16.gmra.mxu1 %v4114_v19  ;;  %v416_v54 = vsel %vm5537_vm4, %v411_v48, %v415_v42  ;;  %v426_v2 = vsel %vm5537_vm4, %v421_v55, %v425_v56  ;;  %v4174_v11 = vor.u32 %v5060_v3, %v4173_v1  ;;  %v441_v18 = vshrl.u32 %v308_v14, 16  ;;  %v309_v19 = vld [vmem:[%s5394_s25 + $0x2c] sm:$0x1]  ;;  %v4329_v42 = vld [vmem:[#allocation2] sm:$0xf]  ;;  %v5024_v1 = vld [vmem:[%s6512_s1 + $0xb0] sm:$0xff] }
  0x4d   : > { %1852 = vmatmul.bf16.gmra.mxu2 %v4162_v22  ;;  %1872 = vmatmul.bf16.gmra.mxu3 %v4210_v23  ;;  %827 = vst [vmem:[#allocation2 + $0x34] sm:$0xf] %v416_v54  ;;  %v439_v22 = vrot.slane %v437_v17, 5  ;;  %v447_v24 = vshll.u32 %v309_v19, 16  ;;  %v435_v32 = vrot.slane %v434_v26, 4  ;;  %v1000_v13 = vrot.slane %v872_v8, 5 }
  0x4e   : > { %3242 = vmatpush.bf16.msra.mxu2 %v5153_v38  ;;  %3331 = vmatpush.bf16.msra.mxu3 %v5161_v39  ;;  %828 = vst [vmem:[#allocation2 + $0x40] sm:$0xf] %v426_v2  ;;  %v443_v23 = vrot.slane %v441_v18, 4  ;;  %v994_v38 = vsel %vm5551_vm5, %v3976_v31, %v993_v33  ;;  %v995_v39 = vrot.slane %v993_v33, 4  ;;  %v4954_v44 = vld [vmem:[#allocation2 + $0x4] sm:$0xf] }
  0x4f   : > { %2639 = vmatpush.bf16.msra.mxu1 %v5025_v40  ;;  %3420 = vmatpush.bf16.msra.mxu0 %v5169_v45  ;;  %v449_v30 = vrot.slane %v447_v24, 5  ;;  %v440_v37 = vsel %vm5537_vm4, %v435_v32, %v439_v22  ;;  %v4043_v40 = vld [vmem:[#allocation2 + $0x24] sm:$0xf0]  ;;  %v5028_v48 = vld [vmem:[#allocation2 + $0x28] sm:$0xf0]  ;;  %v5168_v2 = vld [vmem:[%s6512_s1 + $0x230] sm:$0xff] }
  0x50   : > { %v444_v29 = vor.u32 %v443_v23, %v439_v22  ;;  %829 = vst [vmem:[#allocation2 + $0x4c] sm:$0xf] %v440_v37  ;;  %v4331_v45 = vld [vmem:[#allocation2 + $0xc] sm:$0xf0]  ;;  %v997_v47 = vsel %vm5551_vm5, %v995_v39, %v996_v34  ;;  %v4955_v49 = vld [vmem:[#allocation2 + $0x8] sm:$0xf0]  ;;  %v4046_v50 = vor.u32 %v5026_v36, %v4043_v40  ;;  %v4050_v52 = vor.u32 %v5028_v48, %v4049_v41 }
  0x51   : > { %1138 = vst [vmem:[#allocation2 + $0x50] sm:$0xf] %v994_v38  ;;  %v4334_v51 = vor.u32 %v4954_v44, %v4331_v45  ;;  %v4330_v53 = vor.u32 %v4955_v49, %v4329_v42  ;;  %v310_v54 = vld [vmem:[%s5394_s25 + $0x30] sm:$0xf]  ;;  %v311_v55 = vld [vmem:[%s5394_s25 + $0x34] sm:$0xf] }
  0x52   : > { %v445_v35 = vrot.slane %v444_v29, 4  ;;  %1139 = vst [vmem:[#allocation2 + $0x5c] sm:$0xf] %v997_v47  ;;  %v452_v56 = vshrl.u32 %v310_v54, 16  ;;  %v455_v57 = vshll.u32 %v310_v54, 16  ;;  %v461_v58 = vshll.u32 %v311_v55, 16  ;;  %3243 = vmatpush.bf16.msra.mxu2 %v5152_v61  ;;  %3332 = vmatpush.bf16.msra.mxu3 %v5160_v62 }
  0x53   : > { %v465_v60 = vshrl.u32 %v311_v55, 16  ;;  %2640 = vmatpush.bf16.msra.mxu1 %v5024_v1  ;;  %3421 = vmatpush.bf16.msra.mxu0 %v5168_v2  ;;  %v1002_v19 = vrot.slane %v1000_v13, 4  ;;  %v4341_v22 = vld [vmem:[#allocation2 + $0x18] sm:$0xf]  ;;  %v4958_v23 = vld [vmem:[#allocation2 + $0x20] sm:$0xf0] }
  0x54   : > { %v450_v43 = vsel %vm5537_vm4, %v445_v35, %v449_v30  ;;  %v454_v63 = vrot.slane %v452_v56, 4  ;;  %v457_v0 = vrot.slane %v455_v57, 5  ;;  %v463_v3 = vrot.slane %v461_v58, 5  ;;  %v5029_v20 = vld [vmem:[#allocation2 + $0x34] sm:$0xf] }
  0x55   : > { %830 = vst [vmem:[#allocation2 + $0x58] sm:$0xf] %v450_v43  ;;  %v467_v4 = vrot.slane %v465_v60, 4  ;;  %v4957_v24 = vld [vmem:[#allocation2 + $0x1c] sm:$0xf]  ;;  %v4342_v34 = vor.u32 %v4958_v23, %v4341_v22 }
  0x56   : > { %v458_v6 = vor.u32 %v457_v0, %v454_v63  ;;  %v4055_v27 = vld [vmem:[#allocation2 + $0x3c] sm:$0xf0]  ;;  %v4343_v28 = vld [vmem:[#allocation2 + $0x24] sm:$0xf0]  ;;  %v4061_v29 = vld [vmem:[#allocation2 + $0x38] sm:$0xf] }
  0x57   : > { %v5031_v30 = vld [vmem:[#allocation2 + $0x40] sm:$0xf0]  ;;  %v4058_v31 = vor.u32 %v5029_v20, %v4055_v27  ;;  %v4346_v32 = vor.u32 %v4957_v24, %v4343_v28  ;;  %v313_v35 = vld [vmem:[%s5394_s25 + $0x3c] sm:$0xf]  ;;  %v314_v36 = vld [vmem:[%s5394_s25 + $0x40] sm:$0xf] }
  0x58   : > { %v459_v14 = vrot.slane %v458_v6, 4  ;;  %v4062_v33 = vor.u32 %v5031_v30, %v4061_v29  ;;  %v476_v37 = vshrl.u32 %v313_v35, 16  ;;  %v479_v38 = vshll.u32 %v313_v35, 16  ;;  %v315_v40 = vld [vmem:[%s5394_s25 + $0x44] sm:$0x1]  ;;  %v5159_v20 = vld [vmem:[%s6512_s1 + $0x1e8] sm:$0xff] }
  0x59   : > { %v485_v39 = vshll.u32 %v314_v36, 16  ;;  %v489_v41 = vshrl.u32 %v314_v36, 16  ;;  %v875_v45 = vld [vmem:[%s5394_s25 + $0x40] sm:$0xf]  ;;  %v495_v48 = vshll.u32 %v315_v40, 16  ;;  %3333 = vmatpush.bf16.msra.mxu3 %v5159_v20  ;;  %v5167_v35 = vld [vmem:[%s6512_s1 + $0x228] sm:$0xff] }
  0x5a   : > { %v464_v21 = vsel %vm5537_vm4, %v459_v14, %v463_v3  ;;  %v478_v42 = vrot.slane %v476_v37, 4  ;;  %v481_v43 = vrot.slane %v479_v38, 5  ;;  %v874_v49 = vld [vmem:[%s5394_s25 + $0x3c] sm:$0xe]  ;;  %v5032_v62 = vld [vmem:[#allocation2 + $0x4c] sm:$0xf]  ;;  %3422 = vmatpush.bf16.msra.mxu0 %v5167_v35 }
  0x5b   : > { %831 = vst [vmem:[#allocation2 + $0x64] sm:$0xf] %v464_v21  ;;  %v487_v44 = vrot.slane %v485_v39, 5  ;;  %v491_v47 = vrot.slane %v489_v41, 4  ;;  %v497_v56 = vrot.slane %v495_v48, 5 }
  0x5c   : > { %1817 = vmatmul.bf16.gmra.mxu0 %v4078_v9  ;;  %1837 = vmatmul.bf16.gmra.mxu1 %v4126_v10  ;;  %v468_v9 = vor.u32 %v467_v4, %v463_v3  ;;  %v471_v10 = vshll.u32 %v312_v5, 16  ;;  %v4353_v63 = vld [vmem:[#allocation2 + $0x30] sm:$0xf]  ;;  %v4961_v0 = vld [vmem:[#allocation2 + $0x38] sm:$0xf0] }
  0x5d   : > { %1857 = vmatmul.bf16.gmra.mxu2 %v4174_v11  ;;  %1877 = vmatmul.bf16.gmra.mxu3 %v4222_v12  ;;  %v873_v11 = vld [vmem:[%s5394_s25 + $0x38] sm:$0x1]  ;;  %v3977_v12 = vrot.slane %v871_v7, 9  ;;  %v492_v55 = vor.u32 %v491_v47, %v487_v44  ;;  %v4960_v1 = vld [vmem:[#allocation2 + $0x34] sm:$0xf] }
  0x5e   : > { %v1003_v15 = vrot.slane %v873_v11, 5  ;;  %v469_v16 = vrot.slane %v468_v9, 4  ;;  %v473_v17 = vrot.slane %v471_v10, 5  ;;  %v4067_v4 = vld [vmem:[#allocation2 + $0x54] sm:$0xf0] }
  0x5f   : > { %v1001_v18 = vsel %vm5551_vm5, %v3977_v12, %v1000_v13  ;;  %v493_v61 = vrot.slane %v492_v55, 4  ;;  %v4355_v5 = vld [vmem:[#allocation2 + $0x3c] sm:$0xf0]  ;;  %v4073_v7 = vld [vmem:[#allocation2 + $0x50] sm:$0xf]  ;;  %v4070_v9 = vor.u32 %v5032_v62, %v4067_v4  ;;  %v4354_v12 = vor.u32 %v4961_v0, %v4353_v63 }
  0x60   : > { %1140 = vst [vmem:[#allocation2 + $0x68] sm:$0xf] %v1001_v18  ;;  %v474_v25 = vsel %vm5537_vm4, %v469_v16, %v473_v17  ;;  %v1004_v26 = vsel %vm5551_vm5, %v1002_v19, %v1003_v15  ;;  %v5034_v8 = vld [vmem:[#allocation2 + $0x58] sm:$0xf0]  ;;  %v4358_v10 = vor.u32 %v4960_v1, %v4355_v5  ;;  %v316_v13 = vld [vmem:[%s5394_s25 + $0x48] sm:$0xf] }
  0x61   : > { %832 = vst [vmem:[#allocation2 + $0x70] sm:$0xf] %v474_v25  ;;  %v498_v6 = vsel %vm5537_vm4, %v493_v61, %v497_v56  ;;  %v4074_v11 = vor.u32 %v5034_v8, %v4073_v7  ;;  %v317_v14 = vld [vmem:[%s5394_s25 + $0x4c] sm:$0xf]  ;;  %v500_v15 = vshrl.u32 %v316_v13, 16  ;;  %v503_v16 = vshll.u32 %v316_v13, 16 }
  0x62   : > { %1141 = vst [vmem:[#allocation2 + $0x74] sm:$0xf] %v1004_v26  ;;  %v509_v17 = vshll.u32 %v317_v14, 16  ;;  %v513_v18 = vshrl.u32 %v317_v14, 16  ;;  %v5151_v19 = vld [vmem:[%s6512_s1 + $0x1a8] sm:$0xff] }
  0x63   : > { %834 = vst [vmem:[#allocation2 + $0x88] sm:$0xf] %v498_v6  ;;  %v502_v21 = vrot.slane %v500_v15, 4  ;;  %v505_v22 = vrot.slane %v503_v16, 5  ;;  %v318_v23 = vld [vmem:[%s5394_s25 + $0x50] sm:$0x1]  ;;  %3244 = vmatpush.bf16.msra.mxu2 %v5151_v19 }
  0x64   : > { %v511_v24 = vrot.slane %v509_v17, 5  ;;  %v515_v25 = vrot.slane %v513_v18, 4  ;;  %v519_v27 = vshll.u32 %v318_v23, 16  ;;  %v877_v28 = vld [vmem:[%s5394_s25 + $0x48] sm:$0xe] }
  0x65   : > { %v506_v26 = vor.u32 %v505_v22, %v502_v21  ;;  %v878_v29 = vld [vmem:[%s5394_s25 + $0x4c] sm:$0xf]  ;;  %v321_v0 = vld [vmem:[%s5394_s25 + $0x5c] sm:$0x1]  ;;  %v881_v5 = vld [vmem:[%s5394_s25 + $0x58] sm:$0xf] }
  0x66   : > { %v516_v30 = vor.u32 %v515_v25, %v511_v24  ;;  %v521_v37 = vrot.slane %v519_v27, 5  ;;  %v4963_v47 = vld [vmem:[#allocation2 + $0x4c] sm:$0xf]  ;;  %v543_v7 = vshll.u32 %v321_v0, 16  ;;  %v880_v8 = vld [vmem:[%s5394_s25 + $0x54] sm:$0xe] }
  0x67   : > { %v507_v36 = vrot.slane %v506_v26, 4  ;;  %v4377_v21 = vld [vmem:[#allocation2 + $0x60] sm:$0xf]  ;;  %v4966_v22 = vld [vmem:[#allocation2 + $0x64] sm:$0xf] }
  0x68   : > { %v517_v39 = vrot.slane %v516_v30, 4  ;;  %v545_v15 = vrot.slane %v543_v7, 5  ;;  %v4379_v23 = vld [vmem:[#allocation2 + $0x6c] sm:$0xf0]  ;;  %v4967_v30 = vld [vmem:[#allocation2 + $0x68] sm:$0xf0] }
  0x69   : > { %v5022_v0 = vld [vmem:[%s6512_s1 + $0xa0] sm:$0xff] }
  0x6a   : > { %v522_v48 = vsel %vm5537_vm4, %v517_v39, %v521_v37  ;;  %v4091_v27 = vld [vmem:[#allocation2 + $0x84] sm:$0xf0]  ;;  %v322_v37 = vld [vmem:[%s5394_s25 + $0x60] sm:$0xf] }
  0x6b   : > { %836 = vst [vmem:[#allocation2 + $0xa0] sm:$0xf] %v522_v48  ;;  %v548_v39 = vshrl.u32 %v322_v37, 16  ;;  %v324_v48 = vld [vmem:[%s5394_s25 + $0x68] sm:$0x1] }
  0x6c   : > { %1891 = vmatmul.bf16.vlgmr.msrb.gmra.mxu1 %v4046_v50  ;;  %2558 = vmatmul.bf16.vlgmr.msrb.gmra.mxu0 %v4334_v51  ;;  %v876_v50 = vld [vmem:[%s5394_s25 + $0x44] sm:$0x1]  ;;  %v482_v51 = vor.u32 %v481_v43, %v478_v42  ;;  %v512_v42 = vsel %vm5537_vm4, %v507_v36, %v511_v24  ;;  %v4378_v36 = vor.u32 %v4967_v30, %v4377_v21 }
  0x6d   : > { %1980 = vmatmul.bf16.vlgmr.msrb.gmra.mxu2 %v4050_v52  ;;  %2469 = vmatmul.bf16.vlgmr.msrb.gmra.mxu3 %v4330_v53  ;;  %v3978_v52 = vrot.slane %v874_v49, 9  ;;  %v1007_v53 = vrot.slane %v875_v45, 5  ;;  %v1010_v54 = vrot.slane %v876_v50, 5  ;;  %v5035_v43 = vld [vmem:[#allocation2 + $0x64] sm:$0xf] }
  0x6e   : > { %v483_v57 = vrot.slane %v482_v51, 4  ;;  %v4365_v45 = vld [vmem:[#allocation2 + $0x48] sm:$0xf]  ;;  %835 = vst [vmem:[#allocation2 + $0x94] sm:$0xf] %v512_v42 }
  0x6f   : > { %v1008_v58 = vsel %vm5551_vm5, %v3978_v52, %v1007_v53  ;;  %v1009_v60 = vrot.slane %v1007_v53, 4  ;;  %v4079_v50 = vld [vmem:[#allocation2 + $0x6c] sm:$0xf0]  ;;  %v4367_v51 = vld [vmem:[#allocation2 + $0x54] sm:$0xf0] }
  0x70   : > { %1142 = vst [vmem:[#allocation2 + $0x80] sm:$0xf] %v1008_v58  ;;  %v488_v2 = vsel %vm5537_vm4, %v483_v57, %v487_v44  ;;  %v4085_v44 = vld [vmem:[#allocation2 + $0x68] sm:$0xf]  ;;  %v5037_v52 = vld [vmem:[#allocation2 + $0x70] sm:$0xf0]  ;;  %v4370_v55 = vor.u32 %v4963_v47, %v4367_v51 }
  0x71   : > { %v1011_v3 = vsel %vm5551_vm5, %v1009_v60, %v1010_v54  ;;  %833 = vst [vmem:[#allocation2 + $0x7c] sm:$0xf] %v488_v2  ;;  %v4964_v53 = vld [vmem:[#allocation2 + $0x50] sm:$0xf0]  ;;  %v4082_v54 = vor.u32 %v5035_v43, %v4079_v50  ;;  %v4086_v56 = vor.u32 %v5037_v52, %v4085_v44  ;;  %v320_v60 = vld [vmem:[%s5394_s25 + $0x58] sm:$0xf] }
  0x72   : > { %1143 = vst [vmem:[#allocation2 + $0x8c] sm:$0xf] %v1011_v3  ;;  %v4366_v57 = vor.u32 %v4964_v53, %v4365_v45  ;;  %v319_v58 = vld [vmem:[%s5394_s25 + $0x54] sm:$0xf]  ;;  %v533_v63 = vshll.u32 %v320_v60, 16  ;;  %v537_v1 = vshrl.u32 %v320_v60, 16 }
  0x73   : > { %v524_v61 = vshrl.u32 %v319_v58, 16  ;;  %v527_v62 = vshll.u32 %v319_v58, 16  ;;  %v5150_v43 = vld [vmem:[%s6512_s1 + $0x1a0] sm:$0xff]  ;;  %v550_v45 = vrot.slane %v548_v39, 4  ;;  %v567_v52 = vshll.u32 %v324_v48, 16 }
  0x74   : > { %v535_v4 = vrot.slane %v533_v63, 5  ;;  %v539_v6 = vrot.slane %v537_v1, 4  ;;  %v5158_v44 = vld [vmem:[%s6512_s1 + $0x1e0] sm:$0xff]  ;;  %3245 = vmatpush.bf16.msra.mxu2 %v5150_v43  ;;  %v885_v58 = vld [vmem:[%s5394_s25 + $0x68] sm:$0x1] }
  0x75   : > { %v526_v2 = vrot.slane %v524_v61, 4  ;;  %v529_v3 = vrot.slane %v527_v62, 5  ;;  %3334 = vmatpush.bf16.msra.mxu3 %v5158_v44  ;;  %v883_v53 = vld [vmem:[%s5394_s25 + $0x60] sm:$0xe]  ;;  %v887_v39 = vld [vmem:[%s5394_s25 + $0x70] sm:$0xf] }
  0x76   : > { %v540_v14 = vor.u32 %v539_v6, %v535_v4  ;;  %v3981_v60 = vrot.slane %v883_v53, 9  ;;  %v5166_v1 = vld [vmem:[%s6512_s1 + $0x220] sm:$0xff]  ;;  %v888_v43 = vld [vmem:[%s5394_s25 + $0x74] sm:$0x1] }
  0x77   : > { %v4097_v20 = vld [vmem:[#allocation2 + $0x80] sm:$0xf]  ;;  %3423 = vmatpush.bf16.msra.mxu0 %v5166_v1  ;;  %v4401_v1 = vld [vmem:[#allocation2 + $0x90] sm:$0xf] }
  0x78   : > { %v541_v19 = vrot.slane %v540_v14, 4  ;;  %v5038_v26 = vld [vmem:[#allocation2 + $0x7c] sm:$0xf] }
  0x7c   : > { %1896 = vmatmul.bf16.gmra.mxu1 %v4058_v31  ;;  %2563 = vmatmul.bf16.gmra.mxu0 %v4346_v32  ;;  %v879_v31 = vld [vmem:[%s5394_s25 + $0x50] sm:$0x1]  ;;  %v3979_v32 = vrot.slane %v877_v28, 9  ;;  %v546_v28 = vsel %vm5537_vm4, %v541_v19, %v545_v15  ;;  %v4103_v15 = vld [vmem:[#allocation2 + $0x9c] sm:$0xf0] }
  0x7d   : > { %1985 = vmatmul.bf16.gmra.mxu2 %v4062_v33  ;;  %2474 = vmatmul.bf16.gmra.mxu3 %v4342_v34  ;;  %v1014_v33 = vrot.slane %v878_v29, 5  ;;  %v5023_v34 = vld [vmem:[%s6512_s1 + $0xa8] sm:$0xff]  ;;  %v1017_v38 = vrot.slane %v879_v31, 5  ;;  %838 = vst [vmem:[#allocation2 + $0xb8] sm:$0xf] %v546_v28  ;;  %v4094_v31 = vor.u32 %v5038_v26, %v4091_v27 }
  0x7e   : > { %2641 = vmatpush.bf16.msra.mxu1 %v5023_v34  ;;  %v5040_v29 = vld [vmem:[#allocation2 + $0x88] sm:$0xf0]  ;;  %v326_v28 = vld [vmem:[%s5394_s25 + $0x70] sm:$0xf] }
  0x7f   : > { %v1015_v40 = vsel %vm5551_vm5, %v3979_v32, %v1014_v33  ;;  %v1016_v41 = vrot.slane %v1014_v33, 4  ;;  %v4382_v32 = vor.u32 %v4966_v22, %v4379_v23  ;;  %v4098_v35 = vor.u32 %v5040_v29, %v4097_v20  ;;  %v325_v27 = vld [vmem:[%s5394_s25 + $0x6c] sm:$0xf] }
  0x80   : > { %1144 = vst [vmem:[#allocation2 + $0x98] sm:$0xf] %v1015_v40  ;;  %v551_v40 = vshll.u32 %v322_v37, 16  ;;  %v572_v29 = vshrl.u32 %v325_v27, 16  ;;  %v575_v30 = vshll.u32 %v325_v27, 16 }
  0x81   : > { %v1018_v49 = vsel %vm5551_vm5, %v1016_v41, %v1017_v38  ;;  %v323_v38 = vld [vmem:[%s5394_s25 + $0x64] sm:$0xf] }
  0x82   : > { %1145 = vst [vmem:[#allocation2 + $0xa4] sm:$0xf] %v1018_v49  ;;  %v557_v41 = vshll.u32 %v323_v38, 16  ;;  %v561_v42 = vshrl.u32 %v323_v38, 16  ;;  %v553_v47 = vrot.slane %v551_v40, 5  ;;  %2642 = vmatpush.bf16.msra.mxu1 %v5022_v0  ;;  %v577_v37 = vrot.slane %v575_v30, 5 }
  0x83   : > { %v5157_v30 = vld [vmem:[%s6512_s1 + $0x1d8] sm:$0xff] }
  0x84   : > { %v559_v49 = vrot.slane %v557_v41, 5  ;;  %v563_v50 = vrot.slane %v561_v42, 4  ;;  %v554_v51 = vor.u32 %v553_v47, %v550_v45  ;;  %v886_v42 = vld [vmem:[%s5394_s25 + $0x6c] sm:$0xe]  ;;  %3335 = vmatpush.bf16.msra.mxu3 %v5157_v30 }
  0x85   : > { %v3982_v48 = vrot.slane %v886_v42, 9 }
  0x8c   : > { %1901 = vmatmul.bf16.gmra.mxu1 %v4070_v9  ;;  %2568 = vmatmul.bf16.gmra.mxu0 %v4358_v10  ;;  %v882_v9 = vld [vmem:[%s5394_s25 + $0x5c] sm:$0x1]  ;;  %v530_v10 = vor.u32 %v529_v3, %v526_v2  ;;  %v555_v2 = vrot.slane %v554_v51, 4  ;;  %v569_v3 = vrot.slane %v567_v52, 5 }
  0x8d   : > { %1990 = vmatmul.bf16.gmra.mxu2 %v4074_v11  ;;  %2479 = vmatmul.bf16.gmra.mxu3 %v4354_v12  ;;  %v3980_v11 = vrot.slane %v880_v8, 9  ;;  %v1021_v12 = vrot.slane %v881_v5, 5  ;;  %v1024_v13 = vrot.slane %v882_v9, 5  ;;  %v5041_v9 = vld [vmem:[#allocation2 + $0x94] sm:$0xf] }
  0x8e   : > { %v531_v16 = vrot.slane %v530_v10, 4  ;;  %v560_v8 = vsel %vm5537_vm4, %v555_v2, %v559_v49  ;;  %v4109_v10 = vld [vmem:[#allocation2 + $0x98] sm:$0xf]  ;;  %v4106_v21 = vor.u32 %v5041_v9, %v4103_v15  ;;  %v4972_v2 = vld [vmem:[#allocation2 + $0x94] sm:$0xf] }
  0x8f   : > { %v1022_v17 = vsel %vm5551_vm5, %v3980_v11, %v1021_v12  ;;  %v1023_v18 = vrot.slane %v1021_v12, 4  ;;  %v4389_v11 = vld [vmem:[#allocation2 + $0x78] sm:$0xf]  ;;  %v4969_v12 = vld [vmem:[#allocation2 + $0x7c] sm:$0xf] }
  0x90   : > { %1146 = vst [vmem:[#allocation2 + $0xb0] sm:$0xf] %v1022_v17  ;;  %v536_v24 = vsel %vm5537_vm4, %v531_v16, %v535_v4  ;;  %v1031_v4 = vrot.slane %v885_v58, 5  ;;  %v4391_v16 = vld [vmem:[#allocation2 + $0x84] sm:$0xf0] }
  0x91   : > { %v1025_v25 = vsel %vm5551_vm5, %v1023_v18, %v1024_v13  ;;  %837 = vst [vmem:[#allocation2 + $0xac] sm:$0xf] %v536_v24  ;;  %v5043_v17 = vld [vmem:[#allocation2 + $0xa0] sm:$0xf0]  ;;  %v4394_v22 = vor.u32 %v4969_v12, %v4391_v16 }
  0x92   : > { %1147 = vst [vmem:[#allocation2 + $0xbc] sm:$0xf] %v1025_v25  ;;  %v4970_v18 = vld [vmem:[#allocation2 + $0x80] sm:$0xf0]  ;;  %v4110_v25 = vor.u32 %v5043_v17, %v4109_v10  ;;  %v4973_v10 = vld [vmem:[#allocation2 + $0x98] sm:$0xf0] }
  0x93   : > { %839 = vst [vmem:[#allocation2 + $0xc4] sm:$0xf] %v560_v8  ;;  %v4390_v26 = vor.u32 %v4970_v18, %v4389_v11  ;;  %v4402_v18 = vor.u32 %v4973_v10, %v4401_v1 }
  0x97   : > { %v4121_v0 = vld [vmem:[#allocation2 + $0xb0] sm:$0xf] }
  0x99   : > { %v5046_v9 = vld [vmem:[#allocation2 + $0xb8] sm:$0xf0] }
  0x9a   : > { %v4122_v17 = vor.u32 %v5046_v9, %v4121_v0 }
  0x9c   : > { %1906 = vmatmul.bf16.gmra.mxu1 %v4082_v54  ;;  %2573 = vmatmul.bf16.gmra.mxu0 %v4370_v55  ;;  %v884_v54 = vld [vmem:[%s5394_s25 + $0x64] sm:$0xf] }
  0x9d   : > { %1995 = vmatmul.bf16.gmra.mxu2 %v4086_v56  ;;  %2484 = vmatmul.bf16.gmra.mxu3 %v4366_v57  ;;  %v564_v57 = vor.u32 %v563_v50, %v559_v49  ;;  %v1028_v61 = vrot.slane %v884_v54, 5  ;;  %v1035_v49 = vrot.slane %v887_v39, 5  ;;  %v1038_v50 = vrot.slane %v888_v43, 5 }
  0x9f   : > { %v565_v5 = vrot.slane %v564_v57, 4  ;;  %v1029_v6 = vsel %vm5551_vm5, %v3981_v60, %v1028_v61  ;;  %v1030_v7 = vrot.slane %v1028_v61, 4  ;;  %v1036_v58 = vsel %vm5551_vm5, %v3982_v48, %v1035_v49  ;;  %v891_v48 = vld [vmem:[%s5394_s25 + $0x80] sm:$0x1] }
  0xa0   : > { %1148 = vst [vmem:[#allocation2 + $0xc8] sm:$0xf] %v1029_v6  ;;  %v1037_v60 = vrot.slane %v1035_v49, 4  ;;  %v5044_v6 = vld [vmem:[#allocation2 + $0xac] sm:$0xf] }
  0xa1   : > { %v570_v13 = vsel %vm5537_vm4, %v565_v5, %v569_v3  ;;  %v1032_v14 = vsel %vm5551_vm5, %v1030_v7, %v1031_v4  ;;  %1150 = vst [vmem:[#allocation2 + $0xe0] sm:$0xf] %v1036_v58  ;;  %v4403_v3 = vld [vmem:[#allocation2 + $0x9c] sm:$0xf0]  ;;  %v4115_v7 = vld [vmem:[#allocation2 + $0xb4] sm:$0xf0] }
  0xa2   : > { %840 = vst [vmem:[#allocation2 + $0xd0] sm:$0xf] %v570_v13  ;;  %v1039_v5 = vsel %vm5551_vm5, %v1037_v60, %v1038_v50  ;;  %v4118_v13 = vor.u32 %v5044_v6, %v4115_v7  ;;  %v1045_v60 = vrot.slane %v891_v48, 5  ;;  %v4413_v7 = vld [vmem:[#allocation2 + $0xa8] sm:$0xf] }
  0xa3   : > { %1149 = vst [vmem:[#allocation2 + $0xd4] sm:$0xf] %v1032_v14  ;;  %v4406_v14 = vor.u32 %v4972_v2, %v4403_v3  ;;  %v5021_v2 = vld [vmem:[%s6512_s1 + $0x98] sm:$0xff]  ;;  %v893_v48 = vld [vmem:[%s5394_s25 + $0x88] sm:$0xf] }
  0xa4   : > { %1151 = vst [vmem:[#allocation2 + $0xec] sm:$0xf] %v1039_v5  ;;  %v5165_v3 = vld [vmem:[%s6512_s1 + $0x218] sm:$0xff]  ;;  %v5047_v5 = vld [vmem:[#allocation2 + $0xc4] sm:$0xf]  ;;  %2643 = vmatpush.bf16.msra.mxu1 %v5021_v2  ;;  %v1049_v2 = vrot.slane %v893_v48, 5 }
  0xa5   : > { %3424 = vmatpush.bf16.msra.mxu0 %v5165_v3 }
  0xa7   : > { %v4133_v6 = vld [vmem:[#allocation2 + $0xc8] sm:$0xf] }
  0xa9   : > { %v5694_v33 = vpop.f32.mrf.mxu0  ;;  %v5696_v34 = vpop.f32.mrf.mxu1 }
  0xac   : > { %1911 = vmatmul.bf16.gmra.mxu1 %v4094_v31  ;;  %2578 = vmatmul.bf16.gmra.mxu0 %v4382_v32  ;;  %v581_v31 = vshll.u32 %v326_v28, 16  ;;  %v327_v32 = vld [vmem:[%s5394_s25 + $0x74] sm:$0x1] }
  0xad   : > { %2000 = vmatmul.bf16.gmra.mxu2 %v4098_v35  ;;  %2489 = vmatmul.bf16.gmra.mxu3 %v4378_v36  ;;  %v585_v35 = vshrl.u32 %v326_v28, 16  ;;  %v574_v36 = vrot.slane %v572_v29, 4  ;;  %v591_v41 = vshll.u32 %v327_v32, 16  ;;  %v5149_v29 = vld [vmem:[%s6512_s1 + $0x198] sm:$0xff] }
  0xae   : > { %v583_v38 = vrot.slane %v581_v31, 5  ;;  %3246 = vmatpush.bf16.msra.mxu2 %v5149_v29 }
  0xaf   : > { %v587_v40 = vrot.slane %v585_v35, 4  ;;  %v578_v47 = vor.u32 %v577_v37, %v574_v36  ;;  %v593_v54 = vrot.slane %v591_v41, 5  ;;  %v330_v35 = vld [vmem:[%s5394_s25 + $0x80] sm:$0x1]  ;;  %v890_v41 = vld [vmem:[%s5394_s25 + $0x7c] sm:$0xf] }
  0xb0   : > { %v5709_v55 = vpop.f32.mrf.mxu2  ;;  %v5711_v56 = vpop.f32.mrf.mxu3  ;;  %v615_v39 = vshll.u32 %v330_v35, 16  ;;  %v1042_v50 = vrot.slane %v890_v41, 5 }
  0xb1   : > { %v5714_v62 = vpop.f32.mrf.mxu0  ;;  %v5716_v63 = vpop.f32.mrf.mxu1  ;;  %v588_v53 = vor.u32 %v587_v40, %v583_v38  ;;  %v579_v57 = vrot.slane %v578_v47, 4  ;;  %v889_v40 = vld [vmem:[%s5394_s25 + $0x78] sm:$0xe] }
  0xb2   : > { %v3983_v49 = vrot.slane %v889_v40, 9  ;;  %v617_v58 = vrot.slane %v615_v39, 5  ;;  %v1044_v1 = vrot.slane %v1042_v50, 4 }
  0xb3   : > { %v589_v61 = vrot.slane %v588_v53, 4  ;;  %v584_v4 = vsel %vm5537_vm4, %v579_v57, %v583_v38 }
  0xb4   : > { %841 = vst [vmem:[#allocation2 + $0xdc] sm:$0xf] %v584_v4  ;;  %v1043_v0 = vsel %vm5551_vm5, %v3983_v49, %v1042_v50  ;;  %v1046_v10 = vsel %vm5551_vm5, %v1044_v1, %v1045_v60 }
  0xb5   : > { %v594_v8 = vsel %vm5537_vm4, %v589_v61, %v593_v54  ;;  %1152 = vst [vmem:[#allocation2 + $0xf8] sm:$0xf] %v1043_v0 }
  0xb6   : > { %842 = vst [vmem:[#allocation2 + $0xe8] sm:$0xf] %v594_v8  ;;  %v4975_v8 = vld [vmem:[#allocation2 + $0xac] sm:$0xf] }
  0xb7   : > { %1153 = vst [vmem:[#allocation2 + $0x104] sm:$0xf] %v1046_v10  ;;  %v1051_v10 = vrot.slane %v1049_v2, 4 }
  0xb8   : > { %v5732_v19 = vpop.f32.mrf.mxu2  ;;  %v5734_v20 = vpop.f32.mrf.mxu3 }
  0xb9   : > { %v5736_v23 = vpop.f32.mrf.mxu0  ;;  %v5738_v24 = vpop.f32.mrf.mxu1 }
  0xbc   : > { %1916 = vmatmul.bf16.gmra.mxu1 %v4106_v21  ;;  %2583 = vmatmul.bf16.gmra.mxu0 %v4394_v22  ;;  %v328_v21 = vld [vmem:[%s5394_s25 + $0x78] sm:$0xf]  ;;  %v329_v22 = vld [vmem:[%s5394_s25 + $0x7c] sm:$0xf] }
  0xbd   : > { %2005 = vmatmul.bf16.gmra.mxu2 %v4110_v25  ;;  %2494 = vmatmul.bf16.gmra.mxu3 %v4390_v26  ;;  %v596_v25 = vshrl.u32 %v328_v21, 16  ;;  %v599_v26 = vshll.u32 %v328_v21, 16  ;;  %v605_v27 = vshll.u32 %v329_v22, 16  ;;  %v609_v28 = vshrl.u32 %v329_v22, 16 }
  0xbf   : > { %v598_v31 = vrot.slane %v596_v25, 4  ;;  %v601_v32 = vrot.slane %v599_v26, 5  ;;  %v607_v36 = vrot.slane %v605_v27, 5  ;;  %v611_v37 = vrot.slane %v609_v28, 4 }
  0xc0   : > { %v5746_v44 = vpop.f32.mrf.mxu2  ;;  %v5748_v45 = vpop.f32.mrf.mxu3 }
  0xc1   : > { %v5750_v51 = vpop.f32.mrf.mxu0  ;;  %v5752_v52 = vpop.f32.mrf.mxu1  ;;  %v602_v38 = vor.u32 %v601_v32, %v598_v31  ;;  %v612_v47 = vor.u32 %v611_v37, %v607_v36  ;;  %v331_v31 = vld [vmem:[%s5394_s25 + $0x84] sm:$0xf]  ;;  %v332_v32 = vld [vmem:[%s5394_s25 + $0x88] sm:$0xf] }
  0xc2   : > { %v620_v35 = vshrl.u32 %v331_v31, 16  ;;  %v629_v37 = vshll.u32 %v332_v32, 16  ;;  %v633_v39 = vshrl.u32 %v332_v32, 16 }
  0xc3   : > { %v603_v57 = vrot.slane %v602_v38, 4  ;;  %v613_v61 = vrot.slane %v612_v47, 4  ;;  %v333_v38 = vld [vmem:[%s5394_s25 + $0x8c] sm:$0x1] }
  0xc4   : > { %v622_v40 = vrot.slane %v620_v35, 4  ;;  %v631_v47 = vrot.slane %v629_v37, 5  ;;  %v635_v49 = vrot.slane %v633_v39, 4  ;;  %v639_v50 = vshll.u32 %v333_v38, 16  ;;  %v5052_v35 = vld [vmem:[#allocation2 + $0xe8] sm:$0xf0] }
  0xc5   : > { %v608_v4 = vsel %vm5537_vm4, %v603_v57, %v607_v36  ;;  %v618_v9 = vsel %vm5537_vm4, %v613_v61, %v617_v58  ;;  %v623_v36 = vshll.u32 %v331_v31, 16  ;;  %v892_v57 = vld [vmem:[%s5394_s25 + $0x84] sm:$0xe]  ;;  %v894_v58 = vld [vmem:[%s5394_s25 + $0x8c] sm:$0x1] }
  0xc6   : > { %843 = vst [vmem:[#allocation2 + $0xf4] sm:$0xf] %v608_v4  ;;  %v3984_v1 = vrot.slane %v892_v57, 9  ;;  %v1052_v3 = vrot.slane %v894_v58, 5  ;;  %v4139_v31 = vld [vmem:[#allocation2 + $0xe4] sm:$0xf0] }
  0xc7   : > { %844 = vst [vmem:[#allocation2 + $0x100] sm:$0xf] %v618_v9  ;;  %v625_v41 = vrot.slane %v623_v36, 5  ;;  %v4979_v36 = vld [vmem:[#allocation2 + $0xc8] sm:$0xf0] }
  0xc8   : > { %v5762_v11 = vpop.f32.mrf.mxu2  ;;  %v5764_v12 = vpop.f32.mrf.mxu3  ;;  %v1050_v9 = vsel %vm5551_vm5, %v3984_v1, %v1049_v2  ;;  %v335_v57 = vld [vmem:[%s5394_s25 + $0x94] sm:$0xf] }
  0xc9   : > { %v5766_v15 = vpop.f32.mrf.mxu0  ;;  %v5768_v16 = vpop.f32.mrf.mxu1  ;;  %v626_v0 = vor.u32 %v625_v41, %v622_v40  ;;  %1154 = vst [vmem:[#allocation2 + $0x110] sm:$0xf] %v1050_v9  ;;  %v653_v2 = vshll.u32 %v335_v57, 16  ;;  %v336_v9 = vld [vmem:[%s5394_s25 + $0x98] sm:$0x1] }
  0xcc   : > { %1921 = vmatmul.bf16.gmra.mxu1 %v4118_v13  ;;  %2588 = vmatmul.bf16.gmra.mxu0 %v4406_v14  ;;  %v4127_v13 = vld [vmem:[#allocation2 + $0xcc] sm:$0xf0]  ;;  %v4415_v14 = vld [vmem:[#allocation2 + $0xb4] sm:$0xf0] }
  0xcd   : > { %2010 = vmatmul.bf16.gmra.mxu2 %v4122_v17  ;;  %2499 = vmatmul.bf16.gmra.mxu3 %v4402_v18  ;;  %v5049_v17 = vld [vmem:[#allocation2 + $0xd0] sm:$0xf0]  ;;  %v4130_v25 = vor.u32 %v5047_v5, %v4127_v13  ;;  %v4418_v26 = vor.u32 %v4975_v8, %v4415_v14  ;;  %v627_v8 = vrot.slane %v626_v0, 4  ;;  %v4145_v14 = vld [vmem:[#allocation2 + $0xe0] sm:$0xf] }
  0xce   : > { %v4976_v18 = vld [vmem:[#allocation2 + $0xb0] sm:$0xf0]  ;;  %v4134_v29 = vor.u32 %v5049_v17, %v4133_v6  ;;  %v636_v6 = vor.u32 %v635_v49, %v631_v47  ;;  %v4425_v17 = vld [vmem:[#allocation2 + $0xc0] sm:$0xf]  ;;  %v4146_v48 = vor.u32 %v5052_v35, %v4145_v14 }
  0xcf   : > { %v4414_v30 = vor.u32 %v4976_v18, %v4413_v7  ;;  %v641_v7 = vrot.slane %v639_v50, 5  ;;  %v4978_v18 = vld [vmem:[#allocation2 + $0xc4] sm:$0xf]  ;;  %v4426_v49 = vor.u32 %v4979_v36, %v4425_v17  ;;  %v334_v50 = vld [vmem:[%s5394_s25 + $0x90] sm:$0xf]  ;;  %v663_v17 = vshll.u32 %v336_v9, 16 }
  0xd0   : > { %v5781_v42 = vpop.f32.mrf.mxu2  ;;  %v5783_v43 = vpop.f32.mrf.mxu3  ;;  %v637_v13 = vrot.slane %v636_v6, 4  ;;  %v644_v0 = vshrl.u32 %v334_v50, 16  ;;  %v647_v1 = vshll.u32 %v334_v50, 16  ;;  %v5148_v6 = vld [vmem:[%s6512_s1 + $0x190] sm:$0xff] }
  0xd1   : > { %v5786_v53 = vpop.f32.mrf.mxu0  ;;  %v5788_v54 = vpop.f32.mrf.mxu1  ;;  %3247 = vmatpush.bf16.msra.mxu2 %v5148_v6 }
  0xd2   : > { %v642_v32 = vsel %vm5537_vm4, %v637_v13, %v641_v7  ;;  %v5156_v7 = vld [vmem:[%s6512_s1 + $0x1d0] sm:$0xff] }
  0xd3   : > { %846 = vst [vmem:[#allocation2 + $0x118] sm:$0xf] %v642_v32  ;;  %3336 = vmatpush.bf16.msra.mxu3 %v5156_v7  ;;  %v5053_v7 = vld [vmem:[#allocation2 + $0xf4] sm:$0xf] }
  0xd8   : > { %v5804_v21 = vpop.f32.mrf.mxu2  ;;  %v5806_v22 = vpop.f32.mrf.mxu3 }
  0xd9   : > { %v5808_v27 = vpop.f32.mrf.mxu0  ;;  %v5810_v28 = vpop.f32.mrf.mxu1 }
  0xdc   : > { %1926 = vmatmul.bf16.gmra.mxu1 %v4130_v25  ;;  %2593 = vmatmul.bf16.gmra.mxu0 %v4418_v26  ;;  %v4427_v25 = vld [vmem:[#allocation2 + $0xcc] sm:$0xf0]  ;;  %v632_v26 = vsel %vm5537_vm4, %v627_v8, %v631_v47  ;;  %v649_v8 = vrot.slane %v647_v1, 5 }
  0xdd   : > { %2015 = vmatmul.bf16.gmra.mxu2 %v4134_v29  ;;  %2504 = vmatmul.bf16.gmra.mxu3 %v4414_v30  ;;  %v1053_v29 = vsel %vm5551_vm5, %v1051_v10, %v1052_v3  ;;  %v5050_v30 = vld [vmem:[#allocation2 + $0xdc] sm:$0xf]  ;;  %845 = vst [vmem:[#allocation2 + $0x10c] sm:$0xf] %v632_v26  ;;  %v4430_v40 = vor.u32 %v4978_v18, %v4427_v25  ;;  %v657_v3 = vshrl.u32 %v335_v57, 16  ;;  %v655_v10 = vrot.slane %v653_v2, 5 }
  0xde   : > { %1155 = vst [vmem:[#allocation2 + $0x11c] sm:$0xf] %v1053_v29  ;;  %v4142_v39 = vor.u32 %v5050_v30, %v4139_v31  ;;  %v895_v18 = vld [vmem:[%s5394_s25 + $0x90] sm:$0xe]  ;;  %v896_v25 = vld [vmem:[%s5394_s25 + $0x94] sm:$0xf] }
  0xdf   : > { %v659_v13 = vrot.slane %v657_v3, 4  ;;  %v897_v31 = vld [vmem:[%s5394_s25 + $0x98] sm:$0x1]  ;;  %v3985_v32 = vrot.slane %v895_v18, 9  ;;  %v1056_v35 = vrot.slane %v896_v25, 5  ;;  %v5020_v3 = vld [vmem:[%s6512_s1 + $0x90] sm:$0xff] }
  0xe0   : > { %v5818_v60 = vpop.f32.mrf.mxu2  ;;  %v5820_v61 = vpop.f32.mrf.mxu3  ;;  %2644 = vmatpush.bf16.msra.mxu1 %v5020_v3  ;;  %v5055_v18 = vld [vmem:[#allocation2 + $0x100] sm:$0xf0] }
  0xe1   : > { %v5822_v4 = vpop.f32.mrf.mxu0  ;;  %v5824_v5 = vpop.f32.mrf.mxu1  ;;  %v660_v30 = vor.u32 %v659_v13, %v655_v10  ;;  %v1058_v1 = vrot.slane %v1056_v35, 4  ;;  %v4982_v25 = vld [vmem:[#allocation2 + $0xe0] sm:$0xf0] }
  0xe3   : > { %v661_v57 = vrot.slane %v660_v30, 4 }
  0xe8   : > { %v5834_v37 = vpop.f32.mrf.mxu2  ;;  %v5836_v38 = vpop.f32.mrf.mxu3 }
  0xe9   : > { %v1892_v41 = vpop.f32.mrf.mxu1  ;;  %v2559_v47 = vpop.f32.mrf.mxu0 }
  0xea   : > { %v1893_v58 = vadd.f32 %v1892_v41, %v5694_v33  ;;  %v646_v33 = vrot.slane %v644_v0, 4  ;;  %v1057_v0 = vsel %vm5551_vm5, %v3985_v32, %v1056_v35 }
  0xeb   : > { %1156 = vst [vmem:[#allocation2 + $0x128] sm:$0xf] %v1057_v0 }
  0xec   : > { %1931 = vmatmul.bf16.gmra.mxu1 %v4142_v39  ;;  %2598 = vmatmul.bf16.gmra.mxu0 %v4430_v40  ;;  %v650_v14 = vor.u32 %v649_v8, %v646_v33  ;;  %v4437_v33 = vld [vmem:[#allocation2 + $0xd8] sm:$0xf]  ;;  %v4981_v8 = vld [vmem:[#allocation2 + $0xdc] sm:$0xf] }
  0xed   : > { %2020 = vmatmul.bf16.gmra.mxu2 %v4146_v48  ;;  %2509 = vmatmul.bf16.gmra.mxu3 %v4426_v49  ;;  %v665_v48 = vrot.slane %v663_v17, 5  ;;  %v1059_v49 = vrot.slane %v897_v31, 5  ;;  %v4439_v17 = vld [vmem:[#allocation2 + $0xe4] sm:$0xf0] }
  0xee   : > { %v651_v41 = vrot.slane %v650_v14, 4  ;;  %v4151_v14 = vld [vmem:[#allocation2 + $0xfc] sm:$0xf0]  ;;  %v4442_v31 = vor.u32 %v4981_v8, %v4439_v17 }
  0xef   : > { %v666_v9 = vsel %vm5537_vm4, %v661_v57, %v665_v48  ;;  %v1060_v13 = vsel %vm5551_vm5, %v1058_v1, %v1059_v49  ;;  %v4154_v30 = vor.u32 %v5053_v7, %v4151_v14  ;;  %v337_v48 = vld [vmem:[%s5394_s25 + $0x9c] sm:$0xf]  ;;  %v338_v49 = vld [vmem:[%s5394_s25 + $0xa0] sm:$0xf] }
  0xf0   : > { %v1981_v26 = vpop.f32.mrf.mxu2  ;;  %v2470_v29 = vpop.f32.mrf.mxu3  ;;  %v656_v6 = vsel %vm5537_vm4, %v651_v41, %v655_v10  ;;  %848 = vst [vmem:[#allocation2 + $0x130] sm:$0xf] %v666_v9  ;;  %v4438_v41 = vor.u32 %v4982_v25, %v4437_v33  ;;  %v668_v0 = vshrl.u32 %v337_v48, 16  ;;  %v671_v1 = vshll.u32 %v337_v48, 16  ;;  %v899_v33 = vld [vmem:[%s5394_s25 + $0xa0] sm:$0xf] }
  0xf1   : > { %v1982_v36 = vadd.f32 %v1981_v26, %v1893_v58  ;;  %v1894_v39 = vpop.f32.mrf.mxu1  ;;  %v2561_v40 = vpop.f32.mrf.mxu0  ;;  %v5164_v58 = vld [vmem:[%s6512_s1 + $0x210] sm:$0xff]  ;;  %847 = vst [vmem:[#allocation2 + $0x124] sm:$0xf] %v656_v6  ;;  %v681_v3 = vshrl.u32 %v338_v49, 16  ;;  %v898_v9 = vld [vmem:[%s5394_s25 + $0x9c] sm:$0xe] }
  0xf2   : > { %v1895_v50 = vadd.f32 %v1894_v39, %v5714_v62  ;;  %v4157_v62 = vld [vmem:[#allocation2 + $0xf8] sm:$0xf]  ;;  %3425 = vmatpush.bf16.msra.mxu0 %v5164_v58  ;;  %1157 = vst [vmem:[#allocation2 + $0x134] sm:$0xf] %v1060_v13  ;;  %v670_v6 = vrot.slane %v668_v0, 4  ;;  %v673_v7 = vrot.slane %v671_v1, 5 }
  0xf3   : > { %v2471_v2 = vadd.f32 %v2470_v29, %v1982_v36  ;;  %v4158_v39 = vor.u32 %v5055_v18, %v4157_v62  ;;  %v683_v8 = vrot.slane %v681_v3, 4  ;;  %v900_v13 = vld [vmem:[%s5394_s25 + $0xa4] sm:$0x1]  ;;  %v3986_v25 = vrot.slane %v898_v9, 9  ;;  %v4169_v1 = vld [vmem:[#allocation2 + $0x110] sm:$0xf] }
  0xf4   : > { %v674_v18 = vor.u32 %v673_v7, %v670_v6  ;;  %v4451_v3 = vld [vmem:[#allocation2 + $0xfc] sm:$0xf0]  ;;  %v5056_v7 = vld [vmem:[#allocation2 + $0x10c] sm:$0xf]  ;;  %v4985_v9 = vld [vmem:[#allocation2 + $0xf8] sm:$0xf0] }
  0xf5   : > { %v5866_v10 = vadd.f32 %v2559_v47, %v2471_v2  ;;  %v677_v2 = vshll.u32 %v338_v49, 16 }
  0xf7   : > { %v679_v62 = vrot.slane %v677_v2, 5  ;;  %v4449_v2 = vld [vmem:[#allocation2 + $0xf0] sm:$0xf] }
  0xf8   : > { %v1983_v26 = vpop.f32.mrf.mxu2  ;;  %v2472_v29 = vpop.f32.mrf.mxu3 }
  0xf9   : > { %v1984_v32 = vadd.f32 %v1983_v26, %v1895_v50  ;;  %v1897_v35 = vpop.f32.mrf.mxu1  ;;  %v2564_v36 = vpop.f32.mrf.mxu0  ;;  %v339_v50 = vld [vmem:[%s5394_s25 + $0xa4] sm:$0x1]  ;;  %v1063_v26 = vrot.slane %v899_v33, 5 }
  0xfa   : > { %v1898_v57 = vadd.f32 %v1897_v35, %v5736_v23  ;;  %v687_v23 = vshll.u32 %v339_v50, 16  ;;  %v684_v35 = vor.u32 %v683_v8, %v679_v62  ;;  %v4984_v50 = vld [vmem:[#allocation2 + $0xf4] sm:$0xf] }
  0xfb   : > { %v2473_v47 = vadd.f32 %v2472_v29, %v1984_v32  ;;  %v1066_v29 = vrot.slane %v900_v13, 5  ;;  %v1064_v48 = vsel %vm5551_vm5, %v3986_v25, %v1063_v26  ;;  %v1065_v49 = vrot.slane %v1063_v26, 4 }
  0xfc   : > { %1936 = vmatmul.bf16.gmra.mxu1 %v4154_v30  ;;  %2603 = vmatmul.bf16.gmra.mxu0 %v4442_v31  ;;  %v685_v0 = vrot.slane %v684_v35, 4  ;;  %1158 = vst [vmem:[#allocation2 + $0x140] sm:$0xf] %v1064_v48  ;;  %v341_v35 = vld [vmem:[%s5394_s25 + $0xac] sm:$0xf] }
  0xfd   : > { %2025 = vmatmul.bf16.gmra.mxu2 %v4158_v39  ;;  %2514 = vmatmul.bf16.gmra.mxu3 %v4438_v41  ;;  %v5872_v58 = vadd.f32 %v2561_v40, %v2473_v47  ;;  %v689_v40 = vrot.slane %v687_v23, 5  ;;  %v675_v41 = vrot.slane %v674_v18, 4  ;;  %v1067_v6 = vsel %vm5551_vm5, %v1065_v49, %v1066_v29  ;;  %v5058_v23 = vld [vmem:[#allocation2 + $0x118] sm:$0xf0] }
  0xfe   : > { %1159 = vst [vmem:[#allocation2 + $0x14c] sm:$0xf] %v1067_v6  ;;  %v4170_v29 = vor.u32 %v5058_v23, %v4169_v1  ;;  %v701_v49 = vshll.u32 %v341_v35, 16 }
  0xff   : > { %v690_v33 = vsel %vm5537_vm4, %v685_v0, %v689_v40  ;;  %v5155_v0 = vld [vmem:[%s6512_s1 + $0x1c8] sm:$0xff] }
 0x100   : > { %v1986_v14 = vpop.f32.mrf.mxu2  ;;  %v2475_v17 = vpop.f32.mrf.mxu3  ;;  %850 = vst [vmem:[#allocation2 + $0x148] sm:$0xf] %v690_v33  ;;  %3337 = vmatpush.bf16.msra.mxu3 %v5155_v0  ;;  %v902_v33 = vld [vmem:[%s5394_s25 + $0xac] sm:$0xf]  ;;  %v5059_v0 = vld [vmem:[#allocation2 + $0x124] sm:$0xf] }
 0x101   : > { %v1987_v30 = vadd.f32 %v1986_v14, %v1898_v57  ;;  %v1899_v31 = vpop.f32.mrf.mxu1  ;;  %v2566_v32 = vpop.f32.mrf.mxu0  ;;  %v680_v57 = vsel %vm5537_vm4, %v675_v41, %v679_v62 }
 0x102   : > { %v1900_v39 = vadd.f32 %v1899_v31, %v5750_v51  ;;  %v4163_v51 = vld [vmem:[#allocation2 + $0x114] sm:$0xf0]  ;;  %849 = vst [vmem:[#allocation2 + $0x13c] sm:$0xf] %v680_v57  ;;  %v340_v31 = vld [vmem:[%s5394_s25 + $0xa8] sm:$0xf] }
 0x103   : > { %v2476_v47 = vadd.f32 %v2475_v17, %v1987_v30  ;;  %v4166_v62 = vor.u32 %v5056_v7, %v4163_v51  ;;  %v4454_v17 = vor.u32 %v4984_v50, %v4451_v3  ;;  %v4450_v30 = vor.u32 %v4985_v9, %v4449_v2  ;;  %v342_v50 = vld [vmem:[%s5394_s25 + $0xb0] sm:$0x1]  ;;  %v901_v51 = vld [vmem:[%s5394_s25 + $0xa8] sm:$0xe] }
 0x104   : > { %v692_v41 = vshrl.u32 %v340_v31, 16  ;;  %v695_v48 = vshll.u32 %v340_v31, 16  ;;  %v703_v3 = vrot.slane %v701_v49, 5  ;;  %v711_v7 = vshll.u32 %v342_v50, 16 }
 0x105   : > { %v5886_v8 = vadd.f32 %v2564_v36, %v2476_v47  ;;  %v705_v47 = vshrl.u32 %v341_v35, 16 }
 0x106   : > { %v697_v1 = vrot.slane %v695_v48, 5 }
 0x107   : > { %v707_v57 = vrot.slane %v705_v47, 4  ;;  %v5019_v47 = vld [vmem:[%s6512_s1 + $0x88] sm:$0xff] }
 0x108   : > { %v1988_v13 = vpop.f32.mrf.mxu2  ;;  %v2477_v14 = vpop.f32.mrf.mxu3  ;;  %2645 = vmatpush.bf16.msra.mxu1 %v5019_v47 }
 0x109   : > { %v1989_v18 = vadd.f32 %v1988_v13, %v1900_v39  ;;  %v1902_v25 = vpop.f32.mrf.mxu1  ;;  %v2569_v26 = vpop.f32.mrf.mxu0  ;;  %v5147_v39 = vld [vmem:[%s6512_s1 + $0x188] sm:$0xff]  ;;  %v708_v13 = vor.u32 %v707_v57, %v703_v3 }
 0x10a   : > { %v1903_v40 = vadd.f32 %v1902_v25, %v5766_v15  ;;  %v694_v15 = vrot.slane %v692_v41, 4  ;;  %3248 = vmatpush.bf16.msra.mxu2 %v5147_v39 }
 0x10b   : > { %v2478_v36 = vadd.f32 %v2477_v14, %v1989_v18  ;;  %v903_v14 = vld [vmem:[%s5394_s25 + $0xb0] sm:$0x1] }
 0x10c   : > { %1941 = vmatmul.bf16.gmra.mxu1 %v4166_v62  ;;  %2608 = vmatmul.bf16.gmra.mxu0 %v4454_v17  ;;  %v698_v6 = vor.u32 %v697_v1, %v694_v15  ;;  %v3987_v62 = vrot.slane %v901_v51, 9  ;;  %v1070_v17 = vrot.slane %v902_v33, 5  ;;  %v1073_v31 = vrot.slane %v903_v14, 5  ;;  %v4461_v15 = vld [vmem:[#allocation2 + $0x108] sm:$0xf] }
 0x10d   : > { %2030 = vmatmul.bf16.gmra.mxu2 %v4170_v29  ;;  %2519 = vmatmul.bf16.gmra.mxu3 %v4450_v30  ;;  %v5897_v2 = vadd.f32 %v2566_v32, %v2478_v36  ;;  %v713_v30 = vrot.slane %v711_v7, 5  ;;  %v709_v36 = vrot.slane %v708_v13, 4  ;;  %v4987_v1 = vld [vmem:[#allocation2 + $0x10c] sm:$0xf]  ;;  %v4463_v7 = vld [vmem:[#allocation2 + $0x114] sm:$0xf0] }
 0x10e   : > { %v699_v32 = vrot.slane %v698_v6, 4  ;;  %v1071_v41 = vsel %vm5551_vm5, %v3987_v62, %v1070_v17  ;;  %v1072_v48 = vrot.slane %v1070_v17, 4  ;;  %v4175_v6 = vld [vmem:[#allocation2 + $0x12c] sm:$0xf0]  ;;  %v5061_v51 = vld [vmem:[#allocation2 + $0x130] sm:$0xf0]  ;;  %v4466_v14 = vor.u32 %v4987_v1, %v4463_v7 }
 0x10f   : > { %1160 = vst [vmem:[#allocation2 + $0x158] sm:$0xf] %v1071_v41  ;;  %v714_v50 = vsel %vm5537_vm4, %v709_v36, %v713_v30  ;;  %v4988_v33 = vld [vmem:[#allocation2 + $0x110] sm:$0xf0]  ;;  %v4178_v13 = vor.u32 %v5059_v0, %v4175_v6 }
 0x110   : > { %v1991_v23 = vpop.f32.mrf.mxu2  ;;  %v2480_v9 = vpop.f32.mrf.mxu3  ;;  %v704_v39 = vsel %vm5537_vm4, %v699_v32, %v703_v3  ;;  %v1074_v57 = vsel %vm5551_vm5, %v1072_v48, %v1073_v31  ;;  %852 = vst [vmem:[#allocation2 + $0x160] sm:$0xf] %v714_v50  ;;  %v4462_v32 = vor.u32 %v4988_v33, %v4461_v15  ;;  %v343_v30 = vld [vmem:[%s5394_s25 + $0xb4] sm:$0xf]  ;;  %v344_v31 = vld [vmem:[%s5394_s25 + $0xb8] sm:$0xf] }
 0x111   : > { %v1992_v18 = vadd.f32 %v1991_v23, %v1903_v40  ;;  %v1904_v25 = vpop.f32.mrf.mxu1  ;;  %v2571_v29 = vpop.f32.mrf.mxu0  ;;  %v5163_v40 = vld [vmem:[%s6512_s1 + $0x208] sm:$0xff]  ;;  %851 = vst [vmem:[#allocation2 + $0x154] sm:$0xf] %v704_v39  ;;  %v716_v41 = vshrl.u32 %v343_v30, 16  ;;  %v719_v48 = vshll.u32 %v343_v30, 16  ;;  %v729_v47 = vshrl.u32 %v344_v31, 16 }
 0x112   : > { %v1905_v35 = vadd.f32 %v1904_v25, %v5786_v53  ;;  %v4181_v53 = vld [vmem:[#allocation2 + $0x128] sm:$0xf]  ;;  %3426 = vmatpush.bf16.msra.mxu0 %v5163_v40  ;;  %1161 = vst [vmem:[#allocation2 + $0x164] sm:$0xf] %v1074_v57  ;;  %v905_v15 = vld [vmem:[%s5394_s25 + $0xb8] sm:$0xf] }
 0x113   : > { %v2481_v49 = vadd.f32 %v2480_v9, %v1992_v18  ;;  %v4182_v25 = vor.u32 %v5061_v51, %v4181_v53  ;;  %v718_v39 = vrot.slane %v716_v41, 4  ;;  %v721_v0 = vrot.slane %v719_v48, 5  ;;  %v904_v50 = vld [vmem:[%s5394_s25 + $0xb4] sm:$0xe]  ;;  %v906_v57 = vld [vmem:[%s5394_s25 + $0xbc] sm:$0x1] }
 0x114   : > { %v731_v1 = vrot.slane %v729_v47, 4  ;;  %v3988_v33 = vrot.slane %v904_v50, 9  ;;  %v4193_v48 = vld [vmem:[#allocation2 + $0x140] sm:$0xf]  ;;  %v4475_v47 = vld [vmem:[#allocation2 + $0x12c] sm:$0xf0] }
 0x115   : > { %v5918_v3 = vadd.f32 %v2569_v26, %v2481_v49  ;;  %v725_v49 = vshll.u32 %v344_v31, 16  ;;  %v722_v51 = vor.u32 %v721_v0, %v718_v39  ;;  %v5062_v0 = vld [vmem:[#allocation2 + $0x13c] sm:$0xf]  ;;  %v4991_v50 = vld [vmem:[#allocation2 + $0x128] sm:$0xf0] }
 0x117   : > { %v727_v53 = vrot.slane %v725_v49, 5  ;;  %v4473_v49 = vld [vmem:[#allocation2 + $0x120] sm:$0xf] }
 0x118   : > { %v1993_v23 = vpop.f32.mrf.mxu2  ;;  %v2482_v9 = vpop.f32.mrf.mxu3 }
 0x119   : > { %v1994_v62 = vadd.f32 %v1993_v23, %v1905_v35  ;;  %v1907_v17 = vpop.f32.mrf.mxu1  ;;  %v2574_v18 = vpop.f32.mrf.mxu0  ;;  %v345_v35 = vld [vmem:[%s5394_s25 + $0xbc] sm:$0x1]  ;;  %v1077_v23 = vrot.slane %v905_v15, 5 }
 0x11a   : > { %v1908_v36 = vadd.f32 %v1907_v17, %v5808_v27  ;;  %v735_v27 = vshll.u32 %v345_v35, 16  ;;  %v732_v17 = vor.u32 %v731_v1, %v727_v53  ;;  %v4990_v35 = vld [vmem:[#allocation2 + $0x124] sm:$0xf] }
 0x11b   : > { %v2483_v26 = vadd.f32 %v2482_v9, %v1994_v62  ;;  %v1080_v9 = vrot.slane %v906_v57, 5  ;;  %v1078_v30 = vsel %vm5551_vm5, %v3988_v33, %v1077_v23  ;;  %v1079_v31 = vrot.slane %v1077_v23, 4 }
 0x11c   : > { %1946 = vmatmul.bf16.gmra.mxu1 %v4178_v13  ;;  %2613 = vmatmul.bf16.gmra.mxu0 %v4466_v14  ;;  %v733_v41 = vrot.slane %v732_v17, 4  ;;  %1162 = vst [vmem:[#allocation2 + $0x170] sm:$0xf] %v1078_v30  ;;  %v347_v17 = vld [vmem:[%s5394_s25 + $0xc4] sm:$0xf] }
 0x11d   : > { %2035 = vmatmul.bf16.gmra.mxu2 %v4182_v25  ;;  %2524 = vmatmul.bf16.gmra.mxu3 %v4462_v32  ;;  %v5924_v40 = vadd.f32 %v2571_v29, %v2483_v26  ;;  %v737_v29 = vrot.slane %v735_v27, 5  ;;  %v723_v32 = vrot.slane %v722_v51, 4  ;;  %v1081_v39 = vsel %vm5551_vm5, %v1079_v31, %v1080_v9  ;;  %v5064_v27 = vld [vmem:[#allocation2 + $0x148] sm:$0xf0] }
 0x11e   : > { %1163 = vst [vmem:[#allocation2 + $0x17c] sm:$0xf] %v1081_v39  ;;  %v4194_v9 = vor.u32 %v5064_v27, %v4193_v48  ;;  %v749_v30 = vshll.u32 %v347_v17, 16  ;;  %v753_v31 = vshrl.u32 %v347_v17, 16  ;;  %v908_v27 = vld [vmem:[%s5394_s25 + $0xc4] sm:$0xf] }
 0x11f   : > { %v738_v15 = vsel %vm5537_vm4, %v733_v41, %v737_v29 }
 0x120   : > { %v1996_v6 = vpop.f32.mrf.mxu2  ;;  %v2485_v7 = vpop.f32.mrf.mxu3  ;;  %854 = vst [vmem:[#allocation2 + $0x178] sm:$0xf] %v738_v15  ;;  %v907_v15 = vld [vmem:[%s5394_s25 + $0xc0] sm:$0xe] }
 0x121   : > { %v1997_v13 = vadd.f32 %v1996_v6, %v1908_v36  ;;  %v1909_v14 = vpop.f32.mrf.mxu1  ;;  %v2576_v62 = vpop.f32.mrf.mxu0  ;;  %v728_v36 = vsel %vm5537_vm4, %v723_v32, %v727_v53 }
 0x122   : > { %v1910_v25 = vadd.f32 %v1909_v14, %v5822_v4  ;;  %v4187_v4 = vld [vmem:[#allocation2 + $0x144] sm:$0xf0]  ;;  %853 = vst [vmem:[#allocation2 + $0x16c] sm:$0xf] %v728_v36  ;;  %v346_v14 = vld [vmem:[%s5394_s25 + $0xc0] sm:$0xf] }
 0x123   : > { %v2486_v26 = vadd.f32 %v2485_v7, %v1997_v13  ;;  %v4190_v53 = vor.u32 %v5062_v0, %v4187_v4  ;;  %v4478_v7 = vor.u32 %v4990_v35, %v4475_v47  ;;  %v4474_v13 = vor.u32 %v4991_v50, %v4473_v49  ;;  %v348_v35 = vld [vmem:[%s5394_s25 + $0xc8] sm:$0x1] }
 0x124   : > { %v740_v32 = vshrl.u32 %v346_v14, 16  ;;  %v751_v47 = vrot.slane %v749_v30, 5  ;;  %v755_v36 = vrot.slane %v753_v31, 4  ;;  %v759_v4 = vshll.u32 %v348_v35, 16  ;;  %v5018_v30 = vld [vmem:[%s6512_s1 + $0x80] sm:$0xff] }
 0x125   : > { %v5938_v1 = vadd.f32 %v2574_v18, %v2486_v26  ;;  %v743_v18 = vshll.u32 %v346_v14, 16  ;;  %v5154_v26 = vld [vmem:[%s6512_s1 + $0x1c0] sm:$0xff]  ;;  %v4993_v35 = vld [vmem:[#allocation2 + $0x13c] sm:$0xf]  ;;  %2646 = vmatpush.bf16.msra.mxu1 %v5018_v30 }
 0x126   : > { %v742_v41 = vrot.slane %v740_v32, 4  ;;  %3338 = vmatpush.bf16.msra.mxu3 %v5154_v26  ;;  %v761_v17 = vrot.slane %v759_v4, 5  ;;  %v5162_v31 = vld [vmem:[%s6512_s1 + $0x200] sm:$0xff]  ;;  %v5065_v26 = vld [vmem:[#allocation2 + $0x154] sm:$0xf] }
 0x127   : > { %v745_v48 = vrot.slane %v743_v18, 5  ;;  %v4487_v4 = vld [vmem:[#allocation2 + $0x144] sm:$0xf0]  ;;  %3427 = vmatpush.bf16.msra.mxu0 %v5162_v31 }
 0x128   : > { %v1998_v57 = vpop.f32.mrf.mxu2  ;;  %v2487_v6 = vpop.f32.mrf.mxu3 }
 0x129   : > { %v1999_v51 = vadd.f32 %v1998_v57, %v1910_v25  ;;  %v1912_v33 = vpop.f32.mrf.mxu1  ;;  %v2579_v23 = vpop.f32.mrf.mxu0  ;;  %v5146_v25 = vld [vmem:[%s6512_s1 + $0x180] sm:$0xff]  ;;  %v746_v0 = vor.u32 %v745_v48, %v742_v41  ;;  %v4205_v41 = vld [vmem:[#allocation2 + $0x158] sm:$0xf] }
 0x12a   : > { %v1913_v39 = vadd.f32 %v1912_v33, %v5696_v34  ;;  %3249 = vmatpush.bf16.msra.mxu2 %v5146_v25  ;;  %v4485_v48 = vld [vmem:[#allocation2 + $0x138] sm:$0xf] }
 0x12b   : > { %v2488_v29 = vadd.f32 %v2487_v6, %v1999_v51  ;;  %v756_v6 = vor.u32 %v755_v36, %v751_v47  ;;  %v1084_v51 = vrot.slane %v908_v27, 5  ;;  %v747_v14 = vrot.slane %v746_v0, 4  ;;  %v4199_v0 = vld [vmem:[#allocation2 + $0x15c] sm:$0xf0]  ;;  %v4994_v27 = vld [vmem:[#allocation2 + $0x140] sm:$0xf0] }
 0x12c   : > { %1951 = vmatmul.bf16.gmra.mxu1 %v4190_v53  ;;  %2618 = vmatmul.bf16.gmra.mxu0 %v4478_v7  ;;  %v909_v53 = vld [vmem:[%s5394_s25 + $0xc8] sm:$0x1]  ;;  %v3989_v7 = vrot.slane %v907_v15, 9 }
 0x12d   : > { %2040 = vmatmul.bf16.gmra.mxu2 %v4194_v9  ;;  %2529 = vmatmul.bf16.gmra.mxu3 %v4474_v13  ;;  %v5948_v49 = vadd.f32 %v2576_v62, %v2488_v29  ;;  %v1087_v29 = vrot.slane %v909_v53, 5  ;;  %v757_v32 = vrot.slane %v756_v6, 4  ;;  %v1086_v33 = vrot.slane %v1084_v51, 4 }
 0x12e   : > { %v1085_v34 = vsel %vm5551_vm5, %v3989_v7, %v1084_v51  ;;  %v752_v25 = vsel %vm5537_vm4, %v747_v14, %v751_v47  ;;  %v5067_v47 = vld [vmem:[#allocation2 + $0x160] sm:$0xf0]  ;;  %v4202_v53 = vor.u32 %v5065_v26, %v4199_v0  ;;  %v4490_v7 = vor.u32 %v4993_v35, %v4487_v4  ;;  %v4217_v4 = vld [vmem:[#allocation2 + $0x170] sm:$0xf] }
 0x12f   : > { %1164 = vst [vmem:[#allocation2 + $0x188] sm:$0xf] %v1085_v34  ;;  %v762_v36 = vsel %vm5537_vm4, %v757_v32, %v761_v17  ;;  %v4206_v17 = vor.u32 %v5067_v47, %v4205_v41  ;;  %v5068_v47 = vld [vmem:[#allocation2 + $0x16c] sm:$0xf] }
 0x130   : > { %v2001_v50 = vpop.f32.mrf.mxu2  ;;  %v2490_v57 = vpop.f32.mrf.mxu3  ;;  %855 = vst [vmem:[#allocation2 + $0x184] sm:$0xf] %v752_v25 }
 0x131   : > { %v2002_v9 = vadd.f32 %v2001_v50, %v1913_v39  ;;  %v1914_v62 = vpop.f32.mrf.mxu1  ;;  %v2581_v13 = vpop.f32.mrf.mxu0  ;;  %v1088_v39 = vsel %vm5551_vm5, %v1086_v33, %v1087_v29  ;;  %856 = vst [vmem:[#allocation2 + $0x190] sm:$0xf] %v762_v36  ;;  %v4486_v29 = vor.u32 %v4994_v27, %v4485_v48  ;;  %v859_v33 = vld [vmem:[%s5394_s25] sm:$0xe]  ;;  %v4211_v27 = vld [vmem:[#allocation2 + $0x174] sm:$0xf0] }
 0x132   : > { %1165 = vst [vmem:[#allocation2 + $0x194] sm:$0xf] %v1088_v39  ;;  %v1915_v50 = vadd.f32 %v1914_v62, %v5716_v63  ;;  %v3973_v25 = vrot.slane %v859_v33, 9 }
 0x133   : > { %v2491_v18 = vadd.f32 %v2490_v57, %v2002_v9 }
 0x135   : > { %v5969_v15 = vadd.f32 %v2579_v23, %v2491_v18  ;;  %v860_v23 = vld [vmem:[%s5394_s25 + $0x4] sm:$0xf]  ;;  %v861_v18 = vld [vmem:[%s5394_s25 + $0x8] sm:$0x1] }
 0x136   : > { %v972_v63 = vrot.slane %v860_v23, 5  ;;  %v975_v35 = vrot.slane %v861_v18, 5 }
 0x138   : > { %v2003_v57 = vpop.f32.mrf.mxu2  ;;  %v2492_v6 = vpop.f32.mrf.mxu3  ;;  %v974_v26 = vrot.slane %v972_v63, 4  ;;  %v973_v39 = vsel %vm5551_vm5, %v3973_v25, %v972_v63 }
 0x139   : > { %v2004_v51 = vadd.f32 %v2003_v57, %v1915_v50  ;;  %v1917_v9 = vpop.f32.mrf.mxu1  ;;  %v2584_v14 = vpop.f32.mrf.mxu0  ;;  %1132 = vst [vmem:[#allocation2 + $0x8] sm:$0xf] %v973_v39  ;;  %v4499_v50 = vld [vmem:[#allocation2 + $0x15c] sm:$0xf0]  ;;  %v5071_v39 = vld [vmem:[#allocation2 + $0x184] sm:$0xf] }
 0x13a   : > { %v1918_v62 = vadd.f32 %v1917_v9, %v5738_v24  ;;  %v4996_v24 = vld [vmem:[#allocation2 + $0x154] sm:$0xf] }
 0x13b   : > { %v2493_v32 = vadd.f32 %v2492_v6, %v2004_v51  ;;  %v5070_v6 = vld [vmem:[#allocation2 + $0x178] sm:$0xf0] }
 0x13c   : > { %1956 = vmatmul.bf16.gmra.mxu1 %v4202_v53  ;;  %2623 = vmatmul.bf16.gmra.mxu0 %v4490_v7  ;;  %v4497_v53 = vld [vmem:[#allocation2 + $0x150] sm:$0xf]  ;;  %v4997_v7 = vld [vmem:[#allocation2 + $0x158] sm:$0xf0]  ;;  %v4218_v33 = vor.u32 %v5070_v6, %v4217_v4  ;;  %v4999_v4 = vld [vmem:[#allocation2 + $0x16c] sm:$0xf] }
 0x13d   : > { %2045 = vmatmul.bf16.gmra.mxu2 %v4206_v17  ;;  %2534 = vmatmul.bf16.gmra.mxu3 %v4486_v29  ;;  %v5973_v34 = vadd.f32 %v2581_v13, %v2493_v32  ;;  %v976_v13 = vsel %vm5551_vm5, %v974_v26, %v975_v35  ;;  %v4214_v29 = vor.u32 %v5068_v47, %v4211_v27  ;;  %v5073_v27 = vld [vmem:[#allocation2 + $0x190] sm:$0xf0] }
 0x13e   : > { %1133 = vst [vmem:[#allocation2 + $0x14] sm:$0xf] %v976_v13  ;;  %v4502_v32 = vor.u32 %v4996_v24, %v4499_v50  ;;  %v4498_v18 = vor.u32 %v4997_v7, %v4497_v53  ;;  %v4229_v13 = vld [vmem:[#allocation2 + $0x188] sm:$0xf]  ;;  %v4511_v24 = vld [vmem:[#allocation2 + $0x174] sm:$0xf0] }
 0x13f   : > { %v4509_v50 = vld [vmem:[#allocation2 + $0x168] sm:$0xf]  ;;  %v5000_v6 = vld [vmem:[#allocation2 + $0x170] sm:$0xf0] }
 0x140   : > { %v2006_v30 = vpop.f32.mrf.mxu2  ;;  %v2495_v31 = vpop.f32.mrf.mxu3 }
 0x141   : > { %v2007_v41 = vadd.f32 %v2006_v30, %v1918_v62  ;;  %v1919_v48 = vpop.f32.mrf.mxu1  ;;  %v2586_v36 = vpop.f32.mrf.mxu0 }
 0x142   : > { %v1920_v51 = vadd.f32 %v1919_v48, %v5752_v52 }
 0x143   : > { %v2496_v0 = vadd.f32 %v2495_v31, %v2007_v41 }
 0x145   : > { %v5982_v57 = vadd.f32 %v2584_v14, %v2496_v0  ;;  %v4223_v0 = vld [vmem:[#allocation2 + $0x18c] sm:$0xf0] }
 0x146   : > { %v4226_v7 = vor.u32 %v5071_v39, %v4223_v0  ;;  %v4673_v39 = vld [vmem:[#allocation2 + $0x38] sm:$0xf] }
 0x148   : > { %v2008_v9 = vpop.f32.mrf.mxu2  ;;  %v2497_v17 = vpop.f32.mrf.mxu3 }
 0x149   : > { %v2009_v23 = vadd.f32 %v2008_v9, %v1920_v51  ;;  %v1922_v63 = vpop.f32.mrf.mxu1  ;;  %v2589_v62 = vpop.f32.mrf.mxu0  ;;  %v4514_v51 = vor.u32 %v4999_v4, %v4511_v24  ;;  %v5099_v4 = vld [vmem:[#allocation2 + $0x38] sm:$0xf0]  ;;  %v5098_v24 = vld [vmem:[#allocation2 + $0x34] sm:$0xf] }
 0x14a   : > { %v1923_v31 = vadd.f32 %v1922_v63, %v5768_v16 }
 0x14b   : > { %v2498_v30 = vadd.f32 %v2497_v17, %v2009_v23  ;;  %v4510_v23 = vor.u32 %v5000_v6, %v4509_v50 }
 0x14c   : > { %1961 = vmatmul.bf16.gmra.mxu1 %v4214_v29  ;;  %2628 = vmatmul.bf16.gmra.mxu0 %v4502_v32  ;;  %v4230_v32 = vor.u32 %v5073_v27, %v4229_v13  ;;  %v5100_v13 = vld [vmem:[#allocation2 + $0x40] sm:$0xf0]  ;;  %v4667_v27 = vld [vmem:[#allocation2 + $0x3c] sm:$0xf0] }
 0x14d   : > { %2050 = vmatmul.bf16.gmra.mxu2 %v4218_v33  ;;  %2539 = vmatmul.bf16.gmra.mxu3 %v4498_v18  ;;  %v5985_v14 = vadd.f32 %v2586_v36, %v2498_v30 }
 0x150   : > { %v2011_v25 = vpop.f32.mrf.mxu2  ;;  %v2500_v52 = vpop.f32.mrf.mxu3 }
 0x151   : > { %v2012_v26 = vadd.f32 %v2011_v25, %v1923_v31  ;;  %v1924_v35 = vpop.f32.mrf.mxu1  ;;  %v2591_v41 = vpop.f32.mrf.mxu0 }
 0x152   : > { %v1925_v36 = vadd.f32 %v1924_v35, %v5788_v54  ;;  %v4665_v35 = vld [vmem:[#allocation2 + $0x30] sm:$0xf] }
 0x153   : > { %v2501_v48 = vadd.f32 %v2500_v52, %v2012_v26  ;;  %v4337_v26 = vld [vmem:[#allocation2 + $0x8] sm:$0xf] }
 0x155   : > { %v5988_v47 = vadd.f32 %v2589_v62, %v2501_v48  ;;  %v4956_v48 = vld [vmem:[#allocation2 + $0x10] sm:$0xf0] }
 0x156   : > { %v4338_v6 = vor.u32 %v4956_v48, %v4337_v26  ;;  %v4685_v26 = vld [vmem:[#allocation2 + $0x50] sm:$0xf] }
 0x158   : > { %v2013_v53 = vpop.f32.mrf.mxu2  ;;  %v2502_v16 = vpop.f32.mrf.mxu3 }
 0x159   : > { %v2014_v9 = vadd.f32 %v2013_v53, %v1925_v36  ;;  %v1927_v17 = vpop.f32.mrf.mxu1  ;;  %v2594_v29 = vpop.f32.mrf.mxu0  ;;  %v4674_v36 = vor.u32 %v5100_v13, %v4673_v39  ;;  %v5102_v39 = vld [vmem:[#allocation2 + $0x50] sm:$0xf0]  ;;  %v5101_v13 = vld [vmem:[#allocation2 + $0x4c] sm:$0xf] }
 0x15a   : > { %v1928_v33 = vadd.f32 %v1927_v17, %v5810_v28 }
 0x15b   : > { %v2503_v63 = vadd.f32 %v2502_v16, %v2014_v9  ;;  %v4670_v9 = vor.u32 %v5098_v24, %v4667_v27 }
 0x15c   : > { %1966 = vmatmul.bf16.gmra.mxu1 %v4226_v7  ;;  %2633 = vmatmul.bf16.gmra.mxu0 %v4514_v51  ;;  %v4666_v51 = vor.u32 %v5099_v4, %v4665_v35  ;;  %v5103_v35 = vld [vmem:[#allocation2 + $0x58] sm:$0xf0]  ;;  %v4679_v4 = vld [vmem:[#allocation2 + $0x54] sm:$0xf0] }
 0x15d   : > { %2055 = vmatmul.bf16.gmra.mxu2 %v4230_v32  ;;  %2544 = vmatmul.bf16.gmra.mxu3 %v4510_v23  ;;  %v5991_v62 = vadd.f32 %v2591_v41, %v2503_v63 }
 0x160   : > { %v2016_v18 = vpop.f32.mrf.mxu2  ;;  %v2505_v54 = vpop.f32.mrf.mxu3 }
 0x161   : > { %v2017_v30 = vadd.f32 %v2016_v18, %v1928_v33  ;;  %v1929_v31 = vpop.f32.mrf.mxu1  ;;  %v2596_v25 = vpop.f32.mrf.mxu0 }
 0x162   : > { %v1930_v41 = vadd.f32 %v1929_v31, %v5824_v5  ;;  %v4959_v31 = vld [vmem:[#allocation2 + $0x28] sm:$0xf0] }
 0x163   : > { %v2506_v52 = vadd.f32 %v2505_v54, %v2017_v30  ;;  %v4349_v30 = vld [vmem:[#allocation2 + $0x20] sm:$0xf] }
 0x164   : > { %v4350_v27 = vor.u32 %v4959_v31, %v4349_v30  ;;  %v4697_v30 = vld [vmem:[#allocation2 + $0x68] sm:$0xf]  ;;  %v5106_v31 = vld [vmem:[#allocation2 + $0x70] sm:$0xf0] }
 0x165   : > { %v5994_v0 = vadd.f32 %v2594_v29, %v2506_v52  ;;  %v4677_v52 = vld [vmem:[#allocation2 + $0x48] sm:$0xf] }
 0x168   : > { %v2018_v50 = vpop.f32.mrf.mxu2  ;;  %v2507_v28 = vpop.f32.mrf.mxu3 }
 0x169   : > { %v2019_v53 = vadd.f32 %v2018_v50, %v1930_v41  ;;  %v1932_v16 = vpop.f32.mrf.mxu1  ;;  %v2599_v7 = vpop.f32.mrf.mxu0  ;;  %v4686_v41 = vor.u32 %v5103_v35, %v4685_v26  ;;  %v5105_v26 = vld [vmem:[#allocation2 + $0x68] sm:$0xf0]  ;;  %v5104_v35 = vld [vmem:[#allocation2 + $0x64] sm:$0xf] }
 0x16a   : > { %v1933_v32 = vadd.f32 %v1932_v16, %v5709_v55 }
 0x16b   : > { %v2508_v17 = vadd.f32 %v2507_v28, %v2019_v53  ;;  %v4682_v53 = vor.u32 %v5101_v13, %v4679_v4 }
 0x16c   : > { %2647 = vmatmul.bf16.vlgmr.msra.gmra.mxu1 %v4338_v6  ;;  %3428 = vmatmul.bf16.vlgmr.msra.gmra.mxu0 %v4674_v36  ;;  %v4678_v36 = vor.u32 %v5102_v39, %v4677_v52  ;;  %v4691_v39 = vld [vmem:[#allocation2 + $0x6c] sm:$0xf0] }
 0x16d   : > { %3250 = vmatmul.bf16.vlgmr.msra.gmra.mxu2 %v4666_v51  ;;  %3339 = vmatmul.bf16.vlgmr.msra.gmra.mxu3 %v4670_v9  ;;  %v5997_v29 = vadd.f32 %v2596_v25, %v2508_v17 }
 0x170   : > { %v2021_v23 = vpop.f32.mrf.mxu2  ;;  %v2510_v5 = vpop.f32.mrf.mxu3 }
 0x171   : > { %v2022_v63 = vadd.f32 %v2021_v23, %v1933_v32  ;;  %v1934_v33 = vpop.f32.mrf.mxu1  ;;  %v2601_v18 = vpop.f32.mrf.mxu0 }
 0x172   : > { %v1935_v25 = vadd.f32 %v1934_v33, %v5732_v19  ;;  %v4962_v33 = vld [vmem:[#allocation2 + $0x40] sm:$0xf0] }
 0x173   : > { %v2511_v54 = vadd.f32 %v2510_v5, %v2022_v63  ;;  %v4361_v63 = vld [vmem:[#allocation2 + $0x38] sm:$0xf] }
 0x174   : > { %v4362_v4 = vor.u32 %v4962_v33, %v4361_v63  ;;  %v4709_v63 = vld [vmem:[#allocation2 + $0x80] sm:$0xf]  ;;  %v5109_v33 = vld [vmem:[#allocation2 + $0x88] sm:$0xf0] }
 0x175   : > { %v6000_v48 = vadd.f32 %v2599_v7, %v2511_v54  ;;  %v4689_v54 = vld [vmem:[#allocation2 + $0x60] sm:$0xf] }
 0x178   : > { %v2023_v24 = vpop.f32.mrf.mxu2  ;;  %v2512_v55 = vpop.f32.mrf.mxu3 }
 0x179   : > { %v2024_v50 = vadd.f32 %v2023_v24, %v1935_v25  ;;  %v1937_v28 = vpop.f32.mrf.mxu1  ;;  %v2604_v6 = vpop.f32.mrf.mxu0  ;;  %v4698_v25 = vor.u32 %v5106_v31, %v4697_v30  ;;  %v5108_v30 = vld [vmem:[#allocation2 + $0x80] sm:$0xf0]  ;;  %v5107_v31 = vld [vmem:[#allocation2 + $0x7c] sm:$0xf] }
 0x17a   : > { %v1938_v51 = vadd.f32 %v1937_v28, %v5746_v44 }
 0x17b   : > { %v2513_v16 = vadd.f32 %v2512_v55, %v2024_v50  ;;  %v4694_v50 = vor.u32 %v5104_v35, %v4691_v39 }
 0x17c   : > { %2652 = vmatmul.bf16.gmra.mxu1 %v4350_v27  ;;  %3433 = vmatmul.bf16.gmra.mxu0 %v4686_v41  ;;  %v4690_v41 = vor.u32 %v5105_v26, %v4689_v54  ;;  %v4703_v26 = vld [vmem:[#allocation2 + $0x84] sm:$0xf0] }
 0x17d   : > { %3255 = vmatmul.bf16.gmra.mxu2 %v4678_v36  ;;  %3344 = vmatmul.bf16.gmra.mxu3 %v4682_v53  ;;  %v6003_v7 = vadd.f32 %v2601_v18, %v2513_v16 }
 0x180   : > { %v2026_v9 = vpop.f32.mrf.mxu2  ;;  %v2515_v19 = vpop.f32.mrf.mxu3 }
 0x181   : > { %v2027_v17 = vadd.f32 %v2026_v9, %v1938_v51  ;;  %v1939_v32 = vpop.f32.mrf.mxu1  ;;  %v2606_v23 = vpop.f32.mrf.mxu0 }
 0x182   : > { %v1940_v18 = vadd.f32 %v1939_v32, %v5762_v11  ;;  %v4965_v32 = vld [vmem:[#allocation2 + $0x58] sm:$0xf0] }
 0x183   : > { %v2516_v5 = vadd.f32 %v2515_v19, %v2027_v17  ;;  %v4373_v17 = vld [vmem:[#allocation2 + $0x50] sm:$0xf] }
 0x184   : > { %v4374_v39 = vor.u32 %v4965_v32, %v4373_v17  ;;  %v4721_v17 = vld [vmem:[#allocation2 + $0x98] sm:$0xf]  ;;  %v5112_v32 = vld [vmem:[#allocation2 + $0xa0] sm:$0xf0] }
 0x185   : > { %v6006_v52 = vadd.f32 %v2604_v6, %v2516_v5  ;;  %v4701_v5 = vld [vmem:[#allocation2 + $0x78] sm:$0xf] }
 0x188   : > { %v2028_v13 = vpop.f32.mrf.mxu2  ;;  %v2517_v44 = vpop.f32.mrf.mxu3 }
 0x189   : > { %v2029_v24 = vadd.f32 %v2028_v13, %v1940_v18  ;;  %v1942_v55 = vpop.f32.mrf.mxu1  ;;  %v2609_v27 = vpop.f32.mrf.mxu0  ;;  %v4710_v18 = vor.u32 %v5109_v33, %v4709_v63  ;;  %v5111_v63 = vld [vmem:[#allocation2 + $0x98] sm:$0xf0]  ;;  %v5110_v33 = vld [vmem:[#allocation2 + $0x94] sm:$0xf] }
 0x18a   : > { %v1943_v36 = vadd.f32 %v1942_v55, %v5781_v42 }
 0x18b   : > { %v2518_v28 = vadd.f32 %v2517_v44, %v2029_v24  ;;  %v4706_v24 = vor.u32 %v5107_v31, %v4703_v26 }
 0x18c   : > { %2657 = vmatmul.bf16.gmra.mxu1 %v4362_v4  ;;  %3438 = vmatmul.bf16.gmra.mxu0 %v4698_v25  ;;  %v4702_v25 = vor.u32 %v5108_v30, %v4701_v5  ;;  %v4715_v30 = vld [vmem:[#allocation2 + $0x9c] sm:$0xf0] }
 0x18d   : > { %3260 = vmatmul.bf16.gmra.mxu2 %v4690_v41  ;;  %3349 = vmatmul.bf16.gmra.mxu3 %v4694_v50  ;;  %v6009_v6 = vadd.f32 %v2606_v23, %v2518_v28 }
 0x190   : > { %v2031_v53 = vpop.f32.mrf.mxu2  ;;  %v2520_v11 = vpop.f32.mrf.mxu3 }
 0x191   : > { %v2032_v16 = vadd.f32 %v2031_v53, %v1943_v36  ;;  %v1944_v51 = vpop.f32.mrf.mxu1  ;;  %v2611_v9 = vpop.f32.mrf.mxu0 }
 0x192   : > { %v1945_v23 = vadd.f32 %v1944_v51, %v5804_v21  ;;  %v4968_v51 = vld [vmem:[#allocation2 + $0x70] sm:$0xf0] }
 0x193   : > { %v2521_v19 = vadd.f32 %v2520_v11, %v2032_v16  ;;  %v4385_v16 = vld [vmem:[#allocation2 + $0x68] sm:$0xf] }
 0x194   : > { %v4386_v26 = vor.u32 %v4968_v51, %v4385_v16  ;;  %v4733_v16 = vld [vmem:[#allocation2 + $0xb0] sm:$0xf]  ;;  %v5115_v51 = vld [vmem:[#allocation2 + $0xb8] sm:$0xf0] }
 0x195   : > { %v6012_v54 = vadd.f32 %v2609_v27, %v2521_v19  ;;  %v4713_v19 = vld [vmem:[#allocation2 + $0x90] sm:$0xf] }
 0x198   : > { %v2033_v35 = vpop.f32.mrf.mxu2  ;;  %v2522_v42 = vpop.f32.mrf.mxu3 }
 0x199   : > { %v2034_v13 = vadd.f32 %v2033_v35, %v1945_v23  ;;  %v1947_v44 = vpop.f32.mrf.mxu1  ;;  %v2614_v4 = vpop.f32.mrf.mxu0  ;;  %v4722_v23 = vor.u32 %v5112_v32, %v4721_v17  ;;  %v5114_v17 = vld [vmem:[#allocation2 + $0xb0] sm:$0xf0]  ;;  %v5113_v32 = vld [vmem:[#allocation2 + $0xac] sm:$0xf] }
 0x19a   : > { %v1948_v41 = vadd.f32 %v1947_v44, %v5818_v60 }
 0x19b   : > { %v2523_v55 = vadd.f32 %v2522_v42, %v2034_v13  ;;  %v4718_v13 = vor.u32 %v5110_v33, %v4715_v30 }
 0x19c   : > { %2662 = vmatmul.bf16.gmra.mxu1 %v4374_v39  ;;  %3443 = vmatmul.bf16.gmra.mxu0 %v4710_v18  ;;  %v4714_v18 = vor.u32 %v5111_v63, %v4713_v19  ;;  %v4727_v63 = vld [vmem:[#allocation2 + $0xb4] sm:$0xf0] }
 0x19d   : > { %3265 = vmatmul.bf16.gmra.mxu2 %v4702_v25  ;;  %3354 = vmatmul.bf16.gmra.mxu3 %v4706_v24  ;;  %v6015_v27 = vadd.f32 %v2611_v9, %v2523_v55 }
 0x1a0   : > { %v2036_v50 = vpop.f32.mrf.mxu2  ;;  %v2525_v21 = vpop.f32.mrf.mxu3 }
 0x1a1   : > { %v2037_v28 = vadd.f32 %v2036_v50, %v1948_v41  ;;  %v1949_v36 = vpop.f32.mrf.mxu1  ;;  %v2616_v53 = vpop.f32.mrf.mxu0 }
 0x1a2   : > { %v1950_v9 = vadd.f32 %v1949_v36, %v5834_v37  ;;  %v4971_v36 = vld [vmem:[#allocation2 + $0x88] sm:$0xf0] }
 0x1a3   : > { %v2526_v11 = vadd.f32 %v2525_v21, %v2037_v28  ;;  %v4397_v28 = vld [vmem:[#allocation2 + $0x80] sm:$0xf] }
 0x1a4   : > { %v4398_v30 = vor.u32 %v4971_v36, %v4397_v28  ;;  %v4745_v28 = vld [vmem:[#allocation2 + $0xc8] sm:$0xf]  ;;  %v5118_v36 = vld [vmem:[#allocation2 + $0xd0] sm:$0xf0] }
 0x1a5   : > { %v6018_v5 = vadd.f32 %v2614_v4, %v2526_v11  ;;  %v4725_v11 = vld [vmem:[#allocation2 + $0xa8] sm:$0xf] }
 0x1a8   : > { %v2038_v31 = vpop.f32.mrf.mxu2  ;;  %v2527_v60 = vpop.f32.mrf.mxu3 }
 0x1a9   : > { %v2039_v35 = vadd.f32 %v2038_v31, %v1950_v9  ;;  %v1952_v42 = vpop.f32.mrf.mxu1  ;;  %v2619_v39 = vpop.f32.mrf.mxu0  ;;  %v4734_v9 = vor.u32 %v5115_v51, %v4733_v16  ;;  %v5117_v16 = vld [vmem:[#allocation2 + $0xc8] sm:$0xf0]  ;;  %v5116_v51 = vld [vmem:[#allocation2 + $0xc4] sm:$0xf] }
 0x1aa   : > { %v1953_v25 = vadd.f32 %v1952_v42, %v5711_v56 }
 0x1ab   : > { %v2528_v44 = vadd.f32 %v2527_v60, %v2039_v35  ;;  %v4730_v35 = vor.u32 %v5113_v32, %v4727_v63 }
 0x1ac   : > { %2667 = vmatmul.bf16.gmra.mxu1 %v4386_v26  ;;  %3448 = vmatmul.bf16.gmra.mxu0 %v4722_v23  ;;  %v4726_v23 = vor.u32 %v5114_v17, %v4725_v11  ;;  %v4739_v17 = vld [vmem:[#allocation2 + $0xcc] sm:$0xf0] }
 0x1ad   : > { %3270 = vmatmul.bf16.gmra.mxu2 %v4714_v18  ;;  %3359 = vmatmul.bf16.gmra.mxu3 %v4718_v13  ;;  %v6021_v4 = vadd.f32 %v2616_v53, %v2528_v44 }
 0x1b0   : > { %v2041_v24 = vpop.f32.mrf.mxu2  ;;  %v2530_v37 = vpop.f32.mrf.mxu3 }
 0x1b1   : > { %v2042_v55 = vadd.f32 %v2041_v24, %v1953_v25  ;;  %v1954_v41 = vpop.f32.mrf.mxu1  ;;  %v2621_v50 = vpop.f32.mrf.mxu0 }
 0x1b2   : > { %v1955_v53 = vadd.f32 %v1954_v41, %v5734_v20  ;;  %v4974_v41 = vld [vmem:[#allocation2 + $0xa0] sm:$0xf0] }
 0x1b3   : > { %v2531_v21 = vadd.f32 %v2530_v37, %v2042_v55  ;;  %v4409_v55 = vld [vmem:[#allocation2 + $0x98] sm:$0xf] }
 0x1b4   : > { %v4410_v63 = vor.u32 %v4974_v41, %v4409_v55  ;;  %v4757_v55 = vld [vmem:[#allocation2 + $0xe0] sm:$0xf]  ;;  %v5121_v41 = vld [vmem:[#allocation2 + $0xe8] sm:$0xf0] }
 0x1b5   : > { %v6024_v19 = vadd.f32 %v2619_v39, %v2531_v21  ;;  %v4737_v21 = vld [vmem:[#allocation2 + $0xc0] sm:$0xf] }
 0x1b8   : > { %v2043_v33 = vpop.f32.mrf.mxu2  ;;  %v2532_v56 = vpop.f32.mrf.mxu3 }
 0x1b9   : > { %v2044_v31 = vadd.f32 %v2043_v33, %v1955_v53  ;;  %v1957_v60 = vpop.f32.mrf.mxu1  ;;  %v2624_v26 = vpop.f32.mrf.mxu0  ;;  %v4746_v53 = vor.u32 %v5118_v36, %v4745_v28  ;;  %v5120_v28 = vld [vmem:[#allocation2 + $0xe0] sm:$0xf0]  ;;  %v5119_v36 = vld [vmem:[#allocation2 + $0xdc] sm:$0xf] }
 0x1ba   : > { %v1958_v18 = vadd.f32 %v1957_v60, %v5748_v45 }
 0x1bb   : > { %v2533_v42 = vadd.f32 %v2532_v56, %v2044_v31  ;;  %v4742_v31 = vor.u32 %v5116_v51, %v4739_v17 }
 0x1bc   : > { %2672 = vmatmul.bf16.gmra.mxu1 %v4398_v30  ;;  %3453 = vmatmul.bf16.gmra.mxu0 %v4734_v9  ;;  %v4738_v9 = vor.u32 %v5117_v16, %v4737_v21  ;;  %v4751_v16 = vld [vmem:[#allocation2 + $0xe4] sm:$0xf0] }
 0x1bd   : > { %3275 = vmatmul.bf16.gmra.mxu2 %v4726_v23  ;;  %3364 = vmatmul.bf16.gmra.mxu3 %v4730_v35  ;;  %v6027_v39 = vadd.f32 %v2621_v50, %v2533_v42 }
 0x1c0   : > { %v2046_v13 = vpop.f32.mrf.mxu2  ;;  %v2535_v20 = vpop.f32.mrf.mxu3 }
 0x1c1   : > { %v2047_v44 = vadd.f32 %v2046_v13, %v1958_v18  ;;  %v1959_v25 = vpop.f32.mrf.mxu1  ;;  %v2626_v24 = vpop.f32.mrf.mxu0 }
 0x1c2   : > { %v1960_v50 = vadd.f32 %v1959_v25, %v5764_v12  ;;  %v4977_v25 = vld [vmem:[#allocation2 + $0xb8] sm:$0xf0] }
 0x1c3   : > { %v2536_v37 = vadd.f32 %v2535_v20, %v2047_v44  ;;  %v4421_v44 = vld [vmem:[#allocation2 + $0xb0] sm:$0xf] }
 0x1c4   : > { %v4422_v17 = vor.u32 %v4977_v25, %v4421_v44  ;;  %v4769_v44 = vld [vmem:[#allocation2 + $0xf8] sm:$0xf]  ;;  %v5124_v25 = vld [vmem:[#allocation2 + $0x100] sm:$0xf0] }
 0x1c5   : > { %v6030_v11 = vadd.f32 %v2624_v26, %v2536_v37  ;;  %v4749_v37 = vld [vmem:[#allocation2 + $0xd8] sm:$0xf] }
 0x1c8   : > { %v2048_v32 = vpop.f32.mrf.mxu2  ;;  %v2537_v45 = vpop.f32.mrf.mxu3 }
 0x1c9   : > { %v2049_v33 = vadd.f32 %v2048_v32, %v1960_v50  ;;  %v1962_v56 = vpop.f32.mrf.mxu1  ;;  %v2629_v30 = vpop.f32.mrf.mxu0  ;;  %v4758_v50 = vor.u32 %v5121_v41, %v4757_v55  ;;  %v5123_v55 = vld [vmem:[#allocation2 + $0xf8] sm:$0xf0]  ;;  %v5122_v41 = vld [vmem:[#allocation2 + $0xf4] sm:$0xf] }
 0x1ca   : > { %v1963_v23 = vadd.f32 %v1962_v56, %v5783_v43 }
 0x1cb   : > { %v2538_v60 = vadd.f32 %v2537_v45, %v2049_v33  ;;  %v4754_v33 = vor.u32 %v5119_v36, %v4751_v16 }
 0x1cc   : > { %2677 = vmatmul.bf16.gmra.mxu1 %v4410_v63  ;;  %3458 = vmatmul.bf16.gmra.mxu0 %v4746_v53  ;;  %v4750_v53 = vor.u32 %v5120_v28, %v4749_v37  ;;  %v4763_v28 = vld [vmem:[#allocation2 + $0xfc] sm:$0xf0] }
 0x1cd   : > { %3280 = vmatmul.bf16.gmra.mxu2 %v4738_v9  ;;  %3369 = vmatmul.bf16.gmra.mxu3 %v4742_v31  ;;  %v6033_v26 = vadd.f32 %v2626_v24, %v2538_v60 }
 0x1d0   : > { %v2051_v35 = vpop.f32.mrf.mxu2  ;;  %v2540_v12 = vpop.f32.mrf.mxu3 }
 0x1d1   : > { %v2052_v42 = vadd.f32 %v2051_v35, %v1963_v23  ;;  %v1964_v18 = vpop.f32.mrf.mxu1  ;;  %v2631_v13 = vpop.f32.mrf.mxu0 }
 0x1d2   : > { %v1965_v24 = vadd.f32 %v1964_v18, %v5806_v22  ;;  %v4980_v18 = vld [vmem:[#allocation2 + $0xd0] sm:$0xf0] }
 0x1d3   : > { %v2541_v20 = vadd.f32 %v2540_v12, %v2052_v42  ;;  %v4433_v42 = vld [vmem:[#allocation2 + $0xc8] sm:$0xf] }
 0x1d4   : > { %v4434_v16 = vor.u32 %v4980_v18, %v4433_v42  ;;  %v4781_v18 = vld [vmem:[#allocation2 + $0x110] sm:$0xf] }
 0x1d5   : > { %v6036_v21 = vadd.f32 %v2629_v30, %v2541_v20  ;;  %v4761_v20 = vld [vmem:[#allocation2 + $0xf0] sm:$0xf] }
 0x1d8   : > { %v2053_v51 = vpop.f32.mrf.mxu2  ;;  %v2542_v43 = vpop.f32.mrf.mxu3 }
 0x1d9   : > { %v2054_v32 = vadd.f32 %v2053_v51, %v1965_v24  ;;  %v1967_v45 = vpop.f32.mrf.mxu1  ;;  %v2634_v63 = vpop.f32.mrf.mxu0  ;;  %v4770_v24 = vor.u32 %v5124_v25, %v4769_v44  ;;  %v5126_v44 = vld [vmem:[#allocation2 + $0x110] sm:$0xf0]  ;;  %v5125_v25 = vld [vmem:[#allocation2 + $0x10c] sm:$0xf] }
 0x1da   : > { %v1968_v9 = vadd.f32 %v1967_v45, %v5820_v61 }
 0x1db   : > { %v2543_v56 = vadd.f32 %v2542_v43, %v2054_v32  ;;  %v4766_v32 = vor.u32 %v5122_v41, %v4763_v28 }
 0x1dc   : > { %2682 = vmatmul.bf16.gmra.mxu1 %v4422_v17  ;;  %3463 = vmatmul.bf16.gmra.mxu0 %v4758_v50  ;;  %v4762_v50 = vor.u32 %v5123_v55, %v4761_v20  ;;  %v5127_v20 = vld [vmem:[#allocation2 + $0x118] sm:$0xf0]  ;;  %v4775_v55 = vld [vmem:[#allocation2 + $0x114] sm:$0xf0] }
 0x1dd   : > { %3285 = vmatmul.bf16.gmra.mxu2 %v4750_v53  ;;  %3374 = vmatmul.bf16.gmra.mxu3 %v4754_v33  ;;  %v6039_v30 = vadd.f32 %v2631_v13, %v2543_v56 }
 0x1e0   : > { %v2056_v31 = vpop.f32.mrf.mxu2  ;;  %v2545_v22 = vpop.f32.mrf.mxu3 }
 0x1e1   : > { %v2057_v60 = vadd.f32 %v2056_v31, %v1968_v9  ;;  %v1969_v23 = vpop.f32.mrf.mxu1  ;;  %v2636_v35 = vpop.f32.mrf.mxu0 }
 0x1e2   : > { %v1970_v13 = vadd.f32 %v1969_v23, %v5836_v38  ;;  %v4445_v23 = vld [vmem:[#allocation2 + $0xe0] sm:$0xf] }
 0x1e3   : > { %v2546_v12 = vadd.f32 %v2545_v22, %v2057_v60 }
 0x1e5   : > { %v6042_v37 = vadd.f32 %v2634_v63, %v2546_v12  ;;  %v4983_v12 = vld [vmem:[#allocation2 + $0xe8] sm:$0xf0] }
 0x1e6   : > { %v4446_v28 = vor.u32 %v4983_v12, %v4445_v23  ;;  %v5130_v12 = vld [vmem:[#allocation2 + $0x130] sm:$0xf0] }
 0x1e8   : > { %v2058_v36 = vpop.f32.mrf.mxu2  ;;  %v2547_v61 = vpop.f32.mrf.mxu3 }
 0x1e9   : > { %v2059_v51 = vadd.f32 %v2058_v36, %v1970_v13  ;;  %v2648_v43 = vpop.f32.mrf.mxu1  ;;  %v3429_v17 = vpop.f32.mrf.mxu0  ;;  %v4782_v13 = vor.u32 %v5127_v20, %v4781_v18  ;;  %v4787_v18 = vld [vmem:[#allocation2 + $0x12c] sm:$0xf0] }
 0x1ea   : > { %v2649_v45 = vadd.f32 %v2648_v43, %v5866_v10  ;;  %v4773_v10 = vld [vmem:[#allocation2 + $0x108] sm:$0xf] }
 0x1eb   : > { %v2548_v53 = vadd.f32 %v2547_v61, %v2059_v51 }
 0x1ec   : > { %2687 = vmatmul.bf16.gmra.mxu1 %v4434_v16  ;;  %3468 = vmatmul.bf16.gmra.mxu0 %v4770_v24  ;;  %v4774_v24 = vor.u32 %v5126_v44, %v4773_v10  ;;  %v5129_v10 = vld [vmem:[#allocation2 + $0x128] sm:$0xf0] }
 0x1ed   : > { %3290 = vmatmul.bf16.gmra.mxu2 %v4762_v50  ;;  %3379 = vmatmul.bf16.gmra.mxu3 %v4766_v32  ;;  %v6046_v63 = vadd.f32 %v2636_v35, %v2548_v53 }
 0x1f0   : > { %v3251_v33 = vpop.f32.mrf.mxu2  ;;  %v3340_v38 = vpop.f32.mrf.mxu3 }
 0x1f1   : > { %v3341_v56 = vadd.f32 %v3340_v38, %v3251_v33  ;;  %v2650_v9 = vpop.f32.mrf.mxu1  ;;  %v3431_v31 = vpop.f32.mrf.mxu0 }
 0x1f2   : > { %v2651_v22 = vadd.f32 %v2650_v9, %v5872_v58  ;;  %v4778_v58 = vor.u32 %v5125_v25, %v4775_v55  ;;  %v4457_v9 = vld [vmem:[#allocation2 + $0xf8] sm:$0xf] }
 0x1f3   : > { %v3430_v60 = vadd.f32 %v3429_v17, %v3341_v56 }
 0x1f5   : > { %v6049_v42 = vadd.f32 %v3430_v60, %v2649_v45  ;;  %v4986_v60 = vld [vmem:[#allocation2 + $0x100] sm:$0xf0] }
 0x1f6   : > { %v4458_v25 = vor.u32 %v4986_v60, %v4457_v9  ;;  %v5133_v60 = vld [vmem:[#allocation2 + $0x148] sm:$0xf0] }
 0x1f8   : > { %v3253_v35 = vpop.f32.mrf.mxu2  ;;  %v3342_v41 = vpop.f32.mrf.mxu3 }
 0x1f9   : > { %v3343_v36 = vadd.f32 %v3342_v41, %v3253_v35  ;;  %v2653_v61 = vpop.f32.mrf.mxu1  ;;  %v3434_v16 = vpop.f32.mrf.mxu0 }
 0x1fa   : > { %v2654_v51 = vadd.f32 %v2653_v61, %v5886_v8  ;;  %v4785_v8 = vld [vmem:[#allocation2 + $0x120] sm:$0xf] }
 0x1fb   : > { %v3432_v43 = vadd.f32 %v3431_v31, %v3343_v36  ;;  %v4793_v31 = vld [vmem:[#allocation2 + $0x128] sm:$0xf] }
 0x1fc   : > { %2692 = vmatmul.bf16.gmra.mxu1 %v4446_v28  ;;  %3473 = vmatmul.bf16.gmra.mxu0 %v4782_v13  ;;  %v4794_v55 = vor.u32 %v5130_v12, %v4793_v31  ;;  %v4786_v13 = vor.u32 %v5129_v10, %v4785_v8  ;;  %v5132_v8 = vld [vmem:[#allocation2 + $0x140] sm:$0xf0]  ;;  %v4799_v31 = vld [vmem:[#allocation2 + $0x144] sm:$0xf0] }
 0x1fd   : > { %v6052_v17 = vadd.f32 %v3432_v43, %v2651_v22  ;;  %3295 = vmatmul.bf16.gmra.mxu2 %v4774_v24  ;;  %3384 = vmatmul.bf16.gmra.mxu3 %v4778_v58  ;;  %v5128_v22 = vld [vmem:[#allocation2 + $0x124] sm:$0xf] }
 0x200   : > { %v3256_v50 = vpop.f32.mrf.mxu2  ;;  %v3345_v32 = vpop.f32.mrf.mxu3 }
 0x201   : > { %v3346_v45 = vadd.f32 %v3345_v32, %v3256_v50  ;;  %v2655_v53 = vpop.f32.mrf.mxu1  ;;  %v3436_v33 = vpop.f32.mrf.mxu0 }
 0x202   : > { %v2656_v38 = vadd.f32 %v2655_v53, %v5897_v2  ;;  %v4790_v2 = vor.u32 %v5128_v22, %v4787_v18  ;;  %v4469_v53 = vld [vmem:[#allocation2 + $0x110] sm:$0xf] }
 0x203   : > { %v3435_v56 = vadd.f32 %v3434_v16, %v3346_v45 }
 0x205   : > { %v6055_v23 = vadd.f32 %v3435_v56, %v2654_v51  ;;  %v4989_v56 = vld [vmem:[#allocation2 + $0x118] sm:$0xf0] }
 0x206   : > { %v4470_v22 = vor.u32 %v4989_v56, %v4469_v53  ;;  %v5135_v56 = vld [vmem:[#allocation2 + $0x158] sm:$0xf0] }
 0x208   : > { %v3258_v20 = vpop.f32.mrf.mxu2  ;;  %v3347_v44 = vpop.f32.mrf.mxu3 }
 0x209   : > { %v3348_v35 = vadd.f32 %v3347_v44, %v3258_v20  ;;  %v2658_v41 = vpop.f32.mrf.mxu1  ;;  %v3439_v28 = vpop.f32.mrf.mxu0 }
 0x20a   : > { %v2659_v36 = vadd.f32 %v2658_v41, %v5918_v3  ;;  %v4797_v3 = vld [vmem:[#allocation2 + $0x138] sm:$0xf] }
 0x20b   : > { %v3437_v61 = vadd.f32 %v3436_v33, %v3348_v35  ;;  %v4805_v33 = vld [vmem:[#allocation2 + $0x140] sm:$0xf] }
 0x20c   : > { %2697 = vmatmul.bf16.gmra.mxu1 %v4458_v25  ;;  %3478 = vmatmul.bf16.gmra.mxu0 %v4794_v55  ;;  %v4806_v18 = vor.u32 %v5133_v60, %v4805_v33  ;;  %v4798_v55 = vor.u32 %v5132_v8, %v4797_v3  ;;  %v5134_v3 = vld [vmem:[#allocation2 + $0x154] sm:$0xf]  ;;  %v4811_v33 = vld [vmem:[#allocation2 + $0x15c] sm:$0xf0] }
 0x20d   : > { %v6058_v16 = vadd.f32 %v3437_v61, %v2656_v38  ;;  %3300 = vmatmul.bf16.gmra.mxu2 %v4786_v13  ;;  %3389 = vmatmul.bf16.gmra.mxu3 %v4790_v2  ;;  %v5131_v38 = vld [vmem:[#allocation2 + $0x13c] sm:$0xf] }
 0x210   : > { %v3261_v24 = vpop.f32.mrf.mxu2  ;;  %v3350_v58 = vpop.f32.mrf.mxu3 }
 0x211   : > { %v3351_v51 = vadd.f32 %v3350_v58, %v3261_v24  ;;  %v2660_v43 = vpop.f32.mrf.mxu1  ;;  %v3441_v50 = vpop.f32.mrf.mxu0 }
 0x212   : > { %v2661_v32 = vadd.f32 %v2660_v43, %v5924_v40  ;;  %v4802_v40 = vor.u32 %v5131_v38, %v4799_v31  ;;  %v4481_v43 = vld [vmem:[#allocation2 + $0x128] sm:$0xf] }
 0x213   : > { %v3440_v45 = vadd.f32 %v3439_v28, %v3351_v51 }
 0x215   : > { %v6061_v9 = vadd.f32 %v3440_v45, %v2659_v36  ;;  %v4992_v45 = vld [vmem:[#allocation2 + $0x130] sm:$0xf0] }
 0x216   : > { %v4482_v38 = vor.u32 %v4992_v45, %v4481_v43 }
 0x218   : > { %v3263_v12 = vpop.f32.mrf.mxu2  ;;  %v3352_v10 = vpop.f32.mrf.mxu3 }
 0x219   : > { %v3353_v20 = vadd.f32 %v3352_v10, %v3263_v12  ;;  %v2663_v44 = vpop.f32.mrf.mxu1  ;;  %v3444_v25 = vpop.f32.mrf.mxu0 }
 0x21a   : > { %v2664_v35 = vadd.f32 %v2663_v44, %v5938_v1  ;;  %v4809_v1 = vld [vmem:[#allocation2 + $0x150] sm:$0xf] }
 0x21b   : > { %v3442_v41 = vadd.f32 %v3441_v50, %v3353_v20  ;;  %v4817_v50 = vld [vmem:[#allocation2 + $0x158] sm:$0xf]  ;;  %v349_v20 = vld [vmem:[%s5394_s25 + $0xcc] sm:$0xf] }
 0x21c   : > { %2702 = vmatmul.bf16.gmra.mxu1 %v4470_v22  ;;  %3483 = vmatmul.bf16.gmra.mxu0 %v4806_v18  ;;  %v4810_v22 = vor.u32 %v5135_v56, %v4809_v1  ;;  %v4814_v18 = vor.u32 %v5134_v3, %v4811_v33 }
 0x21d   : > { %v6064_v28 = vadd.f32 %v3442_v41, %v2661_v32  ;;  %3305 = vmatmul.bf16.gmra.mxu2 %v4798_v55  ;;  %3394 = vmatmul.bf16.gmra.mxu3 %v4802_v40  ;;  %v5136_v32 = vld [vmem:[#allocation2 + $0x160] sm:$0xf0]  ;;  %v764_v40 = vshrl.u32 %v349_v20, 16 }
 0x21e   : > { %v4818_v31 = vor.u32 %v5136_v32, %v4817_v50  ;;  %v910_v50 = vld [vmem:[%s5394_s25 + $0xcc] sm:$0xe]  ;;  %v912_v32 = vld [vmem:[%s5394_s25 + $0xd4] sm:$0x1] }
 0x21f   : > { %v3990_v33 = vrot.slane %v910_v50, 9 }
 0x220   : > { %v3266_v13 = vpop.f32.mrf.mxu2  ;;  %v3355_v2 = vpop.f32.mrf.mxu3 }
 0x221   : > { %v3356_v36 = vadd.f32 %v3355_v2, %v3266_v13  ;;  %v2665_v61 = vpop.f32.mrf.mxu1  ;;  %v3446_v24 = vpop.f32.mrf.mxu0  ;;  %v351_v13 = vld [vmem:[%s5394_s25 + $0xd4] sm:$0x1] }
 0x222   : > { %v2666_v58 = vadd.f32 %v2665_v61, %v5948_v49  ;;  %v911_v61 = vld [vmem:[%s5394_s25 + $0xd0] sm:$0xf]  ;;  %v783_v45 = vshll.u32 %v351_v13, 16  ;;  %v4995_v13 = vld [vmem:[#allocation2 + $0x148] sm:$0xf0] }
 0x223   : > { %v3445_v51 = vadd.f32 %v3444_v25, %v3356_v36  ;;  %v350_v25 = vld [vmem:[%s5394_s25 + $0xd0] sm:$0xf] }
 0x224   : > { %v773_v2 = vshll.u32 %v350_v25, 16  ;;  %v777_v36 = vshrl.u32 %v350_v25, 16 }
 0x225   : > { %v6067_v53 = vadd.f32 %v3445_v51, %v2664_v35  ;;  %v767_v35 = vshll.u32 %v349_v20, 16  ;;  %v766_v51 = vrot.slane %v764_v40, 4  ;;  %v261_v20 = vld [vmem:[%s5394_s25 + $0xd0] sm:$0xf] }
 0x226   : > { %v779_v1 = vrot.slane %v777_v36, 4  ;;  %v4821_v36 = vld [vmem:[#allocation2 + $0x168] sm:$0xf]  ;;  %297 = vst [vmem:[#allocation2 + $0x1a4] sm:$0xf] %v261_v20 }
 0x227   : > { %v769_v43 = vrot.slane %v767_v35, 5  ;;  %v4493_v35 = vld [vmem:[#allocation2 + $0x140] sm:$0xf] }
 0x228   : > { %v3268_v60 = vpop.f32.mrf.mxu2  ;;  %v3357_v8 = vpop.f32.mrf.mxu3 }
 0x229   : > { %v3358_v12 = vadd.f32 %v3357_v8, %v3268_v60  ;;  %v2668_v49 = vpop.f32.mrf.mxu1  ;;  %v3449_v10 = vpop.f32.mrf.mxu0 }
 0x22a   : > { %v2669_v44 = vadd.f32 %v2668_v49, %v5969_v15  ;;  %v1091_v15 = vrot.slane %v911_v61, 5  ;;  %v5138_v61 = vld [vmem:[#allocation2 + $0x170] sm:$0xf0] }
 0x22b   : > { %v3447_v55 = vadd.f32 %v3446_v24, %v3358_v12  ;;  %v775_v24 = vrot.slane %v773_v2, 5  ;;  %v785_v12 = vrot.slane %v783_v45, 5 }
 0x22c   : > { %2707 = vmatmul.bf16.gmra.mxu1 %v4482_v38  ;;  %3488 = vmatmul.bf16.gmra.mxu0 %v4818_v31  ;;  %v1093_v49 = vrot.slane %v1091_v15, 4 }
 0x22d   : > { %v6072_v41 = vadd.f32 %v3447_v55, %v2666_v58  ;;  %3310 = vmatmul.bf16.gmra.mxu2 %v4810_v22  ;;  %3399 = vmatmul.bf16.gmra.mxu3 %v4814_v18  ;;  %v770_v58 = vor.u32 %v769_v43, %v766_v51  ;;  %v780_v31 = vor.u32 %v779_v1, %v775_v24  ;;  %v260_v18 = vld [vmem:[%s5394_s25 + $0xcc] sm:$0xf]  ;;  %v1094_v55 = vrot.slane %v912_v32, 5  ;;  %v5139_v1 = vld [vmem:[#allocation2 + $0x178] sm:$0xf0] }
 0x22e   : > { %296 = vst [vmem:[#allocation2 + $0x198] sm:$0xf] %v260_v18  ;;  %v1092_v43 = vsel %vm5551_vm5, %v3990_v33, %v1091_v15  ;;  %v5137_v32 = vld [vmem:[#allocation2 + $0x16c] sm:$0xf] }
 0x22f   : > { %v771_v25 = vrot.slane %v770_v58, 4  ;;  %v781_v2 = vrot.slane %v780_v31, 4  ;;  %v1095_v50 = vsel %vm5551_vm5, %v1093_v49, %v1094_v55  ;;  %1166 = vst [vmem:[#allocation2 + $0x1a0] sm:$0xf] %v1092_v43  ;;  %v4494_v58 = vor.u32 %v4995_v13, %v4493_v35  ;;  %v4505_v13 = vld [vmem:[#allocation2 + $0x158] sm:$0xf] }
 0x230   : > { %v3271_v56 = vpop.f32.mrf.mxu2  ;;  %v3360_v3 = vpop.f32.mrf.mxu3  ;;  %1167 = vst [vmem:[#allocation2 + $0x1ac] sm:$0xf] %v1095_v50  ;;  %v4835_v43 = vld [vmem:[#allocation2 + $0x18c] sm:$0xf0] }
 0x231   : > { %v3361_v60 = vadd.f32 %v3360_v3, %v3271_v56  ;;  %v2670_v8 = vpop.f32.mrf.mxu1  ;;  %v3451_v38 = vpop.f32.mrf.mxu0  ;;  %v776_v51 = vsel %vm5537_vm4, %v771_v25, %v775_v24  ;;  %v4823_v56 = vld [vmem:[#allocation2 + $0x174] sm:$0xf0] }
 0x232   : > { %v2671_v22 = vadd.f32 %v2670_v8, %v5973_v34  ;;  %v4829_v34 = vld [vmem:[#allocation2 + $0x170] sm:$0xf]  ;;  %857 = vst [vmem:[#allocation2 + $0x19c] sm:$0xf] %v776_v51  ;;  %v4822_v8 = vor.u32 %v5138_v61, %v4821_v36  ;;  %v4826_v31 = vor.u32 %v5137_v32, %v4823_v56  ;;  %v5142_v61 = vld [vmem:[#allocation2 + $0x190] sm:$0xf0] }
 0x233   : > { %v3450_v40 = vadd.f32 %v3449_v10, %v3361_v60  ;;  %v786_v10 = vsel %vm5537_vm4, %v781_v2, %v785_v12  ;;  %v4830_v60 = vor.u32 %v5139_v1, %v4829_v34  ;;  %v4998_v2 = vld [vmem:[#allocation2 + $0x160] sm:$0xf0]  ;;  %v5141_v51 = vld [vmem:[#allocation2 + $0x188] sm:$0xf0] }
 0x234   : > { %858 = vst [vmem:[#allocation2 + $0x1a8] sm:$0xf] %v786_v10  ;;  %v4506_v10 = vor.u32 %v4998_v2, %v4505_v13  ;;  %v5144_v13 = vld [vmem:[#allocation2 + $0x1a0] sm:$0xf0] }
 0x235   : > { %v6085_v45 = vadd.f32 %v3450_v40, %v2669_v44 }
 0x238   : > { %v3273_v3 = vpop.f32.mrf.mxu2  ;;  %v3362_v24 = vpop.f32.mrf.mxu3 }
 0x239   : > { %v3363_v44 = vadd.f32 %v3362_v24, %v3273_v3  ;;  %v2673_v15 = vpop.f32.mrf.mxu1  ;;  %v3454_v33 = vpop.f32.mrf.mxu0 }
 0x23a   : > { %v2674_v46 = vadd.f32 %v2673_v15, %v5982_v57  ;;  %v4833_v57 = vld [vmem:[#allocation2 + $0x180] sm:$0xf] }
 0x23b   : > { %v3452_v12 = vadd.f32 %v3451_v38, %v3363_v44  ;;  %v4841_v38 = vld [vmem:[#allocation2 + $0x188] sm:$0xf]  ;;  %v4834_v24 = vor.u32 %v5141_v51, %v4833_v57 }
 0x23c   : > { %2712 = vmatmul.bf16.gmra.mxu1 %v4494_v58  ;;  %3493 = vmatmul.bf16.gmra.mxu0 %v4830_v60  ;;  %v4842_v50 = vor.u32 %v5142_v61, %v4841_v38  ;;  %v4847_v2 = vld [vmem:[#allocation2 + $0x1a4] sm:$0xf0] }
 0x23d   : > { %v6092_v59 = vadd.f32 %v3452_v12, %v2671_v22  ;;  %3315 = vmatmul.bf16.gmra.mxu2 %v4822_v8  ;;  %3404 = vmatmul.bf16.gmra.mxu3 %v4826_v31  ;;  %v5140_v22 = vld [vmem:[#allocation2 + $0x184] sm:$0xf] }
 0x240   : > { %v3276_v49 = vpop.f32.mrf.mxu2  ;;  %v3365_v18 = vpop.f32.mrf.mxu3 }
 0x241   : > { %v3366_v20 = vadd.f32 %v3365_v18, %v3276_v49  ;;  %v2675_v25 = vpop.f32.mrf.mxu1  ;;  %v3456_v55 = vpop.f32.mrf.mxu0  ;;  %v4517_v18 = vld [vmem:[#allocation2 + $0x170] sm:$0xf] }
 0x242   : > { %v2676_v40 = vadd.f32 %v2675_v25, %v5985_v14  ;;  %v4838_v14 = vor.u32 %v5140_v22, %v4835_v43 }
 0x243   : > { %v3455_v35 = vadd.f32 %v3454_v33, %v3366_v20  ;;  %v5001_v20 = vld [vmem:[#allocation2 + $0x178] sm:$0xf0] }
 0x244   : > { %v4518_v61 = vor.u32 %v5001_v20, %v4517_v18 }
 0x245   : > { %v6095_v36 = vadd.f32 %v3455_v35, %v2674_v46  ;;  %v5145_v35 = vld [vmem:[#allocation2 + $0x1a8] sm:$0xf0] }
 0x248   : > { %v3278_v34 = vpop.f32.mrf.mxu2  ;;  %v3367_v1 = vpop.f32.mrf.mxu3 }
 0x249   : > { %v3368_v32 = vadd.f32 %v3367_v1, %v3278_v34  ;;  %v2678_v56 = vpop.f32.mrf.mxu1  ;;  %v3459_v3 = vpop.f32.mrf.mxu0 }
 0x24a   : > { %v2679_v58 = vadd.f32 %v2678_v56, %v5988_v47  ;;  %v4845_v47 = vld [vmem:[#allocation2 + $0x198] sm:$0xf] }
 0x24b   : > { %v3457_v60 = vadd.f32 %v3456_v55, %v3368_v32  ;;  %v4853_v55 = vld [vmem:[#allocation2 + $0x1a0] sm:$0xf]  ;;  %v4846_v1 = vor.u32 %v5144_v13, %v4845_v47 }
 0x24c   : > { %2717 = vmatmul.bf16.gmra.mxu1 %v4506_v10  ;;  %3498 = vmatmul.bf16.gmra.mxu0 %v4842_v50  ;;  %v4854_v51 = vor.u32 %v5145_v35, %v4853_v55 }
 0x24d   : > { %v6098_v44 = vadd.f32 %v3457_v60, %v2676_v40  ;;  %3320 = vmatmul.bf16.gmra.mxu2 %v4834_v24  ;;  %3409 = vmatmul.bf16.gmra.mxu3 %v4838_v14  ;;  %v5143_v40 = vld [vmem:[#allocation2 + $0x19c] sm:$0xf] }
 0x250   : > { %v3281_v15 = vpop.f32.mrf.mxu2  ;;  %v3370_v33 = vpop.f32.mrf.mxu3 }
 0x251   : > { %v3371_v8 = vadd.f32 %v3370_v33, %v3281_v15  ;;  %v2680_v31 = vpop.f32.mrf.mxu1  ;;  %v3461_v46 = vpop.f32.mrf.mxu0 }
 0x252   : > { %v2681_v12 = vadd.f32 %v2680_v31, %v5991_v62  ;;  %v4850_v62 = vor.u32 %v5143_v40, %v4847_v2 }
 0x253   : > { %v3460_v49 = vadd.f32 %v3459_v3, %v3371_v8 }
 0x255   : > { %v6101_v25 = vadd.f32 %v3460_v49, %v2679_v58 }
 0x258   : > { %v3283_v57 = vpop.f32.mrf.mxu2  ;;  %v3372_v38 = vpop.f32.mrf.mxu3 }
 0x259   : > { %v3373_v22 = vadd.f32 %v3372_v38, %v3283_v57  ;;  %v2683_v43 = vpop.f32.mrf.mxu1  ;;  %v3464_v34 = vpop.f32.mrf.mxu0 }
 0x25a   : > { %v2684_v10 = vadd.f32 %v2683_v43, %v5994_v0 }
 0x25b   : > { %v3462_v50 = vadd.f32 %v3461_v46, %v3373_v22 }
 0x25c   : > { %2722 = vmatmul.bf16.gmra.mxu1 %v4518_v61  ;;  %3503 = vmatmul.bf16.gmra.mxu0 %v4854_v51 }
 0x25d   : > { %v6104_v32 = vadd.f32 %v3462_v50, %v2681_v12  ;;  %3325 = vmatmul.bf16.gmra.mxu2 %v4846_v1  ;;  %3414 = vmatmul.bf16.gmra.mxu3 %v4850_v62 }
 0x260   : > { %v3286_v56 = vpop.f32.mrf.mxu2  ;;  %v3375_v3 = vpop.f32.mrf.mxu3 }
 0x261   : > { %v3376_v24 = vadd.f32 %v3375_v3, %v3286_v56  ;;  %v2685_v14 = vpop.f32.mrf.mxu1  ;;  %v3466_v58 = vpop.f32.mrf.mxu0 }
 0x262   : > { %v2686_v60 = vadd.f32 %v2685_v14, %v5997_v29 }
 0x263   : > { %v3465_v15 = vadd.f32 %v3464_v34, %v3376_v24 }
 0x265   : > { %v6107_v33 = vadd.f32 %v3465_v15, %v2684_v10 }
 0x268   : > { %v3288_v8 = vpop.f32.mrf.mxu2  ;;  %v3377_v31 = vpop.f32.mrf.mxu3 }
 0x269   : > { %v3378_v0 = vadd.f32 %v3377_v31, %v3288_v8  ;;  %v2688_v46 = vpop.f32.mrf.mxu1  ;;  %v3469_v49 = vpop.f32.mrf.mxu0 }
 0x26a   : > { %v2689_v12 = vadd.f32 %v2688_v46, %v6000_v48 }
 0x26b   : > { %v3467_v18 = vadd.f32 %v3466_v58, %v3378_v0  ;;  %v6124_v58 = vld [vmem:[%s6513_s2] ss:$0 sm:$0xff] }
 0x26c   : > { %v6128_v0 = vadd.f32 %v6124_v58, %v6052_v17  ;;  %v6145_v17 = vadd.f32 %v6124_v58, %v6058_v16 }
 0x26d   : > { %v6110_v20 = vadd.f32 %v3467_v18, %v2686_v60 }
 0x270   : > { %v3291_v47 = vpop.f32.mrf.mxu2  ;;  %v3380_v55 = vpop.f32.mrf.mxu3 }
 0x271   : > { %v3381_v35 = vadd.f32 %v3380_v55, %v3291_v47  ;;  %v2690_v13 = vpop.f32.mrf.mxu1  ;;  %v3471_v40 = vpop.f32.mrf.mxu0  ;;  %v3616_v47 = vmul.f32 %v6128_v0, %v6128_v0  ;;  %v6153_v55 = vadd.f32 %v6124_v58, %v6061_v9 }
 0x272   : > { %v2691_v29 = vadd.f32 %v2690_v13, %v6003_v7 }
 0x273   : > { %v3470_v2 = vadd.f32 %v3469_v49, %v3381_v35  ;;  %v6133_v49 = vadd.f32 %v6124_v58, %v6049_v42 }
 0x275   : > { %v6113_v57 = vadd.f32 %v3470_v2, %v2689_v12  ;;  %v6137_v12 = vadd.f32 %v6124_v58, %v6055_v23  ;;  %v3577_v13 = vadd.f32 %v6128_v0, %v6133_v49 }
 0x277   : > { %v3617_v42 = vmul.f32 %v6137_v12, %v6137_v12  ;;  %v3578_v9 = vadd.f32 %v3577_v13, %v6137_v12 }
 0x278   : > { %v3293_v38 = vpop.f32.mrf.mxu2  ;;  %v3382_v61 = vpop.f32.mrf.mxu3 }
 0x279   : > { %v3383_v51 = vadd.f32 %v3382_v61, %v3293_v38  ;;  %v2693_v22 = vpop.f32.mrf.mxu1  ;;  %v3474_v43 = vpop.f32.mrf.mxu0  ;;  %v3618_v38 = vmul.f32 %v6145_v17, %v6145_v17  ;;  %v6165_v61 = vadd.f32 %v6124_v58, %v6064_v28 }
 0x27a   : > { %v2694_v48 = vadd.f32 %v2693_v22, %v6006_v52 }
 0x27b   : > { %v3472_v34 = vadd.f32 %v3471_v40, %v3383_v51  ;;  %v3620_v28 = vmul.f32 %v6165_v61, %v6165_v61 }
 0x27d   : > { %v6116_v1 = vadd.f32 %v3472_v34, %v2691_v29  ;;  %v3579_v34 = vadd.f32 %v3578_v9, %v6145_v17 }
 0x280   : > { %v3296_v62 = vpop.f32.mrf.mxu2  ;;  %v3385_v10 = vpop.f32.mrf.mxu3 }
 0x281   : > { %v3386_v50 = vadd.f32 %v3385_v10, %v3296_v62  ;;  %v2695_v56 = vpop.f32.mrf.mxu1  ;;  %v3476_v3 = vpop.f32.mrf.mxu0 }
 0x282   : > { %v2696_v7 = vadd.f32 %v2695_v56, %v6009_v6  ;;  %v3580_v56 = vadd.f32 %v3579_v34, %v6153_v55 }
 0x283   : > { %v3475_v24 = vadd.f32 %v3474_v43, %v3386_v50  ;;  %v3619_v43 = vmul.f32 %v6153_v55, %v6153_v55  ;;  %v6181_v50 = vadd.f32 %v6124_v58, %v6072_v41 }
 0x285   : > { %v6119_v14 = vadd.f32 %v3475_v24, %v2694_v48  ;;  %v6172_v48 = vadd.f32 %v6124_v58, %v6067_v53  ;;  %v6188_v53 = vadd.f32 %v6124_v58, %v6085_v45  ;;  %v3622_v41 = vmul.f32 %v6181_v50, %v6181_v50 }
 0x287   : > { %v3623_v45 = vmul.f32 %v6188_v53, %v6188_v53 }
 0x288   : > { %v3298_v60 = vpop.f32.mrf.mxu2  ;;  %v3387_v52 = vpop.f32.mrf.mxu3 }
 0x289   : > { %v3388_v15 = vadd.f32 %v3387_v52, %v3298_v60  ;;  %v2698_v8 = vpop.f32.mrf.mxu1  ;;  %v3479_v31 = vpop.f32.mrf.mxu0  ;;  %v3581_v52 = vadd.f32 %v3580_v56, %v6165_v61 }
 0x28a   : > { %v2699_v46 = vadd.f32 %v2698_v8, %v6012_v54  ;;  %v3615_v54 = vmul.f32 %v6133_v49, %v6133_v49 }
 0x28b   : > { %v3477_v6 = vadd.f32 %v3476_v3, %v3388_v15 }
 0x28c   : > { %v3647_v2 = vadd.f32 %v3616_v47, %v3615_v54  ;;  %v6202_v54 = vadd.f32 %v6124_v58, %v6095_v36  ;;  %v6216_v36 = vadd.f32 %v6124_v58, %v6101_v25 }
 0x28d   : > { %v6139_v18 = vadd.f32 %v3477_v6, %v2696_v7  ;;  %v3621_v7 = vmul.f32 %v6172_v48, %v6172_v48  ;;  %v3582_v6 = vadd.f32 %v3581_v52, %v6172_v48 }
 0x28e   : > { %v3648_v22 = vadd.f32 %v3647_v2, %v3617_v42  ;;  %v3625_v2 = vmul.f32 %v6202_v54, %v6202_v54  ;;  %v3627_v25 = vmul.f32 %v6216_v36, %v6216_v36 }
 0x28f   : > { %v3583_v42 = vadd.f32 %v3582_v6, %v6181_v50 }
 0x290   : > { %v3301_v23 = vpop.f32.mrf.mxu2  ;;  %v3390_v35 = vpop.f32.mrf.mxu3  ;;  %v3649_v10 = vadd.f32 %v3648_v22, %v3618_v38 }
 0x291   : > { %v3391_v40 = vadd.f32 %v3390_v35, %v3301_v23  ;;  %v6157_v29 = vpop.f32.mrf.mxu1  ;;  %v6159_v16 = vpop.f32.mrf.mxu0  ;;  %v3584_v13 = vadd.f32 %v3583_v42, %v6188_v53 }
 0x292   : > { %v3650_v3 = vadd.f32 %v3649_v10, %v3619_v43  ;;  %v6223_v10 = vadd.f32 %v6124_v58, %v6104_v32  ;;  %v6237_v32 = vadd.f32 %v6124_v58, %v6110_v20 }
 0x293   : > { %v3480_v51 = vadd.f32 %v3479_v31, %v3391_v40 }
 0x294   : > { %v3651_v31 = vadd.f32 %v3650_v3, %v3620_v28  ;;  %v6230_v3 = vadd.f32 %v6124_v58, %v6107_v33  ;;  %v6244_v33 = vadd.f32 %v6124_v58, %v6113_v57 }
 0x295   : > { %v6175_v62 = vadd.f32 %v3480_v51, %v2699_v46  ;;  %v6195_v46 = vadd.f32 %v6124_v58, %v6092_v59  ;;  %v6209_v59 = vadd.f32 %v6124_v58, %v6098_v44 }
 0x296   : > { %v3652_v47 = vadd.f32 %v3651_v31, %v3621_v7  ;;  %v3628_v31 = vmul.f32 %v6223_v10, %v6223_v10 }
 0x297   : > { %v3624_v35 = vmul.f32 %v6195_v46, %v6195_v46  ;;  %v3585_v51 = vadd.f32 %v3584_v13, %v6195_v46  ;;  %v3626_v44 = vmul.f32 %v6209_v59, %v6209_v59 }
 0x298   : > { %v3303_v24 = vpop.f32.mrf.mxu2  ;;  %v3392_v60 = vpop.f32.mrf.mxu3  ;;  %v3653_v23 = vadd.f32 %v3652_v47, %v3622_v41 }
 0x299   : > { %v2703_v15 = vpop.f32.mrf.mxu1  ;;  %v3484_v8 = vpop.f32.mrf.mxu0  ;;  %v3586_v28 = vadd.f32 %v3585_v51, %v6202_v54  ;;  %v3393_v41 = vadd.f32 %v3392_v60, %v3303_v24  ;;  %v3630_v24 = vmul.f32 %v6237_v32, %v6237_v32  ;;  %v6251_v60 = vadd.f32 %v6124_v58, %v6116_v1 }
 0x29a   : > { %v3654_v40 = vadd.f32 %v3653_v23, %v3623_v45  ;;  %v3629_v45 = vmul.f32 %v6230_v3, %v6230_v3 }
 0x29b   : > { %v3587_v7 = vadd.f32 %v3586_v28, %v6209_v59  ;;  %v3482_v51 = vadd.f32 %v6159_v16, %v3393_v41  ;;  %v3631_v28 = vmul.f32 %v6244_v33, %v6244_v33  ;;  %v3632_v16 = vmul.f32 %v6251_v60, %v6251_v60 }
 0x29c   : > { %v3655_v34 = vadd.f32 %v3654_v40, %v3624_v35 }
 0x29d   : > { %v3588_v6 = vadd.f32 %v3587_v7, %v6216_v36  ;;  %v6268_v7 = vadd.f32 %v6124_v58, %v6139_v18 }
 0x29e   : > { %v3656_v56 = vadd.f32 %v3655_v34, %v3625_v2 }
 0x29f   : > { %v3589_v35 = vadd.f32 %v3588_v6, %v6223_v10 }
 0x2a0   : > { %v3306_v38 = vpop.f32.mrf.mxu2  ;;  %v3395_v9 = vpop.f32.mrf.mxu3  ;;  %v3657_v52 = vadd.f32 %v3656_v56, %v3626_v44 }
 0x2a1   : > { %v2705_v22 = vpop.f32.mrf.mxu1  ;;  %v3486_v43 = vpop.f32.mrf.mxu0  ;;  %v3396_v13 = vadd.f32 %v3395_v9, %v3306_v38  ;;  %v3590_v57 = vadd.f32 %v3589_v35, %v6230_v3  ;;  %v6259_v38 = vadd.f32 %v6124_v58, %v6119_v14  ;;  %v2701_v9 = vadd.f32 %v6157_v29, %v6015_v27 }
 0x2a2   : > { %v3658_v47 = vadd.f32 %v3657_v52, %v3627_v25  ;;  %v2704_v14 = vadd.f32 %v2703_v15, %v6018_v5  ;;  %v6276_v29 = vadd.f32 %v6124_v58, %v6175_v62  ;;  %v3634_v15 = vmul.f32 %v6268_v7, %v6268_v7 }
 0x2a3   : > { %v3591_v56 = vadd.f32 %v3590_v57, %v6237_v32  ;;  %v3485_v1 = vadd.f32 %v3484_v8, %v3396_v13  ;;  %v3530_v52 = vadd.f32 %v3482_v51, %v2701_v9  ;;  %v3633_v27 = vmul.f32 %v6259_v38, %v6259_v38 }
 0x2a4   : > { %v3659_v20 = vadd.f32 %v3658_v47, %v3628_v31 }
 0x2a5   : > { %v3592_v31 = vadd.f32 %v3591_v56, %v6244_v33  ;;  %v3531_v18 = vadd.f32 %v3485_v1, %v2704_v14 }
 0x2a6   : > { %v3660_v44 = vadd.f32 %v3659_v20, %v3629_v45 }
 0x2a7   : > { %v3593_v45 = vadd.f32 %v3592_v31, %v6251_v60 }
 0x2a8   : > { %v3308_v42 = vpop.f32.mrf.mxu2  ;;  %v3397_v23 = vpop.f32.mrf.mxu3  ;;  %v3661_v25 = vadd.f32 %v3660_v44, %v3630_v24 }
 0x2a9   : > { %v2708_v40 = vpop.f32.mrf.mxu1  ;;  %v3489_v2 = vpop.f32.mrf.mxu0  ;;  %v3398_v34 = vadd.f32 %v3397_v23, %v3308_v42  ;;  %v2706_v42 = vadd.f32 %v2705_v22, %v6021_v4  ;;  %v3594_v62 = vadd.f32 %v3593_v45, %v6259_v38  ;;  %v3635_v4 = vmul.f32 %v6276_v29, %v6276_v29 }
 0x2aa   : > { %v3662_v6 = vadd.f32 %v3661_v25, %v3631_v28  ;;  %v2709_v24 = vadd.f32 %v2708_v40, %v6024_v19 }
 0x2ab   : > { %v3487_v41 = vadd.f32 %v3486_v43, %v3398_v34  ;;  %v6283_v43 = vadd.f32 %v6124_v58, %v3530_v52  ;;  %v3595_v22 = vadd.f32 %v3594_v62, %v6268_v7  ;;  %v6291_v34 = vadd.f32 %v6124_v58, %v3531_v18 }
 0x2ac   : > { %v3663_v5 = vadd.f32 %v3662_v6, %v3632_v16 }
 0x2ad   : > { %v3532_v20 = vadd.f32 %v3487_v41, %v2706_v42  ;;  %v3636_v9 = vmul.f32 %v6283_v43, %v6283_v43  ;;  %v3596_v56 = vadd.f32 %v3595_v22, %v6276_v29  ;;  %v3637_v16 = vmul.f32 %v6291_v34, %v6291_v34 }
 0x2ae   : > { %v3664_v57 = vadd.f32 %v3663_v5, %v3633_v27 }
 0x2af   : > { %v6297_v1 = vadd.f32 %v6124_v58, %v3532_v20  ;;  %v3597_v25 = vadd.f32 %v3596_v56, %v6283_v43 }
 0x2b0   : > { %v3311_v8 = vpop.f32.mrf.mxu2  ;;  %v3400_v47 = vpop.f32.mrf.mxu3  ;;  %v3665_v28 = vadd.f32 %v3664_v57, %v3634_v15 }
 0x2b1   : > { %v3401_v23 = vadd.f32 %v3400_v47, %v3311_v8  ;;  %v2710_v35 = vpop.f32.mrf.mxu1  ;;  %v3491_v13 = vpop.f32.mrf.mxu0  ;;  %v3598_v27 = vadd.f32 %v3597_v25, %v6291_v34  ;;  %v3638_v8 = vmul.f32 %v6297_v1, %v6297_v1 }
 0x2b2   : > { %v3666_v19 = vadd.f32 %v3665_v28, %v3635_v4  ;;  %v2711_v47 = vadd.f32 %v2710_v35, %v6027_v39 }
 0x2b3   : > { %v3490_v51 = vadd.f32 %v3489_v2, %v3401_v23  ;;  %v3599_v42 = vadd.f32 %v3598_v27, %v6297_v1 }
 0x2b4   : > { %v3667_v6 = vadd.f32 %v3666_v19, %v3636_v9 }
 0x2b5   : > { %v3533_v44 = vadd.f32 %v3490_v51, %v2709_v24 }
 0x2b6   : > { %v3668_v18 = vadd.f32 %v3667_v6, %v3637_v16 }
 0x2b7   : > { %v6303_v52 = vadd.f32 %v6124_v58, %v3533_v44 }
 0x2b8   : > { %v3313_v40 = vpop.f32.mrf.mxu2  ;;  %v3402_v2 = vpop.f32.mrf.mxu3  ;;  %v3669_v15 = vadd.f32 %v3668_v18, %v3638_v8 }
 0x2b9   : > { %v3403_v31 = vadd.f32 %v3402_v2, %v3313_v40  ;;  %v2713_v14 = vpop.f32.mrf.mxu1  ;;  %v3494_v41 = vpop.f32.mrf.mxu0  ;;  %v3639_v23 = vmul.f32 %v6303_v52, %v6303_v52  ;;  %v3600_v62 = vadd.f32 %v3599_v42, %v6303_v52 }
 0x2ba   : > { %v2714_v28 = vadd.f32 %v2713_v14, %v6030_v11 }
 0x2bb   : > { %v3492_v45 = vadd.f32 %v3491_v13, %v3403_v31  ;;  %v3670_v57 = vadd.f32 %v3669_v15, %v3639_v23 }
 0x2bd   : > { %v3534_v5 = vadd.f32 %v3492_v45, %v2711_v47 }
 0x2bf   : > { %v6314_v20 = vadd.f32 %v6124_v58, %v3534_v5 }
 0x2c0   : > { %v3316_v24 = vpop.f32.mrf.mxu2  ;;  %v3405_v51 = vpop.f32.mrf.mxu3 }
 0x2c1   : > { %v3601_v4 = vadd.f32 %v3600_v62, %v6314_v20  ;;  %v3640_v39 = vmul.f32 %v6314_v20, %v6314_v20  ;;  %v3406_v35 = vadd.f32 %v3405_v51, %v3316_v24  ;;  %v2715_v13 = vpop.f32.mrf.mxu1  ;;  %v3496_v22 = vpop.f32.mrf.mxu0 }
 0x2c2   : > { %v2716_v8 = vadd.f32 %v2715_v13, %v6033_v26 }
 0x2c3   : > { %v3671_v44 = vadd.f32 %v3670_v57, %v3640_v39  ;;  %v3495_v9 = vadd.f32 %v3494_v41, %v3406_v35 }
 0x2c5   : > { %v3535_v56 = vadd.f32 %v3495_v9, %v2714_v28 }
 0x2c7   : > { %v6321_v19 = vadd.f32 %v6124_v58, %v3535_v56 }
 0x2c8   : > { %v3318_v40 = vpop.f32.mrf.mxu2  ;;  %v3407_v2 = vpop.f32.mrf.mxu3 }
 0x2c9   : > { %v3602_v25 = vadd.f32 %v3601_v4, %v6321_v19  ;;  %v3641_v16 = vmul.f32 %v6321_v19, %v6321_v19  ;;  %v3408_v31 = vadd.f32 %v3407_v2, %v3318_v40  ;;  %v2718_v6 = vpop.f32.mrf.mxu1  ;;  %v3499_v45 = vpop.f32.mrf.mxu0 }
 0x2ca   : > { %v2719_v62 = vadd.f32 %v2718_v6, %v6036_v21 }
 0x2cb   : > { %v3672_v27 = vadd.f32 %v3671_v44, %v3641_v16  ;;  %v3497_v47 = vadd.f32 %v3496_v22, %v3408_v31 }
 0x2cd   : > { %v3536_v11 = vadd.f32 %v3497_v47, %v2716_v8 }
 0x2cf   : > { %v6328_v14 = vadd.f32 %v6124_v58, %v3536_v11 }
 0x2d0   : > { %v3321_v41 = vpop.f32.mrf.mxu2  ;;  %v3410_v18 = vpop.f32.mrf.mxu3 }
 0x2d1   : > { %v3603_v42 = vadd.f32 %v3602_v25, %v6328_v14  ;;  %v3642_v23 = vmul.f32 %v6328_v14, %v6328_v14  ;;  %v3411_v5 = vadd.f32 %v3410_v18, %v3321_v41  ;;  %v2720_v51 = vpop.f32.mrf.mxu1  ;;  %v3501_v57 = vpop.f32.mrf.mxu0 }
 0x2d2   : > { %v2721_v9 = vadd.f32 %v2720_v51, %v6039_v30 }
 0x2d3   : > { %v3673_v15 = vadd.f32 %v3672_v27, %v3642_v23  ;;  %v3500_v24 = vadd.f32 %v3499_v45, %v3411_v5 }
 0x2d5   : > { %v3537_v26 = vadd.f32 %v3500_v24, %v2719_v62 }
 0x2d7   : > { %v6335_v4 = vadd.f32 %v6124_v58, %v3537_v26 }
 0x2d8   : > { %v3323_v39 = vpop.f32.mrf.mxu2  ;;  %v3412_v35 = vpop.f32.mrf.mxu3 }
 0x2d9   : > { %v3604_v13 = vadd.f32 %v3603_v42, %v6335_v4  ;;  %v3643_v22 = vmul.f32 %v6335_v4, %v6335_v4  ;;  %v3413_v44 = vadd.f32 %v3412_v35, %v3323_v39  ;;  %v2723_v40 = vpop.f32.mrf.mxu1  ;;  %v3504_v25 = vpop.f32.mrf.mxu0 }
 0x2da   : > { %v2724_v45 = vadd.f32 %v2723_v40, %v6042_v37 }
 0x2db   : > { %v3674_v28 = vadd.f32 %v3673_v15, %v3643_v22  ;;  %v3502_v56 = vadd.f32 %v3501_v57, %v3413_v44 }
 0x2dd   : > { %v3538_v21 = vadd.f32 %v3502_v56, %v2721_v9 }
 0x2df   : > { %v6342_v2 = vadd.f32 %v6124_v58, %v3538_v21 }
 0x2e0   : > { %v3326_v16 = vpop.f32.mrf.mxu2  ;;  %v3415_v31 = vpop.f32.mrf.mxu3 }
 0x2e1   : > { %v3605_v6 = vadd.f32 %v3604_v13, %v6342_v2  ;;  %v3644_v27 = vmul.f32 %v6342_v2, %v6342_v2  ;;  %v3416_v8 = vadd.f32 %v3415_v31, %v3326_v16  ;;  %v2725_v18 = vpop.f32.mrf.mxu1  ;;  %v3506_v24 = vpop.f32.mrf.mxu0 }
 0x2e2   : > { %v2726_v26 = vadd.f32 %v2725_v18, %v6046_v63 }
 0x2e3   : > { %v3675_v47 = vadd.f32 %v3674_v28, %v3644_v27  ;;  %v3505_v11 = vadd.f32 %v3504_v25, %v3416_v8 }
 0x2e5   : > { %v3539_v30 = vadd.f32 %v3505_v11, %v2724_v45 }
 0x2e7   : > { %v6349_v41 = vadd.f32 %v6124_v58, %v3539_v30 }
 0x2e8   : > { %v3328_v42 = vpop.f32.mrf.mxu2  ;;  %v3417_v23 = vpop.f32.mrf.mxu3 }
 0x2e9   : > { %v3606_v5 = vadd.f32 %v3605_v6, %v6349_v41  ;;  %v3645_v15 = vmul.f32 %v6349_v41, %v6349_v41  ;;  %v3418_v62 = vadd.f32 %v3417_v23, %v3328_v42 }
 0x2eb   : > { %v3676_v51 = vadd.f32 %v3675_v47, %v3645_v15  ;;  %v3507_v57 = vadd.f32 %v3506_v24, %v3418_v62 }
 0x2ed   : > { %v3540_v37 = vadd.f32 %v3507_v57, %v2726_v26 }
 0x2ef   : > { %v6356_v39 = vadd.f32 %v6124_v58, %v3540_v37 }
 0x2f1   : > { %v3607_v35 = vadd.f32 %v3606_v5, %v6356_v39  ;;  %v3646_v13 = vmul.f32 %v6356_v39, %v6356_v39 }
 0x2f3   : > { %v3608_v22 = vrot.slane %v3607_v35, 4  ;;  %v3677_v44 = vadd.f32 %v3676_v51, %v3646_v13 }
 0x2f5   : > { %v3609_v28 = vadd.f32 %v3608_v22, %v3607_v35  ;;  %v3678_v9 = vrot.slane %v3677_v44, 4 }
 0x2f7   : > { %v3610_v56 = vrot.slane %v3609_v28, 2  ;;  %v3679_v21 = vadd.f32 %v3678_v9, %v3677_v44 }
 0x2f9   : > { %v3611_v40 = vadd.f32 %v3610_v56, %v3609_v28  ;;  %v3680_v25 = vrot.slane %v3679_v21, 2 }
 0x2fb   : > { %v3612_v16 = vrot.slane %v3611_v40, 1  ;;  %v3681_v63 = vadd.f32 %v3680_v25, %v3679_v21 }
 0x2fd   : > { %v3613_v31 = vadd.f32 %v3612_v16, %v3611_v40  ;;  %v3682_v6 = vrot.slane %v3681_v63, 1 }
 0x2ff   : > { %v6361_v27 = vmul.f32 0.00390625, %v3613_v31  ;;  %v3683_v58 = vadd.f32 %v3682_v6, %v3681_v63 }
 0x301   : > { %v3684_v8 = vmul.f32 0.00390625, %v3683_v58  ;;  %v3685_v47 = vmul.f32 %v6361_v27, %v6361_v27  ;;  %v3711_v11 = vsub.f32 %v6303_v52, %v6361_v27  ;;  %v3712_v30 = vsub.f32 %v6314_v20, %v6361_v27 }
 0x302   : > { %v3713_v18 = vsub.f32 %v6321_v19, %v6361_v27  ;;  %v3714_v42 = vsub.f32 %v6328_v14, %v6361_v27  ;;  %v3715_v23 = vsub.f32 %v6335_v4, %v6361_v27  ;;  %v3716_v5 = vsub.f32 %v6342_v2, %v6361_v27 }
 0x303   : > { %v3686_v45 = vsub.f32 %v3684_v8, %v3685_v47  ;;  %v3717_v15 = vsub.f32 %v6349_v41, %v6361_v27  ;;  %v3718_v62 = vsub.f32 %v6356_v39, %v6361_v27  ;;  %v3687_v37 = vsub.f32 %v6133_v49, %v6361_v27 }
 0x304   : > { %v3688_v35 = vsub.f32 %v6128_v0, %v6361_v27  ;;  %v3689_v13 = vsub.f32 %v6137_v12, %v6361_v27  ;;  %v3690_v22 = vsub.f32 %v6145_v17, %v6361_v27  ;;  %v3691_v44 = vsub.f32 %v6153_v55, %v6361_v27 }
 0x305   : > { %v3719_v24 = vadd.f32 1e-05, %v3686_v45  ;;  %v3692_v9 = vsub.f32 %v6165_v61, %v6361_v27  ;;  %v3693_v56 = vsub.f32 %v6172_v48, %v6361_v27  ;;  %v3694_v49 = vsub.f32 %v6181_v50, %v6361_v27 }
 0x306   : > { %v3695_v0 = vsub.f32 %v6188_v53, %v6361_v27  ;;  %v3696_v12 = vsub.f32 %v6195_v46, %v6361_v27  ;;  %v3697_v17 = vsub.f32 %v6202_v54, %v6361_v27  ;;  %v3698_v61 = vsub.f32 %v6209_v59, %v6361_v27 }
 0x307   : > { %5315 = vrsqrt.f32 %v3719_v24  ;;  %v3699_v48 = vsub.f32 %v6216_v36, %v6361_v27  ;;  %v3700_v50 = vsub.f32 %v6223_v10, %v6361_v27  ;;  %v3701_v53 = vsub.f32 %v6230_v3, %v6361_v27 }
 0x308   : > { %v3702_v46 = vsub.f32 %v6237_v32, %v6361_v27  ;;  %v3703_v54 = vsub.f32 %v6244_v33, %v6361_v27  ;;  %vm3726_vm7 = vweird.f32 %v3719_v24  ;;  %v3704_v59 = vsub.f32 %v6251_v60, %v6361_v27 }
 0x309   : > { %v3705_v36 = vsub.f32 %v6259_v38, %v6361_v27  ;;  %v3706_v10 = vsub.f32 %v6268_v7, %v6361_v27  ;;  %v3707_v3 = vsub.f32 %v6276_v29, %v6361_v27  ;;  %v3708_v32 = vsub.f32 %v6283_v43, %v6361_v27 }
 0x30a   : > { %v3709_v33 = vsub.f32 %v6291_v34, %v6361_v27  ;;  %v3710_v40 = vsub.f32 %v6297_v1, %v6361_v27 }
 0x30d   : > { %v5316_v51 = vpop.eup %5315 }
 0x30e   : > { %v3721_v26 = vmul.f32 %v5316_v51, %v3719_v24  ;;  %vm3727_vm6 = vweird.f32 %v5316_v51 }
 0x30f   : > { %vm3728_vm8 = vmor %vm3726_vm7, %vm3727_vm6 }
 0x310   : > { %v3722_v57 = vmul.f32 %v5316_v51, %v3721_v26 }
 0x312   : > { %v3723_v28 = vmul.f32 0.5, %v3722_v57 }
 0x314   : > { %v3724_v55 = vsub.f32 1.5, %v3723_v28 }
 0x316   : > { %v3725_v21 = vmul.f32 %v5316_v51, %v3724_v55 }
 0x318   : > { %v3729_v60 = vsel %vm3728_vm8, %v5316_v51, %v3725_v21 }
 0x319   : > { %v6429_v25 = vmul.f32 %v3729_v60, %v3687_v37  ;;  %v6431_v38 = vmul.f32 %v3729_v60, %v3688_v35  ;;  %v6433_v16 = vmul.f32 %v3729_v60, %v3689_v13  ;;  %v6435_v7 = vmul.f32 %v3729_v60, %v3690_v22 }
 0x31a   : > { %v6437_v29 = vmul.f32 %v3729_v60, %v3691_v44  ;;  %v6439_v63 = vmul.f32 %v3729_v60, %v3692_v9  ;;  %v6441_v43 = vmul.f32 %v3729_v60, %v3693_v56  ;;  %v6443_v31 = vmul.f32 %v3729_v60, %v3694_v49 }
 0x31b   : > { %v6445_v34 = vmul.f32 %v3729_v60, %v3695_v0  ;;  %v3739_v1 = vmul.f32 %v3729_v60, %v3696_v12  ;;  %v3740_v6 = vmul.f32 %v3729_v60, %v3697_v17  ;;  %v3741_v58 = vmul.f32 %v3729_v60, %v3698_v61 }
 0x31c   : > { %v3742_v8 = vmul.f32 %v3729_v60, %v3699_v48  ;;  %v3743_v47 = vmul.f32 %v3729_v60, %v3700_v50  ;;  %v3744_v45 = vmul.f32 %v3729_v60, %v3701_v53  ;;  %v3745_v24 = vmul.f32 %v3729_v60, %v3702_v46 }
 0x31d   : > { %v3746_v51 = vmul.f32 %v3729_v60, %v3703_v54  ;;  %v3747_v26 = vmul.f32 %v3729_v60, %v3704_v59  ;;  %v3748_v57 = vmul.f32 %v3729_v60, %v3705_v36  ;;  %v3749_v37 = vmul.f32 %v3729_v60, %v3706_v10 }
 0x31e   : > { %v3750_v35 = vmul.f32 %v3729_v60, %v3707_v3  ;;  %v3751_v13 = vmul.f32 %v3729_v60, %v3708_v32  ;;  %v3752_v22 = vmul.f32 %v3729_v60, %v3709_v33  ;;  %v3753_v44 = vmul.f32 %v3729_v60, %v3710_v40 }
 0x31f   : > { %v3754_v28 = vmul.f32 %v3729_v60, %v3711_v11  ;;  %v3755_v9 = vmul.f32 %v3729_v60, %v3712_v30  ;;  %v3756_v56 = vmul.f32 %v3729_v60, %v3713_v18  ;;  %v3757_v49 = vmul.f32 %v3729_v60, %v3714_v42 }
 0x320   : > { %v3758_v0 = vmul.f32 %v3729_v60, %v3715_v23  ;;  %v3759_v52 = vmul.f32 %v3729_v60, %v3716_v5  ;;  %v3760_v20 = vmul.f32 %v3729_v60, %v3717_v15  ;;  %v3761_v19 = vmul.f32 %v3729_v60, %v3718_v62 }
 0x321   : > { %v3762_v11 = vmax.f32 %v6429_v25, 0.0  ;;  %v3763_v14 = vmax.f32 %v6431_v38, 0.0  ;;  %v3764_v4 = vmax.f32 %v6433_v16, 0.0  ;;  %v3765_v30 = vmax.f32 %v6435_v7, 0.0 }
 0x322   : > { %v3766_v2 = vmax.f32 %v6437_v29, 0.0  ;;  %v3767_v18 = vmax.f32 %v6439_v63, 0.0  ;;  %v3768_v41 = vmax.f32 %v6441_v43, 0.0  ;;  %v3769_v42 = vmax.f32 %v6443_v31, 0.0 }
 0x323   : > { %v3770_v39 = vmax.f32 %v6445_v34, 0.0  ;;  %v3771_v27 = vmax.f32 %v3739_v1, 0.0  ;;  %v3772_v23 = vmax.f32 %v3740_v6, 0.0  ;;  %v3773_v5 = vmax.f32 %v3741_v58, 0.0 }
 0x324   : > { %v3774_v15 = vmax.f32 %v3742_v8, 0.0  ;;  %v3775_v62 = vmax.f32 %v3743_v47, 0.0  ;;  %v3776_v12 = vmax.f32 %v3744_v45, 0.0  ;;  %v3777_v17 = vmax.f32 %v3745_v24, 0.0 }
 0x325   : > { %v3778_v55 = vmax.f32 %v3746_v51, 0.0  ;;  %v3779_v61 = vmax.f32 %v3747_v26, 0.0  ;;  %v3780_v48 = vmax.f32 %v3748_v57, 0.0  ;;  %v3781_v50 = vmax.f32 %v3749_v37, 0.0 }
 0x326   : > { %v3782_v53 = vmax.f32 %v3750_v35, 0.0  ;;  %v3783_v46 = vmax.f32 %v3751_v13, 0.0  ;;  %v3784_v54 = vmax.f32 %v3752_v22, 0.0  ;;  %v3785_v21 = vmax.f32 %v3753_v44, 0.0 }
 0x327   : > { %v3786_v59 = vmax.f32 %v3754_v28, 0.0  ;;  %v3787_v36 = vmax.f32 %v3755_v9, 0.0  ;;  %v3788_v10 = vmax.f32 %v3756_v56, 0.0  ;;  %v3789_v3 = vmax.f32 %v3757_v49, 0.0 }
 0x328   : > { %v3790_v32 = vmax.f32 %v3758_v0, 0.0  ;;  %v3791_v33 = vmax.f32 %v3759_v52, 0.0  ;;  %v3792_v40 = vmax.f32 %v3760_v20, 0.0  ;;  %v3793_v60 = vmax.f32 %v3761_v19, 0.0 }
 0x329   : > { %v5173_v25 = vpack.c.bf16 %v3763_v14, %v3762_v11  ;;  %v5178_v38 = vpack.c.bf16 %v3765_v30, %v3764_v4  ;;  %v5183_v16 = vpack.c.bf16 %v3767_v18, %v3766_v2  ;;  %v5188_v7 = vpack.c.bf16 %v3769_v42, %v3768_v41 }
 0x32a   : > { %v5193_v29 = vpack.c.bf16 %v3771_v27, %v3770_v39  ;;  %v5198_v63 = vpack.c.bf16 %v3773_v5, %v3772_v23  ;;  %v5203_v43 = vpack.c.bf16 %v3775_v62, %v3774_v15  ;;  %v5208_v31 = vpack.c.bf16 %v3777_v17, %v3776_v12 }
 0x32b   : > { %5174 = vst [vmem:[%s6484_s9] sm:$0xff] %v5173_v25   ;;  %v5213_v34 = vpack.c.bf16 %v3779_v61, %v3778_v55  ;;  %v5218_v1 = vpack.c.bf16 %v3781_v50, %v3780_v48  ;;  %v5223_v6 = vpack.c.bf16 %v3783_v46, %v3782_v53  ;;  %v5228_v58 = vpack.c.bf16 %v3785_v21, %v3784_v54 }
 0x32c   : > { %5250 = vst [vmem:[%s6484_s9 + $0x8] sm:$0xff] %v5178_v38   ;;  %v5233_v8 = vpack.c.bf16 %v3787_v36, %v3786_v59  ;;  %v5238_v47 = vpack.c.bf16 %v3789_v3, %v3788_v10  ;;  %v5243_v45 = vpack.c.bf16 %v3791_v33, %v3790_v32  ;;  %v5248_v24 = vpack.c.bf16 %v3793_v60, %v3792_v40 }
 0x32d   : > { %5251 = vst [vmem:[%s6484_s9 + $0x10] sm:$0xff] %v5183_v16  }
 0x32e   : > { %5252 = vst [vmem:[%s6484_s9 + $0x18] sm:$0xff] %v5188_v7  }
 0x32f   : > { %5253 = vst [vmem:[%s6484_s9 + $0x20] sm:$0xff] %v5193_v29  }
 0x330   : > { %5254 = vst [vmem:[%s6484_s9 + $0x28] sm:$0xff] %v5198_v63  }
 0x331   : > { %5255 = vst [vmem:[%s6484_s9 + $0x30] sm:$0xff] %v5203_v43  }
 0x332   : > { %5256 = vst [vmem:[%s6484_s9 + $0x38] sm:$0xff] %v5208_v31  }
 0x333   : > { %5257 = vst [vmem:[%s6484_s9 + $0x40] sm:$0xff] %v5213_v34  }
 0x334   : > { %5258 = vst [vmem:[%s6484_s9 + $0x48] sm:$0xff] %v5218_v1  }
 0x335   : > { %5259 = vst [vmem:[%s6484_s9 + $0x50] sm:$0xff] %v5223_v6  }
 0x336   : > { %5260 = vst [vmem:[%s6484_s9 + $0x58] sm:$0xff] %v5228_v58  }
 0x337   : > { %5261 = vst [vmem:[%s6484_s9 + $0x60] sm:$0xff] %v5233_v8  }
 0x338   : > { %5262 = vst [vmem:[%s6484_s9 + $0x68] sm:$0xff] %v5238_v47  }
 0x339   : > { %5263 = vst [vmem:[%s6484_s9 + $0x70] sm:$0xff] %v5243_v45  }
 0x33a   : > { %5264 = vst [vmem:[%s6484_s9 + $0x78] sm:$0xff] %v5248_v24  }
 0x33b PF: > { %s13_s14 = sadd.s32 1, %s5339_s14   ;;  %s6519_s12 = smov %s5335_s13 }
 0x33c   : > { %p10_p5 = scmp.ge.s32.totalorder %s13_s14, 4   ;;  %s6520_s13 = smov %s6522_s15 }
 0x33e   :  { %12 = sbr.rel (!%p10_p5) target bundleno = 2 (0x2), region = 76 }

</bundles_post_ra>
